<compile_context>
chip_gen: v6e
topology: v6e:2x2x1
jax: 0.10.0
libtpu: 0.0.40
codegen_flags: <defaults>
</compile_context>

<pallas_src>
import functools

import jax
import jax.numpy as jnp
from jax.experimental import pallas as pl
from jax.experimental.pallas import tpu as pltpu


# ---------------------------------------------------------------------------
# Pallas kernels
# ---------------------------------------------------------------------------
def _enc_conv_kernel(x_ref, w_ref, b_ref, o_ref, *, ho, wo):
    """Conv2d(k=4, s=2, p=1) + bias + ReLU for one batch image.

    x_ref : (ho+1, wo+1, 4*cin) bf16  space-to-depth of the zero-padded input
    w_ref : (4, 4*cin, cout)    bf16  tap groups (dh, dw), rows (dy, dx, cin)
    b_ref : (1, cout)           f32
    o_ref : (ho, wo, cout)      bf16
    """
    x = x_ref[...]
    wk = w_ref[...]
    cout = wk.shape[-1]
    acc = jnp.zeros((ho * wo, cout), jnp.float32)
    for t, (dh, dw) in enumerate(((0, 0), (0, 1), (1, 0), (1, 1))):
        xs = x[dh:dh + ho, dw:dw + wo, :].reshape(ho * wo, -1)
        acc = acc + jnp.dot(xs, wk[t], preferred_element_type=jnp.float32)
    y = jnp.maximum(acc + b_ref[...], 0.0)
    o_ref[...] = y.reshape(ho, wo, cout).astype(o_ref.dtype)


def _dec_phase(x, wk, bias, py, px, hl, wl):
    """One output phase (py, px) of ConvTranspose2d(4, s2, p1) + bias + ReLU."""
    cout = wk.shape[-1]
    acc = jnp.zeros((hl * wl, cout), jnp.float32)
    for t, (dh, dw) in enumerate(((0, 0), (0, 1), (1, 0), (1, 1))):
        xs = x[py + dh:py + dh + hl, px + dw:px + dw + wl, :].reshape(hl * wl, -1)
        acc = acc + jnp.dot(xs, wk[py * 2 + px, t],
                            preferred_element_type=jnp.float32)
    return jnp.maximum(acc + bias, 0.0)


def _dec_convt_kernel(x_ref, w_ref, b_ref, o_ref, *, hl, wl):
    """ConvTranspose2d(4, s2, p1) + bias + ReLU for one batch image.
    The 4 output phases are packed along lanes -> one lane-dense store."""
    x = x_ref[...]
    wk = w_ref[...]
    bias = b_ref[...]
    cout = wk.shape[-1]
    outs = [_dec_phase(x, wk, bias, py, px, hl, wl)
            for py in (0, 1) for px in (0, 1)]
    o = jnp.concatenate(outs, axis=-1)                 # (hl*wl, 4*cout)
    o_ref[...] = o.reshape(hl, wl, 4 * cout).astype(o_ref.dtype)


def _dec_convt_final_kernel(x_ref, w_ref, b_ref, wf_ref, bf_ref, o_ref, *, hl, wl):
    """Last ConvTranspose2d + ReLU fused with the final 1x1 conv (dec_final)."""
    x = x_ref[...]
    wk = w_ref[...]
    bias = b_ref[...]
    wf = wf_ref[...]
    bf = bf_ref[...]
    cch = wf.shape[-1]
    outs = []
    for py in (0, 1):
        for px in (0, 1):
            y = _dec_phase(x, wk, bias, py, px, hl, wl)
            outs.append(jnp.dot(y.astype(wf.dtype), wf,
                                preferred_element_type=jnp.float32) + bf)
    o = jnp.concatenate(outs, axis=-1)                 # (hl*wl, 4*channels)
    o_ref[...] = o.reshape(hl, wl, 4 * cch).astype(o_ref.dtype)


def _latent_kernel(x_ref, we_ref, be_ref, noise_ref, cb_ref, o_ref, *, inv_tau):
    """Fused: enc_final 1x1 conv -> gumbel-softmax over tokens -> codebook."""
    logits = jnp.dot(x_ref[...], we_ref[...],
                     preferred_element_type=jnp.float32) + be_ref[...]
    z = (logits + noise_ref[...]) * inv_tau
    z = z - jnp.max(z, axis=-1, keepdims=True)
    e = jnp.exp(z)
    p = e * pl.reciprocal(jnp.sum(e, axis=-1, keepdims=True), approx=True)
    out = jnp.dot(p.astype(cb_ref.dtype), cb_ref[...],
                  preferred_element_type=jnp.float32)
    o_ref[...] = out.astype(o_ref.dtype)


# ---------------------------------------------------------------------------
# Layer wrappers (pallas_call plumbing)
# ---------------------------------------------------------------------------
def _enc_conv_layer(x_nhwc, w_packed, bias, cout):
    """NHWC -> NHWC, spatial /2. One pallas_call per layer, grid over batch."""
    B, H, W, C = x_nhwc.shape
    ho, wo = H // 2, W // 2
    assert wo % 8 == 0, "keep in-kernel reshape collapses sublane-aligned"
    xp = jnp.pad(x_nhwc, ((0, 0), (1, 1), (1, 1), (0, 0)))
    xs = xp.reshape(B, ho + 1, 2, wo + 1, 2, C)
    xs = xs.transpose(0, 1, 3, 2, 4, 5).reshape(B, ho + 1, wo + 1, 4 * C)
    xs = xs.astype(jnp.bfloat16)
    return pl.pallas_call(
        functools.partial(_enc_conv_kernel, ho=ho, wo=wo),
        out_shape=jax.ShapeDtypeStruct((B, ho, wo, cout), jnp.bfloat16),
        grid=(B,),
        in_specs=[
            pl.BlockSpec((None, ho + 1, wo + 1, 4 * C), lambda b: (b, 0, 0, 0)),
            pl.BlockSpec((4, 4 * C, cout), lambda b: (0, 0, 0)),
            pl.BlockSpec((1, cout), lambda b: (0, 0)),
        ],
        out_specs=pl.BlockSpec((None, ho, wo, cout), lambda b: (b, 0, 0, 0)),
        compiler_params=pltpu.CompilerParams(dimension_semantics=("parallel",)),
    )(xs, w_packed, bias.reshape(1, cout).astype(jnp.float32))


def _dec_convt_layer(x_nhwc, w_packed, bias, cout, final=None):
    """NHWC -> NHWC, spatial x2 (ConvT(4,s2,p1)+ReLU [+ fused 1x1 dec_final])."""
    B, Hl, Wl, C = x_nhwc.shape
    assert Wl % 8 == 0, "keep in-kernel reshape collapses sublane-aligned"
    xp = jnp.pad(x_nhwc, ((0, 0), (1, 1), (1, 1), (0, 0))).astype(jnp.bfloat16)
    in_specs = [
        pl.BlockSpec((None, Hl + 2, Wl + 2, C), lambda b: (b, 0, 0, 0)),
        pl.BlockSpec((4, 4, C, cout), lambda b: (0, 0, 0, 0)),
        pl.BlockSpec((1, cout), lambda b: (0, 0)),
    ]
    args = [xp, w_packed, bias.reshape(1, cout).astype(jnp.float32)]
    if final is None:
        kernel = functools.partial(_dec_convt_kernel, hl=Hl, wl=Wl)
        out_c, out_dtype = cout, jnp.bfloat16
    else:
        wf, bf = final                                  # (cout, channels), (channels,)
        cch = wf.shape[-1]
        kernel = functools.partial(_dec_convt_final_kernel, hl=Hl, wl=Wl)
        in_specs += [pl.BlockSpec((cout, cch), lambda b: (0, 0)),
                     pl.BlockSpec((1, cch), lambda b: (0, 0))]
        args += [wf, bf.reshape(1, cch).astype(jnp.float32)]
        out_c, out_dtype = cch, jnp.float32
    o = pl.pallas_call(
        kernel,
        out_shape=jax.ShapeDtypeStruct((B, Hl, Wl, 4 * out_c), out_dtype),
        grid=(B,),
        in_specs=in_specs,
        out_specs=pl.BlockSpec((None, Hl, Wl, 4 * out_c), lambda b: (b, 0, 0, 0)),
        compiler_params=pltpu.CompilerParams(dimension_semantics=("parallel",)),
    )(*args)
    # unpack lane-packed phases (py, px, c) -> interleaved spatial upsample
    o = o.reshape(B, Hl, Wl, 2, 2, out_c).transpose(0, 1, 3, 2, 4, 5)
    return o.reshape(B, 2 * Hl, 2 * Wl, out_c)


def _latent_fused(rows, w_enc, b_enc, noise, codebook, tau):
    """rows:(M, Ch) bf16 -> (M, D) bf16 ; 1x1 conv + gumbel-softmax + codebook."""
    M, C = rows.shape
    n_tok = w_enc.shape[-1]
    d = codebook.shape[-1]
    tm = M // 2 if M % 16 == 0 else M       # grid of 2 -> both v7x TensorCores
    return pl.pallas_call(
        functools.partial(_latent_kernel, inv_tau=1.0 / tau),
        out_shape=jax.ShapeDtypeStruct((M, d), jnp.bfloat16),
        grid=(M // tm,),
        in_specs=[
            pl.BlockSpec((tm, C), lambda i: (i, 0)),
            pl.BlockSpec((C, n_tok), lambda i: (0, 0)),
            pl.BlockSpec((1, n_tok), lambda i: (0, 0)),
            pl.BlockSpec((tm, n_tok), lambda i: (i, 0)),
            pl.BlockSpec((n_tok, d), lambda i: (0, 0)),
        ],
        out_specs=pl.BlockSpec((tm, d), lambda i: (i, 0)),
        compiler_params=pltpu.CompilerParams(dimension_semantics=("parallel",)),
    )(rows, w_enc, b_enc.reshape(1, n_tok).astype(jnp.float32), noise, codebook)


# ---------------------------------------------------------------------------
# Weight packing (pure indexing, done once per trace)
# ---------------------------------------------------------------------------
def _pack_enc_conv_weight(w):
    """PyTorch Conv2d weight (Cout, Cin, 4, 4) -> (4, 4*Cin, Cout) bf16.
    Group index = (dh, dw); rows within a group ordered (dy, dx, cin) to match
    the space-to-depth channel packing; tap (kh, kw) = (2dh+dy, 2dw+dx)."""
    groups = []
    for dh in (0, 1):
        for dw in (0, 1):
            taps = [jnp.transpose(w[:, :, 2 * dh + dy, 2 * dw + dx])
                    for dy in (0, 1) for dx in (0, 1)]
            groups.append(jnp.concatenate(taps, axis=0))
    return jnp.stack(groups, axis=0).astype(jnp.bfloat16)


def _pack_dec_convt_weight(w):
    """PyTorch ConvTranspose2d weight (Cin, Cout, 4, 4) -> (4, 4, Cin, Cout) bf16.
    First index = output phase (py, px); second = shift (dh, dw).  Phase (py,px)
    at shift (dh,dw) reads original tap W[:, :, 3-py-2dh, 3-px-2dw]."""
    phases = []
    for py in (0, 1):
        for px in (0, 1):
            taps = [w[:, :, 3 - py - 2 * dh, 3 - px - 2 * dw]
                    for dh in (0, 1) for dw in (0, 1)]
            phases.append(jnp.stack(taps, axis=0))
    return jnp.stack(phases, axis=0).astype(jnp.bfloat16)


# ---------------------------------------------------------------------------
# DiscreteVAE forward (normalization=None, straight_through=False, no resblocks)
# ---------------------------------------------------------------------------
def discrete_vae_forward(img_nchw, params, gumbel_noise, tau):
    B = img_nchw.shape[0]
    x = jnp.transpose(img_nchw, (0, 2, 3, 1))            # NCHW -> NHWC

    # encoder: [Conv2d(4, s2, p1) + ReLU] * num_layers
    for (w, b) in params["enc_convs"]:
        x = _enc_conv_layer(x, _pack_enc_conv_weight(w), b, w.shape[0])

    # fused latent: enc_final 1x1 -> gumbel-softmax(dim=tokens) -> codebook
    _, hl, wl, chid = x.shape
    w_enc, b_enc = params["enc_final"]                   # (n_tok, chid, 1, 1)
    codebook = params["codebook"]                        # (n_tok, codebook_dim)
    sampled = _latent_fused(
        x.reshape(B * hl * wl, chid),
        jnp.transpose(w_enc[:, :, 0, 0]).astype(jnp.bfloat16),
        b_enc, gumbel_noise, codebook.astype(jnp.bfloat16), tau)
    x = sampled.reshape(B, hl, wl, codebook.shape[-1])

    # decoder: [ConvT(4, s2, p1) + ReLU] * num_layers (+ fused dec_final 1x1)
    w_fin, b_fin = params["dec_final"]                   # (channels, hdim, 1, 1)
    w_fin2 = jnp.transpose(w_fin[:, :, 0, 0]).astype(jnp.bfloat16)
    n_dec = len(params["dec_convts"])
    for li, (w, b) in enumerate(params["dec_convts"]):
        final = (w_fin2, b_fin) if li == n_dec - 1 else None
        x = _dec_convt_layer(x, _pack_dec_convt_weight(w), b, w.shape[1],
                             final=final)

    return jnp.transpose(x, (0, 3, 1, 2))                # NHWC -> NCHW


# ---------------------------------------------------------------------------
# Pure-JAX f32 reference (sanity check of the fused bf16 kernels)
# ---------------------------------------------------------------------------
def _ref_forward(img_nchw, params, gumbel_noise, tau):
    hi = jax.lax.Precision.HIGHEST
    x = jnp.transpose(img_nchw, (0, 2, 3, 1))
    for (w, b) in params["enc_convs"]:
        x = jax.lax.conv_general_dilated(
            x, jnp.transpose(w, (2, 3, 1, 0)), window_strides=(2, 2),
            padding=((1, 1), (1, 1)), dimension_numbers=("NHWC", "HWIO", "NHWC"),
            precision=hi)
        x = jax.nn.relu(x + b)
    w, b = params["enc_final"]
    logits = jnp.einsum("bhwc,nc->bhwn", x, w[:, :, 0, 0], precision=hi) + b
    B, hl, wl, nt = logits.shape
    z = (logits + gumbel_noise.reshape(B, hl, wl, nt)) / tau
    p = jax.nn.softmax(z, axis=-1)
    x = jnp.einsum("bhwn,nd->bhwd", p, params["codebook"], precision=hi)
    for (w, b) in params["dec_convts"]:
        x = jax.lax.conv_general_dilated(
            x, jnp.transpose(w[:, :, ::-1, ::-1], (2, 3, 0, 1)),
            window_strides=(1, 1), padding=((2, 2), (2, 2)), lhs_dilation=(2, 2),
            dimension_numbers=("NHWC", "HWIO", "NHWC"), precision=hi)
        x = jax.nn.relu(x + b)
    w, b = params["dec_final"]
    out = jnp.einsum("bhwc,oc->bhwo", x, w[:, :, 0, 0], precision=hi) + b
    return jnp.transpose(out, (0, 3, 1, 2))


# ---------------------------------------------------------------------------
# Deterministic parameter construction (PyTorch weight layouts)
# ---------------------------------------------------------------------------
def make_params(key, *, channels, hidden_dim, num_layers, num_tokens, codebook_dim):
    keys = iter(jax.random.split(key, 32))

    def conv_w(cout, cin, k):
        scale = 1.0 / jnp.sqrt(cin * k * k)
        return (jax.random.normal(next(keys), (cout, cin, k, k), jnp.float32) * scale,
                jax.random.normal(next(keys), (cout,), jnp.float32) * 0.01)

    def convT_w(cin, cout, k):
        scale = 1.0 / jnp.sqrt(cin * k * k)
        return (jax.random.normal(next(keys), (cin, cout, k, k), jnp.float32) * scale,
                jax.random.normal(next(keys), (cout,), jnp.float32) * 0.01)

    enc_chans = [channels] + [hidden_dim] * num_layers
    dec_chans = [codebook_dim] + [hidden_dim] * num_layers   # num_resnet_blocks = 0
    return {
        "enc_convs": [conv_w(co, ci, 4) for ci, co in zip(enc_chans[:-1], enc_chans[1:])],
        "enc_final": conv_w(num_tokens, enc_chans[-1], 1),
        "codebook": jax.random.normal(next(keys), (num_tokens, codebook_dim), jnp.float32),
        "dec_convts": [convT_w(ci, co, 4) for ci, co in zip(dec_chans[:-1], dec_chans[1:])],
        "dec_final": conv_w(channels, dec_chans[-1], 1),
    }


# ---------------------------------------------------------------------------
if __name__ == "__main__":
    # Small config consistent with DiscreteVAE.__init__ (spatial divisible by
    # 2**num_layers; 32x32 keeps every in-kernel reshape sublane-aligned at
    # both pyramid levels).
    B, CHANNELS, H, W = 2, 4, 32, 32
    NUM_LAYERS = 2
    HIDDEN = 32
    NUM_TOKENS = 64
    CODEBOOK_DIM = 32
    TAU = 0.9

    key = jax.random.PRNGKey(0)
    k_param, k_img, k_noise = jax.random.split(key, 3)

    params = make_params(k_param, channels=CHANNELS, hidden_dim=HIDDEN,
                         num_layers=NUM_LAYERS, num_tokens=NUM_TOKENS,
                         codebook_dim=CODEBOOK_DIM)
    img = jax.random.normal(k_img, (B, CHANNELS, H, W), jnp.float32)

    # Gumbel noise for F.gumbel_softmax, in the kernel's row layout
    # (B*h*w, num_tokens).
    # TODO(synk): could be drawn in-kernel with pltpu.prng_random_bits; kept as
    # an explicit input to mirror F.gumbel_softmax's separate noise draw.
    hl, wl = H // (2 ** NUM_LAYERS), W // (2 ** NUM_LAYERS)
    noise = jax.random.gumbel(k_noise, (B * hl * wl, NUM_TOKENS), jnp.float32)

    fwd = jax.jit(lambda im, nz: discrete_vae_forward(im, params, nz, TAU))
    out = jax.block_until_ready(fwd(img, noise))

    assert out.shape == (B, CHANNELS, H, W), out.shape
    assert bool(jnp.all(jnp.isfinite(out)))

    # sanity-check the fused bf16 Pallas pipeline against a pure-JAX f32 ref
    ref = _ref_forward(img, params, noise, TAU)
    err = float(jnp.max(jnp.abs(out - ref)))
    scale = float(jnp.max(jnp.abs(ref))) + 1e-6
    assert err < 0.15 * scale, (err, scale)

    print("KERNEL_OK")
</pallas_src>

<mosaic_0001>
module attributes {stable_mosaic.version = 11 : i64} {
  func.func @_enc_conv_kernel(%arg0: i32, %arg1: memref<1x17x17x16xbf16, #tpu.memory_space<vmem>>, %arg2: memref<4x16x32xbf16, #tpu.memory_space<vmem>>, %arg3: memref<1x32xf32, #tpu.memory_space<vmem>>, %arg4: memref<1x16x16x32xbf16, #tpu.memory_space<vmem>>) attributes {dimension_semantics = [#tpu.dimension_semantics<parallel>], iteration_bounds = array<i64: 2>, scalar_prefetch = 0 : i64, scratch_operands = 0 : i64, tpu.core_type = #tpu.core_type<tc>, window_params = [{transform_indices = @transform_0, window_bounds = array<i64: 1, 17, 17, 16>}, {pipeline_mode = #tpu.pipeline_mode<synchronous>, transform_indices = @transform_1, window_bounds = array<i64: 4, 16, 32>}, {pipeline_mode = #tpu.pipeline_mode<synchronous>, transform_indices = @transform_2, window_bounds = array<i64: 1, 32>}, {transform_indices = @transform_3, window_bounds = array<i64: 1, 16, 16, 32>}]} {
    %c0 = arith.constant 0 : index
    %c0_0 = arith.constant 0 : index
    %c0_1 = arith.constant 0 : index
    %c0_2 = arith.constant 0 : index
    %0 = vector.load %arg1[%c0, %c0_0, %c0_1, %c0_2] : memref<1x17x17x16xbf16, #tpu.memory_space<vmem>>, vector<1x17x17x16xbf16>
    %1 = vector.shape_cast %0 : vector<1x17x17x16xbf16> to vector<17x17x16xbf16>
    %c0_3 = arith.constant 0 : index
    %c0_4 = arith.constant 0 : index
    %c0_5 = arith.constant 0 : index
    %2 = vector.load %arg2[%c0_3, %c0_4, %c0_5] : memref<4x16x32xbf16, #tpu.memory_space<vmem>>, vector<4x16x32xbf16>
    %cst = arith.constant 0.000000e+00 : f32
    %3 = vector.broadcast %cst : f32 to vector<256x32xf32>
    %4 = vector.extract_strided_slice %1 {offsets = [0, 0, 0], sizes = [16, 16, 16], strides = [1, 1, 1]} : vector<17x17x16xbf16> to vector<16x16x16xbf16>
    %5 = vector.shape_cast %4 : vector<16x16x16xbf16> to vector<256x16xbf16>
    %6 = vector.extract_strided_slice %2 {offsets = [0, 0, 0], sizes = [1, 16, 32], strides = [1, 1, 1]} : vector<4x16x32xbf16> to vector<1x16x32xbf16>
    %7 = vector.shape_cast %6 : vector<1x16x32xbf16> to vector<16x32xbf16>
    %cst_6 = arith.constant dense<0.000000e+00> : vector<256x32xf32>
    %8 = tpu.matmul %5, %7, %cst_6 {dimension_numbers = #tpu.dot_dimension_numbers<[1], [0], [0], [1], [0, 0, 1, 1], [], []>} : vector<256x16xbf16>, vector<16x32xbf16>, vector<256x32xf32> -> vector<256x32xf32>
    %9 = arith.addf %3, %8 : vector<256x32xf32>
    %10 = vector.extract_strided_slice %1 {offsets = [0, 1, 0], sizes = [16, 16, 16], strides = [1, 1, 1]} : vector<17x17x16xbf16> to vector<16x16x16xbf16>
    %11 = vector.shape_cast %10 : vector<16x16x16xbf16> to vector<256x16xbf16>
    %12 = vector.extract_strided_slice %2 {offsets = [1, 0, 0], sizes = [1, 16, 32], strides = [1, 1, 1]} : vector<4x16x32xbf16> to vector<1x16x32xbf16>
    %13 = vector.shape_cast %12 : vector<1x16x32xbf16> to vector<16x32xbf16>
    %cst_7 = arith.constant dense<0.000000e+00> : vector<256x32xf32>
    %14 = tpu.matmul %11, %13, %cst_7 {dimension_numbers = #tpu.dot_dimension_numbers<[1], [0], [0], [1], [0, 0, 1, 1], [], []>} : vector<256x16xbf16>, vector<16x32xbf16>, vector<256x32xf32> -> vector<256x32xf32>
    %15 = arith.addf %9, %14 : vector<256x32xf32>
    %16 = vector.extract_strided_slice %1 {offsets = [1, 0, 0], sizes = [16, 16, 16], strides = [1, 1, 1]} : vector<17x17x16xbf16> to vector<16x16x16xbf16>
    %17 = vector.shape_cast %16 : vector<16x16x16xbf16> to vector<256x16xbf16>
    %18 = vector.extract_strided_slice %2 {offsets = [2, 0, 0], sizes = [1, 16, 32], strides = [1, 1, 1]} : vector<4x16x32xbf16> to vector<1x16x32xbf16>
    %19 = vector.shape_cast %18 : vector<1x16x32xbf16> to vector<16x32xbf16>
    %cst_8 = arith.constant dense<0.000000e+00> : vector<256x32xf32>
    %20 = tpu.matmul %17, %19, %cst_8 {dimension_numbers = #tpu.dot_dimension_numbers<[1], [0], [0], [1], [0, 0, 1, 1], [], []>} : vector<256x16xbf16>, vector<16x32xbf16>, vector<256x32xf32> -> vector<256x32xf32>
    %21 = arith.addf %15, %20 : vector<256x32xf32>
    %22 = vector.extract_strided_slice %1 {offsets = [1, 1, 0], sizes = [16, 16, 16], strides = [1, 1, 1]} : vector<17x17x16xbf16> to vector<16x16x16xbf16>
    %23 = vector.shape_cast %22 : vector<16x16x16xbf16> to vector<256x16xbf16>
    %24 = vector.extract_strided_slice %2 {offsets = [3, 0, 0], sizes = [1, 16, 32], strides = [1, 1, 1]} : vector<4x16x32xbf16> to vector<1x16x32xbf16>
    %25 = vector.shape_cast %24 : vector<1x16x32xbf16> to vector<16x32xbf16>
    %cst_9 = arith.constant dense<0.000000e+00> : vector<256x32xf32>
    %26 = tpu.matmul %23, %25, %cst_9 {dimension_numbers = #tpu.dot_dimension_numbers<[1], [0], [0], [1], [0, 0, 1, 1], [], []>} : vector<256x16xbf16>, vector<16x32xbf16>, vector<256x32xf32> -> vector<256x32xf32>
    %27 = arith.addf %21, %26 : vector<256x32xf32>
    %c0_10 = arith.constant 0 : index
    %c0_11 = arith.constant 0 : index
    %28 = vector.load %arg3[%c0_10, %c0_11] : memref<1x32xf32, #tpu.memory_space<vmem>>, vector<1x32xf32>
    %29 = vector.broadcast %28 : vector<1x32xf32> to vector<256x32xf32>
    %30 = arith.addf %27, %29 : vector<256x32xf32>
    %cst_12 = arith.constant 0.000000e+00 : f32
    %31 = vector.broadcast %cst_12 : f32 to vector<256x32xf32>
    %32 = arith.maximumf %30, %31 : vector<256x32xf32>
    %33 = vector.shape_cast %32 : vector<256x32xf32> to vector<16x16x32xf32>
    %34 = arith.truncf %33 : vector<16x16x32xf32> to vector<16x16x32xbf16>
    %c0_13 = arith.constant 0 : index
    %c0_14 = arith.constant 0 : index
    %c0_15 = arith.constant 0 : index
    %c0_16 = arith.constant 0 : index
    %35 = vector.load %arg4[%c0_13, %c0_14, %c0_15, %c0_16] : memref<1x16x16x32xbf16, #tpu.memory_space<vmem>>, vector<1x16x16x32xbf16>
    %36 = vector.shape_cast %35 : vector<1x16x16x32xbf16> to vector<16x16x32xbf16>
    %37 = vector.shape_cast %34 : vector<16x16x32xbf16> to vector<1x16x16x32xbf16>
    tpu.vector_store %arg4[%c0_13, %c0_14, %c0_15, %c0_16], %37 {strides = array<i32>} : memref<1x16x16x32xbf16, #tpu.memory_space<vmem>>, vector<1x16x16x32xbf16>,
    return
  }
  func.func @transform_0(%arg0: i32) -> (i32, i32, i32, i32) {
    %c0_i32 = arith.constant 0 : i32
    %c0_i32_0 = arith.constant 0 : i32
    %c0_i32_1 = arith.constant 0 : i32
    %c0_i32_2 = arith.constant 0 : i32
    return %arg0, %c0_i32, %c0_i32_0, %c0_i32_1 : i32, i32, i32, i32
  }
  func.func @transform_1(%arg0: i32) -> (i32, i32, i32) {
    %c0_i32 = arith.constant 0 : i32
    %c0_i32_0 = arith.constant 0 : i32
    %c0_i32_1 = arith.constant 0 : i32
    %c0_i32_2 = arith.constant 0 : i32
    return %c0_i32, %c0_i32_0, %c0_i32_1 : i32, i32, i32
  }
  func.func @transform_2(%arg0: i32) -> (i32, i32) {
    %c0_i32 = arith.constant 0 : i32
    %c0_i32_0 = arith.constant 0 : i32
    %c0_i32_1 = arith.constant 0 : i32
    return %c0_i32, %c0_i32_0 : i32, i32
  }
  func.func @transform_3(%arg0: i32) -> (i32, i32, i32, i32) {
    %c0_i32 = arith.constant 0 : i32
    %c0_i32_0 = arith.constant 0 : i32
    %c0_i32_1 = arith.constant 0 : i32
    %c0_i32_2 = arith.constant 0 : i32
    return %arg0, %c0_i32, %c0_i32_0, %c0_i32_1 : i32, i32, i32, i32
  }
}

module attributes {stable_mosaic.version = 11 : i64} {
  func.func @_enc_conv_kernel(%arg0: i32, %arg1: memref<1x9x9x128xbf16, #tpu.memory_space<vmem>>, %arg2: memref<4x128x32xbf16, #tpu.memory_space<vmem>>, %arg3: memref<1x32xf32, #tpu.memory_space<vmem>>, %arg4: memref<1x8x8x32xbf16, #tpu.memory_space<vmem>>) attributes {dimension_semantics = [#tpu.dimension_semantics<parallel>], iteration_bounds = array<i64: 2>, scalar_prefetch = 0 : i64, scratch_operands = 0 : i64, tpu.core_type = #tpu.core_type<tc>, window_params = [{transform_indices = @transform_0, window_bounds = array<i64: 1, 9, 9, 128>}, {pipeline_mode = #tpu.pipeline_mode<synchronous>, transform_indices = @transform_1, window_bounds = array<i64: 4, 128, 32>}, {pipeline_mode = #tpu.pipeline_mode<synchronous>, transform_indices = @transform_2, window_bounds = array<i64: 1, 32>}, {transform_indices = @transform_3, window_bounds = array<i64: 1, 8, 8, 32>}]} {
    %c0 = arith.constant 0 : index
    %c0_0 = arith.constant 0 : index
    %c0_1 = arith.constant 0 : index
    %c0_2 = arith.constant 0 : index
    %0 = vector.load %arg1[%c0, %c0_0, %c0_1, %c0_2] : memref<1x9x9x128xbf16, #tpu.memory_space<vmem>>, vector<1x9x9x128xbf16>
    %1 = vector.shape_cast %0 : vector<1x9x9x128xbf16> to vector<9x9x128xbf16>
    %c0_3 = arith.constant 0 : index
    %c0_4 = arith.constant 0 : index
    %c0_5 = arith.constant 0 : index
    %2 = vector.load %arg2[%c0_3, %c0_4, %c0_5] : memref<4x128x32xbf16, #tpu.memory_space<vmem>>, vector<4x128x32xbf16>
    %cst = arith.constant 0.000000e+00 : f32
    %3 = vector.broadcast %cst : f32 to vector<64x32xf32>
    %4 = vector.extract_strided_slice %1 {offsets = [0, 0, 0], sizes = [8, 8, 128], strides = [1, 1, 1]} : vector<9x9x128xbf16> to vector<8x8x128xbf16>
    %5 = vector.shape_cast %4 : vector<8x8x128xbf16> to vector<64x128xbf16>
    %6 = vector.extract_strided_slice %2 {offsets = [0, 0, 0], sizes = [1, 128, 32], strides = [1, 1, 1]} : vector<4x128x32xbf16> to vector<1x128x32xbf16>
    %7 = vector.shape_cast %6 : vector<1x128x32xbf16> to vector<128x32xbf16>
    %cst_6 = arith.constant dense<0.000000e+00> : vector<64x32xf32>
    %8 = tpu.matmul %5, %7, %cst_6 {dimension_numbers = #tpu.dot_dimension_numbers<[1], [0], [0], [1], [0, 0, 1, 1], [], []>} : vector<64x128xbf16>, vector<128x32xbf16>, vector<64x32xf32> -> vector<64x32xf32>
    %9 = arith.addf %3, %8 : vector<64x32xf32>
    %10 = vector.extract_strided_slice %1 {offsets = [0, 1, 0], sizes = [8, 8, 128], strides = [1, 1, 1]} : vector<9x9x128xbf16> to vector<8x8x128xbf16>
    %11 = vector.shape_cast %10 : vector<8x8x128xbf16> to vector<64x128xbf16>
    %12 = vector.extract_strided_slice %2 {offsets = [1, 0, 0], sizes = [1, 128, 32], strides = [1, 1, 1]} : vector<4x128x32xbf16> to vector<1x128x32xbf16>
    %13 = vector.shape_cast %12 : vector<1x128x32xbf16> to vector<128x32xbf16>
    %cst_7 = arith.constant dense<0.000000e+00> : vector<64x32xf32>
    %14 = tpu.matmul %11, %13, %cst_7 {dimension_numbers = #tpu.dot_dimension_numbers<[1], [0], [0], [1], [0, 0, 1, 1], [], []>} : vector<64x128xbf16>, vector<128x32xbf16>, vector<64x32xf32> -> vector<64x32xf32>
    %15 = arith.addf %9, %14 : vector<64x32xf32>
    %16 = vector.extract_strided_slice %1 {offsets = [1, 0, 0], sizes = [8, 8, 128], strides = [1, 1, 1]} : vector<9x9x128xbf16> to vector<8x8x128xbf16>
    %17 = vector.shape_cast %16 : vector<8x8x128xbf16> to vector<64x128xbf16>
    %18 = vector.extract_strided_slice %2 {offsets = [2, 0, 0], sizes = [1, 128, 32], strides = [1, 1, 1]} : vector<4x128x32xbf16> to vector<1x128x32xbf16>
    %19 = vector.shape_cast %18 : vector<1x128x32xbf16> to vector<128x32xbf16>
    %cst_8 = arith.constant dense<0.000000e+00> : vector<64x32xf32>
    %20 = tpu.matmul %17, %19, %cst_8 {dimension_numbers = #tpu.dot_dimension_numbers<[1], [0], [0], [1], [0, 0, 1, 1], [], []>} : vector<64x128xbf16>, vector<128x32xbf16>, vector<64x32xf32> -> vector<64x32xf32>
    %21 = arith.addf %15, %20 : vector<64x32xf32>
    %22 = vector.extract_strided_slice %1 {offsets = [1, 1, 0], sizes = [8, 8, 128], strides = [1, 1, 1]} : vector<9x9x128xbf16> to vector<8x8x128xbf16>
    %23 = vector.shape_cast %22 : vector<8x8x128xbf16> to vector<64x128xbf16>
    %24 = vector.extract_strided_slice %2 {offsets = [3, 0, 0], sizes = [1, 128, 32], strides = [1, 1, 1]} : vector<4x128x32xbf16> to vector<1x128x32xbf16>
    %25 = vector.shape_cast %24 : vector<1x128x32xbf16> to vector<128x32xbf16>
    %cst_9 = arith.constant dense<0.000000e+00> : vector<64x32xf32>
    %26 = tpu.matmul %23, %25, %cst_9 {dimension_numbers = #tpu.dot_dimension_numbers<[1], [0], [0], [1], [0, 0, 1, 1], [], []>} : vector<64x128xbf16>, vector<128x32xbf16>, vector<64x32xf32> -> vector<64x32xf32>
    %27 = arith.addf %21, %26 : vector<64x32xf32>
    %c0_10 = arith.constant 0 : index
    %c0_11 = arith.constant 0 : index
    %28 = vector.load %arg3[%c0_10, %c0_11] : memref<1x32xf32, #tpu.memory_space<vmem>>, vector<1x32xf32>
    %29 = vector.broadcast %28 : vector<1x32xf32> to vector<64x32xf32>
    %30 = arith.addf %27, %29 : vector<64x32xf32>
    %cst_12 = arith.constant 0.000000e+00 : f32
    %31 = vector.broadcast %cst_12 : f32 to vector<64x32xf32>
    %32 = arith.maximumf %30, %31 : vector<64x32xf32>
    %33 = vector.shape_cast %32 : vector<64x32xf32> to vector<8x8x32xf32>
    %34 = arith.truncf %33 : vector<8x8x32xf32> to vector<8x8x32xbf16>
    %c0_13 = arith.constant 0 : index
    %c0_14 = arith.constant 0 : index
    %c0_15 = arith.constant 0 : index
    %c0_16 = arith.constant 0 : index
    %35 = vector.load %arg4[%c0_13, %c0_14, %c0_15, %c0_16] : memref<1x8x8x32xbf16, #tpu.memory_space<vmem>>, vector<1x8x8x32xbf16>
    %36 = vector.shape_cast %35 : vector<1x8x8x32xbf16> to vector<8x8x32xbf16>
    %37 = vector.shape_cast %34 : vector<8x8x32xbf16> to vector<1x8x8x32xbf16>
    tpu.vector_store %arg4[%c0_13, %c0_14, %c0_15, %c0_16], %37 {strides = array<i32>} : memref<1x8x8x32xbf16, #tpu.memory_space<vmem>>, vector<1x8x8x32xbf16>,
    return
  }
  func.func @transform_0(%arg0: i32) -> (i32, i32, i32, i32) {
    %c0_i32 = arith.constant 0 : i32
    %c0_i32_0 = arith.constant 0 : i32
    %c0_i32_1 = arith.constant 0 : i32
    %c0_i32_2 = arith.constant 0 : i32
    return %arg0, %c0_i32, %c0_i32_0, %c0_i32_1 : i32, i32, i32, i32
  }
  func.func @transform_1(%arg0: i32) -> (i32, i32, i32) {
    %c0_i32 = arith.constant 0 : i32
    %c0_i32_0 = arith.constant 0 : i32
    %c0_i32_1 = arith.constant 0 : i32
    %c0_i32_2 = arith.constant 0 : i32
    return %c0_i32, %c0_i32_0, %c0_i32_1 : i32, i32, i32
  }
  func.func @transform_2(%arg0: i32) -> (i32, i32) {
    %c0_i32 = arith.constant 0 : i32
    %c0_i32_0 = arith.constant 0 : i32
    %c0_i32_1 = arith.constant 0 : i32
    return %c0_i32, %c0_i32_0 : i32, i32
  }
  func.func @transform_3(%arg0: i32) -> (i32, i32, i32, i32) {
    %c0_i32 = arith.constant 0 : i32
    %c0_i32_0 = arith.constant 0 : i32
    %c0_i32_1 = arith.constant 0 : i32
    %c0_i32_2 = arith.constant 0 : i32
    return %arg0, %c0_i32, %c0_i32_0, %c0_i32_1 : i32, i32, i32, i32
  }
}

module attributes {stable_mosaic.version = 11 : i64} {
  func.func @_latent_kernel(%arg0: i32, %arg1: memref<64x32xbf16, #tpu.memory_space<vmem>>, %arg2: memref<32x64xbf16, #tpu.memory_space<vmem>>, %arg3: memref<1x64xf32, #tpu.memory_space<vmem>>, %arg4: memref<64x64xf32, #tpu.memory_space<vmem>>, %arg5: memref<64x32xbf16, #tpu.memory_space<vmem>>, %arg6: memref<64x32xbf16, #tpu.memory_space<vmem>>) attributes {dimension_semantics = [#tpu.dimension_semantics<parallel>], iteration_bounds = array<i64: 2>, scalar_prefetch = 0 : i64, scratch_operands = 0 : i64, tpu.core_type = #tpu.core_type<tc>, window_params = [{transform_indices = @transform_0, window_bounds = array<i64: 64, 32>}, {pipeline_mode = #tpu.pipeline_mode<synchronous>, transform_indices = @transform_1, window_bounds = array<i64: 32, 64>}, {pipeline_mode = #tpu.pipeline_mode<synchronous>, transform_indices = @transform_2, window_bounds = array<i64: 1, 64>}, {transform_indices = @transform_3, window_bounds = array<i64: 64, 64>}, {pipeline_mode = #tpu.pipeline_mode<synchronous>, transform_indices = @transform_4, window_bounds = array<i64: 64, 32>}, {transform_indices = @transform_5, window_bounds = array<i64: 64, 32>}]} {
    %c0 = arith.constant 0 : index
    %c0_0 = arith.constant 0 : index
    %0 = vector.load %arg1[%c0, %c0_0] : memref<64x32xbf16, #tpu.memory_space<vmem>>, vector<64x32xbf16>
    %c0_1 = arith.constant 0 : index
    %c0_2 = arith.constant 0 : index
    %1 = vector.load %arg2[%c0_1, %c0_2] : memref<32x64xbf16, #tpu.memory_space<vmem>>, vector<32x64xbf16>
    %cst = arith.constant dense<0.000000e+00> : vector<64x64xf32>
    %2 = tpu.matmul %0, %1, %cst {dimension_numbers = #tpu.dot_dimension_numbers<[1], [0], [0], [1], [0, 0, 1, 1], [], []>} : vector<64x32xbf16>, vector<32x64xbf16>, vector<64x64xf32> -> vector<64x64xf32>
    %c0_3 = arith.constant 0 : index
    %c0_4 = arith.constant 0 : index
    %3 = vector.load %arg3[%c0_3, %c0_4] : memref<1x64xf32, #tpu.memory_space<vmem>>, vector<1x64xf32>
    %4 = vector.broadcast %3 : vector<1x64xf32> to vector<64x64xf32>
    %5 = arith.addf %2, %4 : vector<64x64xf32>
    %c0_5 = arith.constant 0 : index
    %c0_6 = arith.constant 0 : index
    %6 = vector.load %arg4[%c0_5, %c0_6] : memref<64x64xf32, #tpu.memory_space<vmem>>, vector<64x64xf32>
    %7 = arith.addf %5, %6 : vector<64x64xf32>
    %cst_7 = arith.constant 1.11111116 : f32
    %8 = vector.broadcast %cst_7 : f32 to vector<64x64xf32>
    %9 = arith.mulf %7, %8 : vector<64x64xf32>
    %cst_8 = arith.constant dense<0xFF800000> : vector<64xf32>
    %10 = vector.multi_reduction <maximumf>, %9, %cst_8 [1] : vector<64x64xf32> to vector<64xf32>
    %11 = vector.shape_cast %10 : vector<64xf32> to vector<64x1xf32>
    %12 = vector.broadcast %11 : vector<64x1xf32> to vector<64x64xf32>
    %13 = arith.subf %9, %12 : vector<64x64xf32>
    %14 = math.exp %13 : vector<64x64xf32>
    %cst_9 = arith.constant dense<0.000000e+00> : vector<64xf32>
    %15 = vector.multi_reduction <add>, %14, %cst_9 [1] : vector<64x64xf32> to vector<64xf32>
    %16 = vector.shape_cast %15 : vector<64xf32> to vector<64x1xf32>
    %17 = tpu.reciprocal %16 {approx = true} : vector<64x1xf32> -> vector<64x1xf32>
    %18 = vector.broadcast %17 : vector<64x1xf32> to vector<64x64xf32>
    %19 = arith.mulf %14, %18 : vector<64x64xf32>
    %20 = arith.truncf %19 : vector<64x64xf32> to vector<64x64xbf16>
    %c0_10 = arith.constant 0 : index
    %c0_11 = arith.constant 0 : index
    %21 = vector.load %arg5[%c0_10, %c0_11] : memref<64x32xbf16, #tpu.memory_space<vmem>>, vector<64x32xbf16>
    %cst_12 = arith.constant dense<0.000000e+00> : vector<64x32xf32>
    %22 = tpu.matmul %20, %21, %cst_12 {dimension_numbers = #tpu.dot_dimension_numbers<[1], [0], [0], [1], [0, 0, 1, 1], [], []>} : vector<64x64xbf16>, vector<64x32xbf16>, vector<64x32xf32> -> vector<64x32xf32>
    %23 = arith.truncf %22 : vector<64x32xf32> to vector<64x32xbf16>
    %c0_13 = arith.constant 0 : index
    %c0_14 = arith.constant 0 : index
    %24 = vector.load %arg6[%c0_13, %c0_14] : memref<64x32xbf16, #tpu.memory_space<vmem>>, vector<64x32xbf16>
    tpu.vector_store %arg6[%c0_13, %c0_14], %23 {strides = array<i32>} : memref<64x32xbf16, #tpu.memory_space<vmem>>, vector<64x32xbf16>,
    return
  }
  func.func @transform_0(%arg0: i32) -> (i32, i32) {
    %c0_i32 = arith.constant 0 : i32
    %c0_i32_0 = arith.constant 0 : i32
    return %arg0, %c0_i32 : i32, i32
  }
  func.func @transform_1(%arg0: i32) -> (i32, i32) {
    %c0_i32 = arith.constant 0 : i32
    %c0_i32_0 = arith.constant 0 : i32
    %c0_i32_1 = arith.constant 0 : i32
    return %c0_i32, %c0_i32_0 : i32, i32
  }
  func.func @transform_2(%arg0: i32) -> (i32, i32) {
    %c0_i32 = arith.constant 0 : i32
    %c0_i32_0 = arith.constant 0 : i32
    %c0_i32_1 = arith.constant 0 : i32
    return %c0_i32, %c0_i32_0 : i32, i32
  }
  func.func @transform_3(%arg0: i32) -> (i32, i32) {
    %c0_i32 = arith.constant 0 : i32
    %c0_i32_0 = arith.constant 0 : i32
    return %arg0, %c0_i32 : i32, i32
  }
  func.func @transform_4(%arg0: i32) -> (i32, i32) {
    %c0_i32 = arith.constant 0 : i32
    %c0_i32_0 = arith.constant 0 : i32
    %c0_i32_1 = arith.constant 0 : i32
    return %c0_i32, %c0_i32_0 : i32, i32
  }
  func.func @transform_5(%arg0: i32) -> (i32, i32) {
    %c0_i32 = arith.constant 0 : i32
    %c0_i32_0 = arith.constant 0 : i32
    return %arg0, %c0_i32 : i32, i32
  }
}

module attributes {stable_mosaic.version = 11 : i64} {
  func.func @_dec_convt_kernel(%arg0: i32, %arg1: memref<1x10x10x32xbf16, #tpu.memory_space<vmem>>, %arg2: memref<4x4x32x32xbf16, #tpu.memory_space<vmem>>, %arg3: memref<1x32xf32, #tpu.memory_space<vmem>>, %arg4: memref<1x8x8x128xbf16, #tpu.memory_space<vmem>>) attributes {dimension_semantics = [#tpu.dimension_semantics<parallel>], iteration_bounds = array<i64: 2>, scalar_prefetch = 0 : i64, scratch_operands = 0 : i64, tpu.core_type = #tpu.core_type<tc>, window_params = [{transform_indices = @transform_0, window_bounds = array<i64: 1, 10, 10, 32>}, {pipeline_mode = #tpu.pipeline_mode<synchronous>, transform_indices = @transform_1, window_bounds = array<i64: 4, 4, 32, 32>}, {pipeline_mode = #tpu.pipeline_mode<synchronous>, transform_indices = @transform_2, window_bounds = array<i64: 1, 32>}, {transform_indices = @transform_3, window_bounds = array<i64: 1, 8, 8, 128>}]} {
    %c0 = arith.constant 0 : index
    %c0_0 = arith.constant 0 : index
    %c0_1 = arith.constant 0 : index
    %c0_2 = arith.constant 0 : index
    %0 = vector.load %arg1[%c0, %c0_0, %c0_1, %c0_2] : memref<1x10x10x32xbf16, #tpu.memory_space<vmem>>, vector<1x10x10x32xbf16>
    %1 = vector.shape_cast %0 : vector<1x10x10x32xbf16> to vector<10x10x32xbf16>
    %c0_3 = arith.constant 0 : index
    %c0_4 = arith.constant 0 : index
    %c0_5 = arith.constant 0 : index
    %c0_6 = arith.constant 0 : index
    %2 = vector.load %arg2[%c0_3, %c0_4, %c0_5, %c0_6] : memref<4x4x32x32xbf16, #tpu.memory_space<vmem>>, vector<4x4x32x32xbf16>
    %c0_7 = arith.constant 0 : index
    %c0_8 = arith.constant 0 : index
    %3 = vector.load %arg3[%c0_7, %c0_8] : memref<1x32xf32, #tpu.memory_space<vmem>>, vector<1x32xf32>
    %cst = arith.constant 0.000000e+00 : f32
    %4 = vector.broadcast %cst : f32 to vector<64x32xf32>
    %5 = vector.extract_strided_slice %1 {offsets = [0, 0, 0], sizes = [8, 8, 32], strides = [1, 1, 1]} : vector<10x10x32xbf16> to vector<8x8x32xbf16>
    %6 = vector.shape_cast %5 : vector<8x8x32xbf16> to vector<64x32xbf16>
    %7 = vector.extract_strided_slice %2 {offsets = [0, 0, 0, 0], sizes = [1, 1, 32, 32], strides = [1, 1, 1, 1]} : vector<4x4x32x32xbf16> to vector<1x1x32x32xbf16>
    %8 = vector.shape_cast %7 : vector<1x1x32x32xbf16> to vector<32x32xbf16>
    %cst_9 = arith.constant dense<0.000000e+00> : vector<64x32xf32>
    %9 = tpu.matmul %6, %8, %cst_9 {dimension_numbers = #tpu.dot_dimension_numbers<[1], [0], [0], [1], [0, 0, 1, 1], [], []>} : vector<64x32xbf16>, vector<32x32xbf16>, vector<64x32xf32> -> vector<64x32xf32>
    %10 = arith.addf %4, %9 : vector<64x32xf32>
    %11 = vector.extract_strided_slice %1 {offsets = [0, 1, 0], sizes = [8, 8, 32], strides = [1, 1, 1]} : vector<10x10x32xbf16> to vector<8x8x32xbf16>
    %12 = vector.shape_cast %11 : vector<8x8x32xbf16> to vector<64x32xbf16>
    %13 = vector.extract_strided_slice %2 {offsets = [0, 1, 0, 0], sizes = [1, 1, 32, 32], strides = [1, 1, 1, 1]} : vector<4x4x32x32xbf16> to vector<1x1x32x32xbf16>
    %14 = vector.shape_cast %13 : vector<1x1x32x32xbf16> to vector<32x32xbf16>
    %cst_10 = arith.constant dense<0.000000e+00> : vector<64x32xf32>
    %15 = tpu.matmul %12, %14, %cst_10 {dimension_numbers = #tpu.dot_dimension_numbers<[1], [0], [0], [1], [0, 0, 1, 1], [], []>} : vector<64x32xbf16>, vector<32x32xbf16>, vector<64x32xf32> -> vector<64x32xf32>
    %16 = arith.addf %10, %15 : vector<64x32xf32>
    %17 = vector.extract_strided_slice %1 {offsets = [1, 0, 0], sizes = [8, 8, 32], strides = [1, 1, 1]} : vector<10x10x32xbf16> to vector<8x8x32xbf16>
    %18 = vector.shape_cast %17 : vector<8x8x32xbf16> to vector<64x32xbf16>
    %19 = vector.extract_strided_slice %2 {offsets = [0, 2, 0, 0], sizes = [1, 1, 32, 32], strides = [1, 1, 1, 1]} : vector<4x4x32x32xbf16> to vector<1x1x32x32xbf16>
    %20 = vector.shape_cast %19 : vector<1x1x32x32xbf16> to vector<32x32xbf16>
    %cst_11 = arith.constant dense<0.000000e+00> : vector<64x32xf32>
    %21 = tpu.matmul %18, %20, %cst_11 {dimension_numbers = #tpu.dot_dimension_numbers<[1], [0], [0], [1], [0, 0, 1, 1], [], []>} : vector<64x32xbf16>, vector<32x32xbf16>, vector<64x32xf32> -> vector<64x32xf32>
    %22 = arith.addf %16, %21 : vector<64x32xf32>
    %23 = vector.extract_strided_slice %1 {offsets = [1, 1, 0], sizes = [8, 8, 32], strides = [1, 1, 1]} : vector<10x10x32xbf16> to vector<8x8x32xbf16>
    %24 = vector.shape_cast %23 : vector<8x8x32xbf16> to vector<64x32xbf16>
    %25 = vector.extract_strided_slice %2 {offsets = [0, 3, 0, 0], sizes = [1, 1, 32, 32], strides = [1, 1, 1, 1]} : vector<4x4x32x32xbf16> to vector<1x1x32x32xbf16>
    %26 = vector.shape_cast %25 : vector<1x1x32x32xbf16> to vector<32x32xbf16>
    %cst_12 = arith.constant dense<0.000000e+00> : vector<64x32xf32>
    %27 = tpu.matmul %24, %26, %cst_12 {dimension_numbers = #tpu.dot_dimension_numbers<[1], [0], [0], [1], [0, 0, 1, 1], [], []>} : vector<64x32xbf16>, vector<32x32xbf16>, vector<64x32xf32> -> vector<64x32xf32>
    %28 = arith.addf %22, %27 : vector<64x32xf32>
    %29 = vector.broadcast %3 : vector<1x32xf32> to vector<64x32xf32>
    %30 = arith.addf %28, %29 : vector<64x32xf32>
    %cst_13 = arith.constant 0.000000e+00 : f32
    %31 = vector.broadcast %cst_13 : f32 to vector<64x32xf32>
    %32 = arith.maximumf %30, %31 : vector<64x32xf32>
    %cst_14 = arith.constant 0.000000e+00 : f32
    %33 = vector.broadcast %cst_14 : f32 to vector<64x32xf32>
    %34 = vector.extract_strided_slice %1 {offsets = [0, 1, 0], sizes = [8, 8, 32], strides = [1, 1, 1]} : vector<10x10x32xbf16> to vector<8x8x32xbf16>
    %35 = vector.shape_cast %34 : vector<8x8x32xbf16> to vector<64x32xbf16>
    %36 = vector.extract_strided_slice %2 {offsets = [1, 0, 0, 0], sizes = [1, 1, 32, 32], strides = [1, 1, 1, 1]} : vector<4x4x32x32xbf16> to vector<1x1x32x32xbf16>
    %37 = vector.shape_cast %36 : vector<1x1x32x32xbf16> to vector<32x32xbf16>
    %cst_15 = arith.constant dense<0.000000e+00> : vector<64x32xf32>
    %38 = tpu.matmul %35, %37, %cst_15 {dimension_numbers = #tpu.dot_dimension_numbers<[1], [0], [0], [1], [0, 0, 1, 1], [], []>} : vector<64x32xbf16>, vector<32x32xbf16>, vector<64x32xf32> -> vector<64x32xf32>
    %39 = arith.addf %33, %38 : vector<64x32xf32>
    %40 = vector.extract_strided_slice %1 {offsets = [0, 2, 0], sizes = [8, 8, 32], strides = [1, 1, 1]} : vector<10x10x32xbf16> to vector<8x8x32xbf16>
    %41 = vector.shape_cast %40 : vector<8x8x32xbf16> to vector<64x32xbf16>
    %42 = vector.extract_strided_slice %2 {offsets = [1, 1, 0, 0], sizes = [1, 1, 32, 32], strides = [1, 1, 1, 1]} : vector<4x4x32x32xbf16> to vector<1x1x32x32xbf16>
    %43 = vector.shape_cast %42 : vector<1x1x32x32xbf16> to vector<32x32xbf16>
    %cst_16 = arith.constant dense<0.000000e+00> : vector<64x32xf32>
    %44 = tpu.matmul %41, %43, %cst_16 {dimension_numbers = #tpu.dot_dimension_numbers<[1], [0], [0], [1], [0, 0, 1, 1], [], []>} : vector<64x32xbf16>, vector<32x32xbf16>, vector<64x32xf32> -> vector<64x32xf32>
    %45 = arith.addf %39, %44 : vector<64x32xf32>
    %46 = vector.extract_strided_slice %1 {offsets = [1, 1, 0], sizes = [8, 8, 32], strides = [1, 1, 1]} : vector<10x10x32xbf16> to vector<8x8x32xbf16>
    %47 = vector.shape_cast %46 : vector<8x8x32xbf16> to vector<64x32xbf16>
    %48 = vector.extract_strided_slice %2 {offsets = [1, 2, 0, 0], sizes = [1, 1, 32, 32], strides = [1, 1, 1, 1]} : vector<4x4x32x32xbf16> to vector<1x1x32x32xbf16>
    %49 = vector.shape_cast %48 : vector<1x1x32x32xbf16> to vector<32x32xbf16>
    %cst_17 = arith.constant dense<0.000000e+00> : vector<64x32xf32>
    %50 = tpu.matmul %47, %49, %cst_17 {dimension_numbers = #tpu.dot_dimension_numbers<[1], [0], [0], [1], [0, 0, 1, 1], [], []>} : vector<64x32xbf16>, vector<32x32xbf16>, vector<64x32xf32> -> vector<64x32xf32>
    %51 = arith.addf %45, %50 : vector<64x32xf32>
    %52 = vector.extract_strided_slice %1 {offsets = [1, 2, 0], sizes = [8, 8, 32], strides = [1, 1, 1]} : vector<10x10x32xbf16> to vector<8x8x32xbf16>
    %53 = vector.shape_cast %52 : vector<8x8x32xbf16> to vector<64x32xbf16>
    %54 = vector.extract_strided_slice %2 {offsets = [1, 3, 0, 0], sizes = [1, 1, 32, 32], strides = [1, 1, 1, 1]} : vector<4x4x32x32xbf16> to vector<1x1x32x32xbf16>
    %55 = vector.shape_cast %54 : vector<1x1x32x32xbf16> to vector<32x32xbf16>
    %cst_18 = arith.constant dense<0.000000e+00> : vector<64x32xf32>
    %56 = tpu.matmul %53, %55, %cst_18 {dimension_numbers = #tpu.dot_dimension_numbers<[1], [0], [0], [1], [0, 0, 1, 1], [], []>} : vector<64x32xbf16>, vector<32x32xbf16>, vector<64x32xf32> -> vector<64x32xf32>
    %57 = arith.addf %51, %56 : vector<64x32xf32>
    %58 = vector.broadcast %3 : vector<1x32xf32> to vector<64x32xf32>
    %59 = arith.addf %57, %58 : vector<64x32xf32>
    %cst_19 = arith.constant 0.000000e+00 : f32
    %60 = vector.broadcast %cst_19 : f32 to vector<64x32xf32>
    %61 = arith.maximumf %59, %60 : vector<64x32xf32>
    %cst_20 = arith.constant 0.000000e+00 : f32
    %62 = vector.broadcast %cst_20 : f32 to vector<64x32xf32>
    %63 = vector.extract_strided_slice %1 {offsets = [1, 0, 0], sizes = [8, 8, 32], strides = [1, 1, 1]} : vector<10x10x32xbf16> to vector<8x8x32xbf16>
    %64 = vector.shape_cast %63 : vector<8x8x32xbf16> to vector<64x32xbf16>
    %65 = vector.extract_strided_slice %2 {offsets = [2, 0, 0, 0], sizes = [1, 1, 32, 32], strides = [1, 1, 1, 1]} : vector<4x4x32x32xbf16> to vector<1x1x32x32xbf16>
    %66 = vector.shape_cast %65 : vector<1x1x32x32xbf16> to vector<32x32xbf16>
    %cst_21 = arith.constant dense<0.000000e+00> : vector<64x32xf32>
    %67 = tpu.matmul %64, %66, %cst_21 {dimension_numbers = #tpu.dot_dimension_numbers<[1], [0], [0], [1], [0, 0, 1, 1], [], []>} : vector<64x32xbf16>, vector<32x32xbf16>, vector<64x32xf32> -> vector<64x32xf32>
    %68 = arith.addf %62, %67 : vector<64x32xf32>
    %69 = vector.extract_strided_slice %1 {offsets = [1, 1, 0], sizes = [8, 8, 32], strides = [1, 1, 1]} : vector<10x10x32xbf16> to vector<8x8x32xbf16>
    %70 = vector.shape_cast %69 : vector<8x8x32xbf16> to vector<64x32xbf16>
    %71 = vector.extract_strided_slice %2 {offsets = [2, 1, 0, 0], sizes = [1, 1, 32, 32], strides = [1, 1, 1, 1]} : vector<4x4x32x32xbf16> to vector<1x1x32x32xbf16>
    %72 = vector.shape_cast %71 : vector<1x1x32x32xbf16> to vector<32x32xbf16>
    %cst_22 = arith.constant dense<0.000000e+00> : vector<64x32xf32>
    %73 = tpu.matmul %70, %72, %cst_22 {dimension_numbers = #tpu.dot_dimension_numbers<[1], [0], [0], [1], [0, 0, 1, 1], [], []>} : vector<64x32xbf16>, vector<32x32xbf16>, vector<64x32xf32> -> vector<64x32xf32>
    %74 = arith.addf %68, %73 : vector<64x32xf32>
    %75 = vector.extract_strided_slice %1 {offsets = [2, 0, 0], sizes = [8, 8, 32], strides = [1, 1, 1]} : vector<10x10x32xbf16> to vector<8x8x32xbf16>
    %76 = vector.shape_cast %75 : vector<8x8x32xbf16> to vector<64x32xbf16>
    %77 = vector.extract_strided_slice %2 {offsets = [2, 2, 0, 0], sizes = [1, 1, 32, 32], strides = [1, 1, 1, 1]} : vector<4x4x32x32xbf16> to vector<1x1x32x32xbf16>
    %78 = vector.shape_cast %77 : vector<1x1x32x32xbf16> to vector<32x32xbf16>
    %cst_23 = arith.constant dense<0.000000e+00> : vector<64x32xf32>
    %79 = tpu.matmul %76, %78, %cst_23 {dimension_numbers = #tpu.dot_dimension_numbers<[1], [0], [0], [1], [0, 0, 1, 1], [], []>} : vector<64x32xbf16>, vector<32x32xbf16>, vector<64x32xf32> -> vector<64x32xf32>
    %80 = arith.addf %74, %79 : vector<64x32xf32>
    %81 = vector.extract_strided_slice %1 {offsets = [2, 1, 0], sizes = [8, 8, 32], strides = [1, 1, 1]} : vector<10x10x32xbf16> to vector<8x8x32xbf16>
    %82 = vector.shape_cast %81 : vector<8x8x32xbf16> to vector<64x32xbf16>
    %83 = vector.extract_strided_slice %2 {offsets = [2, 3, 0, 0], sizes = [1, 1, 32, 32], strides = [1, 1, 1, 1]} : vector<4x4x32x32xbf16> to vector<1x1x32x32xbf16>
    %84 = vector.shape_cast %83 : vector<1x1x32x32xbf16> to vector<32x32xbf16>
    %cst_24 = arith.constant dense<0.000000e+00> : vector<64x32xf32>
    %85 = tpu.matmul %82, %84, %cst_24 {dimension_numbers = #tpu.dot_dimension_numbers<[1], [0], [0], [1], [0, 0, 1, 1], [], []>} : vector<64x32xbf16>, vector<32x32xbf16>, vector<64x32xf32> -> vector<64x32xf32>
    %86 = arith.addf %80, %85 : vector<64x32xf32>
    %87 = vector.broadcast %3 : vector<1x32xf32> to vector<64x32xf32>
    %88 = arith.addf %86, %87 : vector<64x32xf32>
    %cst_25 = arith.constant 0.000000e+00 : f32
    %89 = vector.broadcast %cst_25 : f32 to vector<64x32xf32>
    %90 = arith.maximumf %88, %89 : vector<64x32xf32>
    %cst_26 = arith.constant 0.000000e+00 : f32
    %91 = vector.broadcast %cst_26 : f32 to vector<64x32xf32>
    %92 = vector.extract_strided_slice %1 {offsets = [1, 1, 0], sizes = [8, 8, 32], strides = [1, 1, 1]} : vector<10x10x32xbf16> to vector<8x8x32xbf16>
    %93 = vector.shape_cast %92 : vector<8x8x32xbf16> to vector<64x32xbf16>
    %94 = vector.extract_strided_slice %2 {offsets = [3, 0, 0, 0], sizes = [1, 1, 32, 32], strides = [1, 1, 1, 1]} : vector<4x4x32x32xbf16> to vector<1x1x32x32xbf16>
    %95 = vector.shape_cast %94 : vector<1x1x32x32xbf16> to vector<32x32xbf16>
    %cst_27 = arith.constant dense<0.000000e+00> : vector<64x32xf32>
    %96 = tpu.matmul %93, %95, %cst_27 {dimension_numbers = #tpu.dot_dimension_numbers<[1], [0], [0], [1], [0, 0, 1, 1], [], []>} : vector<64x32xbf16>, vector<32x32xbf16>, vector<64x32xf32> -> vector<64x32xf32>
    %97 = arith.addf %91, %96 : vector<64x32xf32>
    %98 = vector.extract_strided_slice %1 {offsets = [1, 2, 0], sizes = [8, 8, 32], strides = [1, 1, 1]} : vector<10x10x32xbf16> to vector<8x8x32xbf16>
    %99 = vector.shape_cast %98 : vector<8x8x32xbf16> to vector<64x32xbf16>
    %100 = vector.extract_strided_slice %2 {offsets = [3, 1, 0, 0], sizes = [1, 1, 32, 32], strides = [1, 1, 1, 1]} : vector<4x4x32x32xbf16> to vector<1x1x32x32xbf16>
    %101 = vector.shape_cast %100 : vector<1x1x32x32xbf16> to vector<32x32xbf16>
    %cst_28 = arith.constant dense<0.000000e+00> : vector<64x32xf32>
    %102 = tpu.matmul %99, %101, %cst_28 {dimension_numbers = #tpu.dot_dimension_numbers<[1], [0], [0], [1], [0, 0, 1, 1], [], []>} : vector<64x32xbf16>, vector<32x32xbf16>, vector<64x32xf32> -> vector<64x32xf32>
    %103 = arith.addf %97, %102 : vector<64x32xf32>
    %104 = vector.extract_strided_slice %1 {offsets = [2, 1, 0], sizes = [8, 8, 32], strides = [1, 1, 1]} : vector<10x10x32xbf16> to vector<8x8x32xbf16>
    %105 = vector.shape_cast %104 : vector<8x8x32xbf16> to vector<64x32xbf16>
    %106 = vector.extract_strided_slice %2 {offsets = [3, 2, 0, 0], sizes = [1, 1, 32, 32], strides = [1, 1, 1, 1]} : vector<4x4x32x32xbf16> to vector<1x1x32x32xbf16>
    %107 = vector.shape_cast %106 : vector<1x1x32x32xbf16> to vector<32x32xbf16>
    %cst_29 = arith.constant dense<0.000000e+00> : vector<64x32xf32>
    %108 = tpu.matmul %105, %107, %cst_29 {dimension_numbers = #tpu.dot_dimension_numbers<[1], [0], [0], [1], [0, 0, 1, 1], [], []>} : vector<64x32xbf16>, vector<32x32xbf16>, vector<64x32xf32> -> vector<64x32xf32>
    %109 = arith.addf %103, %108 : vector<64x32xf32>
    %110 = vector.extract_strided_slice %1 {offsets = [2, 2, 0], sizes = [8, 8, 32], strides = [1, 1, 1]} : vector<10x10x32xbf16> to vector<8x8x32xbf16>
    %111 = vector.shape_cast %110 : vector<8x8x32xbf16> to vector<64x32xbf16>
    %112 = vector.extract_strided_slice %2 {offsets = [3, 3, 0, 0], sizes = [1, 1, 32, 32], strides = [1, 1, 1, 1]} : vector<4x4x32x32xbf16> to vector<1x1x32x32xbf16>
    %113 = vector.shape_cast %112 : vector<1x1x32x32xbf16> to vector<32x32xbf16>
    %cst_30 = arith.constant dense<0.000000e+00> : vector<64x32xf32>
    %114 = tpu.matmul %111, %113, %cst_30 {dimension_numbers = #tpu.dot_dimension_numbers<[1], [0], [0], [1], [0, 0, 1, 1], [], []>} : vector<64x32xbf16>, vector<32x32xbf16>, vector<64x32xf32> -> vector<64x32xf32>
    %115 = arith.addf %109, %114 : vector<64x32xf32>
    %116 = vector.broadcast %3 : vector<1x32xf32> to vector<64x32xf32>
    %117 = arith.addf %115, %116 : vector<64x32xf32>
    %cst_31 = arith.constant 0.000000e+00 : f32
    %118 = vector.broadcast %cst_31 : f32 to vector<64x32xf32>
    %119 = arith.maximumf %117, %118 : vector<64x32xf32>
    %120 = tpu.concatenate %32, %61, %90, %119 in 1 : vector<64x32xf32>, vector<64x32xf32>, vector<64x32xf32>, vector<64x32xf32> -> vector<64x128xf32>
    %121 = vector.shape_cast %120 : vector<64x128xf32> to vector<8x8x128xf32>
    %122 = arith.truncf %121 : vector<8x8x128xf32> to vector<8x8x128xbf16>
    %c0_32 = arith.constant 0 : index
    %c0_33 = arith.constant 0 : index
    %c0_34 = arith.constant 0 : index
    %c0_35 = arith.constant 0 : index
    %123 = vector.load %arg4[%c0_32, %c0_33, %c0_34, %c0_35] : memref<1x8x8x128xbf16, #tpu.memory_space<vmem>>, vector<1x8x8x128xbf16>
    %124 = vector.shape_cast %123 : vector<1x8x8x128xbf16> to vector<8x8x128xbf16>
    %125 = vector.shape_cast %122 : vector<8x8x128xbf16> to vector<1x8x8x128xbf16>
    tpu.vector_store %arg4[%c0_32, %c0_33, %c0_34, %c0_35], %125 {strides = array<i32>} : memref<1x8x8x128xbf16, #tpu.memory_space<vmem>>, vector<1x8x8x128xbf16>,
    return
  }
  func.func @transform_0(%arg0: i32) -> (i32, i32, i32, i32) {
    %c0_i32 = arith.constant 0 : i32
    %c0_i32_0 = arith.constant 0 : i32
    %c0_i32_1 = arith.constant 0 : i32
    %c0_i32_2 = arith.constant 0 : i32
    return %arg0, %c0_i32, %c0_i32_0, %c0_i32_1 : i32, i32, i32, i32
  }
  func.func @transform_1(%arg0: i32) -> (i32, i32, i32, i32) {
    %c0_i32 = arith.constant 0 : i32
    %c0_i32_0 = arith.constant 0 : i32
    %c0_i32_1 = arith.constant 0 : i32
    %c0_i32_2 = arith.constant 0 : i32
    %c0_i32_3 = arith.constant 0 : i32
    return %c0_i32, %c0_i32_0, %c0_i32_1, %c0_i32_2 : i32, i32, i32, i32
  }
  func.func @transform_2(%arg0: i32) -> (i32, i32) {
    %c0_i32 = arith.constant 0 : i32
    %c0_i32_0 = arith.constant 0 : i32
    %c0_i32_1 = arith.constant 0 : i32
    return %c0_i32, %c0_i32_0 : i32, i32
  }
  func.func @transform_3(%arg0: i32) -> (i32, i32, i32, i32) {
    %c0_i32 = arith.constant 0 : i32
    %c0_i32_0 = arith.constant 0 : i32
    %c0_i32_1 = arith.constant 0 : i32
    %c0_i32_2 = arith.constant 0 : i32
    return %arg0, %c0_i32, %c0_i32_0, %c0_i32_1 : i32, i32, i32, i32
  }
}

module attributes {stable_mosaic.version = 11 : i64} {
  func.func @_dec_convt_final_kernel(%arg0: i32, %arg1: memref<1x18x18x32xbf16, #tpu.memory_space<vmem>>, %arg2: memref<4x4x32x32xbf16, #tpu.memory_space<vmem>>, %arg3: memref<1x32xf32, #tpu.memory_space<vmem>>, %arg4: memref<32x4xbf16, #tpu.memory_space<vmem>>, %arg5: memref<1x4xf32, #tpu.memory_space<vmem>>, %arg6: memref<1x16x16x16xf32, #tpu.memory_space<vmem>>) attributes {dimension_semantics = [#tpu.dimension_semantics<parallel>], iteration_bounds = array<i64: 2>, scalar_prefetch = 0 : i64, scratch_operands = 0 : i64, tpu.core_type = #tpu.core_type<tc>, window_params = [{transform_indices = @transform_0, window_bounds = array<i64: 1, 18, 18, 32>}, {pipeline_mode = #tpu.pipeline_mode<synchronous>, transform_indices = @transform_1, window_bounds = array<i64: 4, 4, 32, 32>}, {pipeline_mode = #tpu.pipeline_mode<synchronous>, transform_indices = @transform_2, window_bounds = array<i64: 1, 32>}, {pipeline_mode = #tpu.pipeline_mode<synchronous>, transform_indices = @transform_3, window_bounds = array<i64: 32, 4>}, {pipeline_mode = #tpu.pipeline_mode<synchronous>, transform_indices = @transform_4, window_bounds = array<i64: 1, 4>}, {transform_indices = @transform_5, window_bounds = array<i64: 1, 16, 16, 16>}]} {
    %c0 = arith.constant 0 : index
    %c0_0 = arith.constant 0 : index
    %c0_1 = arith.constant 0 : index
    %c0_2 = arith.constant 0 : index
    %0 = vector.load %arg1[%c0, %c0_0, %c0_1, %c0_2] : memref<1x18x18x32xbf16, #tpu.memory_space<vmem>>, vector<1x18x18x32xbf16>
    %1 = vector.shape_cast %0 : vector<1x18x18x32xbf16> to vector<18x18x32xbf16>
    %c0_3 = arith.constant 0 : index
    %c0_4 = arith.constant 0 : index
    %c0_5 = arith.constant 0 : index
    %c0_6 = arith.constant 0 : index
    %2 = vector.load %arg2[%c0_3, %c0_4, %c0_5, %c0_6] : memref<4x4x32x32xbf16, #tpu.memory_space<vmem>>, vector<4x4x32x32xbf16>
    %c0_7 = arith.constant 0 : index
    %c0_8 = arith.constant 0 : index
    %3 = vector.load %arg3[%c0_7, %c0_8] : memref<1x32xf32, #tpu.memory_space<vmem>>, vector<1x32xf32>
    %c0_9 = arith.constant 0 : index
    %c0_10 = arith.constant 0 : index
    %4 = vector.load %arg4[%c0_9, %c0_10] : memref<32x4xbf16, #tpu.memory_space<vmem>>, vector<32x4xbf16>
    %c0_11 = arith.constant 0 : index
    %c0_12 = arith.constant 0 : index
    %5 = vector.load %arg5[%c0_11, %c0_12] : memref<1x4xf32, #tpu.memory_space<vmem>>, vector<1x4xf32>
    %cst = arith.constant 0.000000e+00 : f32
    %6 = vector.broadcast %cst : f32 to vector<256x32xf32>
    %7 = vector.extract_strided_slice %1 {offsets = [0, 0, 0], sizes = [16, 16, 32], strides = [1, 1, 1]} : vector<18x18x32xbf16> to vector<16x16x32xbf16>
    %8 = vector.shape_cast %7 : vector<16x16x32xbf16> to vector<256x32xbf16>
    %9 = vector.extract_strided_slice %2 {offsets = [0, 0, 0, 0], sizes = [1, 1, 32, 32], strides = [1, 1, 1, 1]} : vector<4x4x32x32xbf16> to vector<1x1x32x32xbf16>
    %10 = vector.shape_cast %9 : vector<1x1x32x32xbf16> to vector<32x32xbf16>
    %cst_13 = arith.constant dense<0.000000e+00> : vector<256x32xf32>
    %11 = tpu.matmul %8, %10, %cst_13 {dimension_numbers = #tpu.dot_dimension_numbers<[1], [0], [0], [1], [0, 0, 1, 1], [], []>} : vector<256x32xbf16>, vector<32x32xbf16>, vector<256x32xf32> -> vector<256x32xf32>
    %12 = arith.addf %6, %11 : vector<256x32xf32>
    %13 = vector.extract_strided_slice %1 {offsets = [0, 1, 0], sizes = [16, 16, 32], strides = [1, 1, 1]} : vector<18x18x32xbf16> to vector<16x16x32xbf16>
    %14 = vector.shape_cast %13 : vector<16x16x32xbf16> to vector<256x32xbf16>
    %15 = vector.extract_strided_slice %2 {offsets = [0, 1, 0, 0], sizes = [1, 1, 32, 32], strides = [1, 1, 1, 1]} : vector<4x4x32x32xbf16> to vector<1x1x32x32xbf16>
    %16 = vector.shape_cast %15 : vector<1x1x32x32xbf16> to vector<32x32xbf16>
    %cst_14 = arith.constant dense<0.000000e+00> : vector<256x32xf32>
    %17 = tpu.matmul %14, %16, %cst_14 {dimension_numbers = #tpu.dot_dimension_numbers<[1], [0], [0], [1], [0, 0, 1, 1], [], []>} : vector<256x32xbf16>, vector<32x32xbf16>, vector<256x32xf32> -> vector<256x32xf32>
    %18 = arith.addf %12, %17 : vector<256x32xf32>
    %19 = vector.extract_strided_slice %1 {offsets = [1, 0, 0], sizes = [16, 16, 32], strides = [1, 1, 1]} : vector<18x18x32xbf16> to vector<16x16x32xbf16>
    %20 = vector.shape_cast %19 : vector<16x16x32xbf16> to vector<256x32xbf16>
    %21 = vector.extract_strided_slice %2 {offsets = [0, 2, 0, 0], sizes = [1, 1, 32, 32], strides = [1, 1, 1, 1]} : vector<4x4x32x32xbf16> to vector<1x1x32x32xbf16>
    %22 = vector.shape_cast %21 : vector<1x1x32x32xbf16> to vector<32x32xbf16>
    %cst_15 = arith.constant dense<0.000000e+00> : vector<256x32xf32>
    %23 = tpu.matmul %20, %22, %cst_15 {dimension_numbers = #tpu.dot_dimension_numbers<[1], [0], [0], [1], [0, 0, 1, 1], [], []>} : vector<256x32xbf16>, vector<32x32xbf16>, vector<256x32xf32> -> vector<256x32xf32>
    %24 = arith.addf %18, %23 : vector<256x32xf32>
    %25 = vector.extract_strided_slice %1 {offsets = [1, 1, 0], sizes = [16, 16, 32], strides = [1, 1, 1]} : vector<18x18x32xbf16> to vector<16x16x32xbf16>
    %26 = vector.shape_cast %25 : vector<16x16x32xbf16> to vector<256x32xbf16>
    %27 = vector.extract_strided_slice %2 {offsets = [0, 3, 0, 0], sizes = [1, 1, 32, 32], strides = [1, 1, 1, 1]} : vector<4x4x32x32xbf16> to vector<1x1x32x32xbf16>
    %28 = vector.shape_cast %27 : vector<1x1x32x32xbf16> to vector<32x32xbf16>
    %cst_16 = arith.constant dense<0.000000e+00> : vector<256x32xf32>
    %29 = tpu.matmul %26, %28, %cst_16 {dimension_numbers = #tpu.dot_dimension_numbers<[1], [0], [0], [1], [0, 0, 1, 1], [], []>} : vector<256x32xbf16>, vector<32x32xbf16>, vector<256x32xf32> -> vector<256x32xf32>
    %30 = arith.addf %24, %29 : vector<256x32xf32>
    %31 = vector.broadcast %3 : vector<1x32xf32> to vector<256x32xf32>
    %32 = arith.addf %30, %31 : vector<256x32xf32>
    %cst_17 = arith.constant 0.000000e+00 : f32
    %33 = vector.broadcast %cst_17 : f32 to vector<256x32xf32>
    %34 = arith.maximumf %32, %33 : vector<256x32xf32>
    %35 = arith.truncf %34 : vector<256x32xf32> to vector<256x32xbf16>
    %cst_18 = arith.constant dense<0.000000e+00> : vector<256x4xf32>
    %36 = tpu.matmul %35, %4, %cst_18 {dimension_numbers = #tpu.dot_dimension_numbers<[1], [0], [0], [1], [0, 0, 1, 1], [], []>} : vector<256x32xbf16>, vector<32x4xbf16>, vector<256x4xf32> -> vector<256x4xf32>
    %37 = vector.broadcast %5 : vector<1x4xf32> to vector<256x4xf32>
    %38 = arith.addf %36, %37 : vector<256x4xf32>
    %cst_19 = arith.constant 0.000000e+00 : f32
    %39 = vector.broadcast %cst_19 : f32 to vector<256x32xf32>
    %40 = vector.extract_strided_slice %1 {offsets = [0, 1, 0], sizes = [16, 16, 32], strides = [1, 1, 1]} : vector<18x18x32xbf16> to vector<16x16x32xbf16>
    %41 = vector.shape_cast %40 : vector<16x16x32xbf16> to vector<256x32xbf16>
    %42 = vector.extract_strided_slice %2 {offsets = [1, 0, 0, 0], sizes = [1, 1, 32, 32], strides = [1, 1, 1, 1]} : vector<4x4x32x32xbf16> to vector<1x1x32x32xbf16>
    %43 = vector.shape_cast %42 : vector<1x1x32x32xbf16> to vector<32x32xbf16>
    %cst_20 = arith.constant dense<0.000000e+00> : vector<256x32xf32>
    %44 = tpu.matmul %41, %43, %cst_20 {dimension_numbers = #tpu.dot_dimension_numbers<[1], [0], [0], [1], [0, 0, 1, 1], [], []>} : vector<256x32xbf16>, vector<32x32xbf16>, vector<256x32xf32> -> vector<256x32xf32>
    %45 = arith.addf %39, %44 : vector<256x32xf32>
    %46 = vector.extract_strided_slice %1 {offsets = [0, 2, 0], sizes = [16, 16, 32], strides = [1, 1, 1]} : vector<18x18x32xbf16> to vector<16x16x32xbf16>
    %47 = vector.shape_cast %46 : vector<16x16x32xbf16> to vector<256x32xbf16>
    %48 = vector.extract_strided_slice %2 {offsets = [1, 1, 0, 0], sizes = [1, 1, 32, 32], strides = [1, 1, 1, 1]} : vector<4x4x32x32xbf16> to vector<1x1x32x32xbf16>
    %49 = vector.shape_cast %48 : vector<1x1x32x32xbf16> to vector<32x32xbf16>
    %cst_21 = arith.constant dense<0.000000e+00> : vector<256x32xf32>
    %50 = tpu.matmul %47, %49, %cst_21 {dimension_numbers = #tpu.dot_dimension_numbers<[1], [0], [0], [1], [0, 0, 1, 1], [], []>} : vector<256x32xbf16>, vector<32x32xbf16>, vector<256x32xf32> -> vector<256x32xf32>
    %51 = arith.addf %45, %50 : vector<256x32xf32>
    %52 = vector.extract_strided_slice %1 {offsets = [1, 1, 0], sizes = [16, 16, 32], strides = [1, 1, 1]} : vector<18x18x32xbf16> to vector<16x16x32xbf16>
    %53 = vector.shape_cast %52 : vector<16x16x32xbf16> to vector<256x32xbf16>
    %54 = vector.extract_strided_slice %2 {offsets = [1, 2, 0, 0], sizes = [1, 1, 32, 32], strides = [1, 1, 1, 1]} : vector<4x4x32x32xbf16> to vector<1x1x32x32xbf16>
    %55 = vector.shape_cast %54 : vector<1x1x32x32xbf16> to vector<32x32xbf16>
    %cst_22 = arith.constant dense<0.000000e+00> : vector<256x32xf32>
    %56 = tpu.matmul %53, %55, %cst_22 {dimension_numbers = #tpu.dot_dimension_numbers<[1], [0], [0], [1], [0, 0, 1, 1], [], []>} : vector<256x32xbf16>, vector<32x32xbf16>, vector<256x32xf32> -> vector<256x32xf32>
    %57 = arith.addf %51, %56 : vector<256x32xf32>
    %58 = vector.extract_strided_slice %1 {offsets = [1, 2, 0], sizes = [16, 16, 32], strides = [1, 1, 1]} : vector<18x18x32xbf16> to vector<16x16x32xbf16>
    %59 = vector.shape_cast %58 : vector<16x16x32xbf16> to vector<256x32xbf16>
    %60 = vector.extract_strided_slice %2 {offsets = [1, 3, 0, 0], sizes = [1, 1, 32, 32], strides = [1, 1, 1, 1]} : vector<4x4x32x32xbf16> to vector<1x1x32x32xbf16>
    %61 = vector.shape_cast %60 : vector<1x1x32x32xbf16> to vector<32x32xbf16>
    %cst_23 = arith.constant dense<0.000000e+00> : vector<256x32xf32>
    %62 = tpu.matmul %59, %61, %cst_23 {dimension_numbers = #tpu.dot_dimension_numbers<[1], [0], [0], [1], [0, 0, 1, 1], [], []>} : vector<256x32xbf16>, vector<32x32xbf16>, vector<256x32xf32> -> vector<256x32xf32>
    %63 = arith.addf %57, %62 : vector<256x32xf32>
    %64 = vector.broadcast %3 : vector<1x32xf32> to vector<256x32xf32>
    %65 = arith.addf %63, %64 : vector<256x32xf32>
    %cst_24 = arith.constant 0.000000e+00 : f32
    %66 = vector.broadcast %cst_24 : f32 to vector<256x32xf32>
    %67 = arith.maximumf %65, %66 : vector<256x32xf32>
    %68 = arith.truncf %67 : vector<256x32xf32> to vector<256x32xbf16>
    %cst_25 = arith.constant dense<0.000000e+00> : vector<256x4xf32>
    %69 = tpu.matmul %68, %4, %cst_25 {dimension_numbers = #tpu.dot_dimension_numbers<[1], [0], [0], [1], [0, 0, 1, 1], [], []>} : vector<256x32xbf16>, vector<32x4xbf16>, vector<256x4xf32> -> vector<256x4xf32>
    %70 = vector.broadcast %5 : vector<1x4xf32> to vector<256x4xf32>
    %71 = arith.addf %69, %70 : vector<256x4xf32>
    %cst_26 = arith.constant 0.000000e+00 : f32
    %72 = vector.broadcast %cst_26 : f32 to vector<256x32xf32>
    %73 = vector.extract_strided_slice %1 {offsets = [1, 0, 0], sizes = [16, 16, 32], strides = [1, 1, 1]} : vector<18x18x32xbf16> to vector<16x16x32xbf16>
    %74 = vector.shape_cast %73 : vector<16x16x32xbf16> to vector<256x32xbf16>
    %75 = vector.extract_strided_slice %2 {offsets = [2, 0, 0, 0], sizes = [1, 1, 32, 32], strides = [1, 1, 1, 1]} : vector<4x4x32x32xbf16> to vector<1x1x32x32xbf16>
    %76 = vector.shape_cast %75 : vector<1x1x32x32xbf16> to vector<32x32xbf16>
    %cst_27 = arith.constant dense<0.000000e+00> : vector<256x32xf32>
    %77 = tpu.matmul %74, %76, %cst_27 {dimension_numbers = #tpu.dot_dimension_numbers<[1], [0], [0], [1], [0, 0, 1, 1], [], []>} : vector<256x32xbf16>, vector<32x32xbf16>, vector<256x32xf32> -> vector<256x32xf32>
    %78 = arith.addf %72, %77 : vector<256x32xf32>
    %79 = vector.extract_strided_slice %1 {offsets = [1, 1, 0], sizes = [16, 16, 32], strides = [1, 1, 1]} : vector<18x18x32xbf16> to vector<16x16x32xbf16>
    %80 = vector.shape_cast %79 : vector<16x16x32xbf16> to vector<256x32xbf16>
    %81 = vector.extract_strided_slice %2 {offsets = [2, 1, 0, 0], sizes = [1, 1, 32, 32], strides = [1, 1, 1, 1]} : vector<4x4x32x32xbf16> to vector<1x1x32x32xbf16>
    %82 = vector.shape_cast %81 : vector<1x1x32x32xbf16> to vector<32x32xbf16>
    %cst_28 = arith.constant dense<0.000000e+00> : vector<256x32xf32>
    %83 = tpu.matmul %80, %82, %cst_28 {dimension_numbers = #tpu.dot_dimension_numbers<[1], [0], [0], [1], [0, 0, 1, 1], [], []>} : vector<256x32xbf16>, vector<32x32xbf16>, vector<256x32xf32> -> vector<256x32xf32>
    %84 = arith.addf %78, %83 : vector<256x32xf32>
    %85 = vector.extract_strided_slice %1 {offsets = [2, 0, 0], sizes = [16, 16, 32], strides = [1, 1, 1]} : vector<18x18x32xbf16> to vector<16x16x32xbf16>
    %86 = vector.shape_cast %85 : vector<16x16x32xbf16> to vector<256x32xbf16>
    %87 = vector.extract_strided_slice %2 {offsets = [2, 2, 0, 0], sizes = [1, 1, 32, 32], strides = [1, 1, 1, 1]} : vector<4x4x32x32xbf16> to vector<1x1x32x32xbf16>
    %88 = vector.shape_cast %87 : vector<1x1x32x32xbf16> to vector<32x32xbf16>
    %cst_29 = arith.constant dense<0.000000e+00> : vector<256x32xf32>
    %89 = tpu.matmul %86, %88, %cst_29 {dimension_numbers = #tpu.dot_dimension_numbers<[1], [0], [0], [1], [0, 0, 1, 1], [], []>} : vector<256x32xbf16>, vector<32x32xbf16>, vector<256x32xf32> -> vector<256x32xf32>
    %90 = arith.addf %84, %89 : vector<256x32xf32>
    %91 = vector.extract_strided_slice %1 {offsets = [2, 1, 0], sizes = [16, 16, 32], strides = [1, 1, 1]} : vector<18x18x32xbf16> to vector<16x16x32xbf16>
    %92 = vector.shape_cast %91 : vector<16x16x32xbf16> to vector<256x32xbf16>
    %93 = vector.extract_strided_slice %2 {offsets = [2, 3, 0, 0], sizes = [1, 1, 32, 32], strides = [1, 1, 1, 1]} : vector<4x4x32x32xbf16> to vector<1x1x32x32xbf16>
    %94 = vector.shape_cast %93 : vector<1x1x32x32xbf16> to vector<32x32xbf16>
    %cst_30 = arith.constant dense<0.000000e+00> : vector<256x32xf32>
    %95 = tpu.matmul %92, %94, %cst_30 {dimension_numbers = #tpu.dot_dimension_numbers<[1], [0], [0], [1], [0, 0, 1, 1], [], []>} : vector<256x32xbf16>, vector<32x32xbf16>, vector<256x32xf32> -> vector<256x32xf32>
    %96 = arith.addf %90, %95 : vector<256x32xf32>
    %97 = vector.broadcast %3 : vector<1x32xf32> to vector<256x32xf32>
    %98 = arith.addf %96, %97 : vector<256x32xf32>
    %cst_31 = arith.constant 0.000000e+00 : f32
    %99 = vector.broadcast %cst_31 : f32 to vector<256x32xf32>
    %100 = arith.maximumf %98, %99 : vector<256x32xf32>
    %101 = arith.truncf %100 : vector<256x32xf32> to vector<256x32xbf16>
    %cst_32 = arith.constant dense<0.000000e+00> : vector<256x4xf32>
    %102 = tpu.matmul %101, %4, %cst_32 {dimension_numbers = #tpu.dot_dimension_numbers<[1], [0], [0], [1], [0, 0, 1, 1], [], []>} : vector<256x32xbf16>, vector<32x4xbf16>, vector<256x4xf32> -> vector<256x4xf32>
    %103 = vector.broadcast %5 : vector<1x4xf32> to vector<256x4xf32>
    %104 = arith.addf %102, %103 : vector<256x4xf32>
    %cst_33 = arith.constant 0.000000e+00 : f32
    %105 = vector.broadcast %cst_33 : f32 to vector<256x32xf32>
    %106 = vector.extract_strided_slice %1 {offsets = [1, 1, 0], sizes = [16, 16, 32], strides = [1, 1, 1]} : vector<18x18x32xbf16> to vector<16x16x32xbf16>
    %107 = vector.shape_cast %106 : vector<16x16x32xbf16> to vector<256x32xbf16>
    %108 = vector.extract_strided_slice %2 {offsets = [3, 0, 0, 0], sizes = [1, 1, 32, 32], strides = [1, 1, 1, 1]} : vector<4x4x32x32xbf16> to vector<1x1x32x32xbf16>
    %109 = vector.shape_cast %108 : vector<1x1x32x32xbf16> to vector<32x32xbf16>
    %cst_34 = arith.constant dense<0.000000e+00> : vector<256x32xf32>
    %110 = tpu.matmul %107, %109, %cst_34 {dimension_numbers = #tpu.dot_dimension_numbers<[1], [0], [0], [1], [0, 0, 1, 1], [], []>} : vector<256x32xbf16>, vector<32x32xbf16>, vector<256x32xf32> -> vector<256x32xf32>
    %111 = arith.addf %105, %110 : vector<256x32xf32>
    %112 = vector.extract_strided_slice %1 {offsets = [1, 2, 0], sizes = [16, 16, 32], strides = [1, 1, 1]} : vector<18x18x32xbf16> to vector<16x16x32xbf16>
    %113 = vector.shape_cast %112 : vector<16x16x32xbf16> to vector<256x32xbf16>
    %114 = vector.extract_strided_slice %2 {offsets = [3, 1, 0, 0], sizes = [1, 1, 32, 32], strides = [1, 1, 1, 1]} : vector<4x4x32x32xbf16> to vector<1x1x32x32xbf16>
    %115 = vector.shape_cast %114 : vector<1x1x32x32xbf16> to vector<32x32xbf16>
    %cst_35 = arith.constant dense<0.000000e+00> : vector<256x32xf32>
    %116 = tpu.matmul %113, %115, %cst_35 {dimension_numbers = #tpu.dot_dimension_numbers<[1], [0], [0], [1], [0, 0, 1, 1], [], []>} : vector<256x32xbf16>, vector<32x32xbf16>, vector<256x32xf32> -> vector<256x32xf32>
    %117 = arith.addf %111, %116 : vector<256x32xf32>
    %118 = vector.extract_strided_slice %1 {offsets = [2, 1, 0], sizes = [16, 16, 32], strides = [1, 1, 1]} : vector<18x18x32xbf16> to vector<16x16x32xbf16>
    %119 = vector.shape_cast %118 : vector<16x16x32xbf16> to vector<256x32xbf16>
    %120 = vector.extract_strided_slice %2 {offsets = [3, 2, 0, 0], sizes = [1, 1, 32, 32], strides = [1, 1, 1, 1]} : vector<4x4x32x32xbf16> to vector<1x1x32x32xbf16>
    %121 = vector.shape_cast %120 : vector<1x1x32x32xbf16> to vector<32x32xbf16>
    %cst_36 = arith.constant dense<0.000000e+00> : vector<256x32xf32>
    %122 = tpu.matmul %119, %121, %cst_36 {dimension_numbers = #tpu.dot_dimension_numbers<[1], [0], [0], [1], [0, 0, 1, 1], [], []>} : vector<256x32xbf16>, vector<32x32xbf16>, vector<256x32xf32> -> vector<256x32xf32>
    %123 = arith.addf %117, %122 : vector<256x32xf32>
    %124 = vector.extract_strided_slice %1 {offsets = [2, 2, 0], sizes = [16, 16, 32], strides = [1, 1, 1]} : vector<18x18x32xbf16> to vector<16x16x32xbf16>
    %125 = vector.shape_cast %124 : vector<16x16x32xbf16> to vector<256x32xbf16>
    %126 = vector.extract_strided_slice %2 {offsets = [3, 3, 0, 0], sizes = [1, 1, 32, 32], strides = [1, 1, 1, 1]} : vector<4x4x32x32xbf16> to vector<1x1x32x32xbf16>
    %127 = vector.shape_cast %126 : vector<1x1x32x32xbf16> to vector<32x32xbf16>
    %cst_37 = arith.constant dense<0.000000e+00> : vector<256x32xf32>
    %128 = tpu.matmul %125, %127, %cst_37 {dimension_numbers = #tpu.dot_dimension_numbers<[1], [0], [0], [1], [0, 0, 1, 1], [], []>} : vector<256x32xbf16>, vector<32x32xbf16>, vector<256x32xf32> -> vector<256x32xf32>
    %129 = arith.addf %123, %128 : vector<256x32xf32>
    %130 = vector.broadcast %3 : vector<1x32xf32> to vector<256x32xf32>
    %131 = arith.addf %129, %130 : vector<256x32xf32>
    %cst_38 = arith.constant 0.000000e+00 : f32
    %132 = vector.broadcast %cst_38 : f32 to vector<256x32xf32>
    %133 = arith.maximumf %131, %132 : vector<256x32xf32>
    %134 = arith.truncf %133 : vector<256x32xf32> to vector<256x32xbf16>
    %cst_39 = arith.constant dense<0.000000e+00> : vector<256x4xf32>
    %135 = tpu.matmul %134, %4, %cst_39 {dimension_numbers = #tpu.dot_dimension_numbers<[1], [0], [0], [1], [0, 0, 1, 1], [], []>} : vector<256x32xbf16>, vector<32x4xbf16>, vector<256x4xf32> -> vector<256x4xf32>
    %136 = vector.broadcast %5 : vector<1x4xf32> to vector<256x4xf32>
    %137 = arith.addf %135, %136 : vector<256x4xf32>
    %138 = tpu.concatenate %38, %71, %104, %137 in 1 : vector<256x4xf32>, vector<256x4xf32>, vector<256x4xf32>, vector<256x4xf32> -> vector<256x16xf32>
    %139 = vector.shape_cast %138 : vector<256x16xf32> to vector<16x16x16xf32>
    %c0_40 = arith.constant 0 : index
    %c0_41 = arith.constant 0 : index
    %c0_42 = arith.constant 0 : index
    %c0_43 = arith.constant 0 : index
    %140 = vector.load %arg6[%c0_40, %c0_41, %c0_42, %c0_43] : memref<1x16x16x16xf32, #tpu.memory_space<vmem>>, vector<1x16x16x16xf32>
    %141 = vector.shape_cast %140 : vector<1x16x16x16xf32> to vector<16x16x16xf32>
    %142 = vector.shape_cast %139 : vector<16x16x16xf32> to vector<1x16x16x16xf32>
    tpu.vector_store %arg6[%c0_40, %c0_41, %c0_42, %c0_43], %142 {strides = array<i32>} : memref<1x16x16x16xf32, #tpu.memory_space<vmem>>, vector<1x16x16x16xf32>,
    return
  }
  func.func @transform_0(%arg0: i32) -> (i32, i32, i32, i32) {
    %c0_i32 = arith.constant 0 : i32
    %c0_i32_0 = arith.constant 0 : i32
    %c0_i32_1 = arith.constant 0 : i32
    %c0_i32_2 = arith.constant 0 : i32
    return %arg0, %c0_i32, %c0_i32_0, %c0_i32_1 : i32, i32, i32, i32
  }
  func.func @transform_1(%arg0: i32) -> (i32, i32, i32, i32) {
    %c0_i32 = arith.constant 0 : i32
    %c0_i32_0 = arith.constant 0 : i32
    %c0_i32_1 = arith.constant 0 : i32
    %c0_i32_2 = arith.constant 0 : i32
    %c0_i32_3 = arith.constant 0 : i32
    return %c0_i32, %c0_i32_0, %c0_i32_1, %c0_i32_2 : i32, i32, i32, i32
  }
  func.func @transform_2(%arg0: i32) -> (i32, i32) {
    %c0_i32 = arith.constant 0 : i32
    %c0_i32_0 = arith.constant 0 : i32
    %c0_i32_1 = arith.constant 0 : i32
    return %c0_i32, %c0_i32_0 : i32, i32
  }
  func.func @transform_3(%arg0: i32) -> (i32, i32) {
    %c0_i32 = arith.constant 0 : i32
    %c0_i32_0 = arith.constant 0 : i32
    %c0_i32_1 = arith.constant 0 : i32
    return %c0_i32, %c0_i32_0 : i32, i32
  }
  func.func @transform_4(%arg0: i32) -> (i32, i32) {
    %c0_i32 = arith.constant 0 : i32
    %c0_i32_0 = arith.constant 0 : i32
    %c0_i32_1 = arith.constant 0 : i32
    return %c0_i32, %c0_i32_0 : i32, i32
  }
  func.func @transform_5(%arg0: i32) -> (i32, i32, i32, i32) {
    %c0_i32 = arith.constant 0 : i32
    %c0_i32_0 = arith.constant 0 : i32
    %c0_i32_1 = arith.constant 0 : i32
    %c0_i32_2 = arith.constant 0 : i32
    return %arg0, %c0_i32, %c0_i32_0, %c0_i32_1 : i32, i32, i32, i32
  }
}

</mosaic_0001>

<bundles_post_ra>
// kernel: _lambda_.5
= control target key start
LH: loop header
LB: loop body
LE: loop exit
PB: predicated region body
PF: predicated region fallthrough
CT: control target
= control target key end

     0   :  { %s2340_s12 = smov 0   ;;  %s2971_s0 = inlined_call_operand.vmem [shape: bf16[2,17,17,16], index: 0, kind: input, shape index: {}]   ;;  %s2972_s1 = inlined_call_operand.vmem [shape: bf16[4,16,32], index: 1, kind: input, shape index: {}]   ;;  %s2973_s2 = inlined_call_operand.vmem [shape: f32[1,32], index: 2, kind: input, shape index: {}]   ;;  %s2974_s3 = inlined_call_operand.vmem [shape: bf16[2,16,16,32], index: 3, kind: output, shape index: {}]  }
   0x1 LB: > { %s1900_s13 = sadd.s32 4294967295, %s2318_s12   ;;  %p1904_p0 = scmp.ge.s32.totalorder %s2318_s12, 1  ;;  %s2318_s12 = sphi %s2340_s12, %s13_s12  }
   0x2   : > { %p137_p1 = scmp.lt.s32.totalorder %s2318_s12, 3 }
   0x4   : > { %p138_p2 = pnand %p1904_p0, %p137_p1 }
   0x6   : > { %141 = sbr.rel (%p138_p2) target bundleno = 368 (0x170), region = 32 }
   0xb   : > { %v2291_v0 = vld [vmem:[%s2972_s1] sm:$0xff]   ;;  %p161_p3 = scmp.lt.s32.totalorder %s1900_s13, 1  ;;  %v2292_v1 = vld [vmem:[%s2972_s1 + $0x8] sm:$0xff]   ;;  %v2359_v2 = vld [vmem:[%s2972_s1 + $0x10] sm:$0xff]   ;;  %vm672_vm0 = vcmask 130048   ;;  %vm1812_vm4 = vcmask 257024  }
   0xc   : > { %2180 = vmatprep.subr.bf16.mxu1 %v2291_v0  ;;  %2146 = vmatprep.subr.bf16.mxu0 %v2292_v1  ;;  %v2296_v3 = vld [vmem:[%s2972_s1 + $0x18] sm:$0xff]   ;;  %vm231_vm1 = vsmask.f32 3328  ;;  %vm232_vm2 = vsmask.f32 7440 }
   0xd   : > { %s3020_s13 = smov (!%p161_p3, %s1900_s13), 1  ;;  %2181 = vmatpush3.bf16.msra.mxu1 %v2291_v0  ;;  %2147 = vmatpush3.bf16.msra.mxu0 %v2292_v1  ;;  %vm2383_vm3 = vmor %vm231_vm1, %vm232_vm2 }
   0xe   : > { %s2282_s20 = smul.u32 204, %s3020_s13  ;;  %2214 = vmatprep.subr.bf16.mxu0 %v2359_v2  ;;  %2248 = vmatprep.subr.bf16.mxu1 %v2296_v3  ;;  %s2045_s28 = sshll.u32 %s3020_s13, 7 }
   0xf   : > { %s2820_s4 = scalar_lea.vmem %s2974_s3, %s2045_s28 }
  0x10   : > { %s2369_s25 = scalar_lea.vmem %s2971_s0, %s2282_s20 }
  0x11   : > { %v172_v4 = vld [vmem:[%s2369_s25] sm:$0xf]  ;;  %v173_v5 = vld [vmem:[%s2369_s25 + $0x4] sm:$0xf]  ;;  %v175_v6 = vld [vmem:[%s2369_s25 + $0xc] sm:$0xf] }
  0x12   : > { %v235_v7 = vshrl.u32 %v172_v4, 16  ;;  %v238_v8 = vshll.u32 %v172_v4, 16  ;;  %v244_v9 = vshll.u32 %v173_v5, 16  ;;  %v248_v10 = vshrl.u32 %v173_v5, 16  ;;  %v176_v11 = vld [vmem:[%s2369_s25 + $0x10] sm:$0xf] }
  0x13   : > { %v1941_v12 = vcombine.low %v172_v4, %v173_v5  ;;  %v259_v13 = vshrl.u32 %v175_v6, 16  ;;  %v262_v14 = vshll.u32 %v175_v6, 16  ;;  %v268_v15 = vshll.u32 %v176_v11, 16  ;;  %v174_v16 = vld [vmem:[%s2369_s25 + $0x8] sm:$0x1] }
  0x14   : > { %v237_v17 = vrot.slane %v235_v7, 4  ;;  %v240_v18 = vrot.slane %v238_v8, 5  ;;  %v246_v19 = vrot.slane %v244_v9, 5  ;;  %v250_v20 = vrot.slane %v248_v10, 4  ;;  %v177_v21 = vld [vmem:[%s2369_s25 + $0x14] sm:$0x1] }
  0x15   : > { %2182 = vmatprep.mubr.msk.bf16.mxu1 %vm672_vm0, %v1941_v12  ;;  %v261_v22 = vrot.slane %v259_v13, 4  ;;  %v264_v23 = vrot.slane %v262_v14, 5  ;;  %v270_v24 = vrot.slane %v268_v15, 5  ;;  %v272_v25 = vshrl.u32 %v176_v11, 16  ;;  %v178_v26 = vld [vmem:[%s2369_s25 + $0x18] sm:$0xf] }
  0x16   : > { %v2379_v27 = vcombine.low %v175_v6, %v176_v11  ;;  %v241_v28 = vor.u32 %v240_v18, %v237_v17  ;;  %v251_v29 = vor.u32 %v250_v20, %v246_v19  ;;  %v254_v30 = vshll.u32 %v174_v16, 16  ;;  %v179_v35 = vld [vmem:[%s2369_s25 + $0x1c] sm:$0xf]  ;;  %v181_v45 = vld [vmem:[%s2369_s25 + $0x24] sm:$0xf] }
  0x17   : > { %v274_v31 = vrot.slane %v272_v25, 4  ;;  %v265_v33 = vor.u32 %v264_v23, %v261_v22  ;;  %v278_v34 = vshll.u32 %v177_v21, 16  ;;  %v283_v36 = vshrl.u32 %v178_v26, 16  ;;  %v182_v50 = vld [vmem:[%s2369_s25 + $0x28] sm:$0xf] }
  0x18   : > { %2183 = vmatmul.mubr.msk.bf16.vlgmr.msra.gmra.mxu1 %vm672_vm0, %v2379_v27  ;;  %v242_v37 = vrot.slane %v241_v28, 4  ;;  %v252_v38 = vrot.slane %v251_v29, 4  ;;  %v256_v39 = vrot.slane %v254_v30, 5  ;;  %v286_v40 = vshll.u32 %v178_v26, 16  ;;  %v180_v55 = vld [vmem:[%s2369_s25 + $0x20] sm:$0x1] }
  0x19   : > { %v266_v41 = vrot.slane %v265_v33, 4  ;;  %v275_v42 = vor.u32 %v274_v31, %v270_v24  ;;  %v280_v43 = vrot.slane %v278_v34, 5  ;;  %2249 = vmatpush3.bf16.msra.mxu1 %v2296_v3  ;;  %v285_v44 = vrot.slane %v283_v36, 4  ;;  %v183_v60 = vld [vmem:[%s2369_s25 + $0x2c] sm:$0x1] }
  0x1a   : > { %v247_v46 = vsel %vm2383_vm3, %v242_v37, %v246_v19  ;;  %v257_v47 = vsel %vm2383_vm3, %v252_v38, %v256_v39  ;;  %v288_v48 = vrot.slane %v286_v40, 5  ;;  %v292_v49 = vshll.u32 %v179_v35, 16  ;;  %v184_v1 = vld [vmem:[%s2369_s25 + $0x30] sm:$0xf]  ;;  %v185_v14 = vld [vmem:[%s2369_s25 + $0x34] sm:$0xf] }
  0x1b   : > { %v1908_v51 = vcombine.low %v247_v46, %v257_v47  ;;  %v271_v52 = vsel %vm2383_vm3, %v266_v41, %v270_v24  ;;  %v276_v53 = vrot.slane %v275_v42, 4  ;;  %v296_v54 = vshrl.u32 %v179_v35, 16  ;;  %v187_v24 = vld [vmem:[%s2369_s25 + $0x3c] sm:$0xf]  ;;  %v188_v30 = vld [vmem:[%s2369_s25 + $0x40] sm:$0xf] }
  0x1c   : > { %v294_v56 = vrot.slane %v292_v49, 5  ;;  %v2399_v57 = vcombine.low %v178_v26, %v179_v35  ;;  %v307_v58 = vshrl.u32 %v181_v45, 16  ;;  %v310_v59 = vshll.u32 %v181_v45, 16  ;;  %v186_v39 = vld [vmem:[%s2369_s25 + $0x38] sm:$0x1] }
  0x1d   : > { %2148 = vmatprep.mubr.msk.bf16.mxu0 %vm672_vm0, %v1908_v51  ;;  %v281_v61 = vsel %vm2383_vm3, %v276_v53, %v280_v43  ;;  %v298_v62 = vrot.slane %v296_v54, 4  ;;  %v316_v63 = vshll.u32 %v182_v50, 16  ;;  %v320_v0 = vshrl.u32 %v182_v50, 16  ;;  %v189_v40 = vld [vmem:[%s2369_s25 + $0x44] sm:$0x1] }
  0x1e   : > { %v2406_v3 = vcombine.low %v271_v52, %v281_v61  ;;  %2186 = vmatprep.mubr.msk.bf16.mxu1 %vm672_vm0, %v2399_v57  ;;  %v309_v4 = vrot.slane %v307_v58, 4  ;;  %v312_v5 = vrot.slane %v310_v59, 5  ;;  %v2410_v6 = vcombine.low %v181_v45, %v182_v50  ;;  %v190_v45 = vld [vmem:[%s2369_s25 + $0x48] sm:$0xf]  ;;  %v191_v58 = vld [vmem:[%s2369_s25 + $0x4c] sm:$0xf] }
  0x1f   : > { %v318_v7 = vrot.slane %v316_v63, 5  ;;  %v322_v8 = vrot.slane %v320_v0, 4  ;;  %v289_v9 = vor.u32 %v288_v48, %v285_v44  ;;  %v299_v10 = vor.u32 %v298_v62, %v294_v56 }
  0x20   : > { %2149 = vmatmul.mubr.msk.bf16.vlgmr.msra.gmra.mxu0 %vm672_vm0, %v2406_v3  ;;  %2187 = vmatmul.mubr.msk.bf16.gmra.mxu1 %vm672_vm0, %v2410_v6  ;;  %v302_v11 = vshll.u32 %v180_v55, 16  ;;  %v313_v12 = vor.u32 %v312_v5, %v309_v4  ;;  %v326_v13 = vshll.u32 %v183_v60, 16  ;;  %v331_v15 = vshrl.u32 %v184_v1, 16 }
  0x21   : > { %2215 = vmatpush3.bf16.msra.mxu0 %v2359_v2  ;;  %v290_v16 = vrot.slane %v289_v9, 4  ;;  %v300_v17 = vrot.slane %v299_v10, 4  ;;  %v323_v18 = vor.u32 %v322_v8, %v318_v7  ;;  %v334_v19 = vshll.u32 %v184_v1, 16 }
  0x22   : > { %v304_v20 = vrot.slane %v302_v11, 5  ;;  %v314_v21 = vrot.slane %v313_v12, 4  ;;  %v328_v22 = vrot.slane %v326_v13, 5  ;;  %v333_v23 = vrot.slane %v331_v15, 4  ;;  %v194_v12 = vld [vmem:[%s2369_s25 + $0x58] sm:$0xf] }
  0x23   : > { %v295_v25 = vsel %vm2383_vm3, %v290_v16, %v294_v56  ;;  %v324_v26 = vrot.slane %v323_v18, 4  ;;  %v336_v28 = vrot.slane %v334_v19, 5  ;;  %v340_v29 = vshll.u32 %v185_v14, 16 }
  0x24   : > { %v305_v2 = vsel %vm2383_vm3, %v300_v17, %v304_v20  ;;  %v319_v31 = vsel %vm2383_vm3, %v314_v21, %v318_v7  ;;  %v344_v33 = vshrl.u32 %v185_v14, 16  ;;  %v2426_v34 = vcombine.low %v184_v1, %v185_v14  ;;  %v193_v7 = vld [vmem:[%s2369_s25 + $0x54] sm:$0xf]  ;;  %v192_v17 = vld [vmem:[%s2369_s25 + $0x50] sm:$0x1] }
  0x25   : > { %v2428_v35 = vcombine.low %v295_v25, %v305_v2  ;;  %v329_v36 = vsel %vm2383_vm3, %v324_v26, %v328_v22  ;;  %v342_v37 = vrot.slane %v340_v29, 5  ;;  %v355_v38 = vshrl.u32 %v187_v24, 16  ;;  %v195_v22 = vld [vmem:[%s2369_s25 + $0x5c] sm:$0x1] }
  0x26   : > { %v2434_v41 = vcombine.low %v319_v31, %v329_v36  ;;  %v346_v42 = vrot.slane %v344_v33, 4  ;;  %2190 = vmatprep.mubr.msk.bf16.mxu1 %vm672_vm0, %v2426_v34  ;;  %v358_v43 = vshll.u32 %v187_v24, 16  ;;  %v364_v44 = vshll.u32 %v188_v30, 16 }
  0x27   : > { %2152 = vmatprep.mubr.msk.bf16.mxu0 %vm672_vm0, %v2428_v35  ;;  %v357_v46 = vrot.slane %v355_v38, 4  ;;  %v368_v47 = vshrl.u32 %v188_v30, 16  ;;  %v2441_v48 = vcombine.low %v187_v24, %v188_v30  ;;  %v337_v49 = vor.u32 %v336_v28, %v333_v23  ;;  %v196_v28 = vld [vmem:[%s2369_s25 + $0x60] sm:$0xf] }
  0x28   : > { %2153 = vmatmul.mubr.msk.bf16.gmra.mxu0 %vm672_vm0, %v2434_v41  ;;  %v360_v50 = vrot.slane %v358_v43, 5  ;;  %v366_v51 = vrot.slane %v364_v44, 5  ;;  %v347_v52 = vor.u32 %v346_v42, %v342_v37  ;;  %v350_v53 = vshll.u32 %v186_v39, 16  ;;  %v197_v43 = vld [vmem:[%s2369_s25 + $0x64] sm:$0xf] }
  0x29   : > { %v370_v54 = vrot.slane %v368_v47, 4  ;;  %2191 = vmatmul.mubr.msk.bf16.gmra.mxu1 %vm672_vm0, %v2441_v48  ;;  %v338_v55 = vrot.slane %v337_v49, 4  ;;  %v374_v56 = vshll.u32 %v189_v40, 16  ;;  %v379_v59 = vshrl.u32 %v190_v45, 16 }
  0x2a   : > { %v348_v60 = vrot.slane %v347_v52, 4  ;;  %v352_v61 = vrot.slane %v350_v53, 5  ;;  %v361_v62 = vor.u32 %v360_v50, %v357_v46  ;;  %v382_v63 = vshll.u32 %v190_v45, 16 }
  0x2b   : > { %v343_v0 = vsel %vm2383_vm3, %v338_v55, %v342_v37  ;;  %v371_v1 = vor.u32 %v370_v54, %v366_v51  ;;  %v376_v4 = vrot.slane %v374_v56, 5  ;;  %v381_v5 = vrot.slane %v379_v59, 4  ;;  %v199_v54 = vld [vmem:[%s2369_s25 + $0x6c] sm:$0xf] }
  0x2c   : > { %v353_v8 = vsel %vm2383_vm3, %v348_v60, %v352_v61  ;;  %v362_v9 = vrot.slane %v361_v62, 4  ;;  %v384_v10 = vrot.slane %v382_v63, 5  ;;  %v388_v11 = vshll.u32 %v191_v58, 16  ;;  %v200_v60 = vld [vmem:[%s2369_s25 + $0x70] sm:$0xf] }
  0x2d   : > { %v2454_v13 = vcombine.low %v343_v0, %v353_v8  ;;  %v372_v14 = vrot.slane %v371_v1, 4  ;;  %v392_v15 = vshrl.u32 %v191_v58, 16  ;;  %v2456_v16 = vcombine.low %v190_v45, %v191_v58  ;;  %v198_v8 = vld [vmem:[%s2369_s25 + $0x68] sm:$0x1] }
  0x2e   : > { %v367_v18 = vsel %vm2383_vm3, %v362_v9, %v366_v51  ;;  %v390_v19 = vrot.slane %v388_v11, 5  ;;  %v403_v20 = vshrl.u32 %v193_v7, 16  ;;  %v406_v21 = vshll.u32 %v193_v7, 16  ;;  %v201_v9 = vld [vmem:[%s2369_s25 + $0x74] sm:$0x1] }
  0x2f   : > { %2156 = vmatprep.mubr.msk.bf16.mxu0 %vm672_vm0, %v2454_v13  ;;  %v377_v23 = vsel %vm2383_vm3, %v372_v14, %v376_v4  ;;  %v394_v24 = vrot.slane %v392_v15, 4  ;;  %2194 = vmatprep.mubr.msk.bf16.mxu1 %vm672_vm0, %v2456_v16  ;;  %v412_v25 = vshll.u32 %v194_v12, 16  ;;  %v416_v26 = vshrl.u32 %v194_v12, 16  ;;  %v202_v15 = vld [vmem:[%s2369_s25 + $0x78] sm:$0xf] }
  0x30   : > { %v2469_v29 = vcombine.low %v367_v18, %v377_v23  ;;  %v405_v30 = vrot.slane %v403_v20, 4  ;;  %v408_v2 = vrot.slane %v406_v21, 5  ;;  %v2471_v31 = vcombine.low %v193_v7, %v194_v12 }
  0x31   : > { %v414_v33 = vrot.slane %v412_v25, 5  ;;  %v418_v36 = vrot.slane %v416_v26, 4  ;;  %v385_v37 = vor.u32 %v384_v10, %v381_v5  ;;  %v395_v38 = vor.u32 %v394_v24, %v390_v19 }
  0x32   : > { %2157 = vmatmul.mubr.msk.bf16.gmra.mxu0 %vm672_vm0, %v2469_v29  ;;  %2195 = vmatmul.mubr.msk.bf16.gmra.mxu1 %vm672_vm0, %v2471_v31  ;;  %v398_v39 = vshll.u32 %v192_v17, 16  ;;  %v409_v40 = vor.u32 %v408_v2, %v405_v30  ;;  %v422_v42 = vshll.u32 %v195_v22, 16  ;;  %v427_v44 = vshrl.u32 %v196_v28, 16  ;;  %v203_v30 = vld [vmem:[%s2369_s25 + $0x7c] sm:$0xf] }
  0x33   : > { %v386_v45 = vrot.slane %v385_v37, 4  ;;  %v396_v46 = vrot.slane %v395_v38, 4  ;;  %v419_v47 = vor.u32 %v418_v36, %v414_v33  ;;  %v430_v49 = vshll.u32 %v196_v28, 16 }
  0x34   : > { %v400_v50 = vrot.slane %v398_v39, 5  ;;  %v410_v51 = vrot.slane %v409_v40, 4  ;;  %v424_v52 = vrot.slane %v422_v42, 5  ;;  %v429_v53 = vrot.slane %v427_v44, 4  ;;  %v205_v44 = vld [vmem:[%s2369_s25 + $0x84] sm:$0xf] }
  0x35   : > { %v391_v55 = vsel %vm2383_vm3, %v386_v45, %v390_v19  ;;  %v420_v56 = vrot.slane %v419_v47, 4  ;;  %v432_v58 = vrot.slane %v430_v49, 5  ;;  %v436_v59 = vshll.u32 %v197_v43, 16 }
  0x36   : > { %v401_v61 = vsel %vm2383_vm3, %v396_v46, %v400_v50  ;;  %v415_v62 = vsel %vm2383_vm3, %v410_v51, %v414_v33  ;;  %v440_v63 = vshrl.u32 %v197_v43, 16  ;;  %v2486_v0 = vcombine.low %v196_v28, %v197_v43  ;;  %v206_v50 = vld [vmem:[%s2369_s25 + $0x88] sm:$0xf] }
  0x37   : > { %v2488_v1 = vcombine.low %v391_v55, %v401_v61  ;;  %v425_v4 = vsel %vm2383_vm3, %v420_v56, %v424_v52  ;;  %v438_v5 = vrot.slane %v436_v59, 5  ;;  %v451_v7 = vshrl.u32 %v199_v54, 16  ;;  %v204_v55 = vld [vmem:[%s2369_s25 + $0x80] sm:$0x1]  ;;  %v207_v61 = vld [vmem:[%s2369_s25 + $0x8c] sm:$0x1] }
  0x38   : > { %v2494_v10 = vcombine.low %v415_v62, %v425_v4  ;;  %v442_v11 = vrot.slane %v440_v63, 4  ;;  %2198 = vmatprep.mubr.msk.bf16.mxu1 %vm672_vm0, %v2486_v0  ;;  %v454_v12 = vshll.u32 %v199_v54, 16  ;;  %v460_v14 = vshll.u32 %v200_v60, 16 }
  0x39   : > { %2160 = vmatprep.mubr.msk.bf16.mxu0 %vm672_vm0, %v2488_v1  ;;  %v453_v17 = vrot.slane %v451_v7, 4  ;;  %v464_v18 = vshrl.u32 %v200_v60, 16  ;;  %v2501_v19 = vcombine.low %v199_v54, %v200_v60  ;;  %v433_v20 = vor.u32 %v432_v58, %v429_v53  ;;  %v208_v7 = vld [vmem:[%s2369_s25 + $0x90] sm:$0xf] }
  0x3a   : > { %2161 = vmatmul.mubr.msk.bf16.gmra.mxu0 %vm672_vm0, %v2494_v10  ;;  %v456_v21 = vrot.slane %v454_v12, 5  ;;  %v462_v22 = vrot.slane %v460_v14, 5  ;;  %v443_v23 = vor.u32 %v442_v11, %v438_v5  ;;  %v446_v24 = vshll.u32 %v198_v8, 16 }
  0x3b   : > { %v466_v25 = vrot.slane %v464_v18, 4  ;;  %2199 = vmatmul.mubr.msk.bf16.gmra.mxu1 %vm672_vm0, %v2501_v19  ;;  %v434_v26 = vrot.slane %v433_v20, 4  ;;  %v470_v28 = vshll.u32 %v201_v9, 16  ;;  %v475_v2 = vshrl.u32 %v202_v15, 16 }
  0x3c   : > { %v444_v33 = vrot.slane %v443_v23, 4  ;;  %v448_v36 = vrot.slane %v446_v24, 5  ;;  %v457_v37 = vor.u32 %v456_v21, %v453_v17  ;;  %v478_v38 = vshll.u32 %v202_v15, 16  ;;  %v209_v23 = vld [vmem:[%s2369_s25 + $0x94] sm:$0xf] }
  0x3d   : > { %v439_v39 = vsel %vm2383_vm3, %v434_v26, %v438_v5  ;;  %v467_v40 = vor.u32 %v466_v25, %v462_v22  ;;  %v472_v42 = vrot.slane %v470_v28, 5  ;;  %v477_v43 = vrot.slane %v475_v2, 4 }
  0x3e   : > { %v449_v45 = vsel %vm2383_vm3, %v444_v33, %v448_v36  ;;  %v458_v46 = vrot.slane %v457_v37, 4  ;;  %v480_v47 = vrot.slane %v478_v38, 5  ;;  %v484_v49 = vshll.u32 %v203_v30, 16  ;;  %v211_v38 = vld [vmem:[%s2369_s25 + $0x9c] sm:$0xf] }
  0x3f   : > { %v2514_v51 = vcombine.low %v439_v39, %v449_v45  ;;  %v468_v52 = vrot.slane %v467_v40, 4  ;;  %v488_v53 = vshrl.u32 %v203_v30, 16  ;;  %v2516_v54 = vcombine.low %v202_v15, %v203_v30 }
  0x40   : > { %v463_v56 = vsel %vm2383_vm3, %v458_v46, %v462_v22  ;;  %v486_v58 = vrot.slane %v484_v49, 5  ;;  %v499_v59 = vshrl.u32 %v205_v44, 16  ;;  %v502_v60 = vshll.u32 %v205_v44, 16 }
  0x41   : > { %2164 = vmatprep.mubr.msk.bf16.mxu0 %vm672_vm0, %v2514_v51  ;;  %v473_v62 = vsel %vm2383_vm3, %v468_v52, %v472_v42  ;;  %v490_v63 = vrot.slane %v488_v53, 4  ;;  %2202 = vmatprep.mubr.msk.bf16.mxu1 %vm672_vm0, %v2516_v54  ;;  %v508_v4 = vshll.u32 %v206_v50, 16  ;;  %v512_v5 = vshrl.u32 %v206_v50, 16 }
  0x42   : > { %v2529_v8 = vcombine.low %v463_v56, %v473_v62  ;;  %v501_v9 = vrot.slane %v499_v59, 4  ;;  %v504_v11 = vrot.slane %v502_v60, 5  ;;  %v2531_v12 = vcombine.low %v205_v44, %v206_v50  ;;  %v212_v44 = vld [vmem:[%s2369_s25 + $0xa0] sm:$0xf]  ;;  %v210_v56 = vld [vmem:[%s2369_s25 + $0x98] sm:$0x1] }
  0x43   : > { %v510_v14 = vrot.slane %v508_v4, 5  ;;  %v514_v15 = vrot.slane %v512_v5, 4  ;;  %v481_v17 = vor.u32 %v480_v47, %v477_v43  ;;  %v491_v18 = vor.u32 %v490_v63, %v486_v58  ;;  %v214_v63 = vld [vmem:[%s2369_s25 + $0xa8] sm:$0xf] }
  0x44   : > { %2165 = vmatmul.mubr.msk.bf16.gmra.mxu0 %vm672_vm0, %v2529_v8  ;;  %2203 = vmatmul.mubr.msk.bf16.gmra.mxu1 %vm672_vm0, %v2531_v12  ;;  %v494_v20 = vshll.u32 %v204_v55, 16  ;;  %v505_v21 = vor.u32 %v504_v11, %v501_v9  ;;  %v518_v22 = vshll.u32 %v207_v61, 16  ;;  %v523_v24 = vshrl.u32 %v208_v7, 16 }
  0x45   : > { %v482_v25 = vrot.slane %v481_v17, 4  ;;  %v492_v26 = vrot.slane %v491_v18, 4  ;;  %v515_v28 = vor.u32 %v514_v15, %v510_v14  ;;  %v526_v30 = vshll.u32 %v208_v7, 16 }
  0x46   : > { %v496_v2 = vrot.slane %v494_v20, 5  ;;  %v506_v33 = vrot.slane %v505_v21, 4  ;;  %v520_v36 = vrot.slane %v518_v22, 5  ;;  %v525_v37 = vrot.slane %v523_v24, 4  ;;  %v215_v22 = vld [vmem:[%s2369_s25 + $0xac] sm:$0xf] }
  0x47   : > { %v487_v39 = vsel %vm2383_vm3, %v482_v25, %v486_v58  ;;  %v516_v40 = vrot.slane %v515_v28, 4  ;;  %v528_v42 = vrot.slane %v526_v30, 5  ;;  %v532_v43 = vshll.u32 %v209_v23, 16  ;;  %v213_v58 = vld [vmem:[%s2369_s25 + $0xa4] sm:$0x1] }
  0x48   : > { %v497_v45 = vsel %vm2383_vm3, %v492_v26, %v496_v2  ;;  %v511_v46 = vsel %vm2383_vm3, %v506_v33, %v510_v14  ;;  %v536_v47 = vshrl.u32 %v209_v23, 16  ;;  %v2546_v49 = vcombine.low %v208_v7, %v209_v23 }
  0x49   : > { %v2548_v50 = vcombine.low %v487_v39, %v497_v45  ;;  %v521_v52 = vsel %vm2383_vm3, %v516_v40, %v520_v36  ;;  %v534_v53 = vrot.slane %v532_v43, 5  ;;  %v547_v55 = vshrl.u32 %v211_v38, 16  ;;  %v218_v43 = vld [vmem:[%s2369_s25 + $0xb8] sm:$0xf] }
  0x4a   : > { %v2554_v59 = vcombine.low %v511_v46, %v521_v52  ;;  %v538_v60 = vrot.slane %v536_v47, 4  ;;  %2206 = vmatprep.mubr.msk.bf16.mxu1 %vm672_vm0, %v2546_v49  ;;  %v550_v61 = vshll.u32 %v211_v38, 16  ;;  %v556_v62 = vshll.u32 %v212_v44, 16 }
  0x4b   : > { %2168 = vmatprep.mubr.msk.bf16.mxu0 %vm672_vm0, %v2548_v50  ;;  %v549_v4 = vrot.slane %v547_v55, 4  ;;  %v560_v5 = vshrl.u32 %v212_v44, 16  ;;  %v2561_v7 = vcombine.low %v211_v38, %v212_v44  ;;  %v529_v9 = vor.u32 %v528_v42, %v525_v37  ;;  %v217_v37 = vld [vmem:[%s2369_s25 + $0xb4] sm:$0xf] }
  0x4c   : > { %2169 = vmatmul.mubr.msk.bf16.gmra.mxu0 %vm672_vm0, %v2554_v59  ;;  %v552_v11 = vrot.slane %v550_v61, 5  ;;  %v558_v14 = vrot.slane %v556_v62, 5  ;;  %v539_v15 = vor.u32 %v538_v60, %v534_v53  ;;  %v542_v17 = vshll.u32 %v210_v56, 16 }
  0x4d   : > { %v562_v18 = vrot.slane %v560_v5, 4  ;;  %2207 = vmatmul.mubr.msk.bf16.gmra.mxu1 %vm672_vm0, %v2561_v7  ;;  %v530_v20 = vrot.slane %v529_v9, 4  ;;  %v566_v21 = vshll.u32 %v213_v58, 16  ;;  %v571_v23 = vshrl.u32 %v214_v63, 16  ;;  %v216_v58 = vld [vmem:[%s2369_s25 + $0xb0] sm:$0x1] }
  0x4e   : > { %v540_v24 = vrot.slane %v539_v15, 4  ;;  %v544_v25 = vrot.slane %v542_v17, 5  ;;  %v553_v26 = vor.u32 %v552_v11, %v549_v4  ;;  %v574_v28 = vshll.u32 %v214_v63, 16  ;;  %v219_v4 = vld [vmem:[%s2369_s25 + $0xbc] sm:$0x1] }
  0x4f   : > { %v535_v30 = vsel %vm2383_vm3, %v530_v20, %v534_v53  ;;  %v563_v2 = vor.u32 %v562_v18, %v558_v14  ;;  %v568_v33 = vrot.slane %v566_v21, 5  ;;  %v573_v36 = vrot.slane %v571_v23, 4 }
  0x50   : > { %v545_v38 = vsel %vm2383_vm3, %v540_v24, %v544_v25  ;;  %v554_v39 = vrot.slane %v553_v26, 4  ;;  %v576_v40 = vrot.slane %v574_v28, 5  ;;  %v580_v42 = vshll.u32 %v215_v22, 16 }
  0x51   : > { %v2574_v44 = vcombine.low %v535_v30, %v545_v38  ;;  %v564_v45 = vrot.slane %v563_v2, 4  ;;  %v584_v46 = vshrl.u32 %v215_v22, 16  ;;  %v2576_v47 = vcombine.low %v214_v63, %v215_v22 }
  0x52   : > { %v559_v52 = vsel %vm2383_vm3, %v554_v39, %v558_v14  ;;  %v582_v53 = vrot.slane %v580_v42, 5  ;;  %v595_v55 = vshrl.u32 %v217_v37, 16  ;;  %v598_v56 = vshll.u32 %v217_v37, 16 }
  0x53   : > { %2172 = vmatprep.mubr.msk.bf16.mxu0 %vm672_vm0, %v2574_v44  ;;  %v569_v60 = vsel %vm2383_vm3, %v564_v45, %v568_v33  ;;  %v586_v61 = vrot.slane %v584_v46, 4  ;;  %2210 = vmatprep.mubr.msk.bf16.mxu1 %vm672_vm0, %v2576_v47  ;;  %v604_v62 = vshll.u32 %v218_v43, 16  ;;  %v608_v63 = vshrl.u32 %v218_v43, 16 }
  0x54   : > { %v1921_v5 = vcombine.low %v559_v52, %v569_v60  ;;  %v597_v9 = vrot.slane %v595_v55, 4  ;;  %v600_v11 = vrot.slane %v598_v56, 5  ;;  %v2588_v14 = vcombine.low %v217_v37, %v218_v43 }
  0x55   : > { %v606_v15 = vrot.slane %v604_v62, 5  ;;  %v610_v17 = vrot.slane %v608_v63, 4  ;;  %v577_v18 = vor.u32 %v576_v40, %v573_v36  ;;  %v587_v20 = vor.u32 %v586_v61, %v582_v53 }
  0x56   : > { %2173 = vmatmul.mubr.msk.bf16.gmra.mxu0 %vm672_vm0, %v1921_v5  ;;  %2211 = vmatmul.mubr.msk.bf16.gmra.mxu1 %vm672_vm0, %v2588_v14  ;;  %v590_v21 = vshll.u32 %v216_v58, 16  ;;  %v601_v22 = vor.u32 %v600_v11, %v597_v9  ;;  %v614_v23 = vshll.u32 %v219_v4, 16 }
  0x57   : > { %v578_v24 = vrot.slane %v577_v18, 4  ;;  %v588_v25 = vrot.slane %v587_v20, 4  ;;  %v611_v26 = vor.u32 %v610_v17, %v606_v15  ;;  %2250 = vmatprep.mubr.msk.bf16.mxu1 %vm672_vm0, %v2406_v3 }
  0x58   : > { %v592_v28 = vrot.slane %v590_v21, 5  ;;  %v602_v30 = vrot.slane %v601_v22, 4  ;;  %v616_v2 = vrot.slane %v614_v23, 5 }
  0x59   : > { %v583_v33 = vsel %vm2383_vm3, %v578_v24, %v582_v53  ;;  %v612_v36 = vrot.slane %v611_v26, 4 }
  0x5a   : > { %v593_v37 = vsel %vm2383_vm3, %v588_v25, %v592_v28  ;;  %v607_v38 = vsel %vm2383_vm3, %v602_v30, %v606_v15 }
  0x5b   : > { %v1922_v39 = vcombine.low %v583_v33, %v593_v37  ;;  %v617_v40 = vsel %vm2383_vm3, %v612_v36, %v616_v2 }
  0x5c   : > { %v1923_v42 = vcombine.low %v607_v38, %v617_v40 }
  0x5d   : > { %2176 = vmatprep.mubr.msk.bf16.mxu0 %vm672_vm0, %v1922_v39 }
  0x5e   : > { %2177 = vmatmul.mubr.msk.bf16.gmra.mxu0 %vm672_vm0, %v1923_v42  ;;  %2251 = vmatmul.mubr.msk.bf16.vlgmr.msra.gmra.mxu1 %vm672_vm0, %v2428_v35 }
  0x5f   : > { %2216 = vmatprep.mubr.msk.bf16.mxu0 %vm672_vm0, %v2379_v27  ;;  %2254 = vmatprep.mubr.msk.bf16.mxu1 %vm672_vm0, %v2434_v41  ;;  %v220_v27 = vld [vmem:[%s2369_s25 + $0xc0] sm:$0xf] }
  0x60   : > { %v1385_v3 = vshrl.u32 %v220_v27, 16 }
  0x62   : > { %v1387_v41 = vrot.slane %v1385_v3, 4 }
  0x66   : > { %2217 = vmatmul.mubr.msk.bf16.vlgmr.msra.gmra.mxu0 %vm672_vm0, %v2399_v57  ;;  %2255 = vmatmul.mubr.msk.bf16.gmra.mxu1 %vm672_vm0, %v2454_v13  ;;  %v221_v57 = vld [vmem:[%s2369_s25 + $0xc4] sm:$0xf] }
  0x67   : > { %2220 = vmatprep.mubr.msk.bf16.mxu0 %vm672_vm0, %v2410_v6  ;;  %2258 = vmatprep.mubr.msk.bf16.mxu1 %vm672_vm0, %v2469_v29  ;;  %v1388_v6 = vshll.u32 %v220_v27, 16  ;;  %v1398_v35 = vshrl.u32 %v221_v57, 16  ;;  %v222_v29 = vld [vmem:[%s2369_s25 + $0xc8] sm:$0x1] }
  0x6e   : > { %2221 = vmatmul.mubr.msk.bf16.gmra.mxu0 %vm672_vm0, %v2426_v34  ;;  %2259 = vmatmul.mubr.msk.bf16.gmra.mxu1 %vm672_vm0, %v2488_v1  ;;  %v1394_v34 = vshll.u32 %v221_v57, 16  ;;  %v1404_v1 = vshll.u32 %v222_v29, 16 }
  0x6f   : > { %2224 = vmatprep.mubr.msk.bf16.mxu0 %vm672_vm0, %v2441_v48  ;;  %2262 = vmatprep.mubr.msk.bf16.mxu1 %vm672_vm0, %v2494_v10  ;;  %v1390_v48 = vrot.slane %v1388_v6, 5 }
  0x70   : > { %v1396_v13 = vrot.slane %v1394_v34, 5 }
  0x76   : > { %2225 = vmatmul.mubr.msk.bf16.gmra.mxu0 %vm672_vm0, %v2456_v16  ;;  %2263 = vmatmul.mubr.msk.bf16.gmra.mxu1 %vm672_vm0, %v2514_v51  ;;  %v1400_v16 = vrot.slane %v1398_v35, 4  ;;  %v1406_v51 = vrot.slane %v1404_v1, 5 }
  0x77   : > { %2228 = vmatprep.mubr.msk.bf16.mxu0 %vm672_vm0, %v2471_v31  ;;  %2266 = vmatprep.mubr.msk.bf16.mxu1 %vm672_vm0, %v2529_v8  ;;  %v1391_v31 = vor.u32 %v1390_v48, %v1387_v41 }
  0x79   : > { %v1392_v10 = vrot.slane %v1391_v31, 4 }
  0x7e   : > { %2229 = vmatmul.mubr.msk.bf16.gmra.mxu0 %vm672_vm0, %v2486_v0  ;;  %2267 = vmatmul.mubr.msk.bf16.gmra.mxu1 %vm672_vm0, %v2548_v50  ;;  %v1401_v0 = vor.u32 %v1400_v16, %v1396_v13 }
  0x7f   : > { %2232 = vmatprep.mubr.msk.bf16.mxu0 %vm672_vm0, %v2501_v19  ;;  %2270 = vmatprep.mubr.msk.bf16.mxu1 %vm672_vm0, %v2554_v59 }
  0x80   : > { %v1402_v19 = vrot.slane %v1401_v0, 4 }
  0x82   : > { %v1407_v8 = vsel %vm2383_vm3, %v1402_v19, %v1406_v51 }
  0x86   : > { %2233 = vmatmul.mubr.msk.bf16.gmra.mxu0 %vm672_vm0, %v2516_v54  ;;  %2271 = vmatmul.mubr.msk.bf16.gmra.mxu1 %vm672_vm0, %v2574_v44  ;;  %v1397_v54 = vsel %vm2383_vm3, %v1392_v10, %v1396_v13 }
  0x87   : > { %2236 = vmatprep.mubr.msk.bf16.mxu0 %vm672_vm0, %v2531_v12  ;;  %2274 = vmatprep.mubr.msk.bf16.mxu1 %vm672_vm0, %v1921_v5  ;;  %v1992_v12 = vcombine.low %v1397_v54, %v1407_v8 }
  0x8e   : > { %2237 = vmatmul.mubr.msk.bf16.gmra.mxu0 %vm672_vm0, %v2546_v49  ;;  %2275 = vmatmul.mubr.msk.bf16.gmra.mxu1 %vm672_vm0, %v1922_v39  ;;  %v1974_v49 = vcombine.low %v220_v27, %v221_v57 }
  0x8f   : > { %2240 = vmatprep.mubr.msk.bf16.mxu0 %vm672_vm0, %v2561_v7  ;;  %2278 = vmatprep.mubr.msk.bf16.mxu1 %vm672_vm0, %v1923_v42 }
  0x96   : > { %2241 = vmatmul.mubr.msk.bf16.gmra.mxu0 %vm672_vm0, %v2576_v47  ;;  %2279 = vmatmul.mubr.msk.bf16.gmra.mxu1 %vm672_vm0, %v1992_v12 }
  0x97   : > { %2244 = vmatprep.mubr.msk.bf16.mxu0 %vm672_vm0, %v2588_v14 }
  0x9e   : > { %2245 = vmatmul.mubr.msk.bf16.gmra.mxu0 %vm672_vm0, %v1974_v49 }
  0xd8   : > { %v2669_v50 = vpop.f32.mrf.mxu1 }
  0xda   : > { %v2671_v59 = vpop.f32.mrf.mxu1 }
  0xdc   : > { %v2673_v7 = vpop.f32.mrf.mxu1 }
  0xde   : > { %v2675_v32 = vpop.f32.mrf.mxu1 }
  0xe0   : > { %v2677_v43 = vpop.f32.mrf.mxu0  ;;  %v2679_v44 = vpop.f32.mrf.mxu1 }
  0xe2   : > { %v2681_v45 = vpop.f32.mrf.mxu0  ;;  %v2683_v46 = vpop.f32.mrf.mxu1 }
  0xe4   : > { %v2685_v47 = vpop.f32.mrf.mxu0  ;;  %v2687_v52 = vpop.f32.mrf.mxu1 }
  0xe6   : > { %v2689_v53 = vpop.f32.mrf.mxu0  ;;  %v2691_v55 = vpop.f32.mrf.mxu1 }
  0xe8   : > { %v2693_v56 = vpop.f32.mrf.mxu0 }
  0xe9   : > { %v2695_v58 = vpop.f32.mrf.mxu1 }
  0xea   : > { %v2697_v60 = vpop.f32.mrf.mxu0 }
  0xeb   : > { %v2699_v61 = vpop.f32.mrf.mxu1 }
  0xec   : > { %v2701_v62 = vpop.f32.mrf.mxu0 }
  0xed   : > { %v2703_v63 = vpop.f32.mrf.mxu1 }
  0xee   : > { %v2705_v4 = vpop.f32.mrf.mxu0 }
  0xef   : > { %v2707_v5 = vpop.f32.mrf.mxu1 }
  0xf2   : > { %v2709_v9 = vpop.f32.mrf.mxu0  ;;  %v2711_v11 = vpop.f32.mrf.mxu1 }
  0xf4   : > { %v2713_v14 = vpop.f32.mrf.mxu0  ;;  %v2715_v15 = vpop.f32.mrf.mxu1 }
  0xf6   : > { %v2717_v17 = vpop.f32.mrf.mxu0  ;;  %v2719_v18 = vpop.f32.mrf.mxu1 }
  0xf8   : > { %v2721_v20 = vpop.f32.mrf.mxu0  ;;  %v2723_v21 = vpop.f32.mrf.mxu1 }
  0xfa   : > { %v2725_v22 = vpop.f32.mrf.mxu0 }
  0xfb   : > { %v2727_v23 = vpop.f32.mrf.mxu1 }
  0xfc   : > { %v2729_v24 = vpop.f32.mrf.mxu0 }
  0xfd   : > { %v2731_v25 = vpop.f32.mrf.mxu1 }
  0xfe   : > { %v2733_v26 = vpop.f32.mrf.mxu0 }
  0xff   : > { %v2735_v28 = vpop.f32.mrf.mxu1 }
 0x100   : > { %v2737_v30 = vpop.f32.mrf.mxu0 }
 0x101   : > { %v2739_v2 = vpop.f32.mrf.mxu1 }
 0x104   : > { %v2741_v33 = vpop.f32.mrf.mxu0  ;;  %v2743_v36 = vpop.f32.mrf.mxu1 }
 0x106   : > { %v2745_v37 = vpop.f32.mrf.mxu0  ;;  %v2747_v38 = vpop.f32.mrf.mxu1 }
 0x107   : > { %2977 = vst [vmem:[#allocation2_spill] sm:$0xff] %v2747_v38 }
 0x108   : > { %v2749_v39 = vpop.f32.mrf.mxu0  ;;  %v2751_v40 = vpop.f32.mrf.mxu1 }
 0x109   : > { %2978 = vst [vmem:[#allocation3_spill] sm:$0xff] %v2751_v40 }
 0x10a   : > { %v2753_v42 = vpop.f32.mrf.mxu0  ;;  %v2755_v27 = vpop.f32.mrf.mxu1 }
 0x10b   : > { %2979 = vst [vmem:[#allocation4_spill] sm:$0xff] %v2755_v27 }
 0x10c   : > { %v2757_v57 = vpop.f32.mrf.mxu0 }
 0x10d   : > { %v2759_v3 = vpop.f32.mrf.mxu1 }
 0x10e   : > { %2980 = vst [vmem:[#allocation5_spill] sm:$0xff] %v2759_v3  ;;  %v2761_v6 = vpop.f32.mrf.mxu0 }
 0x10f   : > { %v2763_v34 = vpop.f32.mrf.mxu1 }
 0x110   : > { %2981 = vst [vmem:[#allocation6_spill] sm:$0xff] %v2763_v34  ;;  %v2765_v35 = vpop.f32.mrf.mxu0 }
 0x111   : > { %2982 = vst [vmem:[#allocation7_spill] sm:$0xff] %v2765_v35  ;;  %v2767_v41 = vpop.f32.mrf.mxu1 }
 0x112   : > { %2983 = vst [vmem:[#allocation8_spill] sm:$0xff] %v2767_v41  ;;  %v2769_v48 = vpop.f32.mrf.mxu0 }
 0x113   : > { %2984 = vst [vmem:[#allocation9_spill] sm:$0xff] %v2769_v48  ;;  %v2771_v13 = vpop.f32.mrf.mxu1 }
 0x114   : > { %2985 = vst [vmem:[#allocation10_spill] sm:$0xff] %v2771_v13 }
 0x116   : > { %v2773_v16 = vpop.f32.mrf.mxu0  ;;  %v2775_v29 = vpop.f32.mrf.mxu1 }
 0x117   : > { %2986 = vst [vmem:[#allocation11_spill] sm:$0xff] %v2773_v16  ;;  %2987 = vst [vmem:[#allocation12_spill] sm:$0xff] %v2775_v29 }
 0x118   : > { %v2777_v31 = vpop.f32.mrf.mxu0  ;;  %v2779_v0 = vpop.f32.mrf.mxu1 }
 0x119   : > { %2988 = vst [vmem:[#allocation13_spill] sm:$0xff] %v2777_v31  ;;  %2989 = vst [vmem:[#allocation14_spill] sm:$0xff] %v2779_v0 }
 0x11a   : > { %v2781_v1 = vpop.f32.mrf.mxu0  ;;  %v2783_v10 = vpop.f32.mrf.mxu1 }
 0x11b   : > { %2990 = vst [vmem:[#allocation15_spill] sm:$0xff] %v2781_v1  ;;  %2991 = vst [vmem:[#allocation16_spill] sm:$0xff] %v2783_v10  ;;  %v1059_v10 = vadd.f32 %v2669_v50, %v2677_v43  ;;  %v1054_v43 = vadd.f32 %v2675_v32, %v2689_v53 }
 0x11c   : > { %v2785_v19 = vpop.f32.mrf.mxu0  ;;  %v2787_v51 = vpop.f32.mrf.mxu1 }
 0x11d   : > { %2992 = vst [vmem:[#allocation17_spill] sm:$0xff] %v2785_v19  ;;  %2993 = vst [vmem:[#allocation18_spill] sm:$0xff] %v2787_v51  ;;  %v1051_v51 = vadd.f32 %v2671_v59, %v2681_v45 }
 0x11e   : > { %v2789_v54 = vpop.f32.mrf.mxu0  ;;  %v2252_v8 = vpop.f32.mrf.mxu1 }
 0x11f   : > { %2994 = vst [vmem:[#allocation19_spill] sm:$0xff] %v2789_v54 }
 0x120   : > { %v2791_v12 = vpop.f32.mrf.mxu0  ;;  %v1454_v49 = vpop.f32.mrf.mxu1 }
 0x121   : > { %2995 = vst [vmem:[#allocation20_spill] sm:$0xff] %v2791_v12  ;;  %v2804_v12 = vld [vmem:[%s2973_s2] ss:$0 sm:$0xff] }
 0x122   : > { %v2793_v13 = vpop.f32.mrf.mxu0  ;;  %v2253_v29 = vpop.f32.mrf.mxu1 }
 0x123   : > { %2996 = vst [vmem:[#allocation21_spill] sm:$0xff] %v2793_v13 }
 0x124   : > { %v2795_v41 = vpop.f32.mrf.mxu0  ;;  %v1457_v0 = vpop.f32.mrf.mxu1 }
 0x125   : > { %2997 = vst [vmem:[#allocation22_spill] sm:$0xff] %v2795_v41  ;;  %v1062_v41 = vadd.f32 %v2673_v7, %v2685_v47  ;;  %v1075_v7 = vadd.f32 %v2679_v44, %v2693_v56  ;;  %v1067_v47 = vadd.f32 %v2683_v46, %v2697_v60  ;;  %v1078_v44 = vadd.f32 %v2687_v52, %v2701_v62 }
 0x126   : > { %v2218_v1 = vpop.f32.mrf.mxu0  ;;  %v2256_v19 = vpop.f32.mrf.mxu1 }
 0x127   : > { %v1354_v54 = vadd.f32 %v2218_v1, %v1059_v10 }
 0x128   : > { %v1225_v13 = vpop.f32.mrf.mxu0  ;;  %v1470_v34 = vpop.f32.mrf.mxu1 }
 0x129   : > { %v1583_v31 = vadd.f32 %v2252_v8, %v1354_v54  ;;  %v1352_v3 = vadd.f32 %v1225_v13, %v1051_v51 }
 0x12a   : > { %v2219_v16 = vpop.f32.mrf.mxu0  ;;  %v2257_v50 = vpop.f32.mrf.mxu1 }
 0x12b   : > { %v1622_v59 = vadd.f32 %v2804_v12, %v1583_v31  ;;  %v1581_v45 = vadd.f32 %v1454_v49, %v1352_v3  ;;  %v1355_v1 = vadd.f32 %v2219_v16, %v1062_v41  ;;  %v1091_v49 = vadd.f32 %v2695_v58, %v2709_v9 }
 0x12c   : > { %v1228_v10 = vpop.f32.mrf.mxu0  ;;  %v1473_v27 = vpop.f32.mrf.mxu1 }
 0x12d   : > { %v1654_v48 = vmax.f32 %v1622_v59, 0.0  ;;  %v1620_v40 = vadd.f32 %v2804_v12, %v1581_v45  ;;  %v1584_v35 = vadd.f32 %v2253_v29, %v1355_v1  ;;  %v1353_v38 = vadd.f32 %v1228_v10, %v1054_v43 }
 0x12e   : > { %v2222_v32 = vpop.f32.mrf.mxu0  ;;  %v2260_v53 = vpop.f32.mrf.mxu1 }
 0x12f   : > { %v2048_v3 = vpack.c.bf16 %v1654_v48, %v1654_v48  ;;  %v1652_v41 = vmax.f32 %v1620_v40, 0.0  ;;  %v1623_v13 = vadd.f32 %v2804_v12, %v1584_v35  ;;  %v1582_v16 = vadd.f32 %v1457_v0, %v1353_v38 }
 0x130   : > { %v1358_v56 = vadd.f32 %v2222_v32, %v1075_v7  ;;  %v1241_v46 = vpop.f32.mrf.mxu0  ;;  %v1486_v60 = vpop.f32.mrf.mxu1  ;;  %v1070_v40 = vadd.f32 %v2691_v55, %v2705_v4 }
 0x131   : > { %1815 = vst.msk [vmem:[%s2820_s4 + $0x8] sm:$0xf] %vm1812_vm4, %v2048_v3  ;;  %v2046_v29 = vpack.c.bf16 %v1652_v41, %v1652_v41  ;;  %v1655_v31 = vmax.f32 %v1623_v13, 0.0  ;;  %v1621_v51 = vadd.f32 %v2804_v12, %v1582_v16  ;;  %v1356_v54 = vadd.f32 %v1241_v46, %v1067_v47 }
 0x132   : > { %v1587_v48 = vadd.f32 %v2256_v19, %v1358_v56  ;;  %v2223_v35 = vpop.f32.mrf.mxu0  ;;  %v2261_v38 = vpop.f32.mrf.mxu1  ;;  %v1083_v3 = vadd.f32 %v2699_v61, %v2713_v14  ;;  %v1094_v41 = vadd.f32 %v2703_v63, %v2717_v17 }
 0x133   : > { %1813 = vst.msk [vmem:[%s2820_s4] sm:$0xf] %vm1812_vm4, %v2046_v29  ;;  %v2049_v52 = vpack.c.bf16 %v1655_v31, %v1655_v31  ;;  %v1653_v62 = vmax.f32 %v1621_v51, 0.0  ;;  %v1585_v0 = vadd.f32 %v1470_v34, %v1356_v54  ;;  %v1359_v8 = vadd.f32 %v2223_v35, %v1078_v44 }
 0x134   : > { %v1626_v43 = vadd.f32 %v2804_v12, %v1587_v48  ;;  %v1244_v59 = vpop.f32.mrf.mxu0  ;;  %v1489_v45 = vpop.f32.mrf.mxu1 }
 0x135   : > { %1816 = vst.msk [vmem:[%s2820_s4 + $0xc] sm:$0xf] %vm1812_vm4, %v2049_v52  ;;  %v2047_v55 = vpack.c.bf16 %v1653_v62, %v1653_v62  ;;  %v1624_v4 = vadd.f32 %v2804_v12, %v1585_v0  ;;  %v1588_v19 = vadd.f32 %v2257_v50, %v1359_v8  ;;  %v1357_v1 = vadd.f32 %v1244_v59, %v1070_v40 }
 0x136   : > { %v1658_v10 = vmax.f32 %v1626_v43, 0.0  ;;  %v2226_v7 = vpop.f32.mrf.mxu0  ;;  %v2264_v47 = vpop.f32.mrf.mxu1  ;;  %v1107_v40 = vadd.f32 %v2711_v11, %v2725_v22  ;;  %v1099_v0 = vadd.f32 %v2715_v15, %v2729_v24 }
 0x137   : > { %1814 = vst.msk [vmem:[%s2820_s4 + $0x4] sm:$0xf] %vm1812_vm4, %v2047_v55  ;;  %v1656_v34 = vmax.f32 %v1624_v4, 0.0  ;;  %v1627_v58 = vadd.f32 %v2804_v12, %v1588_v19  ;;  %v1586_v9 = vadd.f32 %v1473_v27, %v1357_v1  ;;  %v1362_v32 = vadd.f32 %v2226_v7, %v1091_v49 }
 0x138   : > { %v2052_v50 = vpack.c.bf16 %v1658_v10, %v1658_v10  ;;  %v1257_v13 = vpop.f32.mrf.mxu0  ;;  %v1502_v16 = vpop.f32.mrf.mxu1  ;;  %v1086_v27 = vadd.f32 %v2707_v5, %v2721_v20  ;;  %v1110_v10 = vadd.f32 %v2719_v18, %v2733_v26  ;;  %v1102_v7 = vadd.f32 %v2723_v21, %v2737_v30 }
 0x139   : > { %v2050_v44 = vpack.c.bf16 %v1656_v34, %v1656_v34  ;;  %v1659_v56 = vmax.f32 %v1627_v58, 0.0  ;;  %v1625_v46 = vadd.f32 %v2804_v12, %v1586_v9  ;;  %v1591_v29 = vadd.f32 %v2260_v53, %v1362_v32 }
 0x13a   : > { %1819 = vst.msk [vmem:[%s2820_s4 + $0x18] sm:$0xf] %vm1812_vm4, %v2052_v50  ;;  %v1360_v31 = vadd.f32 %v1257_v13, %v1083_v3  ;;  %v2227_v51 = vpop.f32.mrf.mxu0  ;;  %v2265_v61 = vpop.f32.mrf.mxu1 }
 0x13b   : > { %1817 = vst.msk [vmem:[%s2820_s4 + $0x10] sm:$0xf] %vm1812_vm4, %v2050_v44  ;;  %v2053_v63 = vpack.c.bf16 %v1659_v56, %v1659_v56  ;;  %v1657_v14 = vmax.f32 %v1625_v46, 0.0  ;;  %v1630_v17 = vadd.f32 %v2804_v12, %v1591_v29  ;;  %v1363_v54 = vadd.f32 %v2227_v51, %v1094_v41 }
 0x13c   : > { %v1589_v53 = vadd.f32 %v1486_v60, %v1360_v31  ;;  %v1260_v48 = vpop.f32.mrf.mxu0  ;;  %v1505_v35 = vpop.f32.mrf.mxu1  ;;  %v1115_v56 = vadd.f32 %v2731_v25, %v2745_v37  ;;  %v1126_v51 = vadd.f32 %v2735_v28, %v2749_v39 }
 0x13d   : > { %1820 = vst.msk [vmem:[%s2820_s4 + $0x1c] sm:$0xf] %vm1812_vm4, %v2053_v63  ;;  %v2051_v5 = vpack.c.bf16 %v1657_v14, %v1657_v14  ;;  %v1662_v20 = vmax.f32 %v1630_v17, 0.0  ;;  %v1592_v52 = vadd.f32 %v2261_v38, %v1363_v54  ;;  %v1361_v62 = vadd.f32 %v1260_v48, %v1086_v27 }
 0x13e   : > { %v1628_v8 = vadd.f32 %v2804_v12, %v1589_v53  ;;  %v2230_v49 = vpop.f32.mrf.mxu0  ;;  %v2268_v43 = vpop.f32.mrf.mxu1 }
 0x13f   : > { %1818 = vst.msk [vmem:[%s2820_s4 + $0x14] sm:$0xf] %vm1812_vm4, %v2051_v5  ;;  %v2056_v11 = vpack.c.bf16 %v1662_v20, %v1662_v20  ;;  %v1631_v22 = vadd.f32 %v2804_v12, %v1592_v52  ;;  %v1590_v60 = vadd.f32 %v1489_v45, %v1361_v62  ;;  %v1366_v59 = vadd.f32 %v2230_v49, %v1107_v40 }
 0x140   : > { %v1660_v55 = vmax.f32 %v1628_v8, 0.0  ;;  %v1273_v4 = vpop.f32.mrf.mxu0  ;;  %v1518_v19 = vpop.f32.mrf.mxu1  ;;  %v1118_v20 = vadd.f32 %v2739_v2, %v2753_v42  ;;  %v1139_v52 = vadd.f32 %v2743_v36, %v2757_v57 }
 0x141   : > { %1823 = vst.msk [vmem:[%s2820_s4 + $0x28] sm:$0xf] %vm1812_vm4, %v2056_v11  ;;  %v1663_v38 = vmax.f32 %v1631_v22, 0.0  ;;  %v1629_v15 = vadd.f32 %v2804_v12, %v1590_v60  ;;  %v1595_v24 = vadd.f32 %v2264_v47, %v1366_v59  ;;  %v1364_v1 = vadd.f32 %v1273_v4, %v1099_v0  ;;  %v2998_v60 = vld [vmem:[#allocation2_spill] sm:$0xff] }
 0x142   : > { %v2054_v45 = vpack.c.bf16 %v1660_v55, %v1660_v55  ;;  %v2231_v34 = vpop.f32.mrf.mxu0  ;;  %v2269_v58 = vpop.f32.mrf.mxu1  ;;  %v1123_v47 = vadd.f32 %v2727_v23, %v2741_v33  ;;  %v1131_v59 = vadd.f32 %v2998_v60, %v2761_v6 }
 0x143   : > { %v2057_v9 = vpack.c.bf16 %v1663_v38, %v1663_v38  ;;  %v1661_v32 = vmax.f32 %v1629_v15, 0.0  ;;  %v1634_v3 = vadd.f32 %v2804_v12, %v1595_v24  ;;  %v1593_v41 = vadd.f32 %v1502_v16, %v1364_v1  ;;  %v2999_v38 = vld [vmem:[#allocation7_spill] sm:$0xff] }
 0x144   : > { %1821 = vst.msk [vmem:[%s2820_s4 + $0x20] sm:$0xf] %vm1812_vm4, %v2054_v45  ;;  %v1367_v50 = vadd.f32 %v2231_v34, %v1110_v10  ;;  %v1276_v13 = vpop.f32.mrf.mxu0  ;;  %v1521_v18 = vpop.f32.mrf.mxu1  ;;  %v3000_v15 = vld [vmem:[#allocation3_spill] sm:$0xff] }
 0x145   : > { %1824 = vst.msk [vmem:[%s2820_s4 + $0x2c] sm:$0xf] %vm1812_vm4, %v2057_v9  ;;  %v2055_v21 = vpack.c.bf16 %v1661_v32, %v1661_v32  ;;  %v1666_v26 = vmax.f32 %v1634_v3, 0.0  ;;  %v1632_v30 = vadd.f32 %v2804_v12, %v1593_v41  ;;  %v1365_v44 = vadd.f32 %v1276_v13, %v1102_v7  ;;  %v3001_v9 = vld [vmem:[#allocation9_spill] sm:$0xff]  ;;  %v3002_v32 = vld [vmem:[#allocation4_spill] sm:$0xff] }
 0x146   : > { %v1596_v16 = vadd.f32 %v2265_v61, %v1367_v50  ;;  %v2234_v46 = vpop.f32.mrf.mxu0  ;;  %v2272_v29 = vpop.f32.mrf.mxu1  ;;  %v1142_v24 = vadd.f32 %v3000_v15, %v2999_v38  ;;  %v1134_v3 = vadd.f32 %v3002_v32, %v3001_v9  ;;  %v3013_v32 = vld [vmem:[#allocation20_spill] sm:$0xff] }
 0x147   : > { %1822 = vst.msk [vmem:[%s2820_s4 + $0x24] sm:$0xf] %vm1812_vm4, %v2055_v21  ;;  %v2060_v23 = vpack.c.bf16 %v1666_v26, %v1666_v26  ;;  %v1664_v33 = vmax.f32 %v1632_v30, 0.0  ;;  %v1594_v27 = vadd.f32 %v1505_v35, %v1365_v44  ;;  %v1370_v31 = vadd.f32 %v2234_v46, %v1123_v47 }
 0x148   : > { %v1635_v63 = vadd.f32 %v2804_v12, %v1596_v16  ;;  %v1289_v14 = vpop.f32.mrf.mxu0  ;;  %v1534_v17 = vpop.f32.mrf.mxu1 }
 0x149   : > { %1827 = vst.msk [vmem:[%s2820_s4 + $0x38] sm:$0xf] %vm1812_vm4, %v2060_v23  ;;  %v2058_v25 = vpack.c.bf16 %v1664_v33, %v1664_v33  ;;  %v1633_v37 = vadd.f32 %v2804_v12, %v1594_v27  ;;  %v1599_v61 = vadd.f32 %v2268_v43, %v1370_v31  ;;  %v1368_v54 = vadd.f32 %v1289_v14, %v1115_v56  ;;  %v3003_v23 = vld [vmem:[#allocation11_spill] sm:$0xff]  ;;  %v3004_v33 = vld [vmem:[#allocation5_spill] sm:$0xff] }
 0x14a   : > { %v1667_v40 = vmax.f32 %v1635_v63, 0.0  ;;  %v2235_v53 = vpop.f32.mrf.mxu0  ;;  %v2273_v48 = vpop.f32.mrf.mxu1  ;;  %v1155_v27 = vadd.f32 %v3004_v33, %v3003_v23  ;;  %v3005_v31 = vld [vmem:[#allocation13_spill] sm:$0xff] }
 0x14b   : > { %1825 = vst.msk [vmem:[%s2820_s4 + $0x30] sm:$0xf] %vm1812_vm4, %v2058_v25  ;;  %v1665_v35 = vmax.f32 %v1633_v37, 0.0  ;;  %v1638_v28 = vadd.f32 %v2804_v12, %v1599_v61  ;;  %v1597_v39 = vadd.f32 %v1518_v19, %v1368_v54  ;;  %v1371_v5 = vadd.f32 %v2235_v53, %v1126_v51  ;;  %v3006_v51 = vld [vmem:[#allocation6_spill] sm:$0xff]  ;;  %v3007_v53 = vld [vmem:[#allocation15_spill] sm:$0xff] }
 0x14c   : > { %v2061_v62 = vpack.c.bf16 %v1667_v40, %v1667_v40  ;;  %v1292_v0 = vpop.f32.mrf.mxu0  ;;  %v1537_v8 = vpop.f32.mrf.mxu1  ;;  %v1147_v63 = vadd.f32 %v3006_v51, %v3005_v31 }
 0x14d   : > { %v2059_v49 = vpack.c.bf16 %v1665_v35, %v1665_v35  ;;  %v1670_v43 = vmax.f32 %v1638_v28, 0.0  ;;  %v1636_v11 = vadd.f32 %v2804_v12, %v1597_v39  ;;  %v1600_v22 = vadd.f32 %v2269_v58, %v1371_v5  ;;  %v3008_v35 = vld [vmem:[#allocation8_spill] sm:$0xff] }
 0x14e   : > { %1828 = vst.msk [vmem:[%s2820_s4 + $0x3c] sm:$0xf] %vm1812_vm4, %v2061_v62  ;;  %v1369_v55 = vadd.f32 %v1292_v0, %v1118_v20  ;;  %v2238_v4 = vpop.f32.mrf.mxu0  ;;  %v2276_v2 = vpop.f32.mrf.mxu1  ;;  %v1158_v28 = vadd.f32 %v3008_v35, %v3007_v53  ;;  %v3009_v0 = vld [vmem:[#allocation17_spill] sm:$0xff] }
 0x14f   : > { %1826 = vst.msk [vmem:[%s2820_s4 + $0x34] sm:$0xf] %vm1812_vm4, %v2059_v49  ;;  %v2064_v36 = vpack.c.bf16 %v1670_v43, %v1670_v43  ;;  %v1668_v42 = vmax.f32 %v1636_v11, 0.0  ;;  %v1639_v57 = vadd.f32 %v2804_v12, %v1600_v22  ;;  %v1374_v19 = vadd.f32 %v2238_v4, %v1139_v52  ;;  %v3010_v49 = vld [vmem:[#allocation10_spill] sm:$0xff] }
 0x150   : > { %v1598_v1 = vadd.f32 %v1521_v18, %v1369_v55  ;;  %v1305_v10 = vpop.f32.mrf.mxu0  ;;  %v1550_v7 = vpop.f32.mrf.mxu1  ;;  %v1150_v43 = vadd.f32 %v3010_v49, %v3009_v0 }
 0x151   : > { %1831 = vst.msk [vmem:[%s2820_s4 + $0x48] sm:$0xf] %vm1812_vm4, %v2064_v36  ;;  %v2062_v6 = vpack.c.bf16 %v1668_v42, %v1668_v42  ;;  %v1671_v45 = vmax.f32 %v1639_v57, 0.0  ;;  %v1603_v34 = vadd.f32 %v2272_v29, %v1374_v19  ;;  %v1372_v58 = vadd.f32 %v1305_v10, %v1131_v59  ;;  %v3011_v36 = vld [vmem:[#allocation19_spill] sm:$0xff]  ;;  %v3012_v42 = vld [vmem:[#allocation12_spill] sm:$0xff] }
 0x152   : > { %v1637_v41 = vadd.f32 %v2804_v12, %v1598_v1  ;;  %v2239_v47 = vpop.f32.mrf.mxu0  ;;  %v2277_v50 = vpop.f32.mrf.mxu1  ;;  %v1171_v57 = vadd.f32 %v3012_v42, %v3011_v36 }
 0x153   : > { %1829 = vst.msk [vmem:[%s2820_s4 + $0x40] sm:$0xf] %vm1812_vm4, %v2062_v6  ;;  %v2065_v13 = vpack.c.bf16 %v1671_v45, %v1671_v45  ;;  %v1642_v18 = vadd.f32 %v2804_v12, %v1603_v34  ;;  %v1601_v21 = vadd.f32 %v1534_v17, %v1372_v58  ;;  %v1375_v26 = vadd.f32 %v2239_v47, %v1142_v24  ;;  %v3015_v47 = vld [vmem:[#allocation21_spill] sm:$0xff] }
 0x154   : > { %v1669_v30 = vmax.f32 %v1637_v41, 0.0  ;;  %v1308_v44 = vpop.f32.mrf.mxu0  ;;  %v1553_v25 = vpop.f32.mrf.mxu1 }
 0x155   : > { %1832 = vst.msk [vmem:[%s2820_s4 + $0x4c] sm:$0xf] %vm1812_vm4, %v2065_v13  ;;  %v1674_v56 = vmax.f32 %v1642_v18, 0.0  ;;  %v1640_v16 = vadd.f32 %v2804_v12, %v1601_v21  ;;  %v1604_v46 = vadd.f32 %v2273_v48, %v1375_v26  ;;  %v1373_v29 = vadd.f32 %v1308_v44, %v1134_v3  ;;  %v3014_v3 = vld [vmem:[#allocation14_spill] sm:$0xff]  ;;  %v3016_v13 = vld [vmem:[#allocation16_spill] sm:$0xff] }
 0x156   : > { %v2063_v14 = vpack.c.bf16 %v1669_v30, %v1669_v30  ;;  %v2242_v17 = vpop.f32.mrf.mxu0  ;;  %v2280_v22 = vpop.f32.mrf.mxu1  ;;  %v1163_v41 = vadd.f32 %v3014_v3, %v3013_v32  ;;  %v1174_v18 = vadd.f32 %v3016_v13, %v3015_v47 }
 0x157   : > { %v2068_v37 = vpack.c.bf16 %v1674_v56, %v1674_v56  ;;  %v1672_v61 = vmax.f32 %v1640_v16, 0.0  ;;  %v1643_v54 = vadd.f32 %v2804_v12, %v1604_v46  ;;  %v1602_v40 = vadd.f32 %v1537_v8, %v1373_v29  ;;  %v3017_v16 = vld [vmem:[#allocation22_spill] sm:$0xff] }
 0x158   : > { %1830 = vst.msk [vmem:[%s2820_s4 + $0x44] sm:$0xf] %vm1812_vm4, %v2063_v14  ;;  %v1378_v48 = vadd.f32 %v2242_v17, %v1155_v27  ;;  %v1321_v39 = vpop.f32.mrf.mxu0  ;;  %v1566_v6 = vpop.f32.mrf.mxu1  ;;  %v3018_v46 = vld [vmem:[#allocation18_spill] sm:$0xff] }
 0x159   : > { %1835 = vst.msk [vmem:[%s2820_s4 + $0x58] sm:$0xf] %vm1812_vm4, %v2068_v37  ;;  %v2066_v5 = vpack.c.bf16 %v1672_v61, %v1672_v61  ;;  %v1675_v20 = vmax.f32 %v1643_v54, 0.0  ;;  %v1641_v52 = vadd.f32 %v2804_v12, %v1602_v40  ;;  %v1376_v62 = vadd.f32 %v1321_v39, %v1147_v63 }
 0x15a   : > { %v1607_v11 = vadd.f32 %v2276_v2, %v1378_v48  ;;  %v2243_v8 = vpop.f32.mrf.mxu0  ;;  %v1166_v29 = vadd.f32 %v3018_v46, %v3017_v16  ;;  %v2281_v23 = vpop.f32.mrf.mxu1 }
 0x15b   : > { %1833 = vst.msk [vmem:[%s2820_s4 + $0x50] sm:$0xf] %vm1812_vm4, %v2066_v5  ;;  %v2069_v60 = vpack.c.bf16 %v1675_v20, %v1675_v20  ;;  %v1673_v59 = vmax.f32 %v1641_v52, 0.0  ;;  %v1605_v55 = vadd.f32 %v1550_v7, %v1376_v62  ;;  %v1379_v4 = vadd.f32 %v2243_v8, %v1158_v28 }
 0x15c   : > { %v1646_v19 = vadd.f32 %v2804_v12, %v1607_v11  ;;  %v1324_v38 = vpop.f32.mrf.mxu0  ;;  %v1569_v35 = vpop.f32.mrf.mxu1 }
 0x15d   : > { %1836 = vst.msk [vmem:[%s2820_s4 + $0x5c] sm:$0xf] %vm1812_vm4, %v2069_v60  ;;  %v2067_v15 = vpack.c.bf16 %v1673_v59, %v1673_v59  ;;  %v1644_v2 = vadd.f32 %v2804_v12, %v1605_v55  ;;  %v1608_v24 = vadd.f32 %v2277_v50, %v1379_v4  ;;  %v1377_v1 = vadd.f32 %v1324_v38, %v1150_v43 }
 0x15e   : > { %v1678_v10 = vmax.f32 %v1646_v19, 0.0  ;;  %v2246_v45 = vpop.f32.mrf.mxu0 }
 0x15f   : > { %1834 = vst.msk [vmem:[%s2820_s4 + $0x54] sm:$0xf] %vm1812_vm4, %v2067_v15  ;;  %v1676_v7 = vmax.f32 %v1644_v2, 0.0  ;;  %v1647_v34 = vadd.f32 %v2804_v12, %v1608_v24  ;;  %v1606_v58 = vadd.f32 %v1553_v25, %v1377_v1  ;;  %v1382_v9 = vadd.f32 %v2246_v45, %v1171_v57 }
 0x160   : > { %v2072_v50 = vpack.c.bf16 %v1678_v10, %v1678_v10  ;;  %v1337_v21 = vpop.f32.mrf.mxu0 }
 0x161   : > { %v2070_v26 = vpack.c.bf16 %v1676_v7, %v1676_v7  ;;  %v1679_v30 = vmax.f32 %v1647_v34, 0.0  ;;  %v1645_v44 = vadd.f32 %v2804_v12, %v1606_v58  ;;  %v1611_v56 = vadd.f32 %v2280_v22, %v1382_v9 }
 0x162   : > { %1839 = vst.msk [vmem:[%s2820_s4 + $0x68] sm:$0xf] %vm1812_vm4, %v2072_v50  ;;  %v1380_v33 = vadd.f32 %v1337_v21, %v1163_v41  ;;  %v2247_v27 = vpop.f32.mrf.mxu0 }
 0x163   : > { %1837 = vst.msk [vmem:[%s2820_s4 + $0x60] sm:$0xf] %vm1812_vm4, %v2070_v26  ;;  %v2073_v31 = vpack.c.bf16 %v1679_v30, %v1679_v30  ;;  %v1677_v51 = vmax.f32 %v1645_v44, 0.0  ;;  %v1650_v63 = vadd.f32 %v2804_v12, %v1611_v56  ;;  %v1383_v14 = vadd.f32 %v2247_v27, %v1174_v18 }
 0x164   : > { %v1609_v17 = vadd.f32 %v1566_v6, %v1380_v33  ;;  %v1340_v25 = vpop.f32.mrf.mxu0 }
 0x165   : > { %1840 = vst.msk [vmem:[%s2820_s4 + $0x6c] sm:$0xf] %vm1812_vm4, %v2073_v31  ;;  %v2071_v37 = vpack.c.bf16 %v1677_v51, %v1677_v51  ;;  %v1682_v61 = vmax.f32 %v1650_v63, 0.0  ;;  %v1612_v54 = vadd.f32 %v2281_v23, %v1383_v14  ;;  %v1381_v40 = vadd.f32 %v1340_v25, %v1166_v29 }
 0x166   : > { %v1648_v53 = vadd.f32 %v2804_v12, %v1609_v17 }
 0x167   : > { %1838 = vst.msk [vmem:[%s2820_s4 + $0x64] sm:$0xf] %vm1812_vm4, %v2071_v37  ;;  %v2076_v28 = vpack.c.bf16 %v1682_v61, %v1682_v61  ;;  %v1651_v48 = vadd.f32 %v2804_v12, %v1612_v54  ;;  %v1610_v39 = vadd.f32 %v1569_v35, %v1381_v40 }
 0x168   : > { %v1680_v5 = vmax.f32 %v1648_v53, 0.0 }
 0x169   : > { %1843 = vst.msk [vmem:[%s2820_s4 + $0x78] sm:$0xf] %vm1812_vm4, %v2076_v28  ;;  %v1683_v20 = vmax.f32 %v1651_v48, 0.0  ;;  %v1649_v52 = vadd.f32 %v2804_v12, %v1610_v39 }
 0x16a   : > { %v2074_v62 = vpack.c.bf16 %v1680_v5, %v1680_v5 }
 0x16b   : > { %v2077_v0 = vpack.c.bf16 %v1683_v20, %v1683_v20  ;;  %v1681_v49 = vmax.f32 %v1649_v52, 0.0 }
 0x16c   : > { %1841 = vst.msk [vmem:[%s2820_s4 + $0x70] sm:$0xf] %vm1812_vm4, %v2074_v62 }
 0x16d   : > { %1844 = vst.msk [vmem:[%s2820_s4 + $0x7c] sm:$0xf] %vm1812_vm4, %v2077_v0  ;;  %v2075_v43 = vpack.c.bf16 %v1681_v49, %v1681_v49 }
 0x16f   : > { %1842 = vst.msk [vmem:[%s2820_s4 + $0x74] sm:$0xf] %vm1812_vm4, %v2075_v43 }
 0x170 PF: > { %s13_s12 = sadd.s32 1, %s2318_s12  }
 0x171   : > { %p10_p4 = scmp.ge.s32.totalorder %s13_s12, 4  }
 0x173   :  { %12 = sbr.rel (!%p10_p4) target bundleno = 1 (0x1), region = 62 }

// kernel: _lambda_.6
= control target key start
LH: loop header
LB: loop body
LE: loop exit
PB: predicated region body
PF: predicated region fallthrough
CT: control target
= control target key end

     0   :  { %s1286_s12 = smov 0   ;;  %s1536_s0 = inlined_call_operand.vmem [shape: bf16[2,9,9,128], index: 0, kind: input, shape index: {}]   ;;  %s1537_s1 = inlined_call_operand.vmem [shape: bf16[4,128,32], index: 1, kind: input, shape index: {}]   ;;  %s1538_s2 = inlined_call_operand.vmem [shape: f32[1,32], index: 2, kind: input, shape index: {}]   ;;  %s1539_s3 = inlined_call_operand.vmem [shape: bf16[2,8,8,32], index: 3, kind: output, shape index: {}]  }
   0x1 LB: > { %s1005_s13 = sadd.s32 4294967295, %s1264_s12   ;;  %p1009_p0 = scmp.ge.s32.totalorder %s1264_s12, 1  ;;  %s1264_s12 = sphi %s1286_s12, %s13_s12  }
   0x2   : > { %p137_p1 = scmp.lt.s32.totalorder %s1264_s12, 3 }
   0x4   : > { %p138_p2 = pnand %p1009_p0, %p137_p1 }
   0x5   : > { %p161_p3 = scmp.lt.s32.totalorder (!%p138_p2), %s1005_s13, 1 }
   0x6   : > { %141 = sbr.rel (%p138_p2) target bundleno = 294 (0x126), region = 32 }
   0xb   : > { %v1218_v0 = vld [vmem:[%s1537_s1 + $0x78] sm:$0xff]   ;;  %v1220_v2 = vld [vmem:[%s1537_s1 + $0x70] sm:$0xff]   ;;  %v1222_v4 = vld [vmem:[%s1537_s1 + $0x68] sm:$0xff]   ;;  %s1543_s13 = smov (!%p161_p3, %s1005_s13), 1  ;;  %vm254_vm0 = vsmask.f32 3328 }
   0xc   : > { %v1219_v1 = vld [vmem:[%s1537_s1 + $0x38] sm:$0xff]   ;;  %1113 = vmatprep.subr.bf16.mxu0 %v1218_v0  ;;  %v1221_v3 = vld [vmem:[%s1537_s1 + $0x30] sm:$0xff]   ;;  %v1223_v5 = vld [vmem:[%s1537_s1 + $0x28] sm:$0xff]   ;;  %s1209_s30 = smul.u32 72, %s1543_s13  ;;  %vm255_vm1 = vsmask.f32 7440 }
   0xd   : > { %1137 = vmatprep.subr.bf16.mxu1 %v1219_v1  ;;  %1114 = vmatpush3.bf16.msra.mxu0 %v1218_v0  ;;  %v1224_v6 = vld [vmem:[%s1537_s1 + $0x60] sm:$0xff]   ;;  %v1226_v8 = vld [vmem:[%s1537_s1 + $0x58] sm:$0xff]   ;;  %v1228_v10 = vld [vmem:[%s1537_s1 + $0x50] sm:$0xff]   ;;  %s1064_s7 = sshll.u32 %s1543_s13, 5  ;;  %vm941_vm3 = vcmask 257024  }
   0xe   : > { %1138 = vmatpush3.bf16.msra.mxu1 %v1219_v1  ;;  %1115 = vmatprep.subr.bf16.mxu0 %v1220_v2  ;;  %v1225_v7 = vld [vmem:[%s1537_s1 + $0x20] sm:$0xff]   ;;  %v1227_v9 = vld [vmem:[%s1537_s1 + $0x18] sm:$0xff]   ;;  %s1330_s10 = scalar_lea.vmem %s1536_s0, %s1209_s30  ;;  %v1229_v11 = vld [vmem:[%s1537_s1 + $0x10] sm:$0xff]   ;;  %s1509_s11 = scalar_lea.vmem %s1539_s3, %s1064_s7 }
   0xf   : > { %1139 = vmatprep.subr.bf16.mxu1 %v1221_v3  ;;  %v172_v12 = vld [vmem:[%s1330_s10] sm:$0xf]  ;;  %v173_v13 = vld [vmem:[%s1330_s10 + $0x4] sm:$0x1]  ;;  %v1341_v14 = vld [vmem:[%s1330_s10 + $0x8] sm:$0xf] }
  0x10   : > { %v175_v15 = vld [vmem:[%s1330_s10 + $0xc] sm:$0x1]  ;;  %v1345_v16 = vld [vmem:[%s1330_s10 + $0x10] sm:$0xf]  ;;  %v177_v17 = vld [vmem:[%s1330_s10 + $0x14] sm:$0x1]  ;;  %v1025_v18 = vcombine.low %v172_v12, %v1341_v14 }
  0x11   : > { %1116 = vmatpush3.bf16.msra.mxu0 %v1220_v2  ;;  %v1230_v19 = vld [vmem:[%s1537_s1 + $0x48] sm:$0xff]   ;;  %v258_v20 = vshrl.u32 %v172_v12, 16  ;;  %v261_v21 = vshll.u32 %v172_v12, 16  ;;  %v267_v23 = vshll.u32 %v173_v13, 16  ;;  %v272_v24 = vshrl.u32 %v1341_v14, 16  ;;  %v1232_v41 = vld [vmem:[%s1537_s1 + $0x40] sm:$0xff]   ;;  %vm1368_vm2 = vmor %vm254_vm0, %vm255_vm1 }
  0x12   : > { %1140 = vmatpush3.bf16.msra.mxu1 %v1221_v3  ;;  %1117 = vmatprep.subr.bf16.mxu0 %v1222_v4  ;;  %v1231_v22 = vld [vmem:[%s1537_s1 + $0x8] sm:$0xff]   ;;  %v275_v25 = vshll.u32 %v1341_v14, 16  ;;  %v281_v26 = vshll.u32 %v175_v15, 16  ;;  %v1358_v27 = vld [vmem:[%s1330_s10 + $0x18] sm:$0xf]  ;;  %v286_v30 = vshrl.u32 %v1345_v16, 16 }
  0x13   : > { %1141 = vmatprep.subr.bf16.mxu1 %v1223_v5  ;;  %1153 = vmatprep.mubr.bf16.mxu1 %v1025_v18  ;;  %v260_v28 = vrot.slane %v258_v20, 4  ;;  %v263_v29 = vrot.slane %v261_v21, 5  ;;  %v289_v31 = vshll.u32 %v1345_v16, 16  ;;  %v179_v32 = vld [vmem:[%s1330_s10 + $0x1c] sm:$0x1]  ;;  %v269_v33 = vrot.slane %v267_v23, 5 }
  0x14   : > { %v274_v34 = vrot.slane %v272_v24, 4  ;;  %v277_v35 = vrot.slane %v275_v25, 5  ;;  %v283_v36 = vrot.slane %v281_v26, 5  ;;  %v288_v38 = vrot.slane %v286_v30, 4  ;;  %v1233_v47 = vld [vmem:[%s1537_s1] sm:$0xff]   ;;  %v1236_v60 = vld [vmem:[%s1537_s1 + $0xb8] sm:$0xff]  }
  0x15   : > { %1118 = vmatpush3.bf16.msra.mxu0 %v1222_v4  ;;  %v264_v37 = vor.u32 %v263_v29, %v260_v28  ;;  %v291_v39 = vrot.slane %v289_v31, 5  ;;  %v295_v40 = vshll.u32 %v177_v17, 16  ;;  %v300_v44 = vshrl.u32 %v1358_v27, 16  ;;  %v1237_v63 = vld [vmem:[%s1537_s1 + $0xf8] sm:$0xff]   ;;  %v1238_v3 = vld [vmem:[%s1537_s1 + $0xb0] sm:$0xff]   ;;  %v1241_v12 = vld [vmem:[%s1537_s1 + $0xe8] sm:$0xff]  }
  0x16   : > { %1142 = vmatpush3.bf16.msra.mxu1 %v1223_v5  ;;  %1119 = vmatprep.subr.bf16.mxu0 %v1224_v6  ;;  %v278_v43 = vor.u32 %v277_v35, %v274_v34  ;;  %v303_v45 = vshll.u32 %v1358_v27, 16  ;;  %v309_v46 = vshll.u32 %v179_v32, 16  ;;  %v1026_v1 = vcombine.low %v1345_v16, %v1358_v27  ;;  %v1239_v4 = vld [vmem:[%s1537_s1 + $0xf0] sm:$0xff]   ;;  %v1409_v5 = vld [vmem:[%s1330_s10 + $0x20] sm:$0xf] }
  0x17   : > { %1143 = vmatprep.subr.bf16.mxu1 %v1225_v7  ;;  %v265_v48 = vrot.slane %v264_v37, 4  ;;  %v292_v49 = vor.u32 %v291_v39, %v288_v38  ;;  %v297_v51 = vrot.slane %v295_v40, 5  ;;  %v302_v52 = vrot.slane %v300_v44, 4  ;;  %v185_v23 = vld [vmem:[%s1330_s10 + $0x34] sm:$0x1]  ;;  %v1242_v39 = vld [vmem:[%s1537_s1 + $0xa0] sm:$0xff]  }
  0x18   : > { %v279_v50 = vrot.slane %v278_v43, 4  ;;  %v305_v53 = vrot.slane %v303_v45, 5  ;;  %v311_v58 = vrot.slane %v309_v46, 5  ;;  %v1433_v24 = vld [vmem:[%s1330_s10 + $0x38] sm:$0xf]  ;;  %v351_v34 = vshll.u32 %v185_v23, 16 }
  0x19   : > { %1120 = vmatpush3.bf16.msra.mxu0 %v1224_v6  ;;  %v270_v54 = vsel %vm1368_vm2, %v265_v48, %v269_v33  ;;  %v293_v55 = vrot.slane %v292_v49, 4  ;;  %v181_v6 = vld [vmem:[%s1330_s10 + $0x24] sm:$0x1]  ;;  %v187_v30 = vld [vmem:[%s1330_s10 + $0x3c] sm:$0x1]  ;;  %v359_v37 = vshll.u32 %v1433_v24, 16 }
  0x1a   : > { %1144 = vmatpush3.bf16.msra.mxu1 %v1225_v7  ;;  %1121 = vmatprep.subr.bf16.mxu0 %v1226_v8  ;;  %v1381_v56 = vsel %vm1368_vm2, %v279_v50, %v283_v36  ;;  %v306_v57 = vor.u32 %v305_v53, %v302_v52  ;;  %v1240_v7 = vld [vmem:[%s1537_s1 + $0xa8] sm:$0xff]   ;;  %v323_v13 = vshll.u32 %v181_v6, 16  ;;  %v356_v36 = vshrl.u32 %v1433_v24, 16  ;;  %v1243_v45 = vld [vmem:[%s1537_s1 + $0xe0] sm:$0xff]  }
  0x1b   : > { %1145 = vmatprep.subr.bf16.mxu1 %v1227_v9  ;;  %v1013_v59 = vcombine.low %v270_v54, %v1381_v56  ;;  %v1389_v61 = vsel %vm1368_vm2, %v293_v55, %v297_v51  ;;  %v365_v38 = vshll.u32 %v187_v30, 16  ;;  %v361_v48 = vrot.slane %v359_v37, 5 }
  0x1c   : > { %v307_v62 = vrot.slane %v306_v57, 4  ;;  %v325_v25 = vrot.slane %v323_v13, 5  ;;  %v1049_v44 = vcombine.low %v1381_v56, %v1389_v61  ;;  %v353_v51 = vrot.slane %v351_v34, 5  ;;  %v1244_v56 = vld [vmem:[%s1537_s1 + $0x98] sm:$0xff]   ;;  %v189_v13 = vld [vmem:[%s1330_s10 + $0x44] sm:$0x1] }
  0x1d   : > { %1122 = vmatpush3.bf16.msra.mxu0 %v1226_v8  ;;  %1129 = vmatprep.mubr.bf16.mxu0 %v1013_v59  ;;  %v1416_v8 = vld [vmem:[%s1330_s10 + $0x28] sm:$0xf]  ;;  %v367_v55 = vrot.slane %v365_v38, 5  ;;  %v1245_v59 = vld [vmem:[%s1537_s1 + $0xd8] sm:$0xff]  }
  0x1e   : > { %1146 = vmatpush3.bf16.msra.mxu1 %v1227_v9  ;;  %1123 = vmatprep.subr.bf16.mxu0 %v1228_v10  ;;  %v1396_v0 = vsel %vm1368_vm2, %v307_v62, %v311_v58  ;;  %v183_v9 = vld [vmem:[%s1330_s10 + $0x2c] sm:$0x1]  ;;  %v328_v15 = vshrl.u32 %v1416_v8, 16  ;;  %v331_v17 = vshll.u32 %v1416_v8, 16 }
  0x1f   : > { %1147 = vmatprep.subr.bf16.mxu1 %v1229_v11  ;;  %v1014_v2 = vcombine.low %v1389_v61, %v1396_v0  ;;  %v337_v18 = vshll.u32 %v183_v9, 16  ;;  %v1252_v9 = vld [vmem:[%s1537_s1 + $0x80] sm:$0xff]  }
  0x20   : > { %v330_v26 = vrot.slane %v328_v15, 4  ;;  %v333_v28 = vrot.slane %v331_v17, 5  ;;  %v776_v17 = vshll.u32 %v189_v13, 16 }
  0x21   : > { %1124 = vmatpush3.bf16.msra.mxu0 %v1228_v10  ;;  %v314_v10 = vshrl.u32 %v1409_v5, 16  ;;  %v339_v29 = vrot.slane %v337_v18, 5  ;;  %v1038_v18 = vcombine.low %v1358_v27, %v1409_v5 }
  0x22   : > { %1148 = vmatpush3.bf16.msra.mxu1 %v1229_v11  ;;  %1125 = vmatprep.subr.bf16.mxu0 %v1230_v19  ;;  %v317_v11 = vshll.u32 %v1409_v5, 16  ;;  %v334_v35 = vor.u32 %v333_v28, %v330_v26 }
  0x23   : > { %1149 = vmatprep.subr.bf16.mxu1 %v1231_v22  ;;  %v316_v20 = vrot.slane %v314_v10, 4 }
  0x24   : > { %v319_v21 = vrot.slane %v317_v11, 5  ;;  %v335_v46 = vrot.slane %v334_v35, 4 }
  0x25   : > { %1126 = vmatpush3.bf16.msra.mxu0 %v1230_v19  ;;  %v1427_v19 = vld [vmem:[%s1330_s10 + $0x30] sm:$0xf] }
  0x26   : > { %1150 = vmatpush3.bf16.msra.mxu1 %v1231_v22  ;;  %1127 = vmatprep.subr.bf16.mxu0 %v1232_v41  ;;  %v1027_v22 = vcombine.low %v1409_v5, %v1416_v8  ;;  %v320_v31 = vor.u32 %v319_v21, %v316_v20  ;;  %v342_v32 = vshrl.u32 %v1427_v19, 16  ;;  %v345_v33 = vshll.u32 %v1427_v19, 16 }
  0x27   : > { %1151 = vmatprep.subr.bf16.mxu1 %v1233_v47  ;;  %v1028_v52 = vcombine.low %v1427_v19, %v1433_v24  ;;  %v340_v53 = vsel %vm1368_vm2, %v335_v46, %v339_v29  ;;  %v1039_v21 = vcombine.low %v1416_v8, %v1427_v19 }
  0x28   : > { %v321_v40 = vrot.slane %v320_v31, 4  ;;  %v347_v43 = vrot.slane %v345_v33, 5 }
  0x29   : > { %1128 = vmatpush3.bf16.msra.mxu0 %v1232_v41  ;;  %v344_v41 = vrot.slane %v342_v32, 4 }
  0x2a   : > { %1152 = vmatpush3.bf16.msra.mxu1 %v1233_v47  ;;  %1161 = vmatprep.subr.bf16.mxu0 %v1236_v60  ;;  %v358_v47 = vrot.slane %v356_v36, 4  ;;  %v1450_v49 = vsel %vm1368_vm2, %v321_v40, %v325_v25  ;;  %v778_v25 = vrot.slane %v776_v17, 5 }
  0x2b   : > { %1185 = vmatprep.subr.bf16.mxu1 %v1237_v63  ;;  %v348_v50 = vor.u32 %v347_v43, %v344_v41  ;;  %v1015_v57 = vcombine.low %v1450_v49, %v340_v53  ;;  %v1050_v20 = vcombine.low %v1396_v0, %v1450_v49 }
  0x2c   : > { %1130 = vmatmul.mubr.bf16.vlgmr.msra.gmra.mxu0 %v1014_v2  ;;  %v362_v54 = vor.u32 %v361_v48, %v358_v47  ;;  %v1248_v2 = vld [vmem:[%s1537_s1 + $0x90] sm:$0xff]  }
  0x2d   : > { %1154 = vmatmul.mubr.bf16.vlgmr.msra.gmra.mxu1 %v1026_v1  ;;  %1162 = vmatpush3.bf16.msra.mxu0 %v1236_v60  ;;  %v349_v58 = vrot.slane %v348_v50, 4 }
  0x2e   : > { %1186 = vmatpush3.bf16.msra.mxu1 %v1237_v63  ;;  %1163 = vmatprep.subr.bf16.mxu0 %v1238_v3  ;;  %v363_v60 = vrot.slane %v362_v54, 4  ;;  %v1037_v63 = vcombine.low %v1341_v14, %v1345_v16  ;;  %v1250_v14 = vld [vmem:[%s1537_s1 + $0x88] sm:$0xff]  }
  0x2f   : > { %1187 = vmatprep.subr.bf16.mxu1 %v1239_v4  ;;  %1157 = vmatprep.mubr.bf16.mxu1 %v1027_v22  ;;  %v354_v61 = vsel %vm1368_vm2, %v349_v58, %v353_v51 }
  0x30   : > { %1133 = vmatprep.mubr.bf16.mxu0 %v1015_v57  ;;  %v368_v62 = vsel %vm1368_vm2, %v363_v60, %v367_v55  ;;  %v1051_v22 = vcombine.low %v340_v53, %v354_v61 }
  0x31   : > { %1164 = vmatpush3.bf16.msra.mxu0 %v1238_v3  ;;  %v1016_v1 = vcombine.low %v354_v61, %v368_v62  ;;  %v1249_v3 = vld [vmem:[%s1537_s1 + $0xd0] sm:$0xff]  }
  0x32   : > { %1188 = vmatpush3.bf16.msra.mxu1 %v1239_v4  ;;  %1165 = vmatprep.subr.bf16.mxu0 %v1240_v7  ;;  %v188_v4 = vld [vmem:[%s1330_s10 + $0x40] sm:$0xf] }
  0x33   : > { %1189 = vmatprep.subr.bf16.mxu1 %v1241_v12  ;;  %v767_v16 = vshrl.u32 %v188_v4, 16  ;;  %v770_v6 = vshll.u32 %v188_v4, 16  ;;  %v1040_v27 = vcombine.low %v1433_v24, %v188_v4 }
  0x34   : > { %1134 = vmatmul.mubr.bf16.gmra.mxu0 %v1016_v1 }
  0x35   : > { %1166 = vmatpush3.bf16.msra.mxu0 %v1240_v7  ;;  %1158 = vmatmul.mubr.bf16.gmra.mxu1 %v1028_v52  ;;  %v1251_v7 = vld [vmem:[%s1537_s1 + $0xc8] sm:$0xff]   ;;  %v769_v10 = vrot.slane %v767_v16, 4  ;;  %v772_v11 = vrot.slane %v770_v6, 5 }
  0x36   : > { %1190 = vmatpush3.bf16.msra.mxu1 %v1241_v12  ;;  %1167 = vmatprep.subr.bf16.mxu0 %v1242_v39  ;;  %v1253_v12 = vld [vmem:[%s1537_s1 + $0xc0] sm:$0xff]  }
  0x37   : > { %1191 = vmatprep.subr.bf16.mxu1 %v1243_v45  ;;  %1201 = vmatprep.mubr.bf16.mxu1 %v1049_v44  ;;  %v773_v15 = vor.u32 %v772_v11, %v769_v10 }
  0x38   : > { %1177 = vmatprep.mubr.bf16.mxu0 %v1037_v63 }
  0x39   : > { %1168 = vmatpush3.bf16.msra.mxu0 %v1242_v39  ;;  %v774_v23 = vrot.slane %v773_v15, 4 }
  0x3a   : > { %1192 = vmatpush3.bf16.msra.mxu1 %v1243_v45  ;;  %1169 = vmatprep.subr.bf16.mxu0 %v1244_v56  ;;  %v1501_v45 = vld [vmem:[%s1538_s2] ss:$0 sm:$0xff] }
  0x3b   : > { %1193 = vmatprep.subr.bf16.mxu1 %v1245_v59  ;;  %v779_v26 = vsel %vm1368_vm2, %v774_v23, %v778_v25 }
  0x3c   : > { %v1052_v5 = vcombine.low %v368_v62, %v779_v26 }
  0x3d   : > { %1170 = vmatpush3.bf16.msra.mxu0 %v1244_v56 }
  0x3e   : > { %1194 = vmatpush3.bf16.msra.mxu1 %v1245_v59  ;;  %1171 = vmatprep.subr.bf16.mxu0 %v1248_v2 }
  0x3f   : > { %1195 = vmatprep.subr.bf16.mxu1 %v1249_v3 }
  0x41   : > { %1172 = vmatpush3.bf16.msra.mxu0 %v1248_v2 }
  0x42   : > { %1196 = vmatpush3.bf16.msra.mxu1 %v1249_v3  ;;  %1173 = vmatprep.subr.bf16.mxu0 %v1250_v14 }
  0x43   : > { %1197 = vmatprep.subr.bf16.mxu1 %v1251_v7 }
  0x45   : > { %1174 = vmatpush3.bf16.msra.mxu0 %v1250_v14 }
  0x46   : > { %1198 = vmatpush3.bf16.msra.mxu1 %v1251_v7  ;;  %1175 = vmatprep.subr.bf16.mxu0 %v1252_v9 }
  0x47   : > { %1199 = vmatprep.subr.bf16.mxu1 %v1253_v12 }
  0x49   : > { %1176 = vmatpush3.bf16.msra.mxu0 %v1252_v9 }
  0x4a   : > { %1200 = vmatpush3.bf16.msra.mxu1 %v1253_v12 }
  0x4c   : > { %1178 = vmatmul.mubr.bf16.vlgmr.msra.gmra.mxu0 %v1038_v18 }
  0x4d   : > { %1202 = vmatmul.mubr.bf16.vlgmr.msra.gmra.mxu1 %v1050_v20  ;;  %1181 = vmatprep.mubr.bf16.mxu0 %v1039_v21 }
  0x4e   : > { %1205 = vmatprep.mubr.bf16.mxu1 %v1051_v22 }
  0x54   : > { %1182 = vmatmul.mubr.bf16.gmra.mxu0 %v1040_v27 }
  0x55   : > { %1206 = vmatmul.mubr.bf16.gmra.mxu1 %v1052_v5 }
  0xec   : > { %v1131_v0 = vpop.f32.mrf.mxu0 }
  0xed   : > { %v1155_v28 = vpop.f32.mrf.mxu1 }
  0xee   : > { %v467_v29 = vpop.f32.mrf.mxu0  ;;  %v613_v24 = vadd.f32 %v1155_v28, %v1131_v0 }
  0xef   : > { %v604_v8 = vpop.f32.mrf.mxu1 }
  0xf0   : > { %v1132_v19 = vpop.f32.mrf.mxu0  ;;  %v605_v41 = vadd.f32 %v604_v8, %v467_v29 }
  0xf1   : > { %v1156_v30 = vpop.f32.mrf.mxu1 }
  0xf2   : > { %v470_v31 = vpop.f32.mrf.mxu0  ;;  %v616_v47 = vadd.f32 %v1156_v30, %v1132_v19 }
  0xf3   : > { %v607_v32 = vpop.f32.mrf.mxu1 }
  0xf4   : > { %v1135_v33 = vpop.f32.mrf.mxu0  ;;  %v608_v52 = vadd.f32 %v607_v32, %v470_v31 }
  0xf5   : > { %v1159_v34 = vpop.f32.mrf.mxu1 }
  0xf6   : > { %v483_v35 = vpop.f32.mrf.mxu0  ;;  %v629_v63 = vadd.f32 %v1159_v34, %v1135_v33 }
  0xf7   : > { %v620_v36 = vpop.f32.mrf.mxu1 }
  0xf8   : > { %v1136_v37 = vpop.f32.mrf.mxu0  ;;  %v621_v1 = vadd.f32 %v620_v36, %v483_v35 }
  0xf9   : > { %v1160_v42 = vpop.f32.mrf.mxu1 }
  0xfa   : > { %v486_v38 = vpop.f32.mrf.mxu0  ;;  %v632_v7 = vadd.f32 %v1160_v42, %v1136_v37 }
  0xfb   : > { %v623_v39 = vpop.f32.mrf.mxu1 }
  0xfc   : > { %v624_v18 = vadd.f32 %v623_v39, %v486_v38 }
 0x10c   : > { %v1179_v40 = vpop.f32.mrf.mxu0 }
 0x10d   : > { %v760_v43 = vadd.f32 %v1179_v40, %v613_v24  ;;  %v1203_v44 = vpop.f32.mrf.mxu1 }
 0x10e   : > { %v727_v46 = vpop.f32.mrf.mxu0 }
 0x10f   : > { %v904_v48 = vadd.f32 %v1203_v44, %v760_v43  ;;  %v758_v49 = vadd.f32 %v727_v46, %v605_v41  ;;  %v871_v50 = vpop.f32.mrf.mxu1 }
 0x110   : > { %v1180_v51 = vpop.f32.mrf.mxu0 }
 0x111   : > { %v919_v53 = vadd.f32 %v1501_v45, %v904_v48  ;;  %v902_v54 = vadd.f32 %v871_v50, %v758_v49  ;;  %v761_v55 = vadd.f32 %v1180_v51, %v616_v47  ;;  %v1204_v56 = vpop.f32.mrf.mxu1 }
 0x112   : > { %v730_v57 = vpop.f32.mrf.mxu0 }
 0x113   : > { %v927_v58 = vmax.f32 %v919_v53, 0.0  ;;  %v917_v59 = vadd.f32 %v1501_v45, %v902_v54  ;;  %v905_v60 = vadd.f32 %v1204_v56, %v761_v55  ;;  %v759_v61 = vadd.f32 %v730_v57, %v608_v52  ;;  %v874_v62 = vpop.f32.mrf.mxu1 }
 0x114   : > { %v1183_v2 = vpop.f32.mrf.mxu0 }
 0x115   : > { %v935_v3 = vpack.c.bf16 %v927_v58, %v927_v58  ;;  %v925_v4 = vmax.f32 %v917_v59, 0.0  ;;  %v920_v14 = vadd.f32 %v1501_v45, %v905_v60  ;;  %v903_v16 = vadd.f32 %v874_v62, %v759_v61  ;;  %v1207_v6 = vpop.f32.mrf.mxu1 }
 0x116   : > { %v764_v9 = vadd.f32 %v1183_v2, %v629_v63  ;;  %v743_v10 = vpop.f32.mrf.mxu0 }
 0x117   : > { %944 = vst.msk [vmem:[%s1509_s11 + $0x8] sm:$0xf] %vm941_vm3, %v935_v3  ;;  %v933_v11 = vpack.c.bf16 %v925_v4, %v925_v4  ;;  %v928_v12 = vmax.f32 %v920_v14, 0.0  ;;  %v918_v13 = vadd.f32 %v1501_v45, %v903_v16  ;;  %v762_v15 = vadd.f32 %v743_v10, %v621_v1  ;;  %v887_v17 = vpop.f32.mrf.mxu1 }
 0x118   : > { %v908_v20 = vadd.f32 %v1207_v6, %v764_v9  ;;  %v1184_v21 = vpop.f32.mrf.mxu0 }
 0x119   : > { %942 = vst.msk [vmem:[%s1509_s11] sm:$0xf] %vm941_vm3, %v933_v11  ;;  %v936_v22 = vpack.c.bf16 %v928_v12, %v928_v12  ;;  %v926_v23 = vmax.f32 %v918_v13, 0.0  ;;  %v906_v25 = vadd.f32 %v887_v17, %v762_v15  ;;  %v765_v26 = vadd.f32 %v1184_v21, %v632_v7  ;;  %v1208_v27 = vpop.f32.mrf.mxu1 }
 0x11a   : > { %v923_v5 = vadd.f32 %v1501_v45, %v908_v20  ;;  %v746_v0 = vpop.f32.mrf.mxu0 }
 0x11b   : > { %945 = vst.msk [vmem:[%s1509_s11 + $0xc] sm:$0xf] %vm941_vm3, %v936_v22  ;;  %v934_v28 = vpack.c.bf16 %v926_v23, %v926_v23  ;;  %v921_v29 = vadd.f32 %v1501_v45, %v906_v25  ;;  %v909_v8 = vadd.f32 %v1208_v27, %v765_v26  ;;  %v763_v19 = vadd.f32 %v746_v0, %v624_v18  ;;  %v890_v31 = vpop.f32.mrf.mxu1 }
 0x11c   : > { %v931_v30 = vmax.f32 %v923_v5, 0.0 }
 0x11d   : > { %943 = vst.msk [vmem:[%s1509_s11 + $0x4] sm:$0xf] %vm941_vm3, %v934_v28  ;;  %v929_v32 = vmax.f32 %v921_v29, 0.0  ;;  %v924_v33 = vadd.f32 %v1501_v45, %v909_v8  ;;  %v907_v34 = vadd.f32 %v890_v31, %v763_v19 }
 0x11e   : > { %v939_v35 = vpack.c.bf16 %v931_v30, %v931_v30 }
 0x11f   : > { %v937_v36 = vpack.c.bf16 %v929_v32, %v929_v32  ;;  %v932_v37 = vmax.f32 %v924_v33, 0.0  ;;  %v922_v42 = vadd.f32 %v1501_v45, %v907_v34 }
 0x120   : > { %948 = vst.msk [vmem:[%s1509_s11 + $0x18] sm:$0xf] %vm941_vm3, %v939_v35 }
 0x121   : > { %946 = vst.msk [vmem:[%s1509_s11 + $0x10] sm:$0xf] %vm941_vm3, %v937_v36  ;;  %v940_v38 = vpack.c.bf16 %v932_v37, %v932_v37  ;;  %v930_v24 = vmax.f32 %v922_v42, 0.0 }
 0x123   : > { %949 = vst.msk [vmem:[%s1509_s11 + $0x1c] sm:$0xf] %vm941_vm3, %v940_v38  ;;  %v938_v39 = vpack.c.bf16 %v930_v24, %v930_v24 }
 0x125   : > { %947 = vst.msk [vmem:[%s1509_s11 + $0x14] sm:$0xf] %vm941_vm3, %v938_v39 }
 0x126 PF: > { %s13_s12 = sadd.s32 1, %s1264_s12  }
 0x127   : > { %p10_p4 = scmp.ge.s32.totalorder %s13_s12, 4  }
 0x129   :  { %12 = sbr.rel (!%p10_p4) target bundleno = 1 (0x1), region = 62 }

// kernel: _lambda_.7
= control target key start
LH: loop header
LB: loop body
LE: loop exit
PB: predicated region body
PF: predicated region fallthrough
CT: control target
= control target key end

     0   :  { %s893_s18 = smov 0   ;;  %s980_s0 = inlined_call_operand.vmem [shape: bf16[128,32], index: 0, kind: input, shape index: {}]   ;;  %s981_s1 = inlined_call_operand.vmem [shape: bf16[32,64], index: 1, kind: input, shape index: {}]   ;;  %s982_s2 = inlined_call_operand.vmem [shape: f32[1,64], index: 2, kind: input, shape index: {}]   ;;  %s983_s3 = inlined_call_operand.vmem [shape: f32[128,64], index: 3, kind: input, shape index: {}]   ;;  %s984_s4 = inlined_call_operand.vmem [shape: bf16[64,32], index: 4, kind: input, shape index: {}]   ;;  %s985_s5 = inlined_call_operand.vmem [shape: bf16[128,32], index: 5, kind: output, shape index: {}]  }
   0x1 LB: > { %s715_s19 = sadd.s32 4294967295, %s861_s18   ;;  %p719_p0 = scmp.ge.s32.totalorder %s861_s18, 1  ;;  %s861_s18 = sphi %s893_s18, %s15_s18  }
   0x2   : > { %p199_p1 = scmp.lt.s32.totalorder %s861_s18, 3 }
   0x4   : > { %p200_p2 = pnand %p719_p0, %p199_p1 }
   0x5   : > { %s720_s22 = sshll.u32 (!%p200_p2), %s715_s19, 3 }
   0x6   : > { %203 = sbr.rel (%p200_p2) target bundleno = 753 (0x2f1), region = 40  ;;  %p233_p3 = scmp.lt.s32.totalorder (!%p200_p2), %s720_s22, 15 }
   0xb   : > { %v813_v0 = vld [vmem:[%s981_s1 + $0x8] sm:$0xff]   ;;  %v814_v1 = vld [vmem:[%s981_s1] sm:$0xff]   ;;  %s987_s22 = smov (!%p233_p3, %s720_s22), 15  ;;  %vm302_vm0 = vcmask 261120   ;;  %vm404_vm1 = vcmask 523264   ;;  %vm638_vm2 = vcmask 257024  }
   0xc   : > { %777 = vmatprep.subr.bf16.mxu0 %v813_v0  ;;  %s721_s25 = sshll.u32 %s987_s22, 2  ;;  %s723_s29 = sshll.u32 %s987_s22, 3  ;;  %v726_v6 = vld [vmem:[%s982_s2] ss:$0 sm:$0xff] }
   0xd   : > { %778 = vmatpush3.bf16.msra.mxu0 %v813_v0  ;;  %s236_s28 = scalar_lea.vmem %s980_s0, %s721_s25  ;;  %s919_s7 = scalar_lea.vmem %s983_s3, %s723_s29 }
   0xe   : > { %779 = vmatprep.subr.bf16.mxu0 %v814_v1  ;;  %v815_v2 = vld [vmem:[%s236_s28] sm:$0xff]   ;;  %v816_v3 = vld [vmem:[%s236_s28 + $0x8] sm:$0xff]   ;;  %v817_v4 = vld [vmem:[%s236_s28 + $0x10] sm:$0xff]   ;;  %s248_s21 = scalar_lea.vmem %s985_s5, %s721_s25 }
   0xf   : > { %781 = vmatprep.mubr.msk.bf16.mxu0 %vm302_vm0, %v815_v2  ;;  %v818_v5 = vld [vmem:[%s236_s28 + $0x18] sm:$0xff]   ;;  %v382_v8 = vld [vmem:[%s919_s7 + $0x10] sm:$0xff]  ;;  %v380_v11 = vld [vmem:[%s919_s7] sm:$0xff] }
  0x10   : > { %v383_v15 = vld [vmem:[%s919_s7 + $0x18] sm:$0xff]  ;;  %v381_v20 = vld [vmem:[%s919_s7 + $0x8] sm:$0xff]  ;;  %v386_v30 = vld [vmem:[%s919_s7 + $0x30] sm:$0xff] }
  0x11   : > { %780 = vmatpush3.bf16.msra.mxu0 %v814_v1  ;;  %v384_v32 = vld [vmem:[%s919_s7 + $0x20] sm:$0xff]  ;;  %v387_v41 = vld [vmem:[%s919_s7 + $0x38] sm:$0xff]  ;;  %v385_v43 = vld [vmem:[%s919_s7 + $0x28] sm:$0xff] }
  0x14   : > { %782 = vmatmul.mubr.msk.bf16.vlgmr.msra.gmra.mxu0 %vm302_vm0, %v816_v3 }
  0x15   : > { %785 = vmatprep.mubr.msk.bf16.mxu0 %vm302_vm0, %v817_v4 }
  0x1c   : > { %786 = vmatmul.mubr.msk.bf16.gmra.mxu0 %vm302_vm0, %v818_v5 }
  0xd4   : > { %v783_v7 = vpop.f32.mrf.mxu0 }
  0xd5   : > { %v358_v9 = vadd.f32 %v783_v7, %v726_v6 }
  0xd6   : > { %v349_v10 = vpop.f32.mrf.mxu0 }
  0xd7   : > { %v350_v12 = vadd.f32 %v726_v6, %v349_v10  ;;  %v390_v13 = vadd.f32 %v382_v8, %v358_v9 }
  0xd8   : > { %v784_v14 = vpop.f32.mrf.mxu0 }
  0xd9   : > { %v361_v16 = vadd.f32 %v784_v14, %v726_v6  ;;  %v398_v17 = vmul.f32 1.1111112, %v390_v13  ;;  %v388_v18 = vadd.f32 %v380_v11, %v350_v12 }
  0xda   : > { %v352_v19 = vpop.f32.mrf.mxu0 }
  0xdb   : > { %v391_v21 = vadd.f32 %v383_v15, %v361_v16  ;;  %v353_v22 = vadd.f32 %v726_v6, %v352_v19  ;;  %v411_v23 = vsel %vm404_vm1, %v398_v17, -inf  ;;  %v396_v24 = vmul.f32 1.1111112, %v388_v18 }
  0xdc   : > { %412 = vmax.xlane.f32.xlu1 %v411_v23  ;;  %v787_v25 = vpop.f32.mrf.mxu0 }
  0xdd   : > { %v389_v26 = vadd.f32 %v381_v20, %v353_v22  ;;  %v374_v27 = vadd.f32 %v787_v25, %v726_v6  ;;  %v405_v28 = vsel %vm404_vm1, %v396_v24, -inf  ;;  %v399_v29 = vmul.f32 1.1111112, %v391_v21 }
  0xde   : > { %v365_v31 = vpop.f32.mrf.mxu0  ;;  %406 = vmax.xlane.f32.xlu0 %v405_v28 }
  0xdf   : > { %v366_v33 = vadd.f32 %v726_v6, %v365_v31  ;;  %v414_v34 = vsel %vm404_vm1, %v399_v29, -inf  ;;  %v397_v35 = vmul.f32 1.1111112, %v389_v26  ;;  %v394_v37 = vadd.f32 %v386_v30, %v374_v27  ;;  %v819_v31 = vld [vmem:[%s984_s4 + $0x18] sm:$0xff]  }
  0xe0   : > { %415 = vmax.xlane.f32.xlu1 %v414_v34  ;;  %v788_v36 = vpop.f32.mrf.mxu0  ;;  %789 = vmatprep.subr.bf16.mxu1 %v819_v31  ;;  %v822_v34 = vld [vmem:[%s984_s4] sm:$0xff]  }
  0xe1   : > { %v392_v38 = vadd.f32 %v384_v32, %v366_v33  ;;  %v377_v39 = vadd.f32 %v788_v36, %v726_v6  ;;  %v408_v40 = vsel %vm404_vm1, %v397_v35, -inf  ;;  %v402_v49 = vmul.f32 1.1111112, %v394_v37  ;;  %790 = vmatpush3.bf16.msra.mxu1 %v819_v31  ;;  %v820_v32 = vld [vmem:[%s984_s4 + $0x10] sm:$0xff]   ;;  %v821_v33 = vld [vmem:[%s984_s4 + $0x8] sm:$0xff]  }
  0xe2   : > { %v368_v42 = vpop.f32.mrf.mxu0  ;;  %409 = vmax.xlane.f32.xlu0 %v408_v40  ;;  %791 = vmatprep.subr.bf16.mxu1 %v820_v32 }
  0xe3   : > { %v369_v44 = vadd.f32 %v726_v6, %v368_v42  ;;  %v400_v45 = vmul.f32 1.1111112, %v392_v38  ;;  %v395_v46 = vadd.f32 %v387_v41, %v377_v39  ;;  %v423_v52 = vsel %vm404_vm1, %v402_v49, -inf }
  0xe5   : > { %v393_v47 = vadd.f32 %v385_v43, %v369_v44  ;;  %v417_v48 = vsel %vm404_vm1, %v400_v45, -inf  ;;  %v403_v53 = vmul.f32 1.1111112, %v395_v46  ;;  %792 = vmatpush3.bf16.msra.mxu1 %v820_v32 }
  0xe6   : > { %418 = vmax.xlane.f32.xlu0 %v417_v48  ;;  %793 = vmatprep.subr.bf16.mxu1 %v821_v33 }
  0xe7   : > { %v401_v50 = vmul.f32 1.1111112, %v393_v47  ;;  %v426_v54 = vsel %vm404_vm1, %v403_v53, -inf }
  0xe9   : > { %v420_v51 = vsel %vm404_vm1, %v401_v50, -inf  ;;  %794 = vmatpush3.bf16.msra.mxu1 %v821_v33 }
  0xea   : > { %421 = vmax.xlane.f32.xlu1 %v420_v51  ;;  %424 = vmax.xlane.f32.xlu0 %v423_v52 }
  0xeb   : > { %795 = vmatprep.subr.bf16.mxu1 %v822_v34 }
  0xed   : > { %796 = vmatpush3.bf16.msra.mxu1 %v822_v34 }
  0xee   : > { %427 = vmax.xlane.f32.xlu1 %v426_v54 }
 0x165   : > { %v413_v55 = vpop.xlane.xlu1 %412 }
 0x166   : > { %v431_v56 = vsub.f32 %v398_v17, %v413_v55 }
 0x167   : > { %v407_v57 = vpop.xlane.xlu0 %406 }
 0x168   : > { %v429_v58 = vsub.f32 %v396_v24, %v407_v57  ;;  %v441_v60 = vmul.f32 1.442695, %v431_v56 }
 0x169   : > { %v416_v59 = vpop.xlane.xlu1 %415 }
 0x16a   : > { %v437_v61 = vmul.f32 1.442695, %v429_v58  ;;  %v432_v62 = vsub.f32 %v399_v29, %v416_v59 }
 0x16b   : > { %v410_v63 = vpop.xlane.xlu0 %409 }
 0x16c   : > { %823 = vpow2.f32 %v437_v61  ;;  %v430_v0 = vsub.f32 %v397_v35, %v410_v63  ;;  %v443_v1 = vmul.f32 1.442695, %v432_v62 }
 0x16d   : > { %825 = vpow2.f32 %v441_v60 }
 0x16e   : > { %v439_v2 = vmul.f32 1.442695, %v430_v0 }
 0x16f   : > { %v419_v3 = vpop.xlane.xlu0 %418 }
 0x170   : > { %827 = vpow2.f32 %v439_v2  ;;  %v433_v4 = vsub.f32 %v400_v45, %v419_v3 }
 0x171   : > { %829 = vpow2.f32 %v443_v1 }
 0x172   : > { %v445_v5 = vmul.f32 1.442695, %v433_v4 }
 0x173   : > { %v422_v6 = vpop.xlane.xlu1 %421  ;;  %v425_v7 = vpop.xlane.xlu0 %424 }
 0x174   : > { %831 = vpow2.f32 %v445_v5  ;;  %v434_v8 = vsub.f32 %v401_v50, %v422_v6  ;;  %v435_v9 = vsub.f32 %v402_v49, %v425_v7 }
 0x176   : > { %v447_v10 = vmul.f32 1.442695, %v434_v8  ;;  %v449_v11 = vmul.f32 1.442695, %v435_v9 }
 0x177   : > { %v428_v12 = vpop.xlane.xlu1 %427 }
 0x178   : > { %833 = vpow2.f32 %v447_v10  ;;  %v436_v13 = vsub.f32 %v403_v53, %v428_v12 }
 0x179   : > { %v824_v14 = vpop.eup %823  ;;  %835 = vpow2.f32 %v449_v11 }
 0x17a   : > { %v451_v15 = vmul.f32 1.442695, %v436_v13  ;;  %v453_v16 = vsel %vm404_vm1, %v824_v14, 0.0  ;;  %v826_v17 = vpop.eup %825 }
 0x17b   : > { %454 = vadd.xlane.f32.xlu0 %v453_v16  ;;  %v459_v19 = vsel %vm404_vm1, %v826_v17, 0.0 }
 0x17c   : > { %837 = vpow2.f32 %v451_v15 }
 0x17d   : > { %v828_v18 = vpop.eup %827 }
 0x17e   : > { %v456_v20 = vsel %vm404_vm1, %v828_v18, 0.0  ;;  %v830_v21 = vpop.eup %829 }
 0x17f   : > { %460 = vadd.xlane.f32.xlu0 %v459_v19  ;;  %457 = vadd.xlane.f32.xlu1 %v456_v20  ;;  %v462_v23 = vsel %vm404_vm1, %v830_v21, 0.0 }
 0x181   : > { %v832_v22 = vpop.eup %831 }
 0x182   : > { %v465_v24 = vsel %vm404_vm1, %v832_v22, 0.0 }
 0x183   : > { %463 = vadd.xlane.f32.xlu1 %v462_v23  ;;  %466 = vadd.xlane.f32.xlu0 %v465_v24 }
 0x185   : > { %v834_v25 = vpop.eup %833 }
 0x186   : > { %v836_v26 = vpop.eup %835  ;;  %v468_v27 = vsel %vm404_vm1, %v834_v25, 0.0 }
 0x187   : > { %469 = vadd.xlane.f32.xlu1 %v468_v27  ;;  %v471_v28 = vsel %vm404_vm1, %v836_v26, 0.0 }
 0x188   : > { %472 = vadd.xlane.f32.xlu0 %v471_v28 }
 0x189   : > { %v838_v29 = vpop.eup %837 }
 0x18a   : > { %v474_v30 = vsel %vm404_vm1, %v838_v29, 0.0 }
 0x18b   : > { %475 = vadd.xlane.f32.xlu1 %v474_v30 }
 0x204   : > { %v455_v35 = vpop.xlane.xlu0 %454 }
 0x205   : > { %839 = vrcp.f32 %v455_v35 }
 0x208   : > { %v458_v36 = vpop.xlane.xlu1 %457  ;;  %v461_v37 = vpop.xlane.xlu0 %460 }
 0x209   : > { %841 = vrcp.f32 %v458_v36 }
 0x20a   : > { %843 = vrcp.f32 %v461_v37 }
 0x20c   : > { %v464_v38 = vpop.xlane.xlu1 %463  ;;  %v467_v39 = vpop.xlane.xlu0 %466 }
 0x20d   : > { %845 = vrcp.f32 %v464_v38 }
 0x20e   : > { %847 = vrcp.f32 %v467_v39 }
 0x210   : > { %v470_v40 = vpop.xlane.xlu1 %469 }
 0x211   : > { %849 = vrcp.f32 %v470_v40  ;;  %v473_v41 = vpop.xlane.xlu0 %472 }
 0x212   : > { %851 = vrcp.f32 %v473_v41  ;;  %v840_v42 = vpop.eup %839 }
 0x213   : > { %v485_v45 = vmul.f32 %v840_v42, %v824_v14 }
 0x214   : > { %v476_v43 = vpop.xlane.xlu1 %475 }
 0x215   : > { %853 = vrcp.f32 %v476_v43 }
 0x216   : > { %v842_v44 = vpop.eup %841 }
 0x217   : > { %v486_v46 = vmul.f32 %v842_v44, %v828_v18  ;;  %v844_v47 = vpop.eup %843 }
 0x218   : > { %v487_v50 = vmul.f32 %v844_v47, %v826_v17 }
 0x219   : > { %v493_v48 = vpack.c.bf16 %v486_v46, %v485_v45 }
 0x21a   : > { %v846_v49 = vpop.eup %845 }
 0x21b   : > { %797 = vmatprep.mubr.msk.bf16.mxu1 %vm404_vm1, %v493_v48  ;;  %v488_v51 = vmul.f32 %v846_v49, %v830_v21  ;;  %v848_v52 = vpop.eup %847 }
 0x21c   : > { %v489_v55 = vmul.f32 %v848_v52, %v832_v22 }
 0x21d   : > { %v494_v53 = vpack.c.bf16 %v488_v51, %v487_v50 }
 0x21e   : > { %v850_v54 = vpop.eup %849 }
 0x21f   : > { %798 = vmatmul.mubr.msk.bf16.vlgmr.msra.gmra.mxu1 %vm404_vm1, %v494_v53  ;;  %v490_v56 = vmul.f32 %v850_v54, %v834_v25  ;;  %v852_v57 = vpop.eup %851 }
 0x220   : > { %v491_v60 = vmul.f32 %v852_v57, %v836_v26 }
 0x221   : > { %v495_v58 = vpack.c.bf16 %v490_v56, %v489_v55 }
 0x222   : > { %v854_v59 = vpop.eup %853 }
 0x223   : > { %801 = vmatprep.mubr.msk.bf16.mxu1 %vm404_vm1, %v495_v58  ;;  %v492_v61 = vmul.f32 %v854_v59, %v838_v29 }
 0x225   : > { %v496_v62 = vpack.c.bf16 %v492_v61, %v491_v60 }
 0x227   : > { %802 = vmatmul.mubr.msk.bf16.gmra.mxu1 %vm404_vm1, %v496_v62 }
 0x2df   : > { %v799_v63 = vpop.f32.mrf.mxu1 }
 0x2e0   : > { %v757_v0 = vpack.c.bf16 %v799_v63, %v799_v63 }
 0x2e1   : > { %v575_v1 = vpop.f32.mrf.mxu1 }
 0x2e2   : > { %641 = vst.msk [vmem:[%s248_s21 + $0x8] sm:$0xf] %vm638_vm2, %v757_v0  ;;  %v755_v2 = vpack.c.bf16 %v575_v1, %v575_v1 }
 0x2e3   : > { %v800_v3 = vpop.f32.mrf.mxu1 }
 0x2e4   : > { %639 = vst.msk [vmem:[%s248_s21] sm:$0xf] %vm638_vm2, %v755_v2  ;;  %v758_v4 = vpack.c.bf16 %v800_v3, %v800_v3 }
 0x2e5   : > { %v578_v5 = vpop.f32.mrf.mxu1 }
 0x2e6   : > { %642 = vst.msk [vmem:[%s248_s21 + $0xc] sm:$0xf] %vm638_vm2, %v758_v4  ;;  %v756_v6 = vpack.c.bf16 %v578_v5, %v578_v5 }
 0x2e7   : > { %v803_v7 = vpop.f32.mrf.mxu1 }
 0x2e8   : > { %640 = vst.msk [vmem:[%s248_s21 + $0x4] sm:$0xf] %vm638_vm2, %v756_v6  ;;  %v761_v8 = vpack.c.bf16 %v803_v7, %v803_v7 }
 0x2e9   : > { %v591_v9 = vpop.f32.mrf.mxu1 }
 0x2ea   : > { %645 = vst.msk [vmem:[%s248_s21 + $0x18] sm:$0xf] %vm638_vm2, %v761_v8  ;;  %v759_v10 = vpack.c.bf16 %v591_v9, %v591_v9 }
 0x2eb   : > { %v804_v11 = vpop.f32.mrf.mxu1 }
 0x2ec   : > { %643 = vst.msk [vmem:[%s248_s21 + $0x10] sm:$0xf] %vm638_vm2, %v759_v10  ;;  %v762_v12 = vpack.c.bf16 %v804_v11, %v804_v11 }
 0x2ed   : > { %v594_v13 = vpop.f32.mrf.mxu1 }
 0x2ee   : > { %646 = vst.msk [vmem:[%s248_s21 + $0x1c] sm:$0xf] %vm638_vm2, %v762_v12  ;;  %v760_v14 = vpack.c.bf16 %v594_v13, %v594_v13 }
 0x2f0   : > { %644 = vst.msk [vmem:[%s248_s21 + $0x14] sm:$0xf] %vm638_vm2, %v760_v14 }
 0x2f1 PF: > { %s15_s18 = sadd.s32 1, %s861_s18  }
 0x2f2   : > { %p12_p4 = scmp.ge.s32.totalorder %s15_s18, 4  }
 0x2f4   :  { %14 = sbr.rel (!%p12_p4) target bundleno = 1 (0x1), region = 73 }

// kernel: _lambda_.8
= control target key start
LH: loop header
LB: loop body
LE: loop exit
PB: predicated region body
PF: predicated region fallthrough
CT: control target
= control target key end

     0   :  { %s2761_s12 = smov 0   ;;  %s3374_s0 = inlined_call_operand.vmem [shape: bf16[2,10,10,32], index: 0, kind: input, shape index: {}]   ;;  %s3375_s1 = inlined_call_operand.vmem [shape: bf16[4,4,32,32], index: 1, kind: input, shape index: {}]   ;;  %s3376_s2 = inlined_call_operand.vmem [shape: f32[1,32], index: 2, kind: input, shape index: {}]   ;;  %s3377_s3 = inlined_call_operand.vmem [shape: bf16[2,8,8,128], index: 3, kind: output, shape index: {}]  }
   0x1 LB: > { %s2161_s13 = sadd.s32 4294967295, %s2736_s12   ;;  %p2165_p0 = scmp.ge.s32.totalorder %s2736_s12, 1  ;;  %s2736_s12 = sphi %s2761_s12, %s13_s12  }
   0x2   : > { %p137_p1 = scmp.lt.s32.totalorder %s2736_s12, 3 }
   0x4   : > { %p138_p2 = pnand %p2165_p0, %p137_p1 }
   0x5   : > { %p161_p3 = scmp.lt.s32.totalorder (!%p138_p2), %s2161_s13, 1  ;;  %s2738_s7 = smov (!%p138_p2), 32  }
   0x6   : > { %141 = sbr.rel (%p138_p2) target bundleno = 485 (0x1e5), region = 32  ;;  %s2739_s8 = smov (!%p138_p2), 64  }
   0x7   : > { %s2740_s9 = smov (!%p138_p2), 96  }
   0xb   : > { %v2689_v0 = vld [vmem:[%s3375_s1 + $0x8] sm:$0xff]   ;;  %v2690_v1 = vld [vmem:[%s3375_s1 + $0x18] sm:$0xff]   ;;  %v2691_v2 = vld [vmem:[%s3375_s1] sm:$0xff]   ;;  %s3383_s13 = smov (!%p161_p3, %s2161_s13), 1  ;;  %vm396_vm0 = vcmask 261120   ;;  %vm832_vm4 = vcmask 1042432  }
   0xc   : > { %2437 = vmatprep.subr.bf16.mxu1 %v2689_v0  ;;  %2425 = vmatprep.subr.bf16.mxu0 %v2690_v1  ;;  %v2692_v3 = vld [vmem:[%s3375_s1 + $0x10] sm:$0xff]   ;;  %s2617_s22 = smul.u32 80, %s3383_s13  ;;  %v2792_v4 = vld [vmem:[%s3375_s1 + $0x28] sm:$0xff]   ;;  %v2696_v12 = vld [vmem:[%s3375_s1 + $0x38] sm:$0xff]   ;;  %vm257_vm1 = vsmask.f32 3328 }
   0xd   : > { %2438 = vmatpush3.bf16.msra.mxu1 %v2689_v0  ;;  %2426 = vmatpush3.bf16.msra.mxu0 %v2690_v1  ;;  %vm258_vm2 = vsmask.f32 7440  ;;  %v2700_v48 = vld [vmem:[%s3375_s1 + $0x30] sm:$0xff]   ;;  %vm833_vm5 = vcmask 1046532   ;;  %vm2072_vm7 = vcmask 523264   ;;  %vm2081_vm8 = vcmask 785408  }
   0xe   : > { %2439 = vmatprep.subr.bf16.mxu1 %v2691_v2  ;;  %2427 = vmatprep.subr.bf16.mxu0 %v2692_v3  ;;  %s2787_s25 = scalar_lea.vmem %s3374_s0, %s2617_s22  ;;  %vm2845_vm3 = vmor %vm257_vm1, %vm258_vm2  ;;  %s2305_s10 = sshll.u32 %s3383_s13, 5 }
   0xf   : > { %v2795_v5 = vld [vmem:[%s2787_s25] sm:$0xf]  ;;  %v2798_v6 = vld [vmem:[%s2787_s25 + $0x8] sm:$0xf]  ;;  %v2801_v7 = vld [vmem:[%s2787_s25 + $0x10] sm:$0xf]  ;;  %s3346_s13 = scalar_lea.vmem %s3377_s3, %s2305_s10 }
  0x10   : > { %v261_v8 = vshrl.u32 %v2795_v5, 16  ;;  %v264_v9 = vshll.u32 %v2795_v5, 16  ;;  %v2179_v10 = vcombine.low %v2795_v5, %v2798_v6  ;;  %v2808_v11 = vld [vmem:[%s2787_s25 + $0x18] sm:$0xf]  ;;  %v2818_v14 = vld [vmem:[%s2787_s25 + $0x4] sm:$0x1]  ;;  %vm3013_vm6 = vmor %vm832_vm4, %vm833_vm5 }
  0x11   : > { %2440 = vmatpush3.bf16.msra.mxu1 %v2691_v2  ;;  %2428 = vmatpush3.bf16.msra.mxu0 %v2692_v3  ;;  %v2815_v13 = vcombine.low %v2801_v7, %v2808_v11  ;;  %v2821_v15 = vld [vmem:[%s2787_s25 + $0xc] sm:$0x1]  ;;  %v2826_v16 = vld [vmem:[%s2787_s25 + $0x14] sm:$0x1]  ;;  %v2831_v17 = vld [vmem:[%s2787_s25 + $0x1c] sm:$0x1] }
  0x12   : > { %2449 = vmatprep.subr.bf16.mxu0 %v2792_v4  ;;  %2441 = vmatprep.mubr.msk.bf16.mxu1 %vm396_vm0, %v2179_v10  ;;  %v263_v18 = vrot.slane %v261_v8, 4  ;;  %v266_v19 = vrot.slane %v264_v9, 5  ;;  %v270_v20 = vshll.u32 %v2818_v14, 16  ;;  %v275_v21 = vshrl.u32 %v2798_v6, 16  ;;  %v2840_v26 = vld [vmem:[%s2787_s25 + $0x20] sm:$0xf] }
  0x13   : > { %2461 = vmatprep.subr.bf16.mxu1 %v2696_v12  ;;  %v278_v22 = vshll.u32 %v2798_v6, 16  ;;  %v284_v23 = vshll.u32 %v2821_v15, 16  ;;  %v289_v24 = vshrl.u32 %v2801_v7, 16  ;;  %v292_v25 = vshll.u32 %v2801_v7, 16  ;;  %v2852_v40 = vld [vmem:[%s2787_s25 + $0x24] sm:$0x1] }
  0x14   : > { %2442 = vmatmul.mubr.msk.bf16.vlgmr.msra.gmra.mxu1 %vm396_vm0, %v2815_v13  ;;  %v267_v27 = vor.u32 %v266_v19, %v263_v18  ;;  %v272_v28 = vrot.slane %v270_v20, 5  ;;  %v277_v29 = vrot.slane %v275_v21, 4  ;;  %v298_v30 = vshll.u32 %v2826_v16, 16  ;;  %v2864_v57 = vld [vmem:[%s2787_s25 + $0x28] sm:$0xf]  ;;  %v2699_v9 = vld [vmem:[%s3375_s1 + $0x20] sm:$0xff]  }
  0x15   : > { %2462 = vmatpush3.bf16.msra.mxu1 %v2696_v12  ;;  %v280_v31 = vrot.slane %v278_v22, 5  ;;  %v286_v32 = vrot.slane %v284_v23, 5  ;;  %v291_v33 = vrot.slane %v289_v24, 4  ;;  %v294_v34 = vrot.slane %v292_v25, 5  ;;  %v2869_v59 = vld [vmem:[%s2787_s25 + $0x30] sm:$0xf] }
  0x16   : > { %v268_v36 = vrot.slane %v267_v27, 4  ;;  %v300_v37 = vrot.slane %v298_v30, 5  ;;  %v303_v38 = vshrl.u32 %v2808_v11, 16  ;;  %v306_v39 = vshll.u32 %v2808_v11, 16  ;;  %2463 = vmatprep.subr.bf16.mxu1 %v2700_v48  ;;  %v2872_v60 = vld [vmem:[%s2787_s25 + $0x38] sm:$0xf] }
  0x17   : > { %v281_v41 = vor.u32 %v280_v31, %v277_v29  ;;  %v295_v42 = vor.u32 %v294_v34, %v291_v33  ;;  %v312_v43 = vshll.u32 %v2831_v17, 16  ;;  %v317_v44 = vshrl.u32 %v2840_v26, 16  ;;  %v2875_v61 = vld [vmem:[%s2787_s25 + $0x2c] sm:$0x1]  ;;  %v2903_v21 = vld [vmem:[%s2787_s25 + $0x34] sm:$0x1] }
  0x18   : > { %v305_v45 = vrot.slane %v303_v38, 4  ;;  %v308_v46 = vrot.slane %v306_v39, 5  ;;  %v320_v47 = vshll.u32 %v2840_v26, 16  ;;  %v273_v49 = vsel %vm2845_vm3, %v268_v36, %v272_v28  ;;  %v2704_v10 = vld [vmem:[%s3375_s1 + $0x48] sm:$0xff]   ;;  %v2906_v22 = vld [vmem:[%s2787_s25 + $0x3c] sm:$0x1] }
  0x19   : > { %v282_v50 = vrot.slane %v281_v41, 4  ;;  %v296_v51 = vrot.slane %v295_v42, 4  ;;  %v319_v52 = vrot.slane %v317_v44, 4  ;;  %v314_v54 = vrot.slane %v312_v43, 5  ;;  %2464 = vmatpush3.bf16.msra.mxu1 %v2700_v48  ;;  %v2918_v29 = vld [vmem:[%s2787_s25 + $0x40] sm:$0xf] }
  0x1a   : > { %v309_v53 = vor.u32 %v308_v46, %v305_v45  ;;  %v322_v55 = vrot.slane %v320_v47, 5  ;;  %v326_v56 = vshll.u32 %v2852_v40, 16  ;;  %v2885_v8 = vcombine.low %v2840_v26, %v2864_v57  ;;  %2485 = vmatprep.subr.bf16.mxu1 %v2704_v10  ;;  %v2928_v33 = vld [vmem:[%s3375_s1 + $0x58] sm:$0xff]   ;;  %v2931_v34 = vld [vmem:[%s2787_s25 + $0x44] sm:$0x1] }
  0x1b   : > { %v287_v58 = vsel %vm2845_vm3, %v282_v50, %v286_v32  ;;  %v301_v62 = vsel %vm2845_vm3, %v296_v51, %v300_v37  ;;  %v2899_v19 = vcombine.low %v2869_v59, %v2872_v60  ;;  %v331_v20 = vshrl.u32 %v2864_v57, 16 }
  0x1c   : > { %v310_v63 = vrot.slane %v309_v53, 4  ;;  %v323_v0 = vor.u32 %v322_v55, %v319_v52  ;;  %v2879_v1 = vcombine.low %v273_v49, %v287_v58  ;;  %v328_v2 = vrot.slane %v326_v56, 5  ;;  %2445 = vmatprep.mubr.msk.bf16.mxu1 %vm396_vm0, %v2885_v8  ;;  %v2708_v56 = vld [vmem:[%s3375_s1 + $0x40] sm:$0xff]  }
  0x1d   : > { %v2881_v3 = vcombine.low %v287_v58, %v301_v62  ;;  %v334_v24 = vshll.u32 %v2864_v57, 16  ;;  %v340_v25 = vshll.u32 %v2875_v61, 16  ;;  %2446 = vmatmul.mubr.msk.bf16.gmra.mxu1 %vm396_vm0, %v2899_v19  ;;  %v333_v27 = vrot.slane %v331_v20, 4 }
  0x1e   : > { %v315_v12 = vsel %vm2845_vm3, %v310_v63, %v314_v54  ;;  %v324_v18 = vrot.slane %v323_v0, 4  ;;  %2429 = vmatprep.mubr.msk.bf16.mxu0 %vm396_vm0, %v2879_v1  ;;  %v345_v28 = vshrl.u32 %v2869_v59, 16  ;;  %v348_v32 = vshll.u32 %v2869_v59, 16 }
  0x1f   : > { %v2908_v23 = vcombine.low %v301_v62, %v315_v12  ;;  %v336_v30 = vrot.slane %v334_v24, 5  ;;  %v342_v31 = vrot.slane %v340_v25, 5  ;;  %2465 = vmatprep.mubr.msk.bf16.mxu1 %vm396_vm0, %v2881_v3  ;;  %v354_v37 = vshll.u32 %v2903_v21, 16 }
  0x20   : > { %v347_v36 = vrot.slane %v345_v28, 4  ;;  %v359_v38 = vshrl.u32 %v2872_v60, 16  ;;  %v362_v39 = vshll.u32 %v2872_v60, 16  ;;  %v329_v41 = vsel %vm2845_vm3, %v324_v18, %v328_v2 }
  0x21   : > { %2430 = vmatmul.mubr.msk.bf16.vlgmr.msra.gmra.mxu0 %vm396_vm0, %v2908_v23  ;;  %v337_v42 = vor.u32 %v336_v30, %v333_v27  ;;  %v350_v43 = vrot.slane %v348_v32, 5  ;;  %v368_v44 = vshll.u32 %v2906_v22, 16  ;;  %v2940_v45 = vcombine.low %v315_v12, %v329_v41  ;;  %v2710_v27 = vld [vmem:[%s3375_s1 + $0x78] sm:$0xff]  }
  0x22   : > { %2450 = vmatpush3.bf16.msra.mxu0 %v2792_v4  ;;  %v361_v46 = vrot.slane %v359_v38, 4  ;;  %v364_v47 = vrot.slane %v362_v39, 5  ;;  %v687_v4 = vshrl.u32 %v2918_v29, 16  ;;  %v356_v50 = vrot.slane %v354_v37, 5 }
  0x23   : > { %2451 = vmatprep.subr.bf16.mxu0 %v2699_v9  ;;  %v338_v48 = vrot.slane %v337_v42, 4  ;;  %v351_v49 = vor.u32 %v350_v43, %v347_v36  ;;  %v690_v51 = vshll.u32 %v2918_v29, 16  ;;  %v370_v53 = vrot.slane %v368_v44, 5  ;;  %v2706_v42 = vld [vmem:[%s3375_s1 + $0x50] sm:$0xff]   ;;  %v3008_v43 = vld [vmem:[%s2787_s25 + $0x48] sm:$0xf] }
  0x24   : > { %v365_v52 = vor.u32 %v364_v47, %v361_v46  ;;  %v689_v54 = vrot.slane %v687_v4, 4  ;;  %v696_v55 = vshll.u32 %v2931_v34, 16  ;;  %v2963_v24 = vcombine.low %v2798_v6, %v2801_v7 }
  0x25   : > { %v343_v58 = vsel %vm2845_vm3, %v338_v48, %v342_v31  ;;  %v352_v62 = vrot.slane %v351_v49, 4  ;;  %v692_v63 = vrot.slane %v690_v51, 5  ;;  %2466 = vmatmul.mubr.msk.bf16.vlgmr.msra.gmra.mxu1 %vm396_vm0, %v2940_v45  ;;  %v2210_v32 = vrot.slane %v2795_v5, 9 }
  0x26   : > { %2452 = vmatpush3.bf16.msra.mxu0 %v2699_v9  ;;  %v2951_v0 = vcombine.low %v329_v41, %v343_v58  ;;  %v366_v2 = vrot.slane %v365_v52, 4  ;;  %2486 = vmatpush3.bf16.msra.mxu1 %v2704_v10  ;;  %v698_v18 = vrot.slane %v696_v55, 5  ;;  %v2212_v36 = vrot.slane %v2801_v7, 9 }
  0x27   : > { %2473 = vmatprep.subr.bf16.mxu0 %v2928_v33  ;;  %v357_v9 = vsel %vm2845_vm3, %v352_v62, %v356_v50  ;;  %v693_v12 = vor.u32 %v692_v63, %v689_v54  ;;  %2487 = vmatprep.subr.bf16.mxu1 %v2708_v56  ;;  %v2213_v37 = vrot.slane %v2808_v11, 9  ;;  %v837_v38 = vrot.slane %v2818_v14, 5  ;;  %v2714_v63 = vld [vmem:[%s3375_s1 + $0x88] sm:$0xff]  }
  0x28   : > { %2433 = vmatprep.mubr.msk.bf16.mxu0 %vm396_vm0, %v2951_v0  ;;  %v371_v20 = vsel %vm2845_vm3, %v366_v2, %v370_v53  ;;  %v2965_v25 = vcombine.low %v343_v58, %v357_v9  ;;  %v2993_v39 = vcombine.low %v2808_v11, %v2840_v26  ;;  %v841_v41 = vrot.slane %v2821_v15, 5  ;;  %v191_v11 = vld [vmem:[%s2787_s25 + $0x4c] sm:$0x1]  ;;  %v2712_v15 = vld [vmem:[%s3375_s1 + $0x70] sm:$0xff]  }
  0x29   : > { %v2970_v10 = vcombine.low %v357_v9, %v371_v20  ;;  %v694_v28 = vrot.slane %v693_v12, 4  ;;  %v845_v5 = vrot.slane %v2826_v16, 5  ;;  %v3001_v7 = vcombine.low %v2864_v57, %v2869_v59 }
  0x2a   : > { %2469 = vmatprep.mubr.msk.bf16.mxu1 %vm396_vm0, %v2965_v25  ;;  %2488 = vmatpush3.bf16.msra.mxu1 %v2708_v56  ;;  %v2211_v14 = vrot.slane %v2798_v6, 9  ;;  %v1499_v16 = vshrl.u32 %v3008_v43, 16  ;;  %v1502_v44 = vshll.u32 %v3008_v43, 16  ;;  %v1508_v46 = vshll.u32 %v191_v11, 16 }
  0x2b   : > { %2434 = vmatmul.mubr.msk.bf16.gmra.mxu0 %vm396_vm0, %v2970_v10  ;;  %v2978_v30 = vsel %vm2845_vm3, %v694_v28, %v698_v18  ;;  %2509 = vmatprep.subr.bf16.mxu1 %v2710_v27  ;;  %v2263_v6 = vcombine.low %v2918_v29, %v3008_v43  ;;  %v2240_v47 = vrot.slane %v2918_v29, 9  ;;  %v1133_v4 = vrot.slane %v2931_v34, 5 }
  0x2c   : > { %2453 = vmatprep.mubr.msk.bf16.mxu0 %vm396_vm0, %v2963_v24  ;;  %v2983_v31 = vcombine.low %v371_v20, %v2978_v30  ;;  %v1501_v48 = vrot.slane %v1499_v16, 4  ;;  %v1504_v49 = vrot.slane %v1502_v44, 5  ;;  %v838_v50 = vsel %vm3013_vm6, %v2210_v32, %v837_v38  ;;  %v2715_v44 = vld [vmem:[%s3375_s1 + $0x90] sm:$0xff]  }
  0x2d   : > { %v842_v51 = vsel %vm3013_vm6, %v2211_v14, %v841_v41  ;;  %v2295_v52 = vrot.slane %v3008_v43, 9  ;;  %v1510_v34 = vrot.slane %v1508_v46, 5  ;;  %v1860_v54 = vrot.slane %v191_v11, 5  ;;  %v2713_v11 = vld [vmem:[%s3375_s1 + $0x98] sm:$0xff]   ;;  %v2720_v46 = vld [vmem:[%s3375_s1 + $0xb0] sm:$0xff]  }
  0x2e   : > { %2470 = vmatmul.mubr.msk.bf16.gmra.mxu1 %vm396_vm0, %v2983_v31  ;;  %v1505_v53 = vor.u32 %v1504_v49, %v1501_v48  ;;  %v849_v55 = vrot.slane %v2831_v17, 5  ;;  %v3044_v56 = vcombine.low %v2872_v60, %v2918_v29  ;;  %v2214_v58 = vrot.slane %v2840_v26, 9  ;;  %v2727_v48 = vld [vmem:[%s3375_s1 + $0xf8] sm:$0xff]   ;;  %v2723_v49 = vld [vmem:[%s3375_s1 + $0xd0] sm:$0xff]  }
  0x2f   : > { %2489 = vmatprep.mubr.msk.bf16.mxu1 %vm396_vm0, %v2879_v1  ;;  %v2218_v62 = vcombine.low %v838_v50, %v842_v51  ;;  %v3054_v17 = vsel %vm3013_vm6, %v2240_v47, %v1133_v4  ;;  %v3058_v9 = vsel %vm3013_vm6, %v2295_v52, %v1860_v54  ;;  %v853_v12 = vrot.slane %v2852_v40, 5  ;;  %v2718_v1 = vld [vmem:[%s3375_s1 + $0xb8] sm:$0xff]   ;;  %v2722_v47 = vld [vmem:[%s3375_s1 + $0xc8] sm:$0xff]  }
  0x30   : > { %v1506_v2 = vrot.slane %v1505_v53, 4  ;;  %v2215_v26 = vrot.slane %v2864_v57, 9  ;;  %v857_v18 = vrot.slane %v2875_v61, 5  ;;  %v2296_v20 = vcombine.low %v3054_v17, %v3058_v9  ;;  %v2721_v4 = vld [vmem:[%s3375_s1 + $0xd8] sm:$0xff]  }
  0x31   : > { %v850_v57 = vsel %vm3013_vm6, %v2213_v37, %v849_v55  ;;  %v854_v61 = vsel %vm3013_vm6, %v2214_v58, %v853_v12  ;;  %v2217_v41 = vrot.slane %v2872_v60, 9 }
  0x32   : > { %v1511_v28 = vsel %vm2845_vm3, %v1506_v2, %v1510_v34  ;;  %v858_v35 = vsel %vm3013_vm6, %v2215_v26, %v857_v18  ;;  %v3098_v14 = vcombine.low %v850_v57, %v854_v61 }
  0x33   : > { %2454 = vmatmul.mubr.msk.bf16.vlgmr.msra.gmra.mxu0 %vm396_vm0, %v2993_v39  ;;  %v3074_v40 = vcombine.low %v2978_v30, %v1511_v28  ;;  %v861_v30 = vrot.slane %v2903_v21, 5  ;;  %v3091_v37 = vcombine.low %v854_v61, %v858_v35 }
  0x34   : > { %2474 = vmatpush3.bf16.msra.mxu0 %v2928_v33  ;;  %2457 = vmatprep.mubr.msk.bf16.mxu0 %vm396_vm0, %v3001_v7  ;;  %v2709_v33 = vld [vmem:[%s3375_s1 + $0x68] sm:$0xff]  }
  0x35   : > { %2475 = vmatprep.subr.bf16.mxu0 %v2706_v42 }
  0x36   : > { %2490 = vmatmul.mubr.msk.bf16.vlgmr.msra.gmra.mxu1 %vm396_vm0, %v2908_v23 }
  0x37   : > { %2510 = vmatpush3.bf16.msra.mxu1 %v2710_v27  ;;  %2493 = vmatprep.mubr.msk.bf16.mxu1 %vm396_vm0, %v2951_v0  ;;  %v846_v27 = vsel %vm3013_vm6, %v2212_v36, %v845_v5  ;;  %v2216_v36 = vrot.slane %v2869_v59, 9  ;;  %v865_v5 = vrot.slane %v2906_v22, 5  ;;  %v2716_v22 = vld [vmem:[%s3375_s1 + $0x80] sm:$0xff]  }
  0x38   : > { %2476 = vmatpush3.bf16.msra.mxu0 %v2706_v42  ;;  %2511 = vmatprep.subr.bf16.mxu1 %v2712_v15  ;;  %v3071_v32 = vcombine.low %v842_v51, %v846_v27  ;;  %v3087_v38 = vcombine.low %v846_v27, %v850_v57  ;;  %v2711_v42 = vld [vmem:[%s3375_s1 + $0x60] sm:$0xff]  }
  0x39   : > { %2497 = vmatprep.subr.bf16.mxu0 %v2709_v33  ;;  %v862_v59 = vsel %vm3013_vm6, %v2216_v36, %v861_v30  ;;  %v866_v60 = vsel %vm3013_vm6, %v2217_v41, %v865_v5 }
  0x3a   : > { %v3104_v21 = vcombine.low %v858_v35, %v862_v59  ;;  %v3126_v16 = vcombine.low %v866_v60, %v3054_v17 }
  0x3b   : > { %2458 = vmatmul.mubr.msk.bf16.gmra.mxu0 %vm396_vm0, %v3044_v56  ;;  %2512 = vmatpush3.bf16.msra.mxu1 %v2712_v15  ;;  %v3118_v15 = vcombine.low %v862_v59, %v866_v60 }
  0x3c   : > { %2477 = vmatprep.mubr.msk.bf16.mxu0 %vm396_vm0, %v2218_v62  ;;  %2533 = vmatprep.subr.bf16.mxu1 %v2714_v63 }
  0x3e   : > { %2494 = vmatmul.mubr.msk.bf16.gmra.mxu1 %vm396_vm0, %v2970_v10 }
  0x3f   : > { %2513 = vmatprep.mubr.msk.bf16.mxu1 %vm396_vm0, %v3071_v32 }
  0x43   : > { %2478 = vmatmul.mubr.msk.bf16.vlgmr.msra.gmra.mxu0 %vm396_vm0, %v3087_v38 }
  0x44   : > { %2498 = vmatpush3.bf16.msra.mxu0 %v2709_v33  ;;  %2481 = vmatprep.mubr.msk.bf16.mxu0 %vm396_vm0, %v3091_v37 }
  0x45   : > { %2499 = vmatprep.subr.bf16.mxu0 %v2711_v42 }
  0x46   : > { %2514 = vmatmul.mubr.msk.bf16.vlgmr.msra.gmra.mxu1 %vm396_vm0, %v3098_v14 }
  0x47   : > { %2534 = vmatpush3.bf16.msra.mxu1 %v2714_v63  ;;  %2517 = vmatprep.mubr.msk.bf16.mxu1 %vm396_vm0, %v3104_v21 }
  0x48   : > { %2500 = vmatpush3.bf16.msra.mxu0 %v2711_v42  ;;  %2535 = vmatprep.subr.bf16.mxu1 %v2716_v22 }
  0x49   : > { %2521 = vmatprep.subr.bf16.mxu0 %v2713_v11 }
  0x4b   : > { %2482 = vmatmul.mubr.msk.bf16.gmra.mxu0 %vm396_vm0, %v3118_v15  ;;  %2536 = vmatpush3.bf16.msra.mxu1 %v2716_v22 }
  0x4c   : > { %2501 = vmatprep.mubr.msk.bf16.mxu0 %vm396_vm0, %v2881_v3  ;;  %2557 = vmatprep.subr.bf16.mxu1 %v2718_v1 }
  0x4e   : > { %2518 = vmatmul.mubr.msk.bf16.gmra.mxu1 %vm396_vm0, %v3126_v16 }
  0x4f   : > { %2537 = vmatprep.mubr.msk.bf16.mxu1 %vm396_vm0, %v2963_v24  ;;  %v2717_v24 = vld [vmem:[%s3375_s1 + $0xa8] sm:$0xff]  }
  0x53   : > { %2502 = vmatmul.mubr.msk.bf16.vlgmr.msra.gmra.mxu0 %vm396_vm0, %v2940_v45 }
  0x54   : > { %2522 = vmatpush3.bf16.msra.mxu0 %v2713_v11  ;;  %2505 = vmatprep.mubr.msk.bf16.mxu0 %vm396_vm0, %v2965_v25 }
  0x55   : > { %2523 = vmatprep.subr.bf16.mxu0 %v2715_v44 }
  0x56   : > { %2538 = vmatmul.mubr.msk.bf16.vlgmr.msra.gmra.mxu1 %vm396_vm0, %v2993_v39  ;;  %v2719_v39 = vld [vmem:[%s3375_s1 + $0xa0] sm:$0xff]  }
  0x57   : > { %2558 = vmatpush3.bf16.msra.mxu1 %v2718_v1  ;;  %2541 = vmatprep.mubr.msk.bf16.mxu1 %vm396_vm0, %v3001_v7  ;;  %v2725_v7 = vld [vmem:[%s3375_s1 + $0xc0] sm:$0xff]  }
  0x58   : > { %2524 = vmatpush3.bf16.msra.mxu0 %v2715_v44  ;;  %2559 = vmatprep.subr.bf16.mxu1 %v2720_v46 }
  0x59   : > { %2545 = vmatprep.subr.bf16.mxu0 %v2717_v24 }
  0x5b   : > { %2506 = vmatmul.mubr.msk.bf16.gmra.mxu0 %vm396_vm0, %v2983_v31  ;;  %2560 = vmatpush3.bf16.msra.mxu1 %v2720_v46 }
  0x5c   : > { %2525 = vmatprep.mubr.msk.bf16.mxu0 %vm396_vm0, %v2881_v3  ;;  %2581 = vmatprep.subr.bf16.mxu1 %v2722_v47 }
  0x5e   : > { %2542 = vmatmul.mubr.msk.bf16.gmra.mxu1 %vm396_vm0, %v3044_v56 }
  0x5f   : > { %2561 = vmatprep.mubr.msk.bf16.mxu1 %vm396_vm0, %v2908_v23 }
  0x63   : > { %2526 = vmatmul.mubr.msk.bf16.vlgmr.msra.gmra.mxu0 %vm396_vm0, %v2940_v45 }
  0x64   : > { %2546 = vmatpush3.bf16.msra.mxu0 %v2717_v24  ;;  %2529 = vmatprep.mubr.msk.bf16.mxu0 %vm396_vm0, %v2965_v25 }
  0x65   : > { %2547 = vmatprep.subr.bf16.mxu0 %v2719_v39 }
  0x66   : > { %2562 = vmatmul.mubr.msk.bf16.vlgmr.msra.gmra.mxu1 %vm396_vm0, %v2951_v0 }
  0x67   : > { %2582 = vmatpush3.bf16.msra.mxu1 %v2722_v47  ;;  %2565 = vmatprep.mubr.msk.bf16.mxu1 %vm396_vm0, %v2970_v10 }
  0x68   : > { %2548 = vmatpush3.bf16.msra.mxu0 %v2719_v39  ;;  %2583 = vmatprep.subr.bf16.mxu1 %v2725_v7 }
  0x69   : > { %2569 = vmatprep.subr.bf16.mxu0 %v2721_v4 }
  0x6b   : > { %2530 = vmatmul.mubr.msk.bf16.gmra.mxu0 %vm396_vm0, %v2983_v31  ;;  %2584 = vmatpush3.bf16.msra.mxu1 %v2725_v7 }
  0x6c   : > { %2549 = vmatprep.mubr.msk.bf16.mxu0 %vm396_vm0, %v2815_v13  ;;  %2605 = vmatprep.subr.bf16.mxu1 %v2727_v48  ;;  %v2729_v13 = vld [vmem:[%s3375_s1 + $0xf0] sm:$0xff]  }
  0x6e   : > { %2566 = vmatmul.mubr.msk.bf16.gmra.mxu1 %vm396_vm0, %v3074_v40 }
  0x6f   : > { %2585 = vmatprep.mubr.msk.bf16.mxu1 %vm396_vm0, %v2881_v3  ;;  %v2726_v3 = vld [vmem:[%s3375_s1 + $0xe8] sm:$0xff]  }
  0x73   : > { %2550 = vmatmul.mubr.msk.bf16.vlgmr.msra.gmra.mxu0 %vm396_vm0, %v2885_v8  ;;  %v2728_v8 = vld [vmem:[%s3375_s1 + $0xe0] sm:$0xff]  }
  0x74   : > { %2570 = vmatpush3.bf16.msra.mxu0 %v2721_v4  ;;  %2553 = vmatprep.mubr.msk.bf16.mxu0 %vm396_vm0, %v2899_v19 }
  0x75   : > { %2571 = vmatprep.subr.bf16.mxu0 %v2723_v49 }
  0x76   : > { %2586 = vmatmul.mubr.msk.bf16.vlgmr.msra.gmra.mxu1 %vm396_vm0, %v2940_v45 }
  0x77   : > { %2606 = vmatpush3.bf16.msra.mxu1 %v2727_v48  ;;  %2589 = vmatprep.mubr.msk.bf16.mxu1 %vm396_vm0, %v2965_v25 }
  0x78   : > { %2572 = vmatpush3.bf16.msra.mxu0 %v2723_v49  ;;  %2607 = vmatprep.subr.bf16.mxu1 %v2729_v13 }
  0x79   : > { %2593 = vmatprep.subr.bf16.mxu0 %v2726_v3 }
  0x7b   : > { %2554 = vmatmul.mubr.msk.bf16.gmra.mxu0 %vm396_vm0, %v2263_v6  ;;  %2608 = vmatpush3.bf16.msra.mxu1 %v2729_v13 }
  0x7c   : > { %2573 = vmatprep.mubr.msk.bf16.mxu0 %vm396_vm0, %v3071_v32 }
  0x7e   : > { %2590 = vmatmul.mubr.msk.bf16.gmra.mxu1 %vm396_vm0, %v2983_v31 }
  0x7f   : > { %2609 = vmatprep.mubr.msk.bf16.mxu1 %vm396_vm0, %v3087_v38 }
  0x83   : > { %2574 = vmatmul.mubr.msk.bf16.vlgmr.msra.gmra.mxu0 %vm396_vm0, %v3098_v14 }
  0x84   : > { %2594 = vmatpush3.bf16.msra.mxu0 %v2726_v3  ;;  %2577 = vmatprep.mubr.msk.bf16.mxu0 %vm396_vm0, %v3104_v21 }
  0x85   : > { %2595 = vmatprep.subr.bf16.mxu0 %v2728_v8 }
  0x86   : > { %2610 = vmatmul.mubr.msk.bf16.vlgmr.msra.gmra.mxu1 %vm396_vm0, %v3091_v37 }
  0x87   : > { %2613 = vmatprep.mubr.msk.bf16.mxu1 %vm396_vm0, %v3118_v15 }
  0x88   : > { %2596 = vmatpush3.bf16.msra.mxu0 %v2728_v8 }
  0x8b   : > { %2578 = vmatmul.mubr.msk.bf16.gmra.mxu0 %vm396_vm0, %v3126_v16 }
  0x8c   : > { %2597 = vmatprep.mubr.msk.bf16.mxu0 %vm396_vm0, %v2908_v23 }
  0x8e   : > { %2614 = vmatmul.mubr.msk.bf16.gmra.mxu1 %vm396_vm0, %v2296_v20 }
  0x93   : > { %2598 = vmatmul.mubr.msk.bf16.vlgmr.msra.gmra.mxu0 %vm396_vm0, %v2951_v0 }
  0x94   : > { %2601 = vmatprep.mubr.msk.bf16.mxu0 %vm396_vm0, %v2970_v10 }
  0x9b   : > { %2602 = vmatmul.mubr.msk.bf16.gmra.mxu0 %vm396_vm0, %v3074_v40 }
  0xd4   : > { %v2443_v19 = vpop.f32.mrf.mxu1 }
  0xd6   : > { %v552_v29 = vpop.f32.mrf.mxu1 }
  0xd8   : > { %v2444_v45 = vpop.f32.mrf.mxu1 }
  0xda   : > { %v555_v25 = vpop.f32.mrf.mxu1 }
  0xdd   : > { %v2447_v31 = vpop.f32.mrf.mxu1 }
  0xdf   : > { %v568_v6 = vpop.f32.mrf.mxu1 }
  0xe1   : > { %v2431_v23 = vpop.f32.mrf.mxu0  ;;  %v2448_v33 = vpop.f32.mrf.mxu1 }
  0xe2   : > { %v561_v43 = vadd.f32 %v2443_v19, %v2431_v23 }
  0xe3   : > { %v443_v50 = vpop.f32.mrf.mxu0  ;;  %v571_v0 = vpop.f32.mrf.mxu1 }
  0xe4   : > { %v553_v51 = vadd.f32 %v552_v29, %v443_v50 }
  0xe5   : > { %v2432_v52 = vpop.f32.mrf.mxu0  ;;  %v2467_v10 = vpop.f32.mrf.mxu1 }
  0xe6   : > { %v564_v53 = vadd.f32 %v2444_v45, %v2432_v52 }
  0xe7   : > { %v446_v34 = vpop.f32.mrf.mxu0  ;;  %v763_v55 = vpop.f32.mrf.mxu1 }
  0xe8   : > { %v556_v54 = vadd.f32 %v555_v25, %v446_v34 }
  0xe9   : > { %v2468_v56 = vpop.f32.mrf.mxu1 }
  0xeb   : > { %v2435_v58 = vpop.f32.mrf.mxu0  ;;  %v766_v63 = vpop.f32.mrf.mxu1 }
  0xec   : > { %v577_v62 = vadd.f32 %v2447_v31, %v2435_v58 }
  0xed   : > { %v459_v17 = vpop.f32.mrf.mxu0 }
  0xee   : > { %v569_v2 = vadd.f32 %v568_v6, %v459_v17  ;;  %v2471_v9 = vpop.f32.mrf.mxu1 }
  0xef   : > { %v2436_v12 = vpop.f32.mrf.mxu0 }
  0xf0   : > { %v580_v26 = vadd.f32 %v2448_v33, %v2436_v12  ;;  %v779_v18 = vpop.f32.mrf.mxu1 }
  0xf1   : > { %v462_v20 = vpop.f32.mrf.mxu0 }
  0xf2   : > { %v572_v27 = vadd.f32 %v571_v0, %v462_v20  ;;  %v2472_v28 = vpop.f32.mrf.mxu1 }
  0xf3   : > { %v2455_v32 = vpop.f32.mrf.mxu0 }
  0xf4   : > { %v680_v40 = vadd.f32 %v2455_v32, %v561_v43  ;;  %v782_v57 = vpop.f32.mrf.mxu1 }
  0xf5   : > { %v647_v61 = vpop.f32.mrf.mxu0 }
  0xf6   : > { %v3244_v35 = vadd.f32 %v2467_v10, %v680_v40  ;;  %v678_v36 = vadd.f32 %v647_v61, %v553_v51  ;;  %v2491_v30 = vpop.f32.mrf.mxu1 }
  0xf7   : > { %v2456_v38 = vpop.f32.mrf.mxu0 }
  0xf8   : > { %v3246_v37 = vadd.f32 %v763_v55, %v678_v36  ;;  %v681_v41 = vadd.f32 %v2456_v38, %v564_v53  ;;  %v1014_v5 = vpop.f32.mrf.mxu1 }
  0xf9   : > { %v650_v42 = vpop.f32.mrf.mxu0 }
  0xfa   : > { %v3248_v14 = vadd.f32 %v2468_v56, %v681_v41  ;;  %v679_v59 = vadd.f32 %v650_v42, %v556_v54  ;;  %v2492_v21 = vpop.f32.mrf.mxu1 }
  0xfb   : > { %v2459_v60 = vpop.f32.mrf.mxu0 }
  0xfc   : > { %v3250_v22 = vadd.f32 %v766_v63, %v679_v59  ;;  %v684_v11 = vadd.f32 %v2459_v60, %v577_v62  ;;  %v1017_v15 = vpop.f32.mrf.mxu1 }
  0xfd   : > { %v663_v1 = vpop.f32.mrf.mxu0 }
  0xfe   : > { %v3252_v16 = vadd.f32 %v2471_v9, %v684_v11  ;;  %v682_v44 = vadd.f32 %v663_v1, %v569_v2  ;;  %v2495_v46 = vpop.f32.mrf.mxu1 }
  0xff   : > { %v2460_v24 = vpop.f32.mrf.mxu0 }
 0x100   : > { %v3254_v47 = vadd.f32 %v779_v18, %v682_v44  ;;  %v685_v39 = vadd.f32 %v2460_v24, %v580_v26  ;;  %v1030_v7 = vpop.f32.mrf.mxu1  ;;  %v3265_v26 = vld [vmem:[%s3376_s2] ss:$0 sm:$0xff] }
 0x101   : > { %v666_v4 = vpop.f32.mrf.mxu0 }
 0x102   : > { %v3256_v48 = vadd.f32 %v2472_v28, %v685_v39  ;;  %v683_v49 = vadd.f32 %v666_v4, %v572_v27  ;;  %v2496_v13 = vpop.f32.mrf.mxu1 }
 0x103   : > { %v2479_v3 = vpop.f32.mrf.mxu0 }
 0x104   : > { %v3258_v8 = vadd.f32 %v782_v57, %v683_v49  ;;  %v1033_v19 = vpop.f32.mrf.mxu1  ;;  %v1023_v34 = vadd.f32 %v2491_v30, %v2479_v3 }
 0x105   : > { %v937_v29 = vpop.f32.mrf.mxu0 }
 0x106   : > { %v2515_v45 = vpop.f32.mrf.mxu1  ;;  %v1015_v55 = vadd.f32 %v1014_v5, %v937_v29 }
 0x107   : > { %v2480_v25 = vpop.f32.mrf.mxu0 }
 0x108   : > { %v1198_v31 = vpop.f32.mrf.mxu1  ;;  %v1026_v63 = vadd.f32 %v2492_v21, %v2480_v25 }
 0x109   : > { %v940_v23 = vpop.f32.mrf.mxu0 }
 0x10a   : > { %v2516_v43 = vpop.f32.mrf.mxu1  ;;  %v1018_v18 = vadd.f32 %v1017_v15, %v940_v23 }
 0x10b   : > { %v2483_v6 = vpop.f32.mrf.mxu0 }
 0x10c   : > { %v1201_v50 = vpop.f32.mrf.mxu1  ;;  %v1039_v57 = vadd.f32 %v2495_v46, %v2483_v6 }
 0x10d   : > { %v953_v51 = vpop.f32.mrf.mxu0 }
 0x10e   : > { %v2519_v33 = vpop.f32.mrf.mxu1  ;;  %v1031_v41 = vadd.f32 %v1030_v7, %v953_v51 }
 0x10f   : > { %v2484_v52 = vpop.f32.mrf.mxu0 }
 0x110   : > { %v1214_v53 = vpop.f32.mrf.mxu1  ;;  %v1042_v60 = vadd.f32 %v2496_v13, %v2484_v52 }
 0x111   : > { %v956_v0 = vpop.f32.mrf.mxu0 }
 0x112   : > { %v2520_v54 = vpop.f32.mrf.mxu1  ;;  %v1034_v3 = vadd.f32 %v1033_v19, %v956_v0 }
 0x113   : > { %v2503_v10 = vpop.f32.mrf.mxu0 }
 0x114   : > { %v1124_v56 = vadd.f32 %v2503_v10, %v1023_v34  ;;  %v1217_v58 = vpop.f32.mrf.mxu1 }
 0x115   : > { %v1091_v62 = vpop.f32.mrf.mxu0 }
 0x116   : > { %v1231_v17 = vadd.f32 %v2515_v45, %v1124_v56  ;;  %v1122_v2 = vadd.f32 %v1091_v62, %v1015_v55  ;;  %v3260_v9 = vpop.f32.mrf.mxu1 }
 0x117   : > { %v2504_v12 = vpop.f32.mrf.mxu0 }
 0x118   : > { %v1125_v20 = vadd.f32 %v2504_v12, %v1026_v63  ;;  %v3267_v27 = vpop.f32.mrf.mxu1  ;;  %v1229_v28 = vadd.f32 %v1198_v31, %v1122_v2  ;;  %v1239_v40 = vadd.f32 %v3265_v26, %v1231_v17 }
 0x119   : > { %v1094_v32 = vpop.f32.mrf.mxu0 }
 0x11a   : > { %v1232_v61 = vadd.f32 %v2516_v43, %v1125_v20  ;;  %v1123_v36 = vadd.f32 %v1094_v32, %v1018_v18  ;;  %v3270_v30 = vpop.f32.mrf.mxu1  ;;  %v1237_v11 = vadd.f32 %v3265_v26, %v1229_v28  ;;  %v1247_v1 = vmax.f32 %v1239_v40, 0.0 }
 0x11b   : > { %v2507_v38 = vpop.f32.mrf.mxu0 }
 0x11c   : > { %v1230_v5 = vadd.f32 %v1201_v50, %v1123_v36  ;;  %v1128_v42 = vadd.f32 %v2507_v38, %v1039_v57  ;;  %v1240_v59 = vadd.f32 %v3265_v26, %v1232_v61  ;;  %v3273_v21 = vpop.f32.mrf.mxu1  ;;  %v1245_v31 = vmax.f32 %v1237_v11, 0.0 }
 0x11d   : > { %v1107_v15 = vpop.f32.mrf.mxu0 }
 0x11e   : > { %v1238_v44 = vadd.f32 %v3265_v26, %v1230_v5  ;;  %v1235_v46 = vadd.f32 %v2519_v33, %v1128_v42  ;;  %v1126_v24 = vadd.f32 %v1107_v15, %v1031_v41  ;;  %v1248_v39 = vmax.f32 %v1240_v59, 0.0  ;;  %v2543_v4 = vpop.f32.mrf.mxu1 }
 0x11f   : > { %v2508_v49 = vpop.f32.mrf.mxu0 }
 0x120   : > { %v1246_v7 = vmax.f32 %v1238_v44, 0.0  ;;  %v1129_v29 = vadd.f32 %v2508_v49, %v1042_v60  ;;  %v2629_v45 = vpack.i.bf16 %v1248_v39, %v1247_v1  ;;  %v1392_v25 = vpop.f32.mrf.mxu1  ;;  %v1233_v43 = vadd.f32 %v1214_v53, %v1126_v24 }
 0x121   : > { %v1110_v23 = vpop.f32.mrf.mxu0  ;;  %v1243_v50 = vadd.f32 %v3265_v26, %v1235_v46 }
 0x122   : > { %v1236_v13 = vadd.f32 %v2520_v54, %v1129_v29  ;;  %v1127_v6 = vadd.f32 %v1110_v23, %v1034_v3  ;;  %2630 = vrot.lane.b32.xlu0 %v2629_v45, %s2738_s7  ;;  %v2544_v51 = vpop.f32.mrf.mxu1  ;;  %v2634_v34 = vpack.i.bf16 %v1246_v7, %v1245_v31  ;;  %v1241_v55 = vadd.f32 %v3265_v26, %v1233_v43 }
 0x123   : > { %v2527_v33 = vpop.f32.mrf.mxu0  ;;  %v1251_v53 = vmax.f32 %v1243_v50, 0.0 }
 0x124   : > { %v1234_v52 = vadd.f32 %v1217_v58, %v1127_v6  ;;  %v1244_v10 = vadd.f32 %v3265_v26, %v1236_v13  ;;  %v3279_v19 = vpop.f32.mrf.mxu1  ;;  %v1249_v58 = vmax.f32 %v1241_v55, 0.0  ;;  %v1385_v5 = vadd.f32 %v3260_v9, %v2527_v33 }
 0x125   : > { %v1299_v0 = vpop.f32.mrf.mxu0 }
 0x126   : > { %v1242_v56 = vadd.f32 %v3265_v26, %v1234_v52  ;;  %2635 = vrot.lane.b32.xlu0 %v2634_v34, %s2738_s7  ;;  %v1252_v54 = vmax.f32 %v1244_v10, 0.0  ;;  %v2563_v62 = vpop.f32.mrf.mxu1  ;;  %v1377_v60 = vadd.f32 %v3267_v27, %v1299_v0 }
 0x127   : > { %v2528_v63 = vpop.f32.mrf.mxu0 }
 0x128   : > { %v1250_v17 = vmax.f32 %v1242_v56, 0.0  ;;  %v2639_v2 = vpack.i.bf16 %v1252_v54, %v1251_v53  ;;  %v1563_v12 = vpop.f32.mrf.mxu1  ;;  %v1388_v44 = vadd.f32 %v3270_v30, %v2528_v63 }
 0x129   : > { %v1302_v18 = vpop.f32.mrf.mxu0 }
 0x12a   : > { %2640 = vrot.lane.b32.xlu1 %v2639_v2, %s2738_s7  ;;  %v2564_v20 = vpop.f32.mrf.mxu1  ;;  %v2644_v32 = vpack.i.bf16 %v1250_v17, %v1249_v58  ;;  %v1380_v3 = vadd.f32 %v3273_v21, %v1302_v18 }
 0x12b   : > { %v2531_v28 = vpop.f32.mrf.mxu0 }
 0x12c   : > { %v1566_v40 = vpop.f32.mrf.mxu1  ;;  %v1401_v31 = vadd.f32 %v2543_v4, %v2531_v28 }
 0x12d   : > { %v1315_v57 = vpop.f32.mrf.mxu0 }
 0x12e   : > { %2645 = vrot.lane.b32.xlu1 %v2644_v32, %s2738_s7  ;;  %v2567_v61 = vpop.f32.mrf.mxu1  ;;  %v1393_v6 = vadd.f32 %v1392_v25, %v1315_v57 }
 0x12f   : > { %v2532_v36 = vpop.f32.mrf.mxu0 }
 0x130   : > { %v1579_v38 = vpop.f32.mrf.mxu1  ;;  %v1404_v21 = vadd.f32 %v2544_v51, %v2532_v36 }
 0x131   : > { %v1318_v41 = vpop.f32.mrf.mxu0 }
 0x132   : > { %v2568_v42 = vpop.f32.mrf.mxu1  ;;  %v1396_v17 = vadd.f32 %v3279_v19, %v1318_v41 }
 0x133   : > { %v2551_v59 = vpop.f32.mrf.mxu0 }
 0x134   : > { %v1492_v11 = vadd.f32 %v2551_v59, %v1385_v5  ;;  %v1582_v15 = vpop.f32.mrf.mxu1 }
 0x135   : > { %v1459_v1 = vpop.f32.mrf.mxu0 }
 0x136   : > { %v1490_v46 = vadd.f32 %v1459_v1, %v1377_v60  ;;  %v3286_v24 = vpop.f32.mrf.mxu1  ;;  %v1596_v39 = vadd.f32 %v2563_v62, %v1492_v11 }
 0x137   : > { %v2552_v49 = vpop.f32.mrf.mxu0 }
 0x138   : > { %v1493_v7 = vadd.f32 %v2552_v49, %v1388_v44  ;;  %v3289_v29 = vpop.f32.mrf.mxu1  ;;  %v1594_v9 = vadd.f32 %v1563_v12, %v1490_v46  ;;  %v1604_v13 = vadd.f32 %v3265_v26, %v1596_v39 }
 0x139   : > { %v1462_v45 = vpop.f32.mrf.mxu0 }
 0x13a   : > { %v1597_v23 = vadd.f32 %v2564_v20, %v1493_v7  ;;  %v1491_v27 = vadd.f32 %v1462_v45, %v1380_v3  ;;  %v3291_v43 = vpop.f32.mrf.mxu1  ;;  %v1602_v10 = vadd.f32 %v3265_v26, %v1594_v9  ;;  %v1612_v62 = vmax.f32 %v1604_v13, 0.0 }
 0x13b   : > { %v2555_v30 = vpop.f32.mrf.mxu0 }
 0x13c   : > { %v1605_v50 = vadd.f32 %v3265_v26, %v1597_v23  ;;  %v1595_v33 = vadd.f32 %v1566_v40, %v1491_v27  ;;  %v1496_v52 = vadd.f32 %v2555_v30, %v1401_v31  ;;  %v1744_v34 = vpop.f32.mrf.mxu1  ;;  %v1610_v58 = vmax.f32 %v1602_v10, 0.0 }
 0x13d   : > { %v1475_v0 = vpop.f32.mrf.mxu0 }
 0x13e   : > { %v1613_v55 = vmax.f32 %v1605_v50, 0.0  ;;  %v1603_v4 = vadd.f32 %v3265_v26, %v1595_v33  ;;  %v1600_v56 = vadd.f32 %v2567_v61, %v1496_v52  ;;  %v1494_v53 = vadd.f32 %v1475_v0, %v1393_v6  ;;  %v2591_v54 = vpop.f32.mrf.mxu1 }
 0x13f   : > { %v2556_v63 = vpop.f32.mrf.mxu0 }
 0x140   : > { %v1611_v25 = vmax.f32 %v1603_v4, 0.0  ;;  %v1598_v2 = vadd.f32 %v1579_v38, %v1494_v53  ;;  %v1497_v12 = vadd.f32 %v2556_v63, %v1404_v21  ;;  %v1757_v18 = vpop.f32.mrf.mxu1  ;;  %v2649_v51 = vpack.i.bf16 %v1613_v55, %v1612_v62 }
 0x141   : > { %v1478_v20 = vpop.f32.mrf.mxu0  ;;  %v1608_v28 = vadd.f32 %v3265_v26, %v1600_v56 }
 0x142   : > { %v1601_v32 = vadd.f32 %v2568_v42, %v1497_v12  ;;  %v1495_v40 = vadd.f32 %v1478_v20, %v1396_v17  ;;  %v2592_v57 = vpop.f32.mrf.mxu1  ;;  %2650 = vrot.lane.b32.xlu1 %v2649_v51, %s2739_s8  ;;  %v2654_v36 = vpack.i.bf16 %v1611_v25, %v1610_v58  ;;  %v1606_v5 = vadd.f32 %v3265_v26, %v1598_v2 }
 0x143   : > { %v2575_v61 = vpop.f32.mrf.mxu0  ;;  %v1616_v60 = vmax.f32 %v1608_v28, 0.0 }
 0x144   : > { %v1609_v19 = vadd.f32 %v3265_v26, %v1601_v32  ;;  %v1599_v41 = vadd.f32 %v1582_v15, %v1495_v40  ;;  %v1760_v38 = vpop.f32.mrf.mxu1  ;;  %2655 = vrot.lane.b32.xlu0 %v2654_v36, %s2739_s8  ;;  %v1614_v46 = vmax.f32 %v1606_v5, 0.0  ;;  %v1750_v13 = vadd.f32 %v3286_v24, %v2575_v61 }
 0x145   : > { %v1664_v59 = vpop.f32.mrf.mxu0 }
 0x146   : > { %v1617_v11 = vmax.f32 %v1609_v19, 0.0  ;;  %v1607_v1 = vadd.f32 %v3265_v26, %v1599_v41  ;;  %v2611_v42 = vpop.f32.mrf.mxu1  ;;  %v1742_v50 = vadd.f32 %v3289_v29, %v1664_v59 }
 0x147   : > { %v2576_v44 = vpop.f32.mrf.mxu0 }
 0x148   : > { %v1615_v39 = vmax.f32 %v1607_v1, 0.0  ;;  %v2659_v49 = vpack.i.bf16 %v1617_v11, %v1616_v60  ;;  %v1913_v45 = vpop.f32.mrf.mxu1  ;;  %v1753_v21 = vadd.f32 %v3291_v43, %v2576_v44 }
 0x149   : > { %v1667_v3 = vpop.f32.mrf.mxu0 }
 0x14a   : > { %2660 = vrot.lane.b32.xlu1 %v2659_v49, %s2739_s8  ;;  %v2664_v7 = vpack.i.bf16 %v1615_v39, %v1614_v46  ;;  %v2612_v23 = vpop.f32.mrf.mxu1  ;;  %v1745_v56 = vadd.f32 %v1744_v34, %v1667_v3 }
 0x14b   : > { %v2579_v9 = vpop.f32.mrf.mxu0 }
 0x14c   : > { %2665 = vrot.lane.b32.xlu0 %v2664_v7, %s2739_s8  ;;  %v1916_v6 = vpop.f32.mrf.mxu1  ;;  %v1766_v17 = vadd.f32 %v2591_v54, %v2579_v9 }
 0x14d   : > { %v1680_v31 = vpop.f32.mrf.mxu0 }
 0x14e   : > { %v2615_v4 = vpop.f32.mrf.mxu1  ;;  %v1758_v29 = vadd.f32 %v1757_v18, %v1680_v31 }
 0x14f   : > { %v2580_v15 = vpop.f32.mrf.mxu0 }
 0x150   : > { %v1929_v12 = vpop.f32.mrf.mxu1  ;;  %v1769_v28 = vadd.f32 %v2592_v57, %v2580_v15 }
 0x151   : > { %v1683_v27 = vpop.f32.mrf.mxu0 }
 0x152   : > { %v2616_v19 = vpop.f32.mrf.mxu1  ;;  %v1761_v59 = vadd.f32 %v1760_v38, %v1683_v27 }
 0x153   : > { %v2599_v30 = vpop.f32.mrf.mxu0 }
 0x154   : > { %v1851_v33 = vadd.f32 %v2599_v30, %v1750_v13  ;;  %v1932_v49 = vpop.f32.mrf.mxu1 }
 0x155   : > { %v1818_v52 = vpop.f32.mrf.mxu0 }
 0x156   : > { %v1849_v10 = vadd.f32 %v1818_v52, %v1742_v50  ;;  %v1946_v0 = vadd.f32 %v2611_v42, %v1851_v33 }
 0x157   : > { %v2600_v55 = vpop.f32.mrf.mxu0 }
 0x158   : > { %v1852_v53 = vadd.f32 %v2600_v55, %v1753_v21  ;;  %v1944_v62 = vadd.f32 %v1913_v45, %v1849_v10  ;;  %v1954_v24 = vadd.f32 %v3265_v26, %v1946_v0  ;;  %v810_v21 = vadd.f32 %v3265_v26, %v3244_v35 }
 0x159   : > { %v1821_v63 = vpop.f32.mrf.mxu0  ;;  %v808_v10 = vadd.f32 %v3265_v26, %v3246_v37  ;;  %v811_v55 = vadd.f32 %v3265_v26, %v3248_v14  ;;  %v814_v35 = vadd.f32 %v3265_v26, %v3252_v16  ;;  %v812_v14 = vadd.f32 %v3265_v26, %v3254_v47 }
 0x15a   : > { %v1947_v25 = vadd.f32 %v2612_v23, %v1852_v53  ;;  %v1850_v2 = vadd.f32 %v1821_v63, %v1745_v56  ;;  %v1952_v32 = vadd.f32 %v3265_v26, %v1944_v62  ;;  %v1962_v5 = vmax.f32 %v1954_v24, 0.0 }
 0x15b   : > { %v2603_v58 = vpop.f32.mrf.mxu0  ;;  %v818_v62 = vmax.f32 %v810_v21, 0.0  ;;  %v816_v63 = vmax.f32 %v808_v10, 0.0  ;;  %v819_v24 = vmax.f32 %v811_v55, 0.0 }
 0x15c   : > { %v1955_v20 = vadd.f32 %v3265_v26, %v1947_v25  ;;  %v1945_v51 = vadd.f32 %v1916_v6, %v1850_v2  ;;  %v1855_v43 = vadd.f32 %v2603_v58, %v1766_v17  ;;  %v1960_v1 = vmax.f32 %v1952_v32, 0.0 }
 0x15d   : > { %v1834_v40 = vpop.f32.mrf.mxu0 }
 0x15e   : > { %v1963_v34 = vmax.f32 %v1955_v20, 0.0  ;;  %v1953_v61 = vadd.f32 %v3265_v26, %v1945_v51  ;;  %v1950_v36 = vadd.f32 %v2615_v4, %v1855_v43  ;;  %v1853_v54 = vadd.f32 %v1834_v40, %v1758_v29 }
 0x15f   : > { %v2604_v41 = vpop.f32.mrf.mxu0  ;;  %v809_v4 = vadd.f32 %v3265_v26, %v3250_v22  ;;  %v815_v22 = vadd.f32 %v3265_v26, %v3256_v48  ;;  %v813_v51 = vadd.f32 %v3265_v26, %v3258_v8 }
 0x160   : > { %v1961_v60 = vmax.f32 %v1953_v61, 0.0  ;;  %v1948_v11 = vadd.f32 %v1929_v12, %v1853_v54  ;;  %v1856_v18 = vadd.f32 %v2604_v41, %v1769_v28  ;;  %v2669_v42 = vpack.i.bf16 %v1963_v34, %v1962_v5 }
 0x161   : > { %v1837_v44 = vpop.f32.mrf.mxu0  ;;  %v1958_v57 = vadd.f32 %v3265_v26, %v1950_v36  ;;  %v817_v12 = vmax.f32 %v809_v4, 0.0 }
 0x162   : > { %v1951_v46 = vadd.f32 %v2616_v19, %v1856_v18  ;;  %v1854_v39 = vadd.f32 %v1837_v44, %v1761_v59  ;;  %2670 = vrot.lane.b32.xlu1 %v2669_v42, %s2740_s9  ;;  %v2674_v3 = vpack.i.bf16 %v1961_v60, %v1960_v1  ;;  %v1956_v7 = vadd.f32 %v3265_v26, %v1948_v11 }
 0x163   : > { %v1966_v38 = vmax.f32 %v1958_v57, 0.0 }
 0x164   : > { %v1959_v9 = vadd.f32 %v3265_v26, %v1951_v46  ;;  %v1949_v45 = vadd.f32 %v1932_v49, %v1854_v39  ;;  %2675 = vrot.lane.b32.xlu0 %v2674_v3, %s2740_s9  ;;  %v1964_v23 = vmax.f32 %v1956_v7, 0.0  ;;  %v822_v3 = vmax.f32 %v814_v35, 0.0 }
 0x165   : > { %v823_v7 = vmax.f32 %v815_v22, 0.0 }
 0x166   : > { %v1967_v31 = vmax.f32 %v1959_v9, 0.0  ;;  %v1957_v15 = vadd.f32 %v3265_v26, %v1949_v45  ;;  %v820_v45 = vmax.f32 %v812_v14, 0.0 }
 0x168   : > { %v1965_v27 = vmax.f32 %v1957_v15, 0.0  ;;  %v2684_v13 = vpack.i.bf16 %v1967_v31, %v1966_v38  ;;  %v821_v38 = vmax.f32 %v813_v51, 0.0 }
 0x16a   : > { %2685 = vrot.lane.b32.xlu1 %v2684_v13, %s2740_s9  ;;  %v2679_v30 = vpack.i.bf16 %v1965_v27, %v1964_v23 }
 0x16c   : > { %2680 = vrot.lane.b32.xlu0 %v2679_v30, %s2740_s9 }
 0x194   : > { %v2631_v50 = vpop.permute.xlu0 %2630 }
 0x195   : > { %v2633_v53 = vunpack.i.h.bf16 %v2631_v50  ;;  %v2632_v17 = vunpack.i.l.bf16 %v2631_v50 }
 0x197   : > { %v2067_v43 = vsel %vm396_vm0, %v819_v24, %v2633_v53  ;;  %v2066_v28 = vsel %vm396_vm0, %v818_v62, %v2632_v17 }
 0x198   : > { %v2636_v52 = vpop.permute.xlu0 %2635 }
 0x199   : > { %v2638_v25 = vunpack.i.h.bf16 %v2636_v52  ;;  %v2637_v37 = vunpack.i.l.bf16 %v2636_v52 }
 0x19b   : > { %v2065_v16 = vsel %vm396_vm0, %v817_v12, %v2638_v25  ;;  %v2064_v48 = vsel %vm396_vm0, %v816_v63, %v2637_v37 }
 0x19c   : > { %v3313_v6 = vpop.permute.xlu1 %2640 }
 0x19d   : > { %v2643_v34 = vunpack.i.h.bf16 %v3313_v6  ;;  %v2642_v8 = vunpack.i.l.bf16 %v3313_v6 }
 0x19f   : > { %v2071_v27 = vsel %vm396_vm0, %v823_v7, %v2643_v34  ;;  %v2070_v13 = vsel %vm396_vm0, %v822_v3, %v2642_v8 }
 0x1a0   : > { %v3315_v33 = vpop.permute.xlu1 %2645 }
 0x1a1   : > { %v2648_v26 = vunpack.i.h.bf16 %v3315_v33  ;;  %v2647_v18 = vunpack.i.l.bf16 %v3315_v33 }
 0x1a3   : > { %v2068_v50 = vsel %vm396_vm0, %v820_v45, %v2647_v18  ;;  %v2069_v33 = vsel %vm396_vm0, %v821_v38, %v2648_v26 }
 0x1b4   : > { %v2651_v0 = vpop.permute.xlu1 %2650 }
 0x1b5   : > { %v2653_v58 = vunpack.i.h.bf16 %v2651_v0  ;;  %v2652_v29 = vunpack.i.l.bf16 %v2651_v0 }
 0x1b6   : > { %v2656_v56 = vpop.permute.xlu0 %2655 }
 0x1b7   : > { %v2658_v32 = vunpack.i.h.bf16 %v2656_v56  ;;  %v2657_v40 = vunpack.i.l.bf16 %v2656_v56  ;;  %v2076_v54 = vsel %vm2072_vm7, %v2067_v43, %v2653_v58  ;;  %v2075_v5 = vsel %vm2072_vm7, %v2066_v28, %v2652_v29 }
 0x1b9   : > { %v2074_v1 = vsel %vm2072_vm7, %v2065_v16, %v2658_v32  ;;  %v2073_v44 = vsel %vm2072_vm7, %v2064_v48, %v2657_v40 }
 0x1bc   : > { %v2661_v2 = vpop.permute.xlu1 %2660 }
 0x1bd   : > { %v2663_v57 = vunpack.i.h.bf16 %v2661_v2  ;;  %v2662_v46 = vunpack.i.l.bf16 %v2661_v2 }
 0x1be   : > { %v2666_v20 = vpop.permute.xlu0 %2665 }
 0x1bf   : > { %v2668_v31 = vunpack.i.h.bf16 %v2666_v20  ;;  %v2667_v15 = vunpack.i.l.bf16 %v2666_v20  ;;  %v2080_v52 = vsel %vm2072_vm7, %v2071_v27, %v2663_v57  ;;  %v2079_v21 = vsel %vm2072_vm7, %v2070_v13, %v2662_v46 }
 0x1c1   : > { %v2077_v53 = vsel %vm2072_vm7, %v2068_v50, %v2667_v15  ;;  %v2078_v62 = vsel %vm2072_vm7, %v2069_v33, %v2668_v31 }
 0x1d4   : > { %v2671_v47 = vpop.permute.xlu1 %2670 }
 0x1d5   : > { %v2673_v61 = vunpack.i.h.bf16 %v2671_v47  ;;  %v2672_v36 = vunpack.i.l.bf16 %v2671_v47 }
 0x1d6   : > { %v2676_v19 = vpop.permute.xlu0 %2675 }
 0x1d7   : > { %v2084_v41 = vsel %vm2081_vm8, %v2075_v5, %v2672_v36  ;;  %v2085_v59 = vsel %vm2081_vm8, %v2076_v54, %v2673_v61  ;;  %v2678_v60 = vunpack.i.h.bf16 %v2676_v19  ;;  %v2677_v11 = vunpack.i.l.bf16 %v2676_v19 }
 0x1d8   : > { %v2314_v42 = vpack.c.bf16 %v2085_v59, %v2084_v41 }
 0x1d9   : > { %v2083_v39 = vsel %vm2081_vm8, %v2074_v1, %v2678_v60  ;;  %v2082_v49 = vsel %vm2081_vm8, %v2073_v44, %v2677_v11 }
 0x1da   : > { %2326 = vst [vmem:[%s3346_s13 + $0x8] sm:$0xff] %v2314_v42   ;;  %v2309_v9 = vpack.c.bf16 %v2083_v39, %v2082_v49 }
 0x1dc   : > { %v2686_v23 = vpop.permute.xlu1 %2685  ;;  %2310 = vst [vmem:[%s3346_s13] sm:$0xff] %v2309_v9  }
 0x1dd   : > { %v2688_v30 = vunpack.i.h.bf16 %v2686_v23  ;;  %v2687_v6 = vunpack.i.l.bf16 %v2686_v23 }
 0x1de   : > { %v2681_v10 = vpop.permute.xlu0 %2680 }
 0x1df   : > { %v2088_v0 = vsel %vm2081_vm8, %v2079_v21, %v2687_v6  ;;  %v2089_v55 = vsel %vm2081_vm8, %v2080_v52, %v2688_v30  ;;  %v2683_v4 = vunpack.i.h.bf16 %v2681_v10  ;;  %v2682_v56 = vunpack.i.l.bf16 %v2681_v10 }
 0x1e0   : > { %v2324_v63 = vpack.c.bf16 %v2089_v55, %v2088_v0 }
 0x1e1   : > { %v2086_v17 = vsel %vm2081_vm8, %v2077_v53, %v2682_v56  ;;  %v2087_v25 = vsel %vm2081_vm8, %v2078_v62, %v2683_v4 }
 0x1e2   : > { %2328 = vst [vmem:[%s3346_s13 + $0x18] sm:$0xff] %v2324_v63   ;;  %v2319_v2 = vpack.c.bf16 %v2087_v25, %v2086_v17 }
 0x1e4   : > { %2327 = vst [vmem:[%s3346_s13 + $0x10] sm:$0xff] %v2319_v2  }
 0x1e5 PF: > { %s13_s12 = sadd.s32 1, %s2736_s12  }
 0x1e6   : > { %p10_p4 = scmp.ge.s32.totalorder %s13_s12, 4  }
 0x1e8   :  { %12 = sbr.rel (!%p10_p4) target bundleno = 1 (0x1), region = 62 }

// kernel: _lambda_.9
= control target key start
LH: loop header
LB: loop body
LE: loop exit
PB: predicated region body
PF: predicated region fallthrough
CT: control target
= control target key end

     0   :  { %s7707_s18 = smov 0   ;;  %s10770_s0 = inlined_call_operand.vmem [shape: bf16[2,18,18,32], index: 0, kind: input, shape index: {}]   ;;  %s10771_s1 = inlined_call_operand.vmem [shape: bf16[4,4,32,32], index: 1, kind: input, shape index: {}]   ;;  %s10772_s2 = inlined_call_operand.vmem [shape: f32[1,32], index: 2, kind: input, shape index: {}]   ;;  %s10773_s3 = inlined_call_operand.vmem [shape: bf16[32,4], index: 3, kind: input, shape index: {}]   ;;  %s10774_s4 = inlined_call_operand.vmem [shape: f32[1,4], index: 4, kind: input, shape index: {}]   ;;  %s10775_s5 = inlined_call_operand.vmem [shape: f32[2,16,16,16], index: 5, kind: output, shape index: {}]  }
   0x1 LB: > { %s6068_s19 = sadd.s32 4294967295, %s7672_s18   ;;  %p6072_p0 = scmp.ge.s32.totalorder %s7672_s18, 1  ;;  %s7672_s18 = sphi %s7707_s18, %s15_s18  }
   0x2   : > { %p187_p1 = scmp.lt.s32.totalorder %s7672_s18, 3 }
   0x4   : > { %p188_p2 = pnand %p6072_p0, %p187_p1 }
   0x6   : > { %191 = sbr.rel (%p188_p2) target bundleno = 1700 (0x6a4), region = 40 }
   0xb   : > { %v7599_v0 = vld [vmem:[%s10771_s1 + $0x8] sm:$0xff]   ;;  %p215_p3 = scmp.lt.s32.totalorder %s6068_s19, 1  ;;  %v7600_v1 = vld [vmem:[%s10771_s1 + $0x18] sm:$0xff]   ;;  %v7601_v2 = vld [vmem:[%s10771_s1] sm:$0xff]   ;;  %vm797_vm0 = vcmask 261120   ;;  %v10940_v33 = vmov 0 }
   0xc   : > { %6903 = vmatprep.subr.bf16.mxu1 %v7599_v0  ;;  %6867 = vmatprep.subr.bf16.mxu0 %v7600_v1  ;;  %v7602_v3 = vld [vmem:[%s10771_s1 + $0x10] sm:$0xff]   ;;  %v7733_v4 = vld [vmem:[%s10771_s1 + $0x28] sm:$0xff]   ;;  %v7606_v5 = vld [vmem:[%s10771_s1 + $0x38] sm:$0xff]   ;;  %vm350_vm1 = vsmask.f32 3328  ;;  %vm2085_vm4 = vcmask 1042432  }
   0xd   : > { %s11502_s19 = smov (!%p215_p3, %s6068_s19), 1  ;;  %6904 = vmatpush3.bf16.msra.mxu1 %v7599_v0  ;;  %6868 = vmatpush3.bf16.msra.mxu0 %v7600_v1  ;;  %vm351_vm2 = vsmask.f32 7440  ;;  %v7616_v19 = vld [vmem:[%s10771_s1 + $0x30] sm:$0xff]   ;;  %vm2086_vm5 = vcmask 1046532   ;;  %s7674_s17 = smov 4  }
   0xe   : > { %6905 = vmatprep.subr.bf16.mxu1 %v7601_v2  ;;  %s7587_s28 = smul.u32 216, %s11502_s19  ;;  %6869 = vmatprep.subr.bf16.mxu0 %v7602_v3  ;;  %vm7787_vm3 = vmor %vm350_vm1, %vm351_vm2  ;;  %vm5881_vm7 = vcmask 31744   ;;  %s7675_s21 = smov 8   ;;  %vm5914_vm8 = vcmask 64512   ;;  %vm5947_vm9 = vcmask 97280   ;;  %vm5980_vm10 = vcmask 130048  }
   0xf   : > { %v10941_v33 = vsel %vm7787_vm3, 4294967295, %v10940_v33  ;;  %vm8302_vm6 = vmor %vm2085_vm4, %vm2086_vm5  ;;  %s7676_s24 = smov 12   ;;  %s6506_s27 = sshll.u32 %s11502_s19, 8 }
  0x10   : > { %s7738_s8 = scalar_lea.vmem %s10770_s0, %s7587_s28  ;;  %10942 = vst [vmem:[#allocation3_spill] sm:$0xff] %v10941_v33  ;;  %s10569_s30 = scalar_lea.vmem %s10775_s5, %s6506_s27 }
  0x11   : > { %6906 = vmatpush3.bf16.msra.mxu1 %v7601_v2  ;;  %v7744_v6 = vld [vmem:[%s7738_s8] sm:$0xf]  ;;  %v7747_v7 = vld [vmem:[%s7738_s8 + $0x4] sm:$0xf]  ;;  %v7750_v8 = vld [vmem:[%s7738_s8 + $0xc] sm:$0xf]  ;;  %6870 = vmatpush3.bf16.msra.mxu0 %v7602_v3 }
  0x12   : > { %v354_v9 = vshrl.u32 %v7744_v6, 16  ;;  %v357_v10 = vshll.u32 %v7744_v6, 16  ;;  %v6110_v11 = vcombine.low %v7744_v6, %v7747_v7  ;;  %v7757_v12 = vld [vmem:[%s7738_s8 + $0x10] sm:$0xf]  ;;  %6975 = vmatprep.subr.bf16.mxu1 %v7606_v5  ;;  %v367_v13 = vshrl.u32 %v7747_v7, 16  ;;  %6939 = vmatprep.subr.bf16.mxu0 %v7733_v4 }
  0x13   : > { %v378_v14 = vshrl.u32 %v7750_v8, 16  ;;  %v381_v15 = vshll.u32 %v7750_v8, 16  ;;  %v387_v16 = vshll.u32 %v7757_v12, 16  ;;  %v391_v17 = vshrl.u32 %v7757_v12, 16  ;;  %v7774_v22 = vld [vmem:[%s7738_s8 + $0x8] sm:$0x1] }
  0x14   : > { %6907 = vmatprep.mubr.msk.bf16.mxu1 %vm797_vm0, %v6110_v11  ;;  %v7768_v18 = vcombine.low %v7750_v8, %v7757_v12  ;;  %v7777_v23 = vld [vmem:[%s7738_s8 + $0x14] sm:$0x1]  ;;  %v356_v26 = vrot.slane %v354_v9, 4  ;;  %v359_v27 = vrot.slane %v357_v10, 5  ;;  %v7782_v28 = vld [vmem:[%s7738_s8 + $0x18] sm:$0xf] }
  0x15   : > { %v380_v20 = vrot.slane %v378_v14, 4  ;;  %v383_v21 = vrot.slane %v381_v15, 5  ;;  %v389_v24 = vrot.slane %v387_v16, 5  ;;  %v393_v25 = vrot.slane %v391_v17, 4  ;;  %v7794_v39 = vld [vmem:[%s7738_s8 + $0x1c] sm:$0xf] }
  0x16   : > { %10939 = vst [vmem:[#allocation2_spill] sm:$0xff] %v7768_v18  ;;  %6908 = vmatmul.mubr.msk.bf16.vlgmr.msra.gmra.mxu1 %vm797_vm0, %v7768_v18  ;;  %v363_v30 = vshll.u32 %v7747_v7, 16  ;;  %v369_v31 = vrot.slane %v367_v13, 4  ;;  %v360_v34 = vor.u32 %v359_v27, %v356_v26  ;;  %v373_v35 = vshll.u32 %v7774_v22, 16  ;;  %v7798_v44 = vld [vmem:[%s7738_s8 + $0x20] sm:$0x1] }
  0x17   : > { %v384_v29 = vor.u32 %v383_v21, %v380_v20  ;;  %6976 = vmatpush3.bf16.msra.mxu1 %v7606_v5  ;;  %v394_v32 = vor.u32 %v393_v25, %v389_v24  ;;  %v397_v38 = vshll.u32 %v7777_v23, 16  ;;  %v402_v40 = vshrl.u32 %v7782_v28, 16  ;;  %v7808_v54 = vld [vmem:[%s7738_s8 + $0x24] sm:$0xf]  ;;  %v7818_v59 = vld [vmem:[%s7738_s8 + $0x28] sm:$0xf] }
  0x18   : > { %6977 = vmatprep.subr.bf16.mxu1 %v7616_v19  ;;  %v365_v37 = vrot.slane %v363_v30, 5  ;;  %v361_v42 = vrot.slane %v360_v34, 4  ;;  %v375_v43 = vrot.slane %v373_v35, 5  ;;  %v405_v45 = vshll.u32 %v7782_v28, 16  ;;  %v7823_v0 = vld [vmem:[%s7738_s8 + $0x2c] sm:$0x1] }
  0x19   : > { %v385_v36 = vrot.slane %v384_v29, 4  ;;  %v395_v41 = vrot.slane %v394_v32, 4  ;;  %v399_v48 = vrot.slane %v397_v38, 5  ;;  %v404_v49 = vrot.slane %v402_v40, 4  ;;  %v7835_v14 = vld [vmem:[%s7738_s8 + $0x30] sm:$0xf] }
  0x1a   : > { %v370_v46 = vor.u32 %v369_v31, %v365_v37  ;;  %v366_v50 = vsel %vm7787_vm3, %v361_v42, %v365_v37  ;;  %v407_v51 = vrot.slane %v405_v45, 5  ;;  %v411_v52 = vshll.u32 %v7794_v39, 16  ;;  %10946 = vst [vmem:[#allocation7_spill] sm:$0xff] %v7835_v14  ;;  %v7615_v15 = vld [vmem:[%s10771_s1 + $0x20] sm:$0xff]   ;;  %v7843_v21 = vld [vmem:[%s7738_s8 + $0x34] sm:$0xf] }
  0x1b   : > { %v390_v47 = vsel %vm7787_vm3, %v385_v36, %v389_v24  ;;  %6978 = vmatpush3.bf16.msra.mxu1 %v7616_v19  ;;  %v415_v53 = vshrl.u32 %v7794_v39, 16  ;;  %v400_v56 = vsel %vm7787_vm3, %v395_v41, %v399_v48  ;;  %v421_v57 = vshll.u32 %v7798_v44, 16  ;;  %v7856_v32 = vld [vmem:[%s7738_s8 + $0x38] sm:$0x1]  ;;  %v7868_v40 = vld [vmem:[%s7738_s8 + $0x3c] sm:$0xf] }
  0x1c   : > { %v371_v55 = vrot.slane %v370_v46, 4  ;;  %v7815_v58 = vcombine.low %v7782_v28, %v7794_v39  ;;  %v7820_v60 = vcombine.low %v390_v47, %v400_v56  ;;  %v408_v61 = vor.u32 %v407_v51, %v404_v49  ;;  %10948 = vst [vmem:[#allocation9_spill] sm:$0xff] %v7856_v32  ;;  %10949 = vst [vmem:[#allocation10_spill] sm:$0xff] %v7868_v40  ;;  %v7873_v45 = vld [vmem:[%s7738_s8 + $0x40] sm:$0xf] }
  0x1d   : > { %v413_v62 = vrot.slane %v411_v52, 5  ;;  %v417_v63 = vrot.slane %v415_v53, 4  ;;  %v423_v2 = vrot.slane %v421_v57, 5  ;;  %v426_v3 = vshrl.u32 %v7808_v54, 16  ;;  %10951 = vst [vmem:[#allocation12_spill] sm:$0xff] %v7873_v45 }
  0x1e   : > { %10943 = vst [vmem:[#allocation4_spill] sm:$0xff] %v7815_v58  ;;  %10944 = vst [vmem:[#allocation5_spill] sm:$0xff] %v7820_v60  ;;  %v376_v1 = vsel %vm7787_vm3, %v371_v55, %v375_v43  ;;  %6911 = vmatprep.mubr.msk.bf16.mxu1 %vm797_vm0, %v7815_v58  ;;  %v429_v5 = vshll.u32 %v7808_v54, 16  ;;  %v409_v10 = vrot.slane %v408_v61, 4  ;;  %v435_v13 = vshll.u32 %v7818_v59, 16 }
  0x1f   : > { %v7831_v9 = vcombine.low %v366_v50, %v376_v1  ;;  %v418_v11 = vor.u32 %v417_v63, %v413_v62  ;;  %v428_v16 = vrot.slane %v426_v3, 4  ;;  %v439_v19 = vshrl.u32 %v7818_v59, 16  ;;  %v7886_v61 = vld [vmem:[%s7738_s8 + $0x44] sm:$0x1] }
  0x20   : > { %v431_v17 = vrot.slane %v429_v5, 5  ;;  %v445_v20 = vshll.u32 %v7823_v0, 16  ;;  %v414_v24 = vsel %vm7787_vm3, %v409_v10, %v413_v62  ;;  %v437_v26 = vrot.slane %v435_v13, 5  ;;  %10953 = vst [vmem:[#allocation14_spill] sm:$0xff] %v7886_v61  ;;  %v7896_v5 = vld [vmem:[%s7738_s8 + $0x48] sm:$0xf] }
  0x21   : > { %10945 = vst [vmem:[#allocation6_spill] sm:$0xff] %v7831_v9  ;;  %6871 = vmatprep.mubr.msk.bf16.mxu0 %vm797_vm0, %v7831_v9  ;;  %v419_v25 = vrot.slane %v418_v11, 4  ;;  %v7851_v27 = vcombine.low %v7808_v54, %v7818_v59  ;;  %v441_v30 = vrot.slane %v439_v19, 4  ;;  %v450_v34 = vshrl.u32 %v7835_v14, 16  ;;  %10954 = vst [vmem:[#allocation15_spill] sm:$0xff] %v7896_v5 }
  0x22   : > { %6872 = vmatmul.mubr.msk.bf16.vlgmr.msra.gmra.mxu0 %vm797_vm0, %v7820_v60  ;;  %v432_v29 = vor.u32 %v431_v17, %v428_v16  ;;  %v447_v31 = vrot.slane %v445_v20, 5  ;;  %v453_v36 = vshll.u32 %v7835_v14, 16  ;;  %v459_v37 = vshll.u32 %v7843_v21, 16 }
  0x23   : > { %10947 = vst [vmem:[#allocation8_spill] sm:$0xff] %v7851_v27  ;;  %6940 = vmatpush3.bf16.msra.mxu0 %v7733_v4  ;;  %v424_v35 = vsel %vm7787_vm3, %v419_v25, %v423_v2  ;;  %6912 = vmatmul.mubr.msk.bf16.gmra.mxu1 %vm797_vm0, %v7851_v27  ;;  %v463_v38 = vshrl.u32 %v7843_v21, 16  ;;  %v442_v43 = vor.u32 %v441_v30, %v437_v26  ;;  %v452_v4 = vrot.slane %v450_v34, 4  ;;  %v7915_v30 = vld [vmem:[%s7738_s8 + $0x50] sm:$0x1] }
  0x24   : > { %v7870_v41 = vcombine.low %v414_v24, %v424_v35  ;;  %v433_v42 = vrot.slane %v432_v29, 4  ;;  %6941 = vmatprep.subr.bf16.mxu0 %v7615_v15  ;;  %v455_v46 = vrot.slane %v453_v36, 5  ;;  %v461_v47 = vrot.slane %v459_v37, 5  ;;  %v7906_v24 = vld [vmem:[%s7738_s8 + $0x4c] sm:$0xf]  ;;  %10958 = vst [vmem:[#allocation19_spill] sm:$0xff] %v7915_v30 }
  0x25   : > { %v465_v48 = vrot.slane %v463_v38, 4  ;;  %v469_v49 = vshll.u32 %v7856_v32, 16  ;;  %v443_v51 = vrot.slane %v442_v43, 4  ;;  %v7882_v52 = vcombine.low %v7835_v14, %v7843_v21  ;;  %10957 = vst [vmem:[#allocation18_spill] sm:$0xff] %v7906_v24  ;;  %v7924_v38 = vld [vmem:[%s7738_s8 + $0x54] sm:$0xf] }
  0x26   : > { %10950 = vst [vmem:[#allocation11_spill] sm:$0xff] %v7870_v41  ;;  %v438_v50 = vsel %vm7787_vm3, %v433_v42, %v437_v26  ;;  %6875 = vmatprep.mubr.msk.bf16.mxu0 %vm797_vm0, %v7870_v41  ;;  %v474_v53 = vshrl.u32 %v7868_v40, 16  ;;  %v456_v55 = vor.u32 %v455_v46, %v452_v4  ;;  %v477_v62 = vshll.u32 %v7868_v40, 16  ;;  %10960 = vst [vmem:[#allocation21_spill] sm:$0xff] %v7924_v38 }
  0x27   : > { %10952 = vst [vmem:[#allocation13_spill] sm:$0xff] %v7882_v52  ;;  %v466_v56 = vor.u32 %v465_v48, %v461_v47  ;;  %v471_v57 = vrot.slane %v469_v49, 5  ;;  %6942 = vmatpush3.bf16.msra.mxu0 %v7615_v15  ;;  %v448_v63 = vsel %vm7787_vm3, %v443_v51, %v447_v31  ;;  %6915 = vmatprep.mubr.msk.bf16.mxu1 %vm797_vm0, %v7882_v52  ;;  %v483_v2 = vshll.u32 %v7873_v45, 16  ;;  %v7936_v51 = vld [vmem:[%s7738_s8 + $0x58] sm:$0xf] }
  0x28   : > { %v476_v1 = vrot.slane %v474_v53, 4  ;;  %v487_v3 = vshrl.u32 %v7873_v45, 16  ;;  %v7898_v10 = vcombine.low %v438_v50, %v448_v63  ;;  %v457_v11 = vrot.slane %v456_v55, 4  ;;  %10962 = vst [vmem:[#allocation23_spill] sm:$0xff] %v7936_v51 }
  0x29   : > { %v467_v13 = vrot.slane %v466_v56, 4  ;;  %v479_v16 = vrot.slane %v477_v62, 5  ;;  %v485_v15 = vrot.slane %v483_v2, 5  ;;  %v493_v19 = vshll.u32 %v7886_v61, 16 }
  0x2a   : > { %10955 = vst [vmem:[#allocation16_spill] sm:$0xff] %v7898_v10  ;;  %v489_v17 = vrot.slane %v487_v3, 4  ;;  %v7903_v20 = vcombine.low %v7868_v40, %v7873_v45  ;;  %6876 = vmatmul.mubr.msk.bf16.gmra.mxu0 %vm797_vm0, %v7898_v10  ;;  %v462_v25 = vsel %vm7787_vm3, %v457_v11, %v461_v47  ;;  %v498_v31 = vshrl.u32 %v7896_v5, 16  ;;  %v7950_v11 = vld [vmem:[%s7738_s8 + $0x60] sm:$0xf] }
  0x2b   : > { %v472_v26 = vsel %vm7787_vm3, %v467_v13, %v471_v57  ;;  %v480_v29 = vor.u32 %v479_v16, %v476_v1  ;;  %v495_v36 = vrot.slane %v493_v19, 5  ;;  %v501_v37 = vshll.u32 %v7896_v5, 16  ;;  %v7941_v57 = vld [vmem:[%s7738_s8 + $0x5c] sm:$0x1]  ;;  %10964 = vst [vmem:[#allocation25_spill] sm:$0xff] %v7950_v11 }
  0x2c   : > { %10956 = vst [vmem:[#allocation17_spill] sm:$0xff] %v7903_v20  ;;  %v7918_v34 = vcombine.low %v462_v25, %v472_v26  ;;  %v490_v35 = vor.u32 %v489_v17, %v485_v15  ;;  %6916 = vmatmul.mubr.msk.bf16.gmra.mxu1 %vm797_vm0, %v7903_v20  ;;  %v500_v43 = vrot.slane %v498_v31, 4  ;;  %v507_v4 = vshll.u32 %v7906_v24, 16  ;;  %10963 = vst [vmem:[#allocation24_spill] sm:$0xff] %v7941_v57  ;;  %v7958_v31 = vld [vmem:[%s7738_s8 + $0x64] sm:$0xf] }
  0x2d   : > { %v481_v42 = vrot.slane %v480_v29, 4  ;;  %v511_v46 = vshrl.u32 %v7906_v24, 16  ;;  %v503_v48 = vrot.slane %v501_v37, 5  ;;  %v517_v49 = vshll.u32 %v7915_v30, 16  ;;  %10966 = vst [vmem:[#allocation27_spill] sm:$0xff] %v7958_v31 }
  0x2e   : > { %10959 = vst [vmem:[#allocation20_spill] sm:$0xff] %v7918_v34  ;;  %v491_v47 = vrot.slane %v490_v35, 4  ;;  %6879 = vmatprep.mubr.msk.bf16.mxu0 %vm797_vm0, %v7918_v34  ;;  %v7933_v50 = vcombine.low %v7896_v5, %v7906_v24  ;;  %v509_v55 = vrot.slane %v507_v4, 5  ;;  %v522_v62 = vshrl.u32 %v7924_v38, 16 }
  0x2f   : > { %v486_v53 = vsel %vm7787_vm3, %v481_v42, %v485_v15  ;;  %v513_v56 = vrot.slane %v511_v46, 4  ;;  %v504_v1 = vor.u32 %v503_v48, %v500_v43  ;;  %v519_v2 = vrot.slane %v517_v49, 5  ;;  %v7970_v48 = vld [vmem:[%s7738_s8 + $0x68] sm:$0x1] }
  0x30   : > { %10961 = vst [vmem:[#allocation22_spill] sm:$0xff] %v7933_v50  ;;  %v496_v63 = vsel %vm7787_vm3, %v491_v47, %v495_v36  ;;  %6919 = vmatprep.mubr.msk.bf16.mxu1 %vm797_vm0, %v7933_v50  ;;  %v525_v3 = vshll.u32 %v7924_v38, 16  ;;  %v524_v15 = vrot.slane %v522_v62, 4  ;;  %v531_v17 = vshll.u32 %v7936_v51, 16  ;;  %10968 = vst [vmem:[#allocation29_spill] sm:$0xff] %v7970_v48 }
  0x31   : > { %v7952_v13 = vcombine.low %v486_v53, %v496_v63  ;;  %v514_v16 = vor.u32 %v513_v56, %v509_v55  ;;  %v505_v19 = vrot.slane %v504_v1, 4  ;;  %v535_v26 = vshrl.u32 %v7936_v51, 16  ;;  %v7979_v63 = vld [vmem:[%s7738_s8 + $0x6c] sm:$0xf] }
  0x32   : > { %v527_v25 = vrot.slane %v525_v3, 5  ;;  %v541_v29 = vshll.u32 %v7941_v57, 16  ;;  %v533_v36 = vrot.slane %v531_v17, 5  ;;  %v7964_v37 = vcombine.low %v7924_v38, %v7936_v51  ;;  %10969 = vst [vmem:[#allocation30_spill] sm:$0xff] %v7979_v63 }
  0x33   : > { %10965 = vst [vmem:[#allocation26_spill] sm:$0xff] %v7952_v13  ;;  %6880 = vmatmul.mubr.msk.bf16.gmra.mxu0 %vm797_vm0, %v7952_v13  ;;  %v515_v35 = vrot.slane %v514_v16, 4  ;;  %v546_v42 = vshrl.u32 %v7950_v11, 16  ;;  %v510_v43 = vsel %vm7787_vm3, %v505_v19, %v509_v55  ;;  %v537_v46 = vrot.slane %v535_v26, 4  ;;  %v7993_v26 = vld [vmem:[%s7738_s8 + $0x74] sm:$0x1] }
  0x34   : > { %10967 = vst [vmem:[#allocation28_spill] sm:$0xff] %v7964_v37  ;;  %v528_v4 = vor.u32 %v527_v25, %v524_v15  ;;  %v543_v47 = vrot.slane %v541_v29, 5  ;;  %6920 = vmatmul.mubr.msk.bf16.gmra.mxu1 %vm797_vm0, %v7964_v37  ;;  %v549_v56 = vshll.u32 %v7950_v11, 16  ;;  %v555_v62 = vshll.u32 %v7958_v31, 16  ;;  %v7985_v15 = vld [vmem:[%s7738_s8 + $0x70] sm:$0xf] }
  0x35   : > { %v520_v49 = vsel %vm7787_vm3, %v515_v35, %v519_v2  ;;  %v548_v53 = vrot.slane %v546_v42, 4  ;;  %v538_v3 = vor.u32 %v537_v46, %v533_v36  ;;  %v559_v16 = vshrl.u32 %v7958_v31, 16  ;;  %10971 = vst [vmem:[#allocation32_spill] sm:$0xff] %v7985_v15  ;;  %10973 = vst [vmem:[#allocation34_spill] sm:$0xff] %v7993_v26 }
  0x36   : > { %v7981_v55 = vcombine.low %v510_v43, %v520_v49  ;;  %v529_v1 = vrot.slane %v528_v4, 4  ;;  %v551_v2 = vrot.slane %v549_v56, 5  ;;  %v557_v17 = vrot.slane %v555_v62, 5  ;;  %v8001_v4 = vld [vmem:[%s7738_s8 + $0x78] sm:$0xf] }
  0x37   : > { %v565_v19 = vshll.u32 %v7970_v48, 16  ;;  %v7990_v25 = vcombine.low %v7950_v11, %v7958_v31  ;;  %v539_v35 = vrot.slane %v538_v3, 4  ;;  %v561_v42 = vrot.slane %v559_v16, 4  ;;  %10974 = vst [vmem:[#allocation35_spill] sm:$0xff] %v8001_v4  ;;  %v8008_v62 = vld [vmem:[%s7738_s8 + $0x7c] sm:$0xf] }
  0x38   : > { %10970 = vst [vmem:[#allocation31_spill] sm:$0xff] %v7981_v55  ;;  %v534_v29 = vsel %vm7787_vm3, %v529_v1, %v533_v36  ;;  %6883 = vmatprep.mubr.msk.bf16.mxu0 %vm797_vm0, %v7981_v55  ;;  %v570_v43 = vshrl.u32 %v7979_v63, 16  ;;  %v552_v46 = vor.u32 %v551_v2, %v548_v53  ;;  %v573_v56 = vshll.u32 %v7979_v63, 16  ;;  %10975 = vst [vmem:[#allocation36_spill] sm:$0xff] %v8008_v62  ;;  %v8016_v11 = vld [vmem:[%s7738_s8 + $0x80] sm:$0x1] }
  0x39   : > { %10972 = vst [vmem:[#allocation33_spill] sm:$0xff] %v7990_v25  ;;  %v567_v49 = vrot.slane %v565_v19, 5  ;;  %6923 = vmatprep.mubr.msk.bf16.mxu1 %vm797_vm0, %v7990_v25  ;;  %v579_v36 = vshll.u32 %v7985_v15, 16  ;;  %v544_v1 = vsel %vm7787_vm3, %v539_v35, %v543_v47  ;;  %v562_v3 = vor.u32 %v561_v42, %v557_v17  ;;  %10977 = vst [vmem:[#allocation38_spill] sm:$0xff] %v8016_v11  ;;  %v8024_v47 = vld [vmem:[%s7738_s8 + $0x84] sm:$0xf] }
  0x3a   : > { %v572_v16 = vrot.slane %v570_v43, 4  ;;  %v583_v9 = vshrl.u32 %v7985_v15, 16  ;;  %v8013_v48 = vcombine.low %v534_v29, %v544_v1  ;;  %v553_v53 = vrot.slane %v552_v46, 4  ;;  %10979 = vst [vmem:[#allocation40_spill] sm:$0xff] %v8024_v47  ;;  %v8038_v1 = vld [vmem:[%s7738_s8 + $0x88] sm:$0xf] }
  0x3b   : > { %v575_v2 = vrot.slane %v573_v56, 5  ;;  %v581_v19 = vrot.slane %v579_v36, 5  ;;  %v563_v31 = vrot.slane %v562_v3, 4  ;;  %v589_v38 = vshll.u32 %v7993_v26, 16  ;;  %10980 = vst [vmem:[#allocation41_spill] sm:$0xff] %v8038_v1 }
  0x3c   : > { %10976 = vst [vmem:[#allocation37_spill] sm:$0xff] %v8013_v48  ;;  %v585_v57 = vrot.slane %v583_v9, 4  ;;  %v8021_v30 = vcombine.low %v7979_v63, %v7985_v15  ;;  %6884 = vmatmul.mubr.msk.bf16.gmra.mxu0 %vm797_vm0, %v8013_v48  ;;  %v558_v29 = vsel %vm7787_vm3, %v553_v53, %v557_v17  ;;  %v594_v42 = vshrl.u32 %v8001_v4, 16 }
  0x3d   : > { %v576_v35 = vor.u32 %v575_v2, %v572_v16  ;;  %v597_v9 = vshll.u32 %v8001_v4, 16  ;;  %v568_v43 = vsel %vm7787_vm3, %v563_v31, %v567_v49  ;;  %v591_v56 = vrot.slane %v589_v38, 5  ;;  %v8043_v2 = vld [vmem:[%s7738_s8 + $0x8c] sm:$0x1]  ;;  %v8048_v31 = vld [vmem:[%s7738_s8 + $0x90] sm:$0xf] }
  0x3e   : > { %10978 = vst [vmem:[#allocation39_spill] sm:$0xff] %v8021_v30  ;;  %v586_v46 = vor.u32 %v585_v57, %v581_v19  ;;  %6924 = vmatmul.mubr.msk.bf16.gmra.mxu1 %vm797_vm0, %v8021_v30  ;;  %v603_v36 = vshll.u32 %v8008_v62, 16  ;;  %v8040_v3 = vcombine.low %v558_v29, %v568_v43  ;;  %v596_v16 = vrot.slane %v594_v42, 4  ;;  %10982 = vst [vmem:[#allocation43_spill] sm:$0xff] %v8043_v2 }
  0x3f   : > { %v577_v17 = vrot.slane %v576_v35, 4  ;;  %v599_v53 = vrot.slane %v597_v9, 5  ;;  %v607_v57 = vshrl.u32 %v8008_v62, 16  ;;  %v613_v38 = vshll.u32 %v8016_v11, 16  ;;  %10983 = vst [vmem:[#allocation44_spill] sm:$0xff] %v8048_v31 }
  0x40   : > { %10981 = vst [vmem:[#allocation42_spill] sm:$0xff] %v8040_v3  ;;  %v587_v26 = vrot.slane %v586_v46, 4  ;;  %v605_v63 = vrot.slane %v603_v36, 5  ;;  %6887 = vmatprep.mubr.msk.bf16.mxu0 %vm797_vm0, %v8040_v3  ;;  %v8056_v35 = vcombine.low %v8001_v4, %v8008_v62  ;;  %v618_v42 = vshrl.u32 %v8024_v47, 16  ;;  %v8063_v11 = vld [vmem:[%s7738_s8 + $0x94] sm:$0xf] }
  0x41   : > { %v582_v49 = vsel %vm7787_vm3, %v577_v17, %v581_v19  ;;  %v600_v29 = vor.u32 %v599_v53, %v596_v16  ;;  %v609_v43 = vrot.slane %v607_v57, 4  ;;  %v615_v46 = vrot.slane %v613_v38, 5  ;;  %10985 = vst [vmem:[#allocation46_spill] sm:$0xff] %v8063_v11  ;;  %v8071_v4 = vld [vmem:[%s7738_s8 + $0x98] sm:$0x1] }
  0x42   : > { %10984 = vst [vmem:[#allocation45_spill] sm:$0xff] %v8056_v35  ;;  %v592_v9 = vsel %vm7787_vm3, %v587_v26, %v591_v56  ;;  %v621_v36 = vshll.u32 %v8024_v47, 16  ;;  %6927 = vmatprep.mubr.msk.bf16.mxu1 %vm797_vm0, %v8056_v35  ;;  %v620_v16 = vrot.slane %v618_v42, 4  ;;  %v627_v53 = vshll.u32 %v8038_v1, 16  ;;  %10987 = vst [vmem:[#allocation48_spill] sm:$0xff] %v8071_v4 }
  0x43   : > { %v8065_v19 = vcombine.low %v582_v49, %v592_v9  ;;  %v601_v17 = vrot.slane %v600_v29, 4  ;;  %v610_v62 = vor.u32 %v609_v43, %v605_v63  ;;  %v631_v56 = vshrl.u32 %v8038_v1, 16 }
  0x44   : > { %v623_v26 = vrot.slane %v621_v36, 5  ;;  %v637_v57 = vshll.u32 %v8043_v2, 16  ;;  %v629_v49 = vrot.slane %v627_v53, 5  ;;  %v8081_v29 = vcombine.low %v8024_v47, %v8038_v1  ;;  %v8085_v2 = vld [vmem:[%s7738_s8 + $0x9c] sm:$0xf] }
  0x45   : > { %10986 = vst [vmem:[#allocation47_spill] sm:$0xff] %v8065_v19  ;;  %6888 = vmatmul.mubr.msk.bf16.gmra.mxu0 %vm797_vm0, %v8065_v19  ;;  %v606_v38 = vsel %vm7787_vm3, %v601_v17, %v605_v63  ;;  %v642_v42 = vshrl.u32 %v8048_v31, 16  ;;  %v611_v9 = vrot.slane %v610_v62, 4  ;;  %v633_v36 = vrot.slane %v631_v56, 4  ;;  %10989 = vst [vmem:[#allocation50_spill] sm:$0xff] %v8085_v2 }
  0x46   : > { %10988 = vst [vmem:[#allocation49_spill] sm:$0xff] %v8081_v29  ;;  %v624_v43 = vor.u32 %v623_v26, %v620_v16  ;;  %v639_v15 = vrot.slane %v637_v57, 5  ;;  %6928 = vmatmul.mubr.msk.bf16.gmra.mxu1 %vm797_vm0, %v8081_v29  ;;  %v645_v51 = vshll.u32 %v8048_v31, 16  ;;  %v651_v63 = vshll.u32 %v8063_v11, 16  ;;  %v8093_v53 = vld [vmem:[%s7738_s8 + $0xa0] sm:$0xf] }
  0x47   : > { %v644_v5 = vrot.slane %v642_v42, 4  ;;  %v655_v17 = vshrl.u32 %v8063_v11, 16  ;;  %10990 = vst [vmem:[#allocation51_spill] sm:$0xff] %v8093_v53  ;;  %v8096_v47 = vld [vmem:[%s7738_s8 + $0xa4] sm:$0x1]  ;;  %v616_v62 = vsel %vm7787_vm3, %v611_v9, %v615_v46  ;;  %v634_v26 = vor.u32 %v633_v36, %v629_v49 }
  0x48   : > { %10991 = vst [vmem:[#allocation52_spill] sm:$0xff] %v8096_v47  ;;  %v625_v16 = vrot.slane %v624_v43, 4  ;;  %v661_v56 = vshll.u32 %v8071_v4, 16  ;;  %v8101_v57 = vcombine.low %v606_v38, %v616_v62  ;;  %v647_v42 = vrot.slane %v645_v51, 5  ;;  %v8110_v46 = vld [vmem:[%s7738_s8 + $0xa8] sm:$0xf] }
  0x49   : > { %v653_v1 = vrot.slane %v651_v63, 5  ;;  %v657_v24 = vrot.slane %v655_v17, 4  ;;  %v635_v40 = vrot.slane %v634_v26, 4  ;;  %v8107_v14 = vcombine.low %v8048_v31, %v8063_v11  ;;  %10994 = vst [vmem:[#allocation55_spill] sm:$0xff] %v8110_v46  ;;  %v8124_v62 = vld [vmem:[%s7738_s8 + $0xac] sm:$0xf] }
  0x4a   : > { %10992 = vst [vmem:[#allocation53_spill] sm:$0xff] %v8101_v57  ;;  %v630_v61 = vsel %vm7787_vm3, %v625_v16, %v629_v49  ;;  %v663_v32 = vrot.slane %v661_v56, 5  ;;  %6891 = vmatprep.mubr.msk.bf16.mxu0 %vm797_vm0, %v8101_v57  ;;  %v648_v38 = vor.u32 %v647_v42, %v644_v5  ;;  %v666_v9 = vshrl.u32 %v8085_v2, 16  ;;  %10995 = vst [vmem:[#allocation56_spill] sm:$0xff] %v8124_v62  ;;  %v8127_v5 = vld [vmem:[%s7738_s8 + $0xb0] sm:$0x1] }
  0x4b   : > { %10993 = vst [vmem:[#allocation54_spill] sm:$0xff] %v8107_v14  ;;  %v658_v51 = vor.u32 %v657_v24, %v653_v1  ;;  %v669_v43 = vshll.u32 %v8085_v2, 16  ;;  %v640_v49 = vsel %vm7787_vm3, %v635_v40, %v639_v15  ;;  %6931 = vmatprep.mubr.msk.bf16.mxu1 %vm797_vm0, %v8107_v14  ;;  %v675_v36 = vshll.u32 %v8093_v53, 16  ;;  %10996 = vst [vmem:[#allocation57_spill] sm:$0xff] %v8127_v5  ;;  %v8132_v31 = vld [vmem:[%s7738_s8 + $0xb4] sm:$0xf] }
  0x4c   : > { %v679_v63 = vshrl.u32 %v8093_v53, 16  ;;  %v685_v17 = vshll.u32 %v8096_v47, 16  ;;  %v8129_v24 = vcombine.low %v630_v61, %v640_v49  ;;  %v649_v16 = vrot.slane %v648_v38, 4 }
  0x4d   : > { %v659_v26 = vrot.slane %v658_v51, 4  ;;  %v668_v56 = vrot.slane %v666_v9, 4  ;;  %v671_v40 = vrot.slane %v669_v43, 5  ;;  %v677_v15 = vrot.slane %v675_v36, 5 }
  0x4e   : > { %10997 = vst [vmem:[#allocation58_spill] sm:$0xff] %v8129_v24  ;;  %v681_v42 = vrot.slane %v679_v63, 4  ;;  %v687_v4 = vrot.slane %v685_v17, 5  ;;  %6892 = vmatmul.mubr.msk.bf16.gmra.mxu0 %vm797_vm0, %v8129_v24  ;;  %v654_v47 = vsel %vm7787_vm3, %v649_v16, %v653_v1  ;;  %v8142_v38 = vcombine.low %v8085_v2, %v8093_v53  ;;  %v8149_v63 = vld [vmem:[%s7738_s8 + $0xb8] sm:$0xf] }
  0x4f   : > { %v664_v61 = vsel %vm7787_vm3, %v659_v26, %v663_v32  ;;  %v690_v51 = vshrl.u32 %v8110_v46, 16  ;;  %v672_v43 = vor.u32 %v671_v40, %v668_v56  ;;  %v693_v36 = vshll.u32 %v8110_v46, 16  ;;  %v8157_v26 = vld [vmem:[%s7738_s8 + $0xbc] sm:$0x1] }
  0x50   : > { %10998 = vst [vmem:[#allocation59_spill] sm:$0xff] %v8142_v38  ;;  %v8145_v9 = vcombine.low %v654_v47, %v664_v61  ;;  %v682_v49 = vor.u32 %v681_v42, %v677_v15  ;;  %6932 = vmatmul.mubr.msk.bf16.gmra.mxu1 %vm797_vm0, %v8142_v38  ;;  %v699_v32 = vshll.u32 %v8124_v62, 16  ;;  %v703_v17 = vshrl.u32 %v8124_v62, 16 }
  0x51   : > { %v692_v1 = vrot.slane %v690_v51, 4  ;;  %v709_v16 = vshll.u32 %v8127_v5, 16  ;;  %v673_v47 = vrot.slane %v672_v43, 4  ;;  %v695_v56 = vrot.slane %v693_v36, 5 }
  0x52   : > { %10999 = vst [vmem:[#allocation60_spill] sm:$0xff] %v8145_v9  ;;  %v683_v61 = vrot.slane %v682_v49, 4  ;;  %6895 = vmatprep.mubr.msk.bf16.mxu0 %vm797_vm0, %v8145_v9  ;;  %v8163_v40 = vcombine.low %v8110_v46, %v8124_v62  ;;  %v701_v42 = vrot.slane %v699_v32, 5  ;;  %v705_v51 = vrot.slane %v703_v17, 4 }
  0x53   : > { %v711_v2 = vrot.slane %v709_v16, 5  ;;  %v714_v53 = vshrl.u32 %v8132_v31, 16  ;;  %v678_v5 = vsel %vm7787_vm3, %v673_v47, %v677_v15  ;;  %v696_v49 = vor.u32 %v695_v56, %v692_v1 }
  0x54   : > { %11000 = vst [vmem:[#allocation61_spill] sm:$0xff] %v8163_v40  ;;  %v688_v43 = vsel %vm7787_vm3, %v683_v61, %v687_v4  ;;  %6935 = vmatprep.mubr.msk.bf16.mxu1 %vm797_vm0, %v8163_v40  ;;  %v717_v36 = vshll.u32 %v8132_v31, 16  ;;  %v706_v46 = vor.u32 %v705_v51, %v701_v42  ;;  %v723_v17 = vshll.u32 %v8149_v63, 16 }
  0x55   : > { %v8173_v11 = vcombine.low %v678_v5, %v688_v43  ;;  %v716_v32 = vrot.slane %v714_v53, 4  ;;  %v697_v16 = vrot.slane %v696_v49, 4  ;;  %v727_v45 = vshrl.u32 %v8149_v63, 16 }
  0x56   : > { %v719_v62 = vrot.slane %v717_v36, 5  ;;  %v733_v15 = vshll.u32 %v8157_v26, 16  ;;  %v707_v4 = vrot.slane %v706_v46, 4  ;;  %v725_v1 = vrot.slane %v723_v17, 5  ;;  %v275_v17 = vld [vmem:[%s7738_s8 + $0xc4] sm:$0xf] }
  0x57   : > { %11001 = vst [vmem:[#allocation62_spill] sm:$0xff] %v8173_v11  ;;  %6896 = vmatmul.mubr.msk.bf16.gmra.mxu0 %vm797_vm0, %v8173_v11  ;;  %v8182_v47 = vcombine.low %v8132_v31, %v8149_v63  ;;  %v702_v53 = vsel %vm7787_vm3, %v697_v16, %v701_v42  ;;  %v729_v61 = vrot.slane %v727_v45, 4 }
  0x58   : > { %v720_v5 = vor.u32 %v719_v62, %v716_v32  ;;  %v712_v56 = vsel %vm7787_vm3, %v707_v4, %v711_v2  ;;  %v735_v49 = vrot.slane %v733_v15, 5  ;;  %v8229_v62 = vld [vmem:[%s10773_s3 + $0x8] sm:$0xff]   ;;  %v274_v32 = vld [vmem:[%s7738_s8 + $0xc0] sm:$0xf]  ;;  %v1531_v4 = vshll.u32 %v275_v17, 16 }
  0x59   : > { %11002 = vst [vmem:[#allocation63_spill] sm:$0xff] %v8182_v47  ;;  %6936 = vmatmul.mubr.msk.bf16.gmra.mxu1 %vm797_vm0, %v8182_v47  ;;  %v8190_v51 = vcombine.low %v702_v53, %v712_v56  ;;  %v730_v46 = vor.u32 %v729_v61, %v725_v1  ;;  %7011 = vmatprep.subr.bf16.mxu0 %v8229_v62  ;;  %v1522_v16 = vshrl.u32 %v274_v32, 16  ;;  %v1525_v15 = vshll.u32 %v274_v32, 16 }
  0x5a   : > { %v721_v43 = vrot.slane %v720_v5, 4  ;;  %6979 = vmatprep.mubr.msk.bf16.mxu1 %vm797_vm0, %v7820_v60  ;;  %v1533_v61 = vrot.slane %v1531_v4, 5 }
  0x5b   : > { %11003 = vst [vmem:[#allocation64_spill] sm:$0xff] %v8190_v51  ;;  %v731_v42 = vrot.slane %v730_v46, 4  ;;  %6899 = vmatprep.mubr.msk.bf16.mxu0 %vm797_vm0, %v8190_v51  ;;  %v1524_v53 = vrot.slane %v1522_v16, 4  ;;  %v1527_v5 = vrot.slane %v1525_v15, 5 }
  0x5c   : > { %v726_v36 = vsel %vm7787_vm3, %v721_v43, %v725_v1  ;;  %v1535_v1 = vshrl.u32 %v275_v17, 16  ;;  %v276_v43 = vld [vmem:[%s7738_s8 + $0xc8] sm:$0x1] }
  0x5d   : > { %v736_v45 = vsel %vm7787_vm3, %v731_v42, %v735_v49  ;;  %v1528_v46 = vor.u32 %v1527_v5, %v1524_v53  ;;  %v8277_v53 = vld [vmem:[%s10773_s3] sm:$0xff]   ;;  %v8287_v5 = vcombine.low %v274_v32, %v275_v17  ;;  %v6203_v32 = vrot.slane %v7750_v8, 9 }
  0x5e   : > { %v8200_v2 = vcombine.low %v726_v36, %v736_v45  ;;  %v1537_v56 = vrot.slane %v1535_v1, 4  ;;  %v1541_v36 = vshll.u32 %v276_v43, 16  ;;  %v7626_v43 = vld [vmem:[%s10771_s1 + $0x58] sm:$0xff]  }
  0x5f   : > { %v1529_v42 = vrot.slane %v1528_v46, 4  ;;  %11006 = vst [vmem:[#allocation67_spill] sm:$0xff] %v8287_v5  ;;  %v6202_v46 = vrot.slane %v7744_v6, 9  ;;  %7047 = vmatprep.subr.bf16.mxu1 %v7626_v43  ;;  %v2100_v6 = vrot.slane %v7777_v23, 5  ;;  %v2104_v23 = vrot.slane %v7794_v39, 5 }
  0x60   : > { %11004 = vst [vmem:[#allocation65_spill] sm:$0xff] %v8200_v2  ;;  %6900 = vmatmul.mubr.msk.bf16.gmra.mxu0 %vm797_vm0, %v8200_v2  ;;  %v1538_v49 = vor.u32 %v1537_v56, %v1533_v61  ;;  %v1543_v16 = vrot.slane %v1541_v36, 5  ;;  %v2097_v56 = vrot.slane %v7757_v12, 5  ;;  %v2093_v36 = vrot.slane %v7774_v22, 5 }
  0x61   : > { %6980 = vmatmul.mubr.msk.bf16.vlgmr.msra.gmra.mxu1 %vm797_vm0, %v7870_v41  ;;  %6943 = vmatprep.mubr.msk.bf16.mxu0 %vm797_vm0, %v7768_v18  ;;  %v1534_v15 = vsel %vm7787_vm3, %v1529_v42, %v1533_v61  ;;  %v2090_v61 = vrot.slane %v7747_v7, 5  ;;  %v7627_v7 = vld [vmem:[%s10771_s1 + $0x50] sm:$0xff]   ;;  %v11007_v12 = vmov 0 }
  0x62   : > { %6983 = vmatprep.mubr.msk.bf16.mxu1 %vm797_vm0, %v7898_v10  ;;  %v1539_v45 = vrot.slane %v1538_v49, 4  ;;  %v2099_v17 = vrot.slane %v2097_v56, 4  ;;  %7048 = vmatpush3.bf16.msra.mxu1 %v7626_v43  ;;  %v11008_v12 = vsel %vm8302_vm6, 4294967295, %v11007_v12  ;;  %v2106_v43 = vrot.slane %v2104_v23, 4 }
  0x63   : > { %v2092_v49 = vrot.slane %v2090_v61, 4  ;;  %11009 = vst [vmem:[#allocation68_spill] sm:$0xff] %v11008_v12  ;;  %7049 = vmatprep.subr.bf16.mxu1 %v7627_v7  ;;  %v2091_v22 = vsel %vm8302_vm6, %v6202_v46, %v2090_v61  ;;  %v8325_v61 = vld [vmem:[%s10771_s1 + $0x48] sm:$0xff]   ;;  %v2107_v46 = vrot.slane %v7798_v44, 5 }
  0x64   : > { %v1544_v4 = vsel %vm7787_vm3, %v1539_v45, %v1543_v16  ;;  %v2098_v45 = vsel %vm8302_vm6, %v6203_v32, %v2097_v56  ;;  %v2101_v16 = vsel %vm8302_vm6, %v2099_v17, %v2100_v6  ;;  %v6204_v56 = vrot.slane %v7782_v28, 9 }
  0x65   : > { %v8272_v1 = vcombine.low %v1534_v15, %v1544_v4  ;;  %v2094_v8 = vsel %vm8302_vm6, %v2092_v49, %v2093_v36  ;;  %v8315_v15 = vcombine.low %v2098_v45, %v2101_v16  ;;  %v2111_v4 = vrot.slane %v7818_v59, 5  ;;  %v11015_v45 = vld [vmem:[#allocation9_spill] sm:$0xff] }
  0x66   : > { %7050 = vmatpush3.bf16.msra.mxu1 %v7627_v7  ;;  %v6218_v42 = vcombine.low %v2091_v22, %v2094_v8  ;;  %v6205_v49 = vrot.slane %v7808_v54, 9  ;;  %v2114_v32 = vrot.slane %v7823_v0, 5  ;;  %v2105_v39 = vsel %vm8302_vm6, %v6204_v56, %v2104_v23  ;;  %v11013_v7 = vld [vmem:[#allocation12_spill] sm:$0xff]  ;;  %v11014_v22 = vld [vmem:[#allocation7_spill] sm:$0xff]  ;;  %v11016_v23 = vld [vmem:[#allocation10_spill] sm:$0xff] }
  0x67   : > { %11005 = vst [vmem:[#allocation66_spill] sm:$0xff] %v8272_v1  ;;  %11010 = vst [vmem:[#allocation69_spill] sm:$0xff] %v8315_v15  ;;  %v2113_v36 = vrot.slane %v2111_v4, 4  ;;  %v2108_v59 = vsel %vm8302_vm6, %v2106_v43, %v2107_v46  ;;  %v2118_v0 = vrot.slane %v7843_v21, 5  ;;  %v2125_v6 = vrot.slane %v11013_v7, 5  ;;  %v11017_v43 = vld [vmem:[#allocation14_spill] sm:$0xff] }
  0x68   : > { %6944 = vmatmul.mubr.msk.bf16.vlgmr.msra.gmra.mxu0 %vm797_vm0, %v7815_v58  ;;  %v8336_v17 = vcombine.low %v2105_v39, %v2108_v59  ;;  %v2112_v28 = vsel %vm8302_vm6, %v6205_v49, %v2111_v4  ;;  %v6206_v8 = vrot.slane %v11014_v22, 9  ;;  %v2121_v16 = vrot.slane %v11015_v45, 5  ;;  %v11022_v22 = vld [vmem:[#allocation15_spill] sm:$0xff] }
  0x69   : > { %6984 = vmatmul.mubr.msk.bf16.gmra.mxu1 %vm797_vm0, %v7918_v34  ;;  %6947 = vmatprep.mubr.msk.bf16.mxu0 %vm797_vm0, %v7851_v27  ;;  %v2115_v44 = vsel %vm8302_vm6, %v2113_v36, %v2114_v32  ;;  %v6207_v4 = vrot.slane %v11016_v23, 9  ;;  %v2127_v56 = vrot.slane %v2125_v6, 4  ;;  %v2128_v46 = vrot.slane %v11017_v43, 5  ;;  %v11023_v45 = vld [vmem:[#allocation19_spill] sm:$0xff] }
  0x6a   : > { %6987 = vmatprep.mubr.msk.bf16.mxu1 %vm797_vm0, %v7952_v13  ;;  %7012 = vmatpush3.bf16.msra.mxu0 %v8229_v62  ;;  %11011 = vst [vmem:[#allocation70_spill] sm:$0xff] %v8336_v17  ;;  %v8342_v54 = vcombine.low %v2112_v28, %v2115_v44  ;;  %v2119_v49 = vsel %vm8302_vm6, %v6206_v8, %v2118_v0  ;;  %v11020_v28 = vld [vmem:[#allocation18_spill] sm:$0xff]  ;;  %v6208_v8 = vrot.slane %v11022_v22, 9  ;;  %v2198_v27 = vrot.slane %v8157_v26, 5 }
  0x6b   : > { %7013 = vmatprep.subr.bf16.mxu0 %v8277_v53  ;;  %v2126_v21 = vsel %vm8302_vm6, %v6207_v4, %v2125_v6  ;;  %v2129_v39 = vsel %vm8302_vm6, %v2127_v56, %v2128_v46  ;;  %v2132_v44 = vrot.slane %v11020_v28, 5  ;;  %v2135_v6 = vrot.slane %v11023_v45, 5  ;;  %v11025_v56 = vld [vmem:[#allocation24_spill] sm:$0xff] }
  0x6c   : > { %11012 = vst [vmem:[#allocation71_spill] sm:$0xff] %v8342_v54  ;;  %v8364_v59 = vcombine.low %v2126_v21, %v2129_v39  ;;  %v2142_v43 = vrot.slane %v11025_v56, 5 }
  0x6d   : > { %v2133_v46 = vsel %vm8302_vm6, %v6208_v8, %v2132_v44 }
  0x6e   : > { %7014 = vmatpush3.bf16.msra.mxu0 %v8277_v53  ;;  %11019 = vst [vmem:[#allocation7_spill] sm:$0xff] %v8364_v59 }
  0x6f   : > { %7083 = vmatprep.subr.bf16.mxu0 %v8325_v61 }
  0x70   : > { %6948 = vmatmul.mubr.msk.bf16.gmra.mxu0 %vm797_vm0, %v7882_v52 }
  0x71   : > { %6988 = vmatmul.mubr.msk.bf16.gmra.mxu1 %vm797_vm0, %v7981_v55  ;;  %6951 = vmatprep.mubr.msk.bf16.mxu0 %vm797_vm0, %v7903_v20 }
  0x72   : > { %6991 = vmatprep.mubr.msk.bf16.mxu1 %vm797_vm0, %v8013_v48 }
  0x78   : > { %6952 = vmatmul.mubr.msk.bf16.gmra.mxu0 %vm797_vm0, %v7933_v50 }
  0x79   : > { %6992 = vmatmul.mubr.msk.bf16.gmra.mxu1 %vm797_vm0, %v8040_v3  ;;  %6955 = vmatprep.mubr.msk.bf16.mxu0 %vm797_vm0, %v7964_v37 }
  0x7a   : > { %6995 = vmatprep.mubr.msk.bf16.mxu1 %vm797_vm0, %v8065_v19 }
  0x80   : > { %6956 = vmatmul.mubr.msk.bf16.gmra.mxu0 %vm797_vm0, %v7990_v25 }
  0x81   : > { %6996 = vmatmul.mubr.msk.bf16.gmra.mxu1 %vm797_vm0, %v8101_v57  ;;  %6959 = vmatprep.mubr.msk.bf16.mxu0 %vm797_vm0, %v8021_v30  ;;  %v11049_v30 = vld [vmem:[#allocation52_spill] sm:$0xff] }
  0x82   : > { %6999 = vmatprep.mubr.msk.bf16.mxu1 %vm797_vm0, %v8129_v24  ;;  %v2184_v25 = vrot.slane %v11049_v30, 5 }
  0x88   : > { %6960 = vmatmul.mubr.msk.bf16.gmra.mxu0 %vm797_vm0, %v8056_v35 }
  0x89   : > { %7000 = vmatmul.mubr.msk.bf16.gmra.mxu1 %vm797_vm0, %v8145_v9  ;;  %6963 = vmatprep.mubr.msk.bf16.mxu0 %vm797_vm0, %v8081_v29 }
  0x8a   : > { %7003 = vmatprep.mubr.msk.bf16.mxu1 %vm797_vm0, %v8173_v11 }
  0x90   : > { %6964 = vmatmul.mubr.msk.bf16.gmra.mxu0 %vm797_vm0, %v8107_v14 }
  0x91   : > { %7004 = vmatmul.mubr.msk.bf16.gmra.mxu1 %vm797_vm0, %v8190_v51  ;;  %6967 = vmatprep.mubr.msk.bf16.mxu0 %vm797_vm0, %v8142_v38 }
  0x92   : > { %7007 = vmatprep.mubr.msk.bf16.mxu1 %vm797_vm0, %v8200_v2 }
  0x98   : > { %6968 = vmatmul.mubr.msk.bf16.gmra.mxu0 %vm797_vm0, %v8163_v40 }
  0x99   : > { %7008 = vmatmul.mubr.msk.bf16.gmra.mxu1 %vm797_vm0, %v8272_v1  ;;  %6971 = vmatprep.mubr.msk.bf16.mxu0 %vm797_vm0, %v8182_v47 }
  0x9a   : > { %7051 = vmatprep.mubr.msk.bf16.mxu1 %vm797_vm0, %v6218_v42  ;;  %v2120_v42 = vrot.slane %v2118_v0, 4  ;;  %v11021_v0 = vld [vmem:[#allocation23_spill] sm:$0xff] }
  0x9b   : > { %v2139_v7 = vrot.slane %v11021_v0, 5 }
  0x9c   : > { %v2122_v36 = vsel %vm8302_vm6, %v2120_v42, %v2121_v16  ;;  %v2134_v42 = vrot.slane %v2132_v44, 4  ;;  %v11024_v16 = vld [vmem:[#allocation21_spill] sm:$0xff]  ;;  %v11028_v44 = vld [vmem:[#allocation27_spill] sm:$0xff] }
  0x9d   : > { %v8358_v32 = vcombine.low %v2119_v49, %v2122_v36  ;;  %v6209_v23 = vrot.slane %v11024_v16, 9  ;;  %v2141_v4 = vrot.slane %v2139_v7, 4  ;;  %v2146_v22 = vrot.slane %v11028_v44, 5 }
  0x9e   : > { %v2136_v49 = vsel %vm8302_vm6, %v2134_v42, %v2135_v6  ;;  %v11029_v42 = vld [vmem:[#allocation32_spill] sm:$0xff]  ;;  %v11030_v6 = vld [vmem:[#allocation25_spill] sm:$0xff] }
  0x9f   : > { %11018 = vst [vmem:[#allocation12_spill] sm:$0xff] %v8358_v32  ;;  %v8380_v36 = vcombine.low %v2133_v46, %v2136_v49  ;;  %v2140_v21 = vsel %vm8302_vm6, %v6209_v23, %v2139_v7  ;;  %v2143_v39 = vsel %vm8302_vm6, %v2141_v4, %v2142_v43  ;;  %v2153_v45 = vrot.slane %v11029_v42, 5  ;;  %v11031_v23 = vld [vmem:[#allocation29_spill] sm:$0xff]  ;;  %v11032_v4 = vld [vmem:[#allocation30_spill] sm:$0xff] }
  0xa0   : > { %6972 = vmatmul.mubr.msk.bf16.gmra.mxu0 %vm797_vm0, %v8287_v5  ;;  %v8386_v28 = vcombine.low %v2140_v21, %v2143_v39  ;;  %v6210_v16 = vrot.slane %v11030_v6, 9  ;;  %v2148_v7 = vrot.slane %v2146_v22, 4  ;;  %v2149_v56 = vrot.slane %v11031_v23, 5  ;;  %v11033_v49 = vld [vmem:[#allocation34_spill] sm:$0xff] }
  0xa1   : > { %7052 = vmatmul.mubr.msk.bf16.vlgmr.msra.gmra.mxu1 %vm797_vm0, %v8315_v15  ;;  %11026 = vst [vmem:[#allocation9_spill] sm:$0xff] %v8380_v36  ;;  %v6211_v43 = vrot.slane %v11032_v4, 9  ;;  %v2155_v46 = vrot.slane %v2153_v45, 4  ;;  %v2156_v21 = vrot.slane %v11033_v49, 5  ;;  %v11038_v4 = vld [vmem:[#allocation35_spill] sm:$0xff] }
  0xa2   : > { %7055 = vmatprep.mubr.msk.bf16.mxu1 %vm797_vm0, %v8336_v17  ;;  %11027 = vst [vmem:[#allocation10_spill] sm:$0xff] %v8386_v28  ;;  %v2147_v39 = vsel %vm8302_vm6, %v6210_v16, %v2146_v22  ;;  %v2150_v33 = vsel %vm8302_vm6, %v2148_v7, %v2149_v56  ;;  %v11036_v22 = vld [vmem:[#allocation36_spill] sm:$0xff]  ;;  %v6212_v49 = vrot.slane %v11038_v4, 9 }
  0xa3   : > { %v8404_v18 = vcombine.low %v2147_v39, %v2150_v33  ;;  %v2154_v42 = vsel %vm8302_vm6, %v6211_v43, %v2153_v45  ;;  %v2157_v6 = vsel %vm8302_vm6, %v2155_v46, %v2156_v21  ;;  %v2160_v16 = vrot.slane %v11036_v22, 5  ;;  %v11037_v33 = vld [vmem:[#allocation41_spill] sm:$0xff]  ;;  %v11039_v43 = vld [vmem:[#allocation38_spill] sm:$0xff]  ;;  %v11040_v46 = vld [vmem:[#allocation40_spill] sm:$0xff] }
  0xa4   : > { %v8410_v23 = vcombine.low %v2154_v42, %v2157_v6  ;;  %v2167_v56 = vrot.slane %v11037_v33, 5  ;;  %v2163_v39 = vrot.slane %v11039_v43, 5  ;;  %v6213_v21 = vrot.slane %v11040_v46, 9  ;;  %v11041_v6 = vld [vmem:[#allocation43_spill] sm:$0xff] }
  0xa5   : > { %11034 = vst [vmem:[#allocation14_spill] sm:$0xff] %v8404_v18  ;;  %v2162_v45 = vrot.slane %v2160_v16, 4  ;;  %v2170_v5 = vrot.slane %v11041_v6, 5  ;;  %v2161_v40 = vsel %vm8302_vm6, %v6212_v49, %v2160_v16  ;;  %v11045_v49 = vld [vmem:[#allocation51_spill] sm:$0xff] }
  0xa6   : > { %11035 = vst [vmem:[#allocation18_spill] sm:$0xff] %v8410_v23  ;;  %v2169_v42 = vrot.slane %v2167_v56, 4  ;;  %v2168_v4 = vsel %vm8302_vm6, %v6213_v21, %v2167_v56 }
  0xa7   : > { %v2164_v22 = vsel %vm8302_vm6, %v2162_v45, %v2163_v39  ;;  %v2181_v45 = vrot.slane %v11045_v49, 5  ;;  %v11046_v39 = vld [vmem:[#allocation44_spill] sm:$0xff] }
  0xa8   : > { %v8430_v14 = vcombine.low %v2161_v40, %v2164_v22  ;;  %v2171_v43 = vsel %vm8302_vm6, %v2169_v42, %v2170_v5  ;;  %v11044_v40 = vld [vmem:[#allocation46_spill] sm:$0xff]  ;;  %v6214_v21 = vrot.slane %v11046_v39, 9  ;;  %v11047_v42 = vld [vmem:[#allocation48_spill] sm:$0xff] }
  0xa9   : > { %7056 = vmatmul.mubr.msk.bf16.gmra.mxu1 %vm797_vm0, %v8342_v54  ;;  %v8436_v6 = vcombine.low %v2168_v4, %v2171_v43  ;;  %v2177_v22 = vrot.slane %v11047_v42, 5  ;;  %v11048_v43 = vld [vmem:[#allocation50_spill] sm:$0xff]  ;;  %v2183_v35 = vrot.slane %v2181_v45, 4 }
  0xaa   : > { %7059 = vmatprep.mubr.msk.bf16.mxu1 %vm797_vm0, %v8358_v32  ;;  %11042 = vst [vmem:[#allocation23_spill] sm:$0xff] %v8430_v14 }
  0xab   : > { %11043 = vst [vmem:[#allocation15_spill] sm:$0xff] %v8436_v6  ;;  %v2185_v42 = vsel %vm8302_vm6, %v2183_v35, %v2184_v25  ;;  %v2195_v25 = vrot.slane %v8149_v63, 5 }
  0xb1   : > { %7060 = vmatmul.mubr.msk.bf16.gmra.mxu1 %vm797_vm0, %v8364_v59 }
  0xb2   : > { %7063 = vmatprep.mubr.msk.bf16.mxu1 %vm797_vm0, %v8380_v36 }
  0xb9   : > { %7064 = vmatmul.mubr.msk.bf16.gmra.mxu1 %vm797_vm0, %v8386_v28 }
  0xba   : > { %7067 = vmatprep.mubr.msk.bf16.mxu1 %vm797_vm0, %v8404_v18 }
  0xc1   : > { %7068 = vmatmul.mubr.msk.bf16.gmra.mxu1 %vm797_vm0, %v8410_v23 }
  0xc2   : > { %7071 = vmatprep.mubr.msk.bf16.mxu1 %vm797_vm0, %v8430_v14 }
  0xc9   : > { %7072 = vmatmul.mubr.msk.bf16.gmra.mxu1 %vm797_vm0, %v8436_v6 }
  0xd6   : > { %v6909_v0 = vpop.f32.mrf.mxu1 }
  0xd8   : > { %v1181_v8 = vpop.f32.mrf.mxu1 }
  0xda   : > { %v8402_v44 = vpop.f32.mrf.mxu1 }
  0xdc   : > { %v8417_v7 = vpop.f32.mrf.mxu1 }
  0xe2   : > { %v6873_v47 = vpop.f32.mrf.mxu0 }
  0xe3   : > { %v8428_v38 = vadd.f32 %v6909_v0, %v6873_v47  ;;  %v6913_v33 = vpop.f32.mrf.mxu1  ;;  %v2174_v0 = vrot.slane %v11044_v40, 5 }
  0xe4   : > { %v880_v46 = vpop.f32.mrf.mxu0 }
  0xe5   : > { %v8438_v29 = vadd.f32 %v1181_v8, %v880_v46  ;;  %v1197_v16 = vpop.f32.mrf.mxu1  ;;  %v2176_v8 = vrot.slane %v2174_v0, 4  ;;  %v6215_v46 = vrot.slane %v11048_v43, 9  ;;  %v2175_v40 = vsel %vm8302_vm6, %v6214_v21, %v2174_v0 }
  0xe6   : > { %v8442_v47 = vpop.f32.mrf.mxu0 }
  0xe7   : > { %v6914_v56 = vpop.f32.mrf.mxu1  ;;  %v2178_v49 = vsel %vm8302_vm6, %v2176_v8, %v2177_v22  ;;  %v2182_v39 = vsel %vm8302_vm6, %v6215_v46, %v2181_v45  ;;  %v11052_v8 = vld [vmem:[#allocation56_spill] sm:$0xff] }
  0xe8   : > { %v8448_v5 = vpop.f32.mrf.mxu0  ;;  %v8460_v50 = vcombine.low %v2175_v40, %v2178_v49  ;;  %v8468_v52 = vcombine.low %v2182_v39, %v2185_v42  ;;  %v2188_v45 = vrot.slane %v11052_v8, 5  ;;  %v11054_v49 = vld [vmem:[#allocation57_spill] sm:$0xff] }
  0xe9   : > { %v8452_v4 = vpop.f32.mrf.mxu1  ;;  %v2191_v39 = vrot.slane %v11054_v49, 5 }
  0xea   : > { %v6877_v37 = vpop.f32.mrf.mxu0  ;;  %11050 = vst [vmem:[#allocation19_spill] sm:$0xff] %v8460_v50  ;;  %11051 = vst [vmem:[#allocation21_spill] sm:$0xff] %v8468_v52  ;;  %7075 = vmatprep.mubr.msk.bf16.mxu1 %vm797_vm0, %v8460_v50  ;;  %v2190_v40 = vrot.slane %v2188_v45, 4 }
  0xeb   : > { %v8466_v20 = vadd.f32 %v6913_v33, %v6877_v37  ;;  %7076 = vmatmul.mubr.msk.bf16.gmra.mxu1 %vm797_vm0, %v8468_v52  ;;  %v11053_v33 = vld [vmem:[#allocation55_spill] sm:$0xff] }
  0xec   : > { %v6917_v43 = vpop.f32.mrf.mxu1  ;;  %v896_v30 = vpop.f32.mrf.mxu0  ;;  %v6216_v46 = vrot.slane %v11053_v33, 9 }
  0xed   : > { %v8472_v0 = vadd.f32 %v1197_v16, %v896_v30  ;;  %v6217_v16 = vrot.slane %v8132_v31, 9  ;;  %v2197_v30 = vrot.slane %v2195_v25, 4 }
  0xee   : > { %v1213_v21 = vpop.f32.mrf.mxu1  ;;  %v6878_v22 = vpop.f32.mrf.mxu0  ;;  %v2189_v63 = vsel %vm8302_vm6, %v6216_v46, %v2188_v45  ;;  %v7630_v45 = vld [vmem:[%s10771_s1 + $0x68] sm:$0xff]   ;;  %v7631_v46 = vld [vmem:[%s10771_s1 + $0x60] sm:$0xff]  }
  0xef   : > { %v8478_v37 = vadd.f32 %v6914_v56, %v6878_v22  ;;  %v2192_v56 = vsel %vm8302_vm6, %v2190_v40, %v2191_v39  ;;  %v2196_v33 = vsel %vm8302_vm6, %v6217_v16, %v2195_v25  ;;  %v2199_v31 = vsel %vm8302_vm6, %v2197_v30, %v2198_v27  ;;  %7119 = vmatprep.subr.bf16.mxu1 %v7630_v45 }
  0xf0   : > { %v6918_v35 = vpop.f32.mrf.mxu1  ;;  %v8482_v42 = vpop.f32.mrf.mxu0  ;;  %v8492_v22 = vcombine.low %v2189_v63, %v2192_v56  ;;  %v8500_v26 = vcombine.low %v2196_v33, %v2199_v31  ;;  %7120 = vmatpush3.bf16.msra.mxu1 %v7630_v45 }
  0xf1   : > { %7121 = vmatprep.subr.bf16.mxu1 %v7631_v46 }
  0xf2   : > { %v8486_v58 = vpop.f32.mrf.mxu1  ;;  %11055 = vst [vmem:[#allocation24_spill] sm:$0xff] %v8492_v22  ;;  %11056 = vst [vmem:[#allocation27_spill] sm:$0xff] %v8500_v26  ;;  %7079 = vmatprep.mubr.msk.bf16.mxu1 %vm797_vm0, %v8492_v22 }
  0xf3   : > { %v6881_v8 = vpop.f32.mrf.mxu0  ;;  %7080 = vmatmul.mubr.msk.bf16.gmra.mxu1 %vm797_vm0, %v8500_v26 }
  0xf4   : > { %v8498_v49 = vadd.f32 %v6917_v43, %v6881_v8  ;;  %v6921_v39 = vpop.f32.mrf.mxu1  ;;  %7123 = vmatprep.mubr.msk.bf16.mxu1 %vm797_vm0, %v7820_v60  ;;  %7122 = vmatpush3.bf16.msra.mxu1 %v7631_v46 }
  0xf5   : > { %v912_v40 = vpop.f32.mrf.mxu0  ;;  %7191 = vmatprep.subr.bf16.mxu1 %v8229_v62 }
  0xf6   : > { %v8510_v25 = vadd.f32 %v1213_v21, %v912_v40  ;;  %v1229_v43 = vpop.f32.mrf.mxu1 }
  0xf7   : > { %v6882_v27 = vpop.f32.mrf.mxu0 }
  0xf8   : > { %v8516_v16 = vadd.f32 %v6918_v35, %v6882_v27  ;;  %v6922_v63 = vpop.f32.mrf.mxu1 }
  0xf9   : > { %v8518_v30 = vpop.f32.mrf.mxu0 }
  0xfa   : > { %v8520_v56 = vpop.f32.mrf.mxu1 }
  0xfb   : > { %7124 = vmatmul.mubr.msk.bf16.vlgmr.msra.gmra.mxu1 %vm797_vm0, %v7870_v41 }
  0xfc   : > { %v6885_v21 = vpop.f32.mrf.mxu0  ;;  %7127 = vmatprep.mubr.msk.bf16.mxu1 %vm797_vm0, %v7898_v10  ;;  %7192 = vmatpush3.bf16.msra.mxu1 %v8229_v62 }
  0xfd   : > { %v8523_v8 = vadd.f32 %v6921_v39, %v6885_v21  ;;  %7193 = vmatprep.subr.bf16.mxu1 %v8277_v53 }
  0xfe   : > { %v6925_v33 = vpop.f32.mrf.mxu1  ;;  %v928_v31 = vpop.f32.mrf.mxu0 }
  0xff   : > { %v8530_v35 = vadd.f32 %v1229_v43, %v928_v31 }
 0x100   : > { %v1245_v45 = vpop.f32.mrf.mxu1  ;;  %v6886_v46 = vpop.f32.mrf.mxu0  ;;  %7194 = vmatpush3.bf16.msra.mxu1 %v8277_v53 }
 0x101   : > { %v8533_v40 = vadd.f32 %v6922_v63, %v6886_v46 }
 0x102   : > { %v6926_v39 = vpop.f32.mrf.mxu1  ;;  %v8535_v27 = vpop.f32.mrf.mxu0 }
 0x103   : > { %7128 = vmatmul.mubr.msk.bf16.gmra.mxu1 %vm797_vm0, %v7918_v34 }
 0x104   : > { %v8538_v21 = vpop.f32.mrf.mxu1  ;;  %7131 = vmatprep.mubr.msk.bf16.mxu1 %vm797_vm0, %v7952_v13 }
 0x105   : > { %v6889_v12 = vpop.f32.mrf.mxu0 }
 0x106   : > { %v8540_v26 = vadd.f32 %v6925_v33, %v6889_v12  ;;  %v6929_v43 = vpop.f32.mrf.mxu1 }
 0x107   : > { %v944_v62 = vpop.f32.mrf.mxu0 }
 0x108   : > { %v8546_v63 = vadd.f32 %v1245_v45, %v944_v62  ;;  %v1261_v46 = vpop.f32.mrf.mxu1 }
 0x109   : > { %v6890_v31 = vpop.f32.mrf.mxu0 }
 0x10a   : > { %v8548_v22 = vadd.f32 %v6926_v39, %v6890_v31  ;;  %v6930_v52 = vpop.f32.mrf.mxu1 }
 0x10b   : > { %v8550_v53 = vpop.f32.mrf.mxu0  ;;  %7132 = vmatmul.mubr.msk.bf16.gmra.mxu1 %vm797_vm0, %v7981_v55 }
 0x10c   : > { %v8552_v50 = vpop.f32.mrf.mxu1  ;;  %7135 = vmatprep.mubr.msk.bf16.mxu1 %vm797_vm0, %v8013_v48 }
 0x10e   : > { %v6893_v12 = vpop.f32.mrf.mxu0 }
 0x10f   : > { %v8558_v33 = vadd.f32 %v6929_v43, %v6893_v12 }
 0x110   : > { %v960_v45 = vpop.f32.mrf.mxu0  ;;  %v6933_v62 = vpop.f32.mrf.mxu1 }
 0x111   : > { %v8560_v6 = vadd.f32 %v1261_v46, %v960_v45 }
 0x112   : > { %v6894_v39 = vpop.f32.mrf.mxu0  ;;  %v1277_v31 = vpop.f32.mrf.mxu1 }
 0x113   : > { %v8562_v14 = vadd.f32 %v6930_v52, %v6894_v39  ;;  %7136 = vmatmul.mubr.msk.bf16.gmra.mxu1 %vm797_vm0, %v8040_v3 }
 0x114   : > { %v8564_v23 = vpop.f32.mrf.mxu0  ;;  %v6934_v18 = vpop.f32.mrf.mxu1  ;;  %7139 = vmatprep.mubr.msk.bf16.mxu1 %vm797_vm0, %v8065_v19 }
 0x116   : > { %v8568_v36 = vpop.f32.mrf.mxu1 }
 0x117   : > { %v6897_v28 = vpop.f32.mrf.mxu0 }
 0x118   : > { %v8572_v43 = vadd.f32 %v6933_v62, %v6897_v28 }
 0x119   : > { %v976_v46 = vpop.f32.mrf.mxu0  ;;  %v6937_v12 = vpop.f32.mrf.mxu1 }
 0x11a   : > { %v8574_v45 = vadd.f32 %v1277_v31, %v976_v46 }
 0x11b   : > { %v6898_v52 = vpop.f32.mrf.mxu0  ;;  %v1293_v39 = vpop.f32.mrf.mxu1  ;;  %7140 = vmatmul.mubr.msk.bf16.gmra.mxu1 %vm797_vm0, %v8101_v57 }
 0x11c   : > { %v8576_v59 = vadd.f32 %v6934_v18, %v6898_v52  ;;  %7143 = vmatprep.mubr.msk.bf16.mxu1 %vm797_vm0, %v8129_v24 }
 0x11d   : > { %v8578_v32 = vpop.f32.mrf.mxu0  ;;  %v6938_v54 = vpop.f32.mrf.mxu1 }
 0x11f   : > { %v8582_v17 = vpop.f32.mrf.mxu1 }
 0x120   : > { %v6901_v28 = vpop.f32.mrf.mxu0 }
 0x121   : > { %v6981_v62 = vpop.f32.mrf.mxu1  ;;  %v8586_v15 = vadd.f32 %v6937_v12, %v6901_v28 }
 0x122   : > { %v992_v31 = vpop.f32.mrf.mxu0 }
 0x123   : > { %v1597_v46 = vpop.f32.mrf.mxu1  ;;  %v8588_v19 = vadd.f32 %v1293_v39, %v992_v31  ;;  %7144 = vmatmul.mubr.msk.bf16.gmra.mxu1 %vm797_vm0, %v8145_v9  ;;  %v1193_v31 = vadd.f32 %v8402_v44, %v8442_v47  ;;  %v8605_v9 = vld [vmem:[%s10772_s2] ss:$0 sm:$0xff] }
 0x124   : > { %v6902_v18 = vpop.f32.mrf.mxu0  ;;  %7147 = vmatprep.mubr.msk.bf16.mxu1 %vm797_vm0, %v8173_v11  ;;  %v1185_v11 = vadd.f32 %v8417_v7, %v8448_v5 }
 0x125   : > { %v6982_v52 = vpop.f32.mrf.mxu1  ;;  %v8590_v3 = vadd.f32 %v6938_v54, %v6902_v18 }
 0x126   : > { %v8594_v57 = vpop.f32.mrf.mxu0 }
 0x127   : > { %v1600_v48 = vpop.f32.mrf.mxu1 }
 0x128   : > { %v6945_v24 = vpop.f32.mrf.mxu0 }
 0x129   : > { %v6985_v12 = vpop.f32.mrf.mxu1  ;;  %v1491_v28 = vadd.f32 %v6945_v24, %v8428_v38 }
 0x12a   : > { %v1362_v55 = vpop.f32.mrf.mxu0 }
 0x12b   : > { %v1613_v39 = vpop.f32.mrf.mxu1  ;;  %v1726_v54 = vadd.f32 %v6981_v62, %v1491_v28  ;;  %v1489_v18 = vadd.f32 %v1362_v55, %v8438_v29  ;;  %7148 = vmatmul.mubr.msk.bf16.gmra.mxu1 %vm797_vm0, %v8190_v51 }
 0x12c   : > { %v6946_v13 = vpop.f32.mrf.mxu0  ;;  %7151 = vmatprep.mubr.msk.bf16.mxu1 %vm797_vm0, %v8200_v2 }
 0x12d   : > { %v6986_v34 = vpop.f32.mrf.mxu1  ;;  %v1724_v10 = vadd.f32 %v1597_v46, %v1489_v18  ;;  %v1492_v24 = vadd.f32 %v6946_v13, %v1193_v31  ;;  %v1764_v55 = vadd.f32 %v8605_v9, %v1726_v54 }
 0x12e   : > { %v1365_v38 = vpop.f32.mrf.mxu0 }
 0x12f   : > { %v1616_v44 = vpop.f32.mrf.mxu1  ;;  %v1727_v29 = vadd.f32 %v6982_v52, %v1492_v24  ;;  %v1490_v47 = vadd.f32 %v1365_v38, %v1185_v11  ;;  %v1762_v41 = vadd.f32 %v8605_v9, %v1724_v10  ;;  %v1796_v18 = vmax.f32 %v1764_v55, 0.0 }
 0x130   : > { %v6949_v62 = vpop.f32.mrf.mxu0  ;;  %v1201_v24 = vadd.f32 %v8452_v4, %v8482_v42 }
 0x131   : > { %v6989_v28 = vpop.f32.mrf.mxu1  ;;  %v1765_v7 = vadd.f32 %v8605_v9, %v1727_v29  ;;  %v1725_v5 = vadd.f32 %v1600_v48, %v1490_v47  ;;  %v1495_v13 = vadd.f32 %v6949_v62, %v8466_v20  ;;  %v1794_v10 = vmax.f32 %v1762_v41, 0.0  ;;  %v7629_v41 = vld [vmem:[%s10771_s1 + $0x40] sm:$0xff]  }
 0x132   : > { %v1378_v46 = vpop.f32.mrf.mxu0 }
 0x133   : > { %v1629_v31 = vpop.f32.mrf.mxu1  ;;  %v1797_v51 = vmax.f32 %v1765_v7, 0.0  ;;  %v1763_v60 = vadd.f32 %v8605_v9, %v1725_v5  ;;  %v1493_v2 = vadd.f32 %v1378_v46, %v8472_v0  ;;  %v1730_v54 = vadd.f32 %v6985_v12, %v1495_v13  ;;  %7152 = vmatmul.mubr.msk.bf16.gmra.mxu1 %vm797_vm0, %v8272_v1 }
 0x134   : > { %v6950_v52 = vpop.f32.mrf.mxu0 }
 0x135   : > { %v6990_v11 = vpop.f32.mrf.mxu1  ;;  %v1827_v38 = vpack.c.bf16 %v1797_v51, %v1796_v18  ;;  %v1795_v29 = vmax.f32 %v1763_v60, 0.0  ;;  %v1728_v20 = vadd.f32 %v1613_v39, %v1493_v2  ;;  %v1496_v48 = vadd.f32 %v6950_v52, %v8478_v37  ;;  %v8639_v52 = vld [vmem:[%s10771_s1 + $0x78] sm:$0xff]  }
 0x136   : > { %v1381_v55 = vpop.f32.mrf.mxu0  ;;  %v1768_v0 = vadd.f32 %v8605_v9, %v1730_v54 }
 0x137   : > { %v1632_v47 = vpop.f32.mrf.mxu1  ;;  %v1494_v62 = vadd.f32 %v1381_v55, %v1201_v24  ;;  %v1826_v7 = vpack.c.bf16 %v1795_v29, %v1794_v10  ;;  %v1731_v12 = vadd.f32 %v6986_v34, %v1496_v48  ;;  %v1766_v2 = vadd.f32 %v8605_v9, %v1728_v20 }
 0x138   : > { %v6953_v5 = vpop.f32.mrf.mxu0  ;;  %v1217_v24 = vadd.f32 %v8486_v58, %v8518_v30 }
 0x139   : > { %v6993_v13 = vpop.f32.mrf.mxu1  ;;  %v1729_v60 = vadd.f32 %v1616_v44, %v1494_v62  ;;  %v1499_v51 = vadd.f32 %v6953_v5, %v8498_v49  ;;  %7015 = vmatprep.mubr.msk.bf16.mxu0 %vm797_vm0, %v1826_v7  ;;  %v1769_v4 = vadd.f32 %v8605_v9, %v1731_v12  ;;  %v1800_v44 = vmax.f32 %v1768_v0, 0.0 }
 0x13a   : > { %v1394_v37 = vpop.f32.mrf.mxu0  ;;  %7016 = vmatmul.mubr.msk.bf16.vlgmr.msra.gmra.mxu0 %vm797_vm0, %v1827_v38 }
 0x13b   : > { %v1645_v42 = vpop.f32.mrf.mxu1  ;;  %v1767_v34 = vadd.f32 %v8605_v9, %v1729_v60  ;;  %v1734_v39 = vadd.f32 %v6989_v28, %v1499_v51  ;;  %v1497_v46 = vadd.f32 %v1394_v37, %v8510_v25  ;;  %7084 = vmatpush3.bf16.msra.mxu0 %v8325_v61  ;;  %v1801_v18 = vmax.f32 %v1769_v4, 0.0 }
 0x13c   : > { %v6954_v49 = vpop.f32.mrf.mxu0  ;;  %7085 = vmatprep.subr.bf16.mxu0 %v7629_v41  ;;  %v1798_v25 = vmax.f32 %v1766_v2, 0.0 }
 0x13d   : > { %v6994_v54 = vpop.f32.mrf.mxu1  ;;  %v1799_v10 = vmax.f32 %v1767_v34, 0.0  ;;  %v1732_v38 = vadd.f32 %v1629_v31, %v1497_v46  ;;  %v1500_v28 = vadd.f32 %v6954_v49, %v8516_v16  ;;  %v1829_v29 = vpack.c.bf16 %v1801_v18, %v1800_v44 }
 0x13e   : > { %v1397_v61 = vpop.f32.mrf.mxu0  ;;  %v1772_v48 = vadd.f32 %v8605_v9, %v1734_v39 }
 0x13f   : > { %v1648_v20 = vpop.f32.mrf.mxu1  ;;  %v1735_v55 = vadd.f32 %v6990_v11, %v1500_v28  ;;  %v1498_v62 = vadd.f32 %v1397_v61, %v1217_v24  ;;  %7086 = vmatpush3.bf16.msra.mxu0 %v7629_v41  ;;  %v1828_v0 = vpack.c.bf16 %v1799_v10, %v1798_v25  ;;  %v1770_v58 = vadd.f32 %v8605_v9, %v1732_v38 }
 0x140   : > { %v6957_v7 = vpop.f32.mrf.mxu0  ;;  %7155 = vmatprep.subr.bf16.mxu0 %v8639_v52  ;;  %v1804_v51 = vmax.f32 %v1772_v48, 0.0 }
 0x141   : > { %v6997_v12 = vpop.f32.mrf.mxu1  ;;  %v1773_v30 = vadd.f32 %v8605_v9, %v1735_v55  ;;  %v1733_v31 = vadd.f32 %v1632_v47, %v1498_v62  ;;  %v1503_v16 = vadd.f32 %v6957_v7, %v8523_v8  ;;  %7019 = vmatprep.mubr.msk.bf16.mxu0 %vm797_vm0, %v1828_v0  ;;  %v1233_v47 = vadd.f32 %v8520_v56, %v8535_v27 }
 0x142   : > { %v1410_v5 = vpop.f32.mrf.mxu0  ;;  %7020 = vmatmul.mubr.msk.bf16.gmra.mxu0 %vm797_vm0, %v1829_v29  ;;  %v1802_v39 = vmax.f32 %v1770_v58, 0.0 }
 0x143   : > { %v1661_v60 = vpop.f32.mrf.mxu1  ;;  %v1805_v11 = vmax.f32 %v1773_v30, 0.0  ;;  %v1771_v41 = vadd.f32 %v8605_v9, %v1733_v31  ;;  %v1501_v2 = vadd.f32 %v1410_v5, %v8530_v35  ;;  %v1738_v4 = vadd.f32 %v6993_v13, %v1503_v16 }
 0x144   : > { %v6958_v37 = vpop.f32.mrf.mxu0 }
 0x145   : > { %v6998_v34 = vpop.f32.mrf.mxu1  ;;  %v1831_v8 = vpack.c.bf16 %v1805_v11, %v1804_v51  ;;  %v1803_v46 = vmax.f32 %v1771_v41, 0.0  ;;  %v1736_v44 = vadd.f32 %v1645_v42, %v1501_v2  ;;  %v1504_v18 = vadd.f32 %v6958_v37, %v8533_v40 }
 0x146   : > { %v1413_v49 = vpop.f32.mrf.mxu0  ;;  %v1776_v35 = vadd.f32 %v8605_v9, %v1738_v4 }
 0x147   : > { %v1664_v24 = vpop.f32.mrf.mxu1  ;;  %v1502_v10 = vadd.f32 %v1413_v49, %v1233_v47  ;;  %v1830_v38 = vpack.c.bf16 %v1803_v46, %v1802_v39  ;;  %v1739_v28 = vadd.f32 %v6994_v54, %v1504_v18  ;;  %v1774_v56 = vadd.f32 %v8605_v9, %v1736_v44 }
 0x148   : > { %v6961_v25 = vpop.f32.mrf.mxu0  ;;  %v1808_v54 = vmax.f32 %v1776_v35, 0.0 }
 0x149   : > { %v7001_v13 = vpop.f32.mrf.mxu1  ;;  %v1737_v29 = vadd.f32 %v1648_v20, %v1502_v10  ;;  %v1507_v61 = vadd.f32 %v6961_v25, %v8540_v26  ;;  %7023 = vmatprep.mubr.msk.bf16.mxu0 %vm797_vm0, %v1830_v38  ;;  %v1777_v27 = vadd.f32 %v8605_v9, %v1739_v28  ;;  %v1249_v26 = vadd.f32 %v8538_v21, %v8550_v53 }
 0x14a   : > { %v1426_v42 = vpop.f32.mrf.mxu0  ;;  %7024 = vmatmul.mubr.msk.bf16.gmra.mxu0 %vm797_vm0, %v1831_v8  ;;  %v1806_v16 = vmax.f32 %v1774_v56, 0.0 }
 0x14b   : > { %v1677_v40 = vpop.f32.mrf.mxu1  ;;  %v1775_v48 = vadd.f32 %v8605_v9, %v1737_v29  ;;  %v1742_v55 = vadd.f32 %v6997_v12, %v1507_v61  ;;  %v1505_v62 = vadd.f32 %v1426_v42, %v8546_v63  ;;  %v1809_v7 = vmax.f32 %v1777_v27, 0.0 }
 0x14c   : > { %v6962_v20 = vpop.f32.mrf.mxu0 }
 0x14d   : > { %v7002_v0 = vpop.f32.mrf.mxu1  ;;  %v1807_v58 = vmax.f32 %v1775_v48, 0.0  ;;  %v1740_v30 = vadd.f32 %v1661_v60, %v1505_v62  ;;  %v1508_v31 = vadd.f32 %v6962_v20, %v8548_v22  ;;  %v1833_v5 = vpack.c.bf16 %v1809_v7, %v1808_v54 }
 0x14e   : > { %v1429_v51 = vpop.f32.mrf.mxu0  ;;  %v1780_v12 = vadd.f32 %v8605_v9, %v1742_v55 }
 0x14f   : > { %v1680_v11 = vpop.f32.mrf.mxu1  ;;  %v1743_v63 = vadd.f32 %v6998_v34, %v1508_v31  ;;  %v1506_v41 = vadd.f32 %v1429_v51, %v1249_v26  ;;  %v1832_v4 = vpack.c.bf16 %v1807_v58, %v1806_v16  ;;  %v1778_v47 = vadd.f32 %v8605_v9, %v1740_v30 }
 0x150   : > { %v6965_v2 = vpop.f32.mrf.mxu0  ;;  %v1812_v8 = vmax.f32 %v1780_v12, 0.0 }
 0x151   : > { %v7005_v37 = vpop.f32.mrf.mxu1  ;;  %v1781_v39 = vadd.f32 %v8605_v9, %v1743_v63  ;;  %v1741_v21 = vadd.f32 %v1664_v24, %v1506_v41  ;;  %v1511_v53 = vadd.f32 %v6965_v2, %v8558_v33  ;;  %7027 = vmatprep.mubr.msk.bf16.mxu0 %vm797_vm0, %v1832_v4  ;;  %v1265_v24 = vadd.f32 %v8552_v50, %v8564_v23 }
 0x152   : > { %v1442_v22 = vpop.f32.mrf.mxu0  ;;  %7028 = vmatmul.mubr.msk.bf16.gmra.mxu0 %vm797_vm0, %v1833_v5  ;;  %v1810_v38 = vmax.f32 %v1778_v47, 0.0 }
 0x153   : > { %v1693_v60 = vpop.f32.mrf.mxu1  ;;  %v1813_v46 = vmax.f32 %v1781_v39, 0.0  ;;  %v1779_v44 = vadd.f32 %v8605_v9, %v1741_v21  ;;  %v1509_v34 = vadd.f32 %v1442_v22, %v8560_v6  ;;  %v1746_v18 = vadd.f32 %v7001_v13, %v1511_v53 }
 0x154   : > { %v6966_v49 = vpop.f32.mrf.mxu0  ;;  %v1297_v22 = vadd.f32 %v8582_v17, %v8594_v57 }
 0x155   : > { %v7006_v10 = vpop.f32.mrf.mxu1  ;;  %v1835_v33 = vpack.c.bf16 %v1813_v46, %v1812_v8  ;;  %v1811_v35 = vmax.f32 %v1779_v44, 0.0  ;;  %v1744_v28 = vadd.f32 %v1677_v40, %v1509_v34  ;;  %v1512_v25 = vadd.f32 %v6966_v49, %v8562_v14 }
 0x156   : > { %v1445_v29 = vpop.f32.mrf.mxu0  ;;  %v1784_v27 = vadd.f32 %v8605_v9, %v1746_v18 }
 0x157   : > { %v1510_v61 = vadd.f32 %v1445_v29, %v1265_v24  ;;  %v1834_v56 = vpack.c.bf16 %v1811_v35, %v1810_v38  ;;  %v1747_v6 = vadd.f32 %v7002_v0, %v1512_v25  ;;  %v1696_v48 = vpop.f32.mrf.mxu1  ;;  %v1782_v50 = vadd.f32 %v8605_v9, %v1744_v28 }
 0x158   : > { %v6969_v42 = vpop.f32.mrf.mxu0  ;;  %v1816_v7 = vmax.f32 %v1784_v27, 0.0 }
 0x159   : > { %v1745_v13 = vadd.f32 %v1680_v11, %v1510_v61  ;;  %v1515_v55 = vadd.f32 %v6969_v42, %v8572_v43  ;;  %7031 = vmatprep.mubr.msk.bf16.mxu0 %vm797_vm0, %v1834_v56  ;;  %v1785_v23 = vadd.f32 %v8605_v9, %v1747_v6  ;;  %v7009_v26 = vpop.f32.mrf.mxu1  ;;  %v1281_v43 = vadd.f32 %v8568_v36, %v8578_v32  ;;  %v11057_v42 = vld [vmem:[#allocation6_spill] sm:$0xff] }
 0x15a   : > { %v1458_v40 = vpop.f32.mrf.mxu0  ;;  %7032 = vmatmul.mubr.msk.bf16.gmra.mxu0 %vm797_vm0, %v1835_v33  ;;  %v1814_v16 = vmax.f32 %v1782_v50, 0.0  ;;  %v11060_v50 = vld [vmem:[#allocation16_spill] sm:$0xff] }
 0x15b   : > { %v1783_v14 = vadd.f32 %v8605_v9, %v1745_v13  ;;  %v1750_v62 = vadd.f32 %v7005_v37, %v1515_v55  ;;  %v1513_v54 = vadd.f32 %v1458_v40, %v8574_v45  ;;  %v1817_v20 = vmax.f32 %v1785_v23, 0.0  ;;  %v1709_v63 = vpop.f32.mrf.mxu1  ;;  %v11058_v13 = vld [vmem:[#allocation5_spill] sm:$0xff]  ;;  %v11059_v55 = vld [vmem:[#allocation11_spill] sm:$0xff]  ;;  %v11061_v23 = vld [vmem:[#allocation20_spill] sm:$0xff] }
 0x15c   : > { %v6970_v0 = vpop.f32.mrf.mxu0  ;;  %v11062_v40 = vld [vmem:[#allocation26_spill] sm:$0xff] }
 0x15d   : > { %v1815_v58 = vmax.f32 %v1783_v14, 0.0  ;;  %v1748_v30 = vadd.f32 %v1693_v60, %v1513_v54  ;;  %v1516_v31 = vadd.f32 %v6970_v0, %v8576_v59  ;;  %v1837_v5 = vpack.c.bf16 %v1817_v20, %v1816_v7  ;;  %v7010_v8 = vpop.f32.mrf.mxu1  ;;  %v11063_v14 = vld [vmem:[#allocation31_spill] sm:$0xff]  ;;  %v11067_v7 = vld [vmem:[#allocation53_spill] sm:$0xff]  ;;  %v11068_v20 = vld [vmem:[#allocation58_spill] sm:$0xff] }
 0x15e   : > { %v1461_v51 = vpop.f32.mrf.mxu0  ;;  %v1788_v11 = vadd.f32 %v8605_v9, %v1750_v62  ;;  %v11064_v62 = vld [vmem:[#allocation37_spill] sm:$0xff]  ;;  %v11066_v54 = vld [vmem:[#allocation47_spill] sm:$0xff]  ;;  %v11069_v0 = vld [vmem:[#allocation60_spill] sm:$0xff] }
 0x15f   : > { %v1751_v12 = vadd.f32 %v7006_v10, %v1516_v31  ;;  %v1514_v45 = vadd.f32 %v1461_v51, %v1281_v43  ;;  %v1836_v2 = vpack.c.bf16 %v1815_v58, %v1814_v16  ;;  %v1786_v4 = vadd.f32 %v8605_v9, %v1748_v30  ;;  %v11071_v43 = vld [vmem:[#allocation64_spill] sm:$0xff]  ;;  %v11072_v58 = vld [vmem:[#allocation65_spill] sm:$0xff]  ;;  %v11074_v16 = vld [vmem:[#allocation70_spill] sm:$0xff] }
 0x160   : > { %v6973_v41 = vpop.f32.mrf.mxu0  ;;  %v1820_v36 = vmax.f32 %v1788_v11, 0.0  ;;  %v11073_v30 = vld [vmem:[#allocation69_spill] sm:$0xff] }
 0x161   : > { %v1789_v37 = vadd.f32 %v8605_v9, %v1751_v12  ;;  %v1749_v47 = vadd.f32 %v1696_v48, %v1514_v45  ;;  %v1519_v32 = vadd.f32 %v6973_v41, %v8586_v15  ;;  %7035 = vmatprep.mubr.msk.bf16.mxu0 %vm797_vm0, %v1836_v2  ;;  %v1818_v44 = vmax.f32 %v1786_v4, 0.0  ;;  %v7633_v48 = vld [vmem:[%s10771_s1 + $0x70] sm:$0xff]   ;;  %v11077_v45 = vld [vmem:[#allocation7_spill] sm:$0xff]  ;;  %v11078_v2 = vld [vmem:[#allocation9_spill] sm:$0xff] }
 0x162   : > { %v1474_v59 = vpop.f32.mrf.mxu0  ;;  %7036 = vmatmul.mubr.msk.bf16.gmra.mxu0 %vm797_vm0, %v1837_v5  ;;  %v11075_v5 = vld [vmem:[#allocation71_spill] sm:$0xff]  ;;  %v11076_v12 = vld [vmem:[#allocation12_spill] sm:$0xff]  ;;  %v11079_v4 = vld [vmem:[#allocation10_spill] sm:$0xff] }
 0x163   : > { %v1821_v39 = vmax.f32 %v1789_v37, 0.0  ;;  %v1787_v21 = vadd.f32 %v8605_v9, %v1749_v47  ;;  %v1517_v53 = vadd.f32 %v1474_v59, %v8588_v19  ;;  %v1754_v60 = vadd.f32 %v7009_v26, %v1519_v32  ;;  %v1712_v19 = vpop.f32.mrf.mxu1  ;;  %v11070_v26 = vld [vmem:[#allocation62_spill] sm:$0xff] }
 0x164   : > { %v6974_v46 = vpop.f32.mrf.mxu0  ;;  %v11080_v32 = vld [vmem:[#allocation14_spill] sm:$0xff] }
 0x165   : > { %v1839_v34 = vpack.c.bf16 %v1821_v39, %v1820_v36  ;;  %v1819_v15 = vmax.f32 %v1787_v21, 0.0  ;;  %v1752_v18 = vadd.f32 %v1709_v63, %v1517_v53  ;;  %v1520_v49 = vadd.f32 %v6974_v46, %v8590_v3  ;;  %v8746_v31 = vpop.f32.mrf.mxu1  ;;  %v11081_v59 = vld [vmem:[#allocation18_spill] sm:$0xff]  ;;  %v11082_v21 = vld [vmem:[#allocation23_spill] sm:$0xff]  ;;  %v11085_v46 = vld [vmem:[#allocation21_spill] sm:$0xff] }
 0x166   : > { %v1477_v10 = vpop.f32.mrf.mxu0  ;;  %v1792_v33 = vadd.f32 %v8605_v9, %v1754_v60  ;;  %v11083_v53 = vld [vmem:[#allocation15_spill] sm:$0xff] }
 0x167   : > { %v1518_v24 = vadd.f32 %v1477_v10, %v1297_v22  ;;  %v1838_v38 = vpack.c.bf16 %v1819_v15, %v1818_v44  ;;  %v1755_v35 = vadd.f32 %v7010_v8, %v1520_v49  ;;  %v1790_v28 = vadd.f32 %v8605_v9, %v1752_v18  ;;  %v8752_v51 = vpop.f32.mrf.mxu1  ;;  %v11084_v8 = vld [vmem:[#allocation19_spill] sm:$0xff]  ;;  %v7651_v44 = vld [vmem:[%s7738_s8 + $0xc4] sm:$0xf]  ;;  %v7652_v18 = vld [vmem:[%s7738_s8 + $0xc0] sm:$0xf] }
 0x168   : > { %v1824_v29 = vmax.f32 %v1792_v33, 0.0  ;;  %v6288_v49 = vrot.slane %v7652_v18, 9 }
 0x169   : > { %v1753_v25 = vadd.f32 %v1712_v19, %v1518_v24  ;;  %7039 = vmatprep.mubr.msk.bf16.mxu0 %vm797_vm0, %v1838_v38  ;;  %v1793_v57 = vadd.f32 %v8605_v9, %v1755_v35  ;;  %v1822_v61 = vmax.f32 %v1790_v28, 0.0  ;;  %v8754_v11 = vpop.f32.mrf.mxu1  ;;  %v7653_v24 = vld [vmem:[%s7738_s8 + $0xc8] sm:$0x1]  ;;  %v11086_v19 = vld [vmem:[#allocation24_spill] sm:$0xff] }
 0x16a   : > { %7040 = vmatmul.mubr.msk.bf16.gmra.mxu0 %vm797_vm0, %v1839_v34  ;;  %v2850_v34 = vrot.slane %v7651_v44, 5  ;;  %v2853_v38 = vrot.slane %v7653_v24, 5  ;;  %v11087_v35 = vld [vmem:[#allocation27_spill] sm:$0xff] }
 0x16b   : > { %v1791_v17 = vadd.f32 %v8605_v9, %v1753_v25  ;;  %v1825_v3 = vmax.f32 %v1793_v57, 0.0  ;;  %v8760_v63 = vpop.f32.mrf.mxu1 }
 0x16c   : > { %v2852_v10 = vrot.slane %v2850_v34, 4  ;;  %v2851_v25 = vsel %vm8302_vm6, %v6288_v49, %v2850_v34  ;;  %v7634_v49 = vld [vmem:[%s10771_s1 + $0x98] sm:$0xff]  }
 0x16d   : > { %v1823_v56 = vmax.f32 %v1791_v17, 0.0  ;;  %v1841_v27 = vpack.c.bf16 %v1825_v3, %v1824_v29  ;;  %v8762_v41 = vpop.f32.mrf.mxu1 }
 0x16e   : > { %v2854_v57 = vsel %vm8302_vm6, %v2852_v10, %v2853_v38 }
 0x16f   : > { %v1840_v6 = vpack.c.bf16 %v1823_v56, %v1822_v61  ;;  %v8768_v37 = vpop.f32.mrf.mxu1  ;;  %v8809_v29 = vcombine.low %v2851_v25, %v2854_v57  ;;  %v7635_v25 = vld [vmem:[%s10771_s1 + $0x90] sm:$0xff]  }
 0x171   : > { %7043 = vmatprep.mubr.msk.bf16.mxu0 %vm797_vm0, %v1840_v6  ;;  %v8770_v47 = vpop.f32.mrf.mxu1  ;;  %11089 = vst [vmem:[#allocation32_spill] sm:$0xff] %v8809_v29 }
 0x172   : > { %7044 = vmatmul.mubr.msk.bf16.gmra.mxu0 %vm797_vm0, %v1841_v27 }
 0x173   : > { %7087 = vmatprep.mubr.msk.bf16.mxu0 %vm797_vm0, %v11057_v42  ;;  %v8776_v36 = vpop.f32.mrf.mxu1 }
 0x175   : > { %v8778_v39 = vpop.f32.mrf.mxu1 }
 0x177   : > { %v8784_v22 = vpop.f32.mrf.mxu1 }
 0x179   : > { %v8786_v60 = vpop.f32.mrf.mxu1 }
 0x17a   : > { %7088 = vmatmul.mubr.msk.bf16.vlgmr.msra.gmra.mxu0 %vm797_vm0, %v11058_v13 }
 0x17b   : > { %7156 = vmatpush3.bf16.msra.mxu0 %v8639_v52  ;;  %7091 = vmatprep.mubr.msk.bf16.mxu0 %vm797_vm0, %v11059_v55  ;;  %v11065_v52 = vld [vmem:[#allocation42_spill] sm:$0xff]  ;;  %v8793_v15 = vpop.f32.mrf.mxu1 }
 0x17c   : > { %7157 = vmatprep.subr.bf16.mxu0 %v7633_v48 }
 0x17d   : > { %v8797_v33 = vpop.f32.mrf.mxu1 }
 0x17f   : > { %7158 = vmatpush3.bf16.msra.mxu0 %v7633_v48  ;;  %v8807_v17 = vpop.f32.mrf.mxu1 }
 0x180   : > { %7227 = vmatprep.subr.bf16.mxu0 %v7634_v49 }
 0x181   : > { %v8811_v3 = vpop.f32.mrf.mxu1 }
 0x182   : > { %7092 = vmatmul.mubr.msk.bf16.gmra.mxu0 %vm797_vm0, %v11060_v50 }
 0x183   : > { %7095 = vmatprep.mubr.msk.bf16.mxu0 %vm797_vm0, %v11061_v23  ;;  %v8817_v61 = vpop.f32.mrf.mxu1 }
 0x185   : > { %v8819_v56 = vpop.f32.mrf.mxu1 }
 0x187   : > { %v8825_v42 = vpop.f32.mrf.mxu1 }
 0x189   : > { %v8831_v34 = vpop.f32.mrf.mxu1 }
 0x18a   : > { %7096 = vmatmul.mubr.msk.bf16.gmra.mxu0 %vm797_vm0, %v11062_v40  ;;  %11094 = vst [vmem:[#allocation36_spill] sm:$0xff] %v8831_v34 }
 0x18b   : > { %7099 = vmatprep.mubr.msk.bf16.mxu0 %vm797_vm0, %v11063_v14  ;;  %v8840_v24 = vpop.f32.mrf.mxu1 }
 0x18c   : > { %11097 = vst [vmem:[#allocation38_spill] sm:$0xff] %v8840_v24  ;;  %v11159_v24 = vld [vmem:[#allocation59_spill] sm:$0xff] }
 0x18d   : > { %v8849_v28 = vpop.f32.mrf.mxu1 }
 0x18e   : > { %11100 = vst [vmem:[#allocation46_spill] sm:$0xff] %v8849_v28  ;;  %v11153_v28 = vld [vmem:[#allocation49_spill] sm:$0xff] }
 0x192   : > { %7100 = vmatmul.mubr.msk.bf16.gmra.mxu0 %vm797_vm0, %v11064_v62 }
 0x193   : > { %7103 = vmatprep.mubr.msk.bf16.mxu0 %vm797_vm0, %v11065_v52 }
 0x19a   : > { %7104 = vmatmul.mubr.msk.bf16.gmra.mxu0 %vm797_vm0, %v11066_v54 }
 0x19b   : > { %7107 = vmatprep.mubr.msk.bf16.mxu0 %vm797_vm0, %v11067_v7 }
 0x1a2   : > { %7108 = vmatmul.mubr.msk.bf16.gmra.mxu0 %vm797_vm0, %v11068_v20 }
 0x1a3   : > { %7111 = vmatprep.mubr.msk.bf16.mxu0 %vm797_vm0, %v11069_v0 }
 0x1aa   : > { %7112 = vmatmul.mubr.msk.bf16.gmra.mxu0 %vm797_vm0, %v11070_v26 }
 0x1ab   : > { %7115 = vmatprep.mubr.msk.bf16.mxu0 %vm797_vm0, %v11071_v43 }
 0x1b2   : > { %7116 = vmatmul.mubr.msk.bf16.gmra.mxu0 %vm797_vm0, %v11072_v58 }
 0x1b3   : > { %7159 = vmatprep.mubr.msk.bf16.mxu0 %vm797_vm0, %v11073_v30 }
 0x1ba   : > { %7160 = vmatmul.mubr.msk.bf16.vlgmr.msra.gmra.mxu0 %vm797_vm0, %v11074_v16 }
 0x1bb   : > { %7163 = vmatprep.mubr.msk.bf16.mxu0 %vm797_vm0, %v11075_v5  ;;  %7228 = vmatpush3.bf16.msra.mxu0 %v7634_v49  ;;  %v11136_v5 = vld [vmem:[#allocation4_spill] sm:$0xff] }
 0x1bc   : > { %7229 = vmatprep.subr.bf16.mxu0 %v7635_v25 }
 0x1bf   : > { %7230 = vmatpush3.bf16.msra.mxu0 %v7635_v25 }
 0x1c2   : > { %7164 = vmatmul.mubr.msk.bf16.gmra.mxu0 %vm797_vm0, %v11076_v12 }
 0x1c3   : > { %7167 = vmatprep.mubr.msk.bf16.mxu0 %vm797_vm0, %v11077_v45 }
 0x1ca   : > { %7168 = vmatmul.mubr.msk.bf16.gmra.mxu0 %vm797_vm0, %v11078_v2  ;;  %v7639_v2 = vld [vmem:[%s10771_s1 + $0xa0] sm:$0xff]  }
 0x1cb   : > { %7171 = vmatprep.mubr.msk.bf16.mxu0 %vm797_vm0, %v11079_v4  ;;  %v7638_v4 = vld [vmem:[%s10771_s1 + $0xa8] sm:$0xff]  }
 0x1cc   : > { %7299 = vmatprep.subr.bf16.mxu0 %v7638_v4 }
 0x1d2   : > { %7172 = vmatmul.mubr.msk.bf16.gmra.mxu0 %vm797_vm0, %v11080_v32 }
 0x1d3   : > { %7175 = vmatprep.mubr.msk.bf16.mxu0 %vm797_vm0, %v11081_v59 }
 0x1da   : > { %7176 = vmatmul.mubr.msk.bf16.gmra.mxu0 %vm797_vm0, %v11082_v21 }
 0x1db   : > { %7179 = vmatprep.mubr.msk.bf16.mxu0 %vm797_vm0, %v11083_v53 }
 0x1e2   : > { %7180 = vmatmul.mubr.msk.bf16.gmra.mxu0 %vm797_vm0, %v11084_v8 }
 0x1e3   : > { %7183 = vmatprep.mubr.msk.bf16.mxu0 %vm797_vm0, %v11085_v46 }
 0x1ea   : > { %7184 = vmatmul.mubr.msk.bf16.gmra.mxu0 %vm797_vm0, %v11086_v19 }
 0x1eb   : > { %7187 = vmatprep.mubr.msk.bf16.mxu0 %vm797_vm0, %v11087_v35 }
 0x1f2   : > { %7188 = vmatmul.mubr.msk.bf16.gmra.mxu0 %vm797_vm0, %v8809_v29 }
 0x1f3   : > { %7231 = vmatprep.mubr.msk.bf16.mxu0 %vm797_vm0, %v11058_v13 }
 0x1fa   : > { %v8821_v27 = vpop.f32.mrf.mxu0  ;;  %7232 = vmatmul.mubr.msk.bf16.vlgmr.msra.gmra.mxu0 %vm797_vm0, %v11059_v55 }
 0x1fb   : > { %11090 = vst [vmem:[#allocation25_spill] sm:$0xff] %v8821_v27  ;;  %7235 = vmatprep.mubr.msk.bf16.mxu0 %vm797_vm0, %v11060_v50  ;;  %7300 = vmatpush3.bf16.msra.mxu0 %v7638_v4 }
 0x1fc   : > { %v8823_v6 = vpop.f32.mrf.mxu0  ;;  %7301 = vmatprep.subr.bf16.mxu0 %v7639_v2 }
 0x1fd   : > { %11091 = vst [vmem:[#allocation29_spill] sm:$0xff] %v8823_v6 }
 0x1fe   : > { %v8827_v48 = vpop.f32.mrf.mxu0 }
 0x1ff   : > { %11092 = vst [vmem:[#allocation30_spill] sm:$0xff] %v8827_v48  ;;  %7302 = vmatpush3.bf16.msra.mxu0 %v7639_v2  ;;  %v7655_v2 = vld [vmem:[%s10773_s3] sm:$0xff]  }
 0x200   : > { %v8829_v44 = vpop.f32.mrf.mxu0 }
 0x201   : > { %11093 = vst [vmem:[#allocation34_spill] sm:$0xff] %v8829_v44 }
 0x202   : > { %v8833_v18 = vpop.f32.mrf.mxu0  ;;  %7236 = vmatmul.mubr.msk.bf16.gmra.mxu0 %vm797_vm0, %v11061_v23  ;;  %v11139_v23 = vld [vmem:[#allocation17_spill] sm:$0xff] }
 0x203   : > { %11095 = vst [vmem:[#allocation41_spill] sm:$0xff] %v8833_v18  ;;  %7239 = vmatprep.mubr.msk.bf16.mxu0 %vm797_vm0, %v11062_v40 }
 0x204   : > { %v8838_v10 = vpop.f32.mrf.mxu0 }
 0x205   : > { %11096 = vst [vmem:[#allocation35_spill] sm:$0xff] %v8838_v10  ;;  %v8855_v10 = vpop.f32.mrf.mxu1 }
 0x206   : > { %v8842_v38 = vpop.f32.mrf.mxu0  ;;  %11103 = vst [vmem:[#allocation48_spill] sm:$0xff] %v8855_v10 }
 0x207   : > { %11098 = vst [vmem:[#allocation40_spill] sm:$0xff] %v8842_v38 }
 0x208   : > { %v8847_v57 = vpop.f32.mrf.mxu0 }
 0x209   : > { %11099 = vst [vmem:[#allocation43_spill] sm:$0xff] %v8847_v57  ;;  %v8866_v57 = vld [vmem:[%s10771_s1 + $0x88] sm:$0xff]  }
 0x20a   : > { %v8851_v13 = vpop.f32.mrf.mxu0  ;;  %7263 = vmatprep.subr.bf16.mxu1 %v8866_v57  ;;  %7240 = vmatmul.mubr.msk.bf16.gmra.mxu0 %vm797_vm0, %v11063_v14 }
 0x20b   : > { %11101 = vst [vmem:[#allocation51_spill] sm:$0xff] %v8851_v13  ;;  %v8870_v13 = vpop.f32.mrf.mxu1  ;;  %7243 = vmatprep.mubr.msk.bf16.mxu0 %vm797_vm0, %v11064_v62 }
 0x20c   : > { %v8853_v18 = vpop.f32.mrf.mxu0  ;;  %11106 = vst [vmem:[#allocation56_spill] sm:$0xff] %v8870_v13 }
 0x20d   : > { %11102 = vst [vmem:[#allocation44_spill] sm:$0xff] %v8853_v18  ;;  %v8877_v44 = vpop.f32.mrf.mxu1 }
 0x20e   : > { %v8861_v49 = vpop.f32.mrf.mxu0  ;;  %11109 = vst [vmem:[#allocation6_spill] sm:$0xff] %v8877_v44 }
 0x20f   : > { %11104 = vst [vmem:[#allocation50_spill] sm:$0xff] %v8861_v49 }
 0x210   : > { %v8868_v25 = vpop.f32.mrf.mxu0 }
 0x211   : > { %11105 = vst [vmem:[#allocation52_spill] sm:$0xff] %v8868_v25  ;;  %v8887_v25 = vpop.f32.mrf.mxu1 }
 0x212   : > { %v8873_v18 = vpop.f32.mrf.mxu0  ;;  %11112 = vst [vmem:[#allocation74_spill] sm:$0xff] %v8887_v25  ;;  %7244 = vmatmul.mubr.msk.bf16.gmra.mxu0 %vm797_vm0, %v11065_v52  ;;  %v11148_v25 = vld [vmem:[#allocation45_spill] sm:$0xff] }
 0x213   : > { %11107 = vst [vmem:[#allocation55_spill] sm:$0xff] %v8873_v18  ;;  %v8893_v18 = vpop.f32.mrf.mxu1  ;;  %7247 = vmatprep.mubr.msk.bf16.mxu0 %vm797_vm0, %v11066_v54 }
 0x214   : > { %v8875_v38 = vpop.f32.mrf.mxu0  ;;  %11115 = vst [vmem:[#allocation77_spill] sm:$0xff] %v8893_v18  ;;  %v11147_v18 = vld [vmem:[#allocation39_spill] sm:$0xff] }
 0x215   : > { %11108 = vst [vmem:[#allocation57_spill] sm:$0xff] %v8875_v38 }
 0x216   : > { %v8883_v49 = vpop.f32.mrf.mxu0 }
 0x217   : > { %11110 = vst [vmem:[#allocation72_spill] sm:$0xff] %v8883_v49  ;;  %v8903_v49 = vpop.f32.mrf.mxu1 }
 0x218   : > { %v8885_v48 = vpop.f32.mrf.mxu0  ;;  %11118 = vst [vmem:[#allocation80_spill] sm:$0xff] %v8903_v49 }
 0x219   : > { %11111 = vst [vmem:[#allocation73_spill] sm:$0xff] %v8885_v48 }
 0x21a   : > { %v8889_v6 = vpop.f32.mrf.mxu0  ;;  %7248 = vmatmul.mubr.msk.bf16.gmra.mxu0 %vm797_vm0, %v11067_v7 }
 0x21b   : > { %11113 = vst [vmem:[#allocation75_spill] sm:$0xff] %v8889_v6  ;;  %v8909_v6 = vpop.f32.mrf.mxu1  ;;  %7251 = vmatprep.mubr.msk.bf16.mxu0 %vm797_vm0, %v11068_v20  ;;  %v11138_v20 = vld [vmem:[#allocation13_spill] sm:$0xff] }
 0x21c   : > { %v8891_v27 = vpop.f32.mrf.mxu0  ;;  %11121 = vst [vmem:[#allocation83_spill] sm:$0xff] %v8909_v6 }
 0x21d   : > { %11114 = vst [vmem:[#allocation76_spill] sm:$0xff] %v8891_v27 }
 0x21e   : > { %v8899_v38 = vpop.f32.mrf.mxu0 }
 0x21f   : > { %11116 = vst [vmem:[#allocation78_spill] sm:$0xff] %v8899_v38  ;;  %v8919_v38 = vpop.f32.mrf.mxu1 }
 0x220   : > { %v8901_v29 = vpop.f32.mrf.mxu0  ;;  %11124 = vst [vmem:[#allocation86_spill] sm:$0xff] %v8919_v38 }
 0x221   : > { %11117 = vst [vmem:[#allocation79_spill] sm:$0xff] %v8901_v29 }
 0x222   : > { %v8905_v48 = vpop.f32.mrf.mxu0  ;;  %7252 = vmatmul.mubr.msk.bf16.gmra.mxu0 %vm797_vm0, %v11069_v0  ;;  %v11137_v0 = vld [vmem:[#allocation8_spill] sm:$0xff] }
 0x223   : > { %11119 = vst [vmem:[#allocation81_spill] sm:$0xff] %v8905_v48  ;;  %v8925_v48 = vpop.f32.mrf.mxu1  ;;  %7255 = vmatprep.mubr.msk.bf16.mxu0 %vm797_vm0, %v11070_v26  ;;  %v7654_v26 = vld [vmem:[%s10773_s3 + $0x8] sm:$0xff]  }
 0x224   : > { %v8907_v35 = vpop.f32.mrf.mxu0  ;;  %11127 = vst [vmem:[#allocation89_spill] sm:$0xff] %v8925_v48  ;;  %7371 = vmatprep.subr.bf16.mxu0 %v7654_v26 }
 0x225   : > { %11120 = vst [vmem:[#allocation82_spill] sm:$0xff] %v8907_v35 }
 0x226   : > { %v8915_v27 = vpop.f32.mrf.mxu0 }
 0x227   : > { %11122 = vst [vmem:[#allocation84_spill] sm:$0xff] %v8915_v27  ;;  %v8935_v27 = vpop.f32.mrf.mxu1 }
 0x228   : > { %v8917_v19 = vpop.f32.mrf.mxu0  ;;  %11130 = vst [vmem:[#allocation92_spill] sm:$0xff] %v8935_v27  ;;  %v11142_v27 = vld [vmem:[#allocation33_spill] sm:$0xff] }
 0x229   : > { %11123 = vst [vmem:[#allocation85_spill] sm:$0xff] %v8917_v19 }
 0x22a   : > { %v8921_v29 = vpop.f32.mrf.mxu0  ;;  %7256 = vmatmul.mubr.msk.bf16.gmra.mxu0 %vm797_vm0, %v11071_v43 }
 0x22b   : > { %11125 = vst [vmem:[#allocation87_spill] sm:$0xff] %v8921_v29  ;;  %v8941_v29 = vpop.f32.mrf.mxu1  ;;  %7259 = vmatprep.mubr.msk.bf16.mxu0 %vm797_vm0, %v11072_v58 }
 0x22c   : > { %v8923_v46 = vpop.f32.mrf.mxu0  ;;  %11133 = vst [vmem:[#allocation95_spill] sm:$0xff] %v8941_v29  ;;  %v11141_v29 = vld [vmem:[#allocation28_spill] sm:$0xff] }
 0x22d   : > { %11126 = vst [vmem:[#allocation88_spill] sm:$0xff] %v8923_v46 }
 0x22e   : > { %v8931_v35 = vpop.f32.mrf.mxu0 }
 0x22f   : > { %11128 = vst [vmem:[#allocation90_spill] sm:$0xff] %v8931_v35  ;;  %v8951_v35 = vpop.f32.mrf.mxu1 }
 0x230   : > { %v8933_v8 = vpop.f32.mrf.mxu0 }
 0x231   : > { %11129 = vst [vmem:[#allocation91_spill] sm:$0xff] %v8933_v8 }
 0x232   : > { %v8937_v19 = vpop.f32.mrf.mxu0  ;;  %7260 = vmatmul.mubr.msk.bf16.gmra.mxu0 %vm797_vm0, %v8272_v1 }
 0x233   : > { %11131 = vst [vmem:[#allocation93_spill] sm:$0xff] %v8937_v19  ;;  %v8957_v19 = vpop.f32.mrf.mxu1  ;;  %7303 = vmatprep.mubr.msk.bf16.mxu0 %vm797_vm0, %v11136_v5 }
 0x234   : > { %v8939_v53 = vpop.f32.mrf.mxu0 }
 0x235   : > { %11132 = vst [vmem:[#allocation94_spill] sm:$0xff] %v8939_v53 }
 0x236   : > { %v8947_v46 = vpop.f32.mrf.mxu0 }
 0x237   : > { %11134 = vst [vmem:[#allocation96_spill] sm:$0xff] %v8947_v46  ;;  %v8967_v46 = vpop.f32.mrf.mxu1 }
 0x238   : > { %v8949_v21 = vpop.f32.mrf.mxu0 }
 0x239   : > { %11135 = vst [vmem:[#allocation97_spill] sm:$0xff] %v8949_v21  ;;  %v8977_v45 = vpop.f32.mrf.mxu1 }
 0x23a   : > { %v8953_v8 = vpop.f32.mrf.mxu0  ;;  %7304 = vmatmul.mubr.msk.bf16.vlgmr.msra.gmra.mxu0 %vm797_vm0, %v11137_v0 }
 0x23b   : > { %v8987_v30 = vpop.f32.mrf.mxu1  ;;  %7307 = vmatprep.mubr.msk.bf16.mxu0 %vm797_vm0, %v11138_v20  ;;  %7372 = vmatpush3.bf16.msra.mxu0 %v7654_v26  ;;  %v11140_v26 = vld [vmem:[#allocation22_spill] sm:$0xff] }
 0x23c   : > { %v8955_v59 = vpop.f32.mrf.mxu0  ;;  %7373 = vmatprep.subr.bf16.mxu0 %v7655_v2 }
 0x23d   : > { %v8996_v1 = vpop.f32.mrf.mxu1 }
 0x23e   : > { %v8963_v53 = vpop.f32.mrf.mxu0 }
 0x23f   : > { %v9009_v54 = vpop.f32.mrf.mxu1  ;;  %7374 = vmatpush3.bf16.msra.mxu0 %v7655_v2 }
 0x240   : > { %v8965_v32 = vpop.f32.mrf.mxu0 }
 0x241   : > { %v9015_v14 = vpop.f32.mrf.mxu1 }
 0x242   : > { %v8969_v21 = vpop.f32.mrf.mxu0  ;;  %7308 = vmatmul.mubr.msk.bf16.gmra.mxu0 %vm797_vm0, %v11139_v23 }
 0x243   : > { %7311 = vmatprep.mubr.msk.bf16.mxu0 %vm797_vm0, %v11140_v26  ;;  %v9025_v55 = vpop.f32.mrf.mxu1 }
 0x244   : > { %v8979_v12 = vpop.f32.mrf.mxu0 }
 0x245   : > { %v9031_v2 = vpop.f32.mrf.mxu1 }
 0x246   : > { %v8985_v16 = vpop.f32.mrf.mxu0 }
 0x247   : > { %v9041_v26 = vpop.f32.mrf.mxu1 }
 0x248   : > { %v8989_v58 = vpop.f32.mrf.mxu0 }
 0x249   : > { %v9047_v6 = vpop.f32.mrf.mxu1 }
 0x24a   : > { %v8991_v43 = vpop.f32.mrf.mxu0  ;;  %7312 = vmatmul.mubr.msk.bf16.gmra.mxu0 %vm797_vm0, %v11141_v29 }
 0x24b   : > { %7315 = vmatprep.mubr.msk.bf16.mxu0 %vm797_vm0, %v11142_v27  ;;  %v9057_v27 = vpop.f32.mrf.mxu1 }
 0x24c   : > { %v8998_v4 = vpop.f32.mrf.mxu0 }
 0x24d   : > { %v9063_v10 = vpop.f32.mrf.mxu1 }
 0x24e   : > { %v9004_v7 = vpop.f32.mrf.mxu0 }
 0x250   : > { %v9011_v52 = vpop.f32.mrf.mxu0 }
 0x252   : > { %v9013_v62 = vpop.f32.mrf.mxu0  ;;  %7316 = vmatmul.mubr.msk.bf16.gmra.mxu0 %vm797_vm0, %v11147_v18 }
 0x253   : > { %7319 = vmatprep.mubr.msk.bf16.mxu0 %vm797_vm0, %v11148_v25  ;;  %v9073_v25 = vpop.f32.mrf.mxu1 }
 0x254   : > { %v9017_v40 = vpop.f32.mrf.mxu0 }
 0x256   : > { %v9023_v50 = vpop.f32.mrf.mxu0 }
 0x258   : > { %v9027_v20 = vpop.f32.mrf.mxu0 }
 0x25a   : > { %v9029_v0 = vpop.f32.mrf.mxu0  ;;  %7320 = vmatmul.mubr.msk.bf16.gmra.mxu0 %vm797_vm0, %v11153_v28  ;;  %v2524_v28 = vadd.f32 %v8953_v8, %v8746_v31  ;;  %v2519_v8 = vadd.f32 %v8965_v32, %v8760_v63 }
 0x25c   : > { %v9033_v5 = vpop.f32.mrf.mxu0  ;;  %v2816_v63 = vadd.f32 %v8977_v45, %v2519_v8 }
 0x25e   : > { %v9039_v23 = vpop.f32.mrf.mxu0 }
 0x25f   : > { %11143 = vst [vmem:[#allocation98_spill] sm:$0xff] %v9039_v23 }
 0x260   : > { %v9043_v48 = vpop.f32.mrf.mxu0 }
 0x261   : > { %11144 = vst [vmem:[#allocation99_spill] sm:$0xff] %v9043_v48 }
 0x262   : > { %v9045_v38 = vpop.f32.mrf.mxu0 }
 0x263   : > { %11145 = vst [vmem:[#allocation100_spill] sm:$0xff] %v9045_v38 }
 0x264   : > { %v9049_v49 = vpop.f32.mrf.mxu0 }
 0x265   : > { %11146 = vst [vmem:[#allocation101_spill] sm:$0xff] %v9049_v49  ;;  %v11154_v49 = vld [vmem:[#allocation54_spill] sm:$0xff] }
 0x266   : > { %v9055_v29 = vpop.f32.mrf.mxu0  ;;  %7323 = vmatprep.mubr.msk.bf16.mxu0 %vm797_vm0, %v11154_v49 }
 0x267   : > { %11149 = vst [vmem:[#allocation102_spill] sm:$0xff] %v9055_v29  ;;  %7324 = vmatmul.mubr.msk.bf16.gmra.mxu0 %vm797_vm0, %v11159_v24  ;;  %v2527_v24 = vadd.f32 %v8963_v53, %v8754_v11  ;;  %v11163_v53 = vld [vmem:[#allocation67_spill] sm:$0xff] }
 0x268   : > { %v9059_v44 = vpop.f32.mrf.mxu0 }
 0x269   : > { %11150 = vst [vmem:[#allocation103_spill] sm:$0xff] %v9059_v44  ;;  %v9079_v44 = vpop.f32.mrf.mxu1 }
 0x26a   : > { %v9061_v13 = vpop.f32.mrf.mxu0 }
 0x26b   : > { %11151 = vst [vmem:[#allocation104_spill] sm:$0xff] %v9061_v13 }
 0x26c   : > { %v9065_v38 = vpop.f32.mrf.mxu0 }
 0x26d   : > { %11152 = vst [vmem:[#allocation105_spill] sm:$0xff] %v9065_v38  ;;  %v11160_v38 = vld [vmem:[#allocation61_spill] sm:$0xff] }
 0x26e   : > { %v9071_v18 = vpop.f32.mrf.mxu0  ;;  %7327 = vmatprep.mubr.msk.bf16.mxu0 %vm797_vm0, %v11160_v38 }
 0x26f   : > { %11155 = vst [vmem:[#allocation106_spill] sm:$0xff] %v9071_v18  ;;  %v9093_v18 = vpop.f32.mrf.mxu1 }
 0x270   : > { %v9075_v29 = vpop.f32.mrf.mxu0 }
 0x271   : > { %11156 = vst [vmem:[#allocation107_spill] sm:$0xff] %v9075_v29  ;;  %v2516_v29 = vadd.f32 %v8955_v59, %v8752_v51  ;;  %v11162_v51 = vld [vmem:[#allocation63_spill] sm:$0xff]  ;;  %v2818_v59 = vadd.f32 %v8967_v46, %v2527_v24  ;;  %v2543_v46 = vadd.f32 %v8985_v16, %v8770_v47 }
 0x272   : > { %v9077_v48 = vpop.f32.mrf.mxu0  ;;  %7328 = vmatmul.mubr.msk.bf16.gmra.mxu0 %vm797_vm0, %v11162_v51 }
 0x273   : > { %11157 = vst [vmem:[#allocation108_spill] sm:$0xff] %v9077_v48  ;;  %v2815_v31 = vadd.f32 %v8957_v19, %v2516_v29  ;;  %7331 = vmatprep.mubr.msk.bf16.mxu0 %vm797_vm0, %v11163_v53 }
 0x274   : > { %v9081_v13 = vpop.f32.mrf.mxu0 }
 0x275   : > { %11158 = vst [vmem:[#allocation109_spill] sm:$0xff] %v9081_v13  ;;  %v2817_v13 = vadd.f32 %v8951_v35, %v2524_v28  ;;  %v2540_v35 = vadd.f32 %v8969_v21, %v8762_v41 }
 0x276   : > { %v9089_v49 = vpop.f32.mrf.mxu0 }
 0x277   : > { %11161 = vst [vmem:[#allocation110_spill] sm:$0xff] %v9089_v49  ;;  %v9103_v49 = vpop.f32.mrf.mxu1  ;;  %v2821_v21 = vadd.f32 %v8987_v30, %v2540_v35  ;;  %v2822_v35 = vadd.f32 %v9009_v54, %v2543_v46 }
 0x278   : > { %v9095_v48 = vpop.f32.mrf.mxu0 }
 0x279   : > { %v9118_v28 = vpop.f32.mrf.mxu1 }
 0x27a   : > { %v7161_v23 = vpop.f32.mrf.mxu0 }
 0x27b   : > { %v3036_v38 = vadd.f32 %v7161_v23, %v2817_v13  ;;  %v2532_v13 = vadd.f32 %v8979_v12, %v8768_v37  ;;  %v9124_v12 = vld [vmem:[%s7738_s8 + $0xcc] sm:$0xf]  ;;  %v9127_v37 = vld [vmem:[%s7738_s8 + $0xd0] sm:$0xf] }
 0x27c   : > { %v2907_v34 = vpop.f32.mrf.mxu0  ;;  %v6360_v47 = vcombine.low %v9124_v12, %v9127_v37 }
 0x27d   : > { %v3034_v11 = vadd.f32 %v2907_v34, %v2815_v31  ;;  %v3068_v32 = vadd.f32 %v8605_v9, %v3036_v38  ;;  %v2819_v45 = vadd.f32 %v8996_v1, %v2532_v13  ;;  %v2535_v38 = vadd.f32 %v8989_v58, %v8776_v36 }
 0x27e   : > { %v7162_v23 = vpop.f32.mrf.mxu0  ;;  %7332 = vmatmul.mubr.msk.bf16.gmra.mxu0 %vm797_vm0, %v6360_v47 }
 0x27f   : > { %v3037_v19 = vadd.f32 %v7162_v23, %v2818_v59  ;;  %v3066_v29 = vadd.f32 %v8605_v9, %v3034_v11  ;;  %v3100_v31 = vmax.f32 %v3068_v32, 0.0  ;;  %v2556_v11 = vadd.f32 %v8991_v43, %v8778_v39  ;;  %v9138_v23 = vpop.f32.mrf.mxu1 }
 0x280   : > { %v2910_v41 = vpop.f32.mrf.mxu0  ;;  %v2548_v32 = vadd.f32 %v8998_v4, %v8784_v22  ;;  %v2559_v43 = vadd.f32 %v9004_v7, %v8786_v60  ;;  %v2551_v7 = vadd.f32 %v9011_v52, %v8793_v15  ;;  %v9170_v52 = vld [vmem:[%s10771_s1 + $0xb8] sm:$0xff]  }
 0x281   : > { %v3069_v34 = vadd.f32 %v8605_v9, %v3037_v19  ;;  %v3035_v24 = vadd.f32 %v2910_v41, %v2816_v63  ;;  %v3098_v58 = vmax.f32 %v3066_v29, 0.0  ;;  %v2820_v41 = vadd.f32 %v9015_v14, %v2535_v38  ;;  %v9147_v39 = vpop.f32.mrf.mxu1  ;;  %v7637_v29 = vld [vmem:[%s10771_s1 + $0x80] sm:$0xff]  }
 0x282   : > { %v7165_v16 = vpop.f32.mrf.mxu0 }
 0x283   : > { %v3101_v30 = vmax.f32 %v3069_v34, 0.0  ;;  %v3067_v8 = vadd.f32 %v8605_v9, %v3035_v24  ;;  %v3040_v59 = vadd.f32 %v7165_v16, %v2821_v21  ;;  %v2825_v24 = vadd.f32 %v9025_v55, %v2556_v11 }
 0x284   : > { %v2923_v1 = vpop.f32.mrf.mxu0  ;;  %v2824_v11 = vadd.f32 %v9047_v6, %v2551_v7 }
 0x285   : > { %v3131_v36 = vpack.c.bf16 %v3101_v30, %v3100_v31  ;;  %v3099_v13 = vmax.f32 %v3067_v8, 0.0  ;;  %v3038_v63 = vadd.f32 %v2923_v1, %v2819_v45  ;;  %v3072_v54 = vadd.f32 %v8605_v9, %v3040_v59  ;;  %v9165_v8 = vpop.f32.mrf.mxu1 }
 0x286   : > { %v7166_v19 = vpop.f32.mrf.mxu0  ;;  %v2823_v45 = vadd.f32 %v9031_v2, %v2548_v32  ;;  %v2826_v31 = vadd.f32 %v9041_v26, %v2559_v43  ;;  %v2572_v30 = vadd.f32 %v9013_v62, %v8797_v33  ;;  %v9178_v33 = vld [vmem:[%s10772_s2] ss:$0 sm:$0xff]  ;;  %v2588_v43 = vadd.f32 %v9029_v0, %v8819_v56 }
 0x287   : > { %v3130_v21 = vpack.c.bf16 %v3099_v13, %v3098_v58  ;;  %v3041_v46 = vadd.f32 %v7166_v19, %v2822_v35  ;;  %v3070_v22 = vadd.f32 %v8605_v9, %v3038_v63  ;;  %v3104_v38 = vmax.f32 %v3072_v54, 0.0  ;;  %v9183_v13 = vpop.f32.mrf.mxu1 }
 0x288   : > { %v2926_v34 = vpop.f32.mrf.mxu0 }
 0x289   : > { %v3073_v14 = vadd.f32 %v8605_v9, %v3041_v46  ;;  %v3039_v4 = vadd.f32 %v2926_v34, %v2820_v41  ;;  %7195 = vmatprep.mubr.msk.bf16.mxu1 %vm797_vm0, %v3130_v21  ;;  %v3102_v15 = vmax.f32 %v3070_v22, 0.0  ;;  %v2567_v41 = vadd.f32 %v9027_v20, %v8817_v61  ;;  %v9198_v34 = vpop.f32.mrf.mxu1 }
 0x28a   : > { %v7169_v60 = vpop.f32.mrf.mxu0  ;;  %7196 = vmatmul.mubr.msk.bf16.vlgmr.msra.gmra.mxu1 %vm797_vm0, %v3131_v36  ;;  %v2575_v36 = vadd.f32 %v9023_v50, %v8811_v3  ;;  %v2580_v61 = vadd.f32 %v9033_v5, %v8825_v42  ;;  %v11166_v42 = vld [vmem:[#allocation38_spill] sm:$0xff] }
 0x28b   : > { %v3105_v16 = vmax.f32 %v3073_v14, 0.0  ;;  %v3071_v47 = vadd.f32 %v8605_v9, %v3039_v4  ;;  %v3044_v55 = vadd.f32 %v7169_v60, %v2825_v24  ;;  %7264 = vmatpush3.bf16.msra.mxu1 %v8866_v57  ;;  %v2564_v57 = vadd.f32 %v9017_v40, %v8807_v17  ;;  %v11164_v60 = vld [vmem:[#allocation36_spill] sm:$0xff]  ;;  %v7149_v56 = vpop.f32.mrf.mxu1 }
 0x28c   : > { %v2939_v2 = vpop.f32.mrf.mxu0  ;;  %7265 = vmatprep.subr.bf16.mxu1 %v7637_v29  ;;  %v2829_v40 = vadd.f32 %v9057_v27, %v2572_v30  ;;  %v2830_v46 = vadd.f32 %v9073_v25, %v2575_v36  ;;  %v2828_v4 = vadd.f32 %v9079_v44, %v2567_v41  ;;  %v2831_v5 = vadd.f32 %v9103_v49, %v2580_v61  ;;  %v11167_v44 = vld [vmem:[#allocation99_spill] sm:$0xff] }
 0x28d   : > { %v3133_v59 = vpack.c.bf16 %v3105_v16, %v3104_v38  ;;  %v3103_v9 = vmax.f32 %v3071_v47, 0.0  ;;  %v3042_v35 = vadd.f32 %v2939_v2, %v2823_v45  ;;  %v3076_v1 = vadd.f32 %v9178_v33, %v3044_v55  ;;  %v11165_v38 = vld [vmem:[#allocation98_spill] sm:$0xff]  ;;  %v11175_v61 = vld [vmem:[#allocation103_spill] sm:$0xff] }
 0x28e   : > { %v7170_v26 = vpop.f32.mrf.mxu0  ;;  %v2827_v19 = vadd.f32 %v9063_v10, %v2564_v57  ;;  %v2591_v0 = vadd.f32 %v11165_v38, %v11164_v60  ;;  %v2833_v47 = vadd.f32 %v9093_v18, %v2588_v43  ;;  %v2583_v2 = vadd.f32 %v11167_v44, %v11166_v42  ;;  %v11176_v38 = vld [vmem:[#allocation74_spill] sm:$0xff]  ;;  %v11178_v42 = vld [vmem:[#allocation77_spill] sm:$0xff] }
 0x28f   : > { %v3132_v62 = vpack.c.bf16 %v3103_v9, %v3102_v15  ;;  %v3045_v58 = vadd.f32 %v7170_v26, %v2826_v31  ;;  %7266 = vmatpush3.bf16.msra.mxu1 %v7637_v29  ;;  %v3074_v17 = vadd.f32 %v9178_v33, %v3042_v35  ;;  %v3108_v3 = vmax.f32 %v3076_v1, 0.0  ;;  %v11168_v26 = vld [vmem:[#allocation46_spill] sm:$0xff]  ;;  %v2784_v1 = vpop.f32.mrf.mxu1  ;;  %v11179_v44 = vld [vmem:[#allocation105_spill] sm:$0xff] }
 0x290   : > { %v2942_v63 = vpop.f32.mrf.mxu0  ;;  %7335 = vmatprep.subr.bf16.mxu1 %v9170_v52  ;;  %v2834_v57 = vadd.f32 %v9118_v28, %v2591_v0  ;;  %v2832_v41 = vadd.f32 %v9138_v23, %v2583_v2  ;;  %v11172_v28 = vld [vmem:[#allocation56_spill] sm:$0xff]  ;;  %v2612_v2 = vadd.f32 %v11179_v44, %v11178_v42 }
 0x291   : > { %v3077_v6 = vadd.f32 %v9178_v33, %v3045_v58  ;;  %v3043_v32 = vadd.f32 %v2942_v63, %v2824_v11  ;;  %7199 = vmatprep.mubr.msk.bf16.mxu1 %vm797_vm0, %v3132_v62  ;;  %v3106_v10 = vmax.f32 %v3074_v17, 0.0  ;;  %v11169_v11 = vld [vmem:[#allocation100_spill] sm:$0xff] }
 0x292   : > { %v7173_v50 = vpop.f32.mrf.mxu0  ;;  %7200 = vmatmul.mubr.msk.bf16.gmra.mxu1 %vm797_vm0, %v3133_v59  ;;  %v2604_v62 = vadd.f32 %v11169_v11, %v11168_v26  ;;  %v11170_v17 = vld [vmem:[#allocation48_spill] sm:$0xff] }
 0x293   : > { %v3109_v21 = vmax.f32 %v3077_v6, 0.0  ;;  %v3075_v54 = vadd.f32 %v9178_v33, %v3043_v32  ;;  %v3048_v27 = vadd.f32 %v7173_v50, %v2829_v40  ;;  %v11171_v6 = vld [vmem:[#allocation101_spill] sm:$0xff]  ;;  %v11177_v0 = vld [vmem:[#allocation104_spill] sm:$0xff] }
 0x294   : > { %v2955_v29 = vpop.f32.mrf.mxu0  ;;  %v2596_v32 = vadd.f32 %v11171_v6, %v11170_v17  ;;  %v11182_v17 = vld [vmem:[#allocation83_spill] sm:$0xff] }
 0x295   : > { %v3135_v24 = vpack.c.bf16 %v3109_v21, %v3108_v3  ;;  %v3107_v22 = vmax.f32 %v3075_v54, 0.0  ;;  %v3046_v20 = vadd.f32 %v2955_v29, %v2827_v19  ;;  %v3080_v7 = vadd.f32 %v9178_v33, %v3048_v27  ;;  %v11173_v54 = vld [vmem:[#allocation102_spill] sm:$0xff] }
 0x296   : > { %v7174_v14 = vpop.f32.mrf.mxu0  ;;  %v2607_v27 = vadd.f32 %v11173_v54, %v11172_v28  ;;  %v2837_v29 = vadd.f32 %v9147_v39, %v2604_v62  ;;  %v2835_v23 = vadd.f32 %v9165_v8, %v2596_v32  ;;  %v11185_v28 = vld [vmem:[#allocation108_spill] sm:$0xff] }
 0x297   : > { %v3134_v45 = vpack.c.bf16 %v3107_v22, %v3106_v10  ;;  %v3049_v25 = vadd.f32 %v7174_v14, %v2830_v46  ;;  %v3078_v55 = vadd.f32 %v9178_v33, %v3046_v20  ;;  %v3112_v59 = vmax.f32 %v3080_v7, 0.0  ;;  %v7150_v46 = vpop.f32.mrf.mxu1  ;;  %v11174_v20 = vld [vmem:[#allocation6_spill] sm:$0xff] }
 0x298   : > { %v2958_v16 = vpop.f32.mrf.mxu0  ;;  %v2599_v14 = vadd.f32 %v11175_v61, %v11174_v20  ;;  %v2838_v60 = vadd.f32 %v9183_v13, %v2607_v27  ;;  %v11180_v13 = vld [vmem:[#allocation80_spill] sm:$0xff] }
 0x299   : > { %v3081_v31 = vadd.f32 %v9178_v33, %v3049_v25  ;;  %v3047_v30 = vadd.f32 %v2958_v16, %v2828_v4  ;;  %7203 = vmatprep.mubr.msk.bf16.mxu1 %vm797_vm0, %v3134_v45  ;;  %v3110_v36 = vmax.f32 %v3078_v55, 0.0  ;;  %v2620_v16 = vadd.f32 %v11177_v0, %v11176_v38 }
 0x29a   : > { %v7177_v15 = vpop.f32.mrf.mxu0  ;;  %7204 = vmatmul.mubr.msk.bf16.gmra.mxu1 %vm797_vm0, %v3135_v24 }
 0x29b   : > { %v3113_v9 = vmax.f32 %v3081_v31, 0.0  ;;  %v3079_v35 = vadd.f32 %v9178_v33, %v3047_v30  ;;  %v3052_v18 = vadd.f32 %v7177_v15, %v2833_v47  ;;  %v2787_v47 = vpop.f32.mrf.mxu1 }
 0x29c   : > { %v2971_v58 = vpop.f32.mrf.mxu0 }
 0x29d   : > { %v3137_v49 = vpack.c.bf16 %v3113_v9, %v3112_v59  ;;  %v3111_v63 = vmax.f32 %v3079_v35, 0.0  ;;  %v3050_v40 = vadd.f32 %v2971_v58, %v2831_v5  ;;  %v3084_v3 = vadd.f32 %v9178_v33, %v3052_v18  ;;  %v7153_v11 = vpop.f32.mrf.mxu1 }
 0x29e   : > { %v7178_v19 = vpop.f32.mrf.mxu0  ;;  %v2836_v59 = vadd.f32 %v9198_v34, %v2599_v14  ;;  %v2841_v58 = vadd.f32 %v7149_v56, %v2620_v16  ;;  %v11183_v34 = vld [vmem:[#allocation107_spill] sm:$0xff] }
 0x29f   : > { %v3136_v50 = vpack.c.bf16 %v3111_v63, %v3110_v36  ;;  %v3053_v21 = vadd.f32 %v7178_v19, %v2834_v57  ;;  %v3082_v10 = vadd.f32 %v9178_v33, %v3050_v40  ;;  %v3116_v45 = vmax.f32 %v3084_v3, 0.0  ;;  %v11181_v57 = vld [vmem:[#allocation106_spill] sm:$0xff]  ;;  %v2800_v27 = vpop.f32.mrf.mxu1 }
 0x2a0   : > { %v2974_v43 = vpop.f32.mrf.mxu0  ;;  %v2623_v26 = vadd.f32 %v11181_v57, %v11180_v13  ;;  %v2839_v40 = vadd.f32 %v2784_v1, %v2612_v2  ;;  %v2615_v6 = vadd.f32 %v11183_v34, %v11182_v17 }
 0x2a1   : > { %v3085_v24 = vadd.f32 %v9178_v33, %v3053_v21  ;;  %v3051_v22 = vadd.f32 %v2974_v43, %v2832_v41  ;;  %7207 = vmatprep.mubr.msk.bf16.mxu1 %vm797_vm0, %v3136_v50  ;;  %v3114_v31 = vmax.f32 %v3082_v10, 0.0  ;;  %v11184_v21 = vld [vmem:[#allocation86_spill] sm:$0xff] }
 0x2a2   : > { %v7181_v4 = vpop.f32.mrf.mxu0  ;;  %7208 = vmatmul.mubr.msk.bf16.gmra.mxu1 %vm797_vm0, %v3137_v49  ;;  %v2842_v56 = vadd.f32 %v7150_v46, %v2623_v26  ;;  %v2636_v54 = vadd.f32 %v11185_v28, %v11184_v21  ;;  %v2840_v14 = vadd.f32 %v2787_v47, %v2615_v6  ;;  %v11189_v46 = vld [vmem:[#allocation110_spill] sm:$0xff]  ;;  %v7641_v21 = vld [vmem:[%s10771_s1 + $0xb0] sm:$0xff]  }
 0x2a3   : > { %v3117_v7 = vmax.f32 %v3085_v24, 0.0  ;;  %v3083_v25 = vadd.f32 %v9178_v33, %v3051_v22  ;;  %v3056_v39 = vadd.f32 %v7181_v4, %v2837_v29  ;;  %v11186_v22 = vld [vmem:[#allocation89_spill] sm:$0xff]  ;;  %v11192_v28 = vld [vmem:[#allocation4_spill] sm:$0xff] }
 0x2a4   : > { %v2987_v55 = vpop.f32.mrf.mxu0  ;;  %v2845_v0 = vadd.f32 %v7153_v11, %v2636_v54  ;;  %v11193_v54 = vld [vmem:[#allocation8_spill] sm:$0xff] }
 0x2a5   : > { %v3139_v8 = vpack.c.bf16 %v3117_v7, %v3116_v45  ;;  %v3115_v30 = vmax.f32 %v3083_v25, 0.0  ;;  %v3054_v5 = vadd.f32 %v2987_v55, %v2835_v23  ;;  %v3088_v35 = vadd.f32 %v9178_v33, %v3056_v39  ;;  %v11187_v23 = vld [vmem:[#allocation109_spill] sm:$0xff]  ;;  %v11188_v25 = vld [vmem:[#allocation92_spill] sm:$0xff] }
 0x2a6   : > { %v7182_v15 = vpop.f32.mrf.mxu0  ;;  %v2628_v20 = vadd.f32 %v11187_v23, %v11186_v22  ;;  %v2639_v39 = vadd.f32 %v11189_v46, %v11188_v25  ;;  %v11201_v22 = vld [vmem:[#allocation49_spill] sm:$0xff]  ;;  %v11202_v23 = vld [vmem:[#allocation54_spill] sm:$0xff] }
 0x2a7   : > { %v3138_v9 = vpack.c.bf16 %v3115_v30, %v3114_v31  ;;  %v3057_v18 = vadd.f32 %v7182_v15, %v2838_v60  ;;  %v3086_v36 = vadd.f32 %v9178_v33, %v3054_v5  ;;  %v3120_v19 = vmax.f32 %v3088_v35, 0.0  ;;  %v7154_v60 = vpop.f32.mrf.mxu1  ;;  %v11190_v30 = vld [vmem:[#allocation95_spill] sm:$0xff] }
 0x2a8   : > { %v2990_v62 = vpop.f32.mrf.mxu0  ;;  %v2631_v47 = vadd.f32 %v9095_v48, %v11190_v30 }
 0x2a9   : > { %v3089_v49 = vadd.f32 %v9178_v33, %v3057_v18  ;;  %v3055_v63 = vadd.f32 %v2990_v62, %v2836_v59  ;;  %7211 = vmatprep.mubr.msk.bf16.mxu1 %vm797_vm0, %v3138_v9  ;;  %v3118_v29 = vmax.f32 %v3086_v36, 0.0  ;;  %v2846_v59 = vadd.f32 %v7154_v60, %v2639_v39  ;;  %v2803_v9 = vpop.f32.mrf.mxu1  ;;  %v11208_v39 = vld [vmem:[#allocation26_spill] sm:$0xff] }
 0x2aa   : > { %v7185_v32 = vpop.f32.mrf.mxu0  ;;  %7212 = vmatmul.mubr.msk.bf16.gmra.mxu1 %vm797_vm0, %v3139_v8  ;;  %v2843_v8 = vadd.f32 %v2800_v27, %v2628_v20  ;;  %v2844_v62 = vadd.f32 %v2803_v9, %v2631_v47  ;;  %v11194_v27 = vld [vmem:[#allocation13_spill] sm:$0xff]  ;;  %v11203_v20 = vld [vmem:[#allocation59_spill] sm:$0xff] }
 0x2ab   : > { %v3121_v41 = vmax.f32 %v3089_v49, 0.0  ;;  %v3087_v50 = vadd.f32 %v9178_v33, %v3055_v63  ;;  %v3060_v3 = vadd.f32 %v7185_v32, %v2841_v58 }
 0x2ac   : > { %v3003_v43 = vpop.f32.mrf.mxu0 }
 0x2ad   : > { %v3141_v10 = vpack.c.bf16 %v3121_v41, %v3120_v19  ;;  %v3119_v1 = vmax.f32 %v3087_v50, 0.0  ;;  %v3058_v24 = vadd.f32 %v3003_v43, %v2839_v40  ;;  %v3092_v45 = vadd.f32 %v9178_v33, %v3060_v3  ;;  %v11195_v43 = vld [vmem:[#allocation17_spill] sm:$0xff] }
 0x2ae   : > { %v7186_v61 = vpop.f32.mrf.mxu0 }
 0x2af   : > { %v3140_v4 = vpack.c.bf16 %v3119_v1, %v3118_v29  ;;  %v3061_v7 = vadd.f32 %v7186_v61, %v2842_v56  ;;  %v3090_v16 = vadd.f32 %v9178_v33, %v3058_v24  ;;  %v3124_v42 = vmax.f32 %v3092_v45, 0.0  ;;  %v11191_v56 = vld [vmem:[#allocation2_spill] sm:$0xff]  ;;  %v11198_v1 = vld [vmem:[#allocation33_spill] sm:$0xff]  ;;  %v11206_v45 = vld [vmem:[#allocation16_spill] sm:$0xff] }
 0x2b0   : > { %v3006_v38 = vpop.f32.mrf.mxu0  ;;  %v11196_v29 = vld [vmem:[#allocation22_spill] sm:$0xff]  ;;  %v11200_v24 = vld [vmem:[#allocation45_spill] sm:$0xff] }
 0x2b1   : > { %v3093_v55 = vadd.f32 %v9178_v33, %v3061_v7  ;;  %v3059_v31 = vadd.f32 %v3006_v38, %v2840_v14  ;;  %7215 = vmatprep.mubr.msk.bf16.mxu1 %vm797_vm0, %v3140_v4  ;;  %v3122_v18 = vmax.f32 %v3090_v16, 0.0  ;;  %v11204_v61 = vld [vmem:[#allocation61_spill] sm:$0xff]  ;;  %v11205_v14 = vld [vmem:[#allocation11_spill] sm:$0xff]  ;;  %v11207_v7 = vld [vmem:[#allocation20_spill] sm:$0xff] }
 0x2b2   : > { %v7189_v5 = vpop.f32.mrf.mxu0  ;;  %7216 = vmatmul.mubr.msk.bf16.gmra.mxu1 %vm797_vm0, %v3141_v10  ;;  %v11197_v10 = vld [vmem:[#allocation28_spill] sm:$0xff]  ;;  %v11210_v38 = vld [vmem:[#allocation37_spill] sm:$0xff] }
 0x2b3   : > { %v3125_v44 = vmax.f32 %v3093_v55, 0.0  ;;  %v3091_v2 = vadd.f32 %v9178_v33, %v3059_v31  ;;  %v3064_v15 = vadd.f32 %v7189_v5, %v2845_v0  ;;  %v11211_v0 = vld [vmem:[#allocation42_spill] sm:$0xff]  ;;  %v11212_v31 = vld [vmem:[#allocation47_spill] sm:$0xff] }
 0x2b4   : > { %v3019_v35 = vpop.f32.mrf.mxu0  ;;  %v11214_v5 = vld [vmem:[#allocation58_spill] sm:$0xff] }
 0x2b5   : > { %v3143_v13 = vpack.c.bf16 %v3125_v44, %v3124_v42  ;;  %v3123_v57 = vmax.f32 %v3091_v2, 0.0  ;;  %v3062_v26 = vadd.f32 %v3019_v35, %v2843_v8  ;;  %v3096_v48 = vadd.f32 %v9178_v33, %v3064_v15  ;;  %v11213_v8 = vld [vmem:[#allocation53_spill] sm:$0xff]  ;;  %v11215_v15 = vld [vmem:[#allocation60_spill] sm:$0xff] }
 0x2b6   : > { %v7190_v11 = vpop.f32.mrf.mxu0  ;;  %v3915_v42 = vshrl.u32 %v9124_v12, 16  ;;  %v3918_v44 = vshll.u32 %v9124_v12, 16  ;;  %v3928_v2 = vshrl.u32 %v9127_v37, 16  ;;  %v11217_v12 = vld [vmem:[#allocation64_spill] sm:$0xff] }
 0x2b7   : > { %v3142_v58 = vpack.c.bf16 %v3123_v57, %v3122_v18  ;;  %v3065_v36 = vadd.f32 %v7190_v11, %v2846_v59  ;;  %v3094_v63 = vadd.f32 %v9178_v33, %v3062_v26  ;;  %v3128_v34 = vmax.f32 %v3096_v48, 0.0  ;;  %v279_v26 = vld [vmem:[%s7738_s8 + $0xd4] sm:$0x1] }
 0x2b8   : > { %v3022_v49 = vpop.f32.mrf.mxu0  ;;  %v3924_v59 = vshll.u32 %v9127_v37, 16  ;;  %v3917_v35 = vrot.slane %v3915_v42, 4  ;;  %v3920_v18 = vrot.slane %v3918_v44, 5  ;;  %v3930_v57 = vrot.slane %v3928_v2, 4  ;;  %v7643_v44 = vld [vmem:[%s10771_s1 + $0xd8] sm:$0xff]  }
 0x2b9   : > { %v3097_v40 = vadd.f32 %v9178_v33, %v3065_v36  ;;  %v3063_v17 = vadd.f32 %v3022_v49, %v2844_v62  ;;  %7219 = vmatprep.mubr.msk.bf16.mxu1 %vm797_vm0, %v3142_v58  ;;  %v3126_v19 = vmax.f32 %v3094_v63, 0.0  ;;  %v11216_v62 = vld [vmem:[#allocation62_spill] sm:$0xff]  ;;  %v3934_v36 = vshll.u32 %v279_v26, 16 }
 0x2ba   : > { %7220 = vmatmul.mubr.msk.bf16.gmra.mxu1 %vm797_vm0, %v3143_v13  ;;  %v9309_v4 = vpop.f32.mrf.mxu0  ;;  %v3926_v13 = vrot.slane %v3924_v59, 5  ;;  %v3921_v58 = vor.u32 %v3920_v18, %v3917_v35 }
 0x2bb   : > { %v3129_v6 = vmax.f32 %v3097_v40, 0.0  ;;  %v3095_v32 = vadd.f32 %v9178_v33, %v3063_v17  ;;  %v3936_v40 = vrot.slane %v3934_v36, 5 }
 0x2bc   : > { %v9315_v25 = vpop.f32.mrf.mxu0  ;;  %v3931_v48 = vor.u32 %v3930_v57, %v3926_v13  ;;  %v3922_v37 = vrot.slane %v3921_v58, 4 }
 0x2bd   : > { %v3145_v41 = vpack.c.bf16 %v3129_v6, %v3128_v34  ;;  %v3127_v50 = vmax.f32 %v3095_v32, 0.0  ;;  %v11218_v34 = vld [vmem:[#allocation65_spill] sm:$0xff]  ;;  %v11219_v6 = vld [vmem:[#allocation66_spill] sm:$0xff] }
 0x2be   : > { %v9317_v46 = vpop.f32.mrf.mxu0  ;;  %v3932_v63 = vrot.slane %v3931_v48, 4  ;;  %v11229_v32 = vld [vmem:[#allocation70_spill] sm:$0xff] }
 0x2bf   : > { %v3144_v3 = vpack.c.bf16 %v3127_v50, %v3126_v19  ;;  %v3927_v19 = vsel %vm7787_vm3, %v3922_v37, %v3926_v13  ;;  %v7644_v13 = vld [vmem:[%s10771_s1 + $0xd0] sm:$0xff]  }
 0x2c1   : > { %7223 = vmatprep.mubr.msk.bf16.mxu1 %vm797_vm0, %v3144_v3 }
 0x2c2   : > { %7224 = vmatmul.mubr.msk.bf16.gmra.mxu1 %vm797_vm0, %v3145_v41  ;;  %v3937_v41 = vsel %vm7787_vm3, %v3932_v63, %v3936_v40 }
 0x2c3   : > { %7267 = vmatprep.mubr.msk.bf16.mxu1 %vm797_vm0, %v11191_v56  ;;  %v9374_v3 = vcombine.low %v3927_v19, %v3937_v41  ;;  %v11230_v41 = vld [vmem:[#allocation71_spill] sm:$0xff] }
 0x2ca   : > { %7268 = vmatmul.mubr.msk.bf16.vlgmr.msra.gmra.mxu1 %vm797_vm0, %v11192_v28 }
 0x2cb   : > { %7336 = vmatpush3.bf16.msra.mxu1 %v9170_v52  ;;  %7271 = vmatprep.mubr.msk.bf16.mxu1 %vm797_vm0, %v11193_v54  ;;  %v11199_v52 = vld [vmem:[#allocation39_spill] sm:$0xff] }
 0x2cc   : > { %7337 = vmatprep.subr.bf16.mxu1 %v7641_v21 }
 0x2cf   : > { %7338 = vmatpush3.bf16.msra.mxu1 %v7641_v21  ;;  %v11221_v21 = vld [vmem:[#allocation69_spill] sm:$0xff] }
 0x2d0   : > { %7407 = vmatprep.subr.bf16.mxu1 %v7643_v44 }
 0x2d2   : > { %7272 = vmatmul.mubr.msk.bf16.gmra.mxu1 %vm797_vm0, %v11194_v27  ;;  %v9389_v27 = vld [vmem:[%s10774_s4] ss:$0 sm:$0xff] }
 0x2d3   : > { %7275 = vmatprep.mubr.msk.bf16.mxu1 %vm797_vm0, %v11195_v43 }
 0x2da   : > { %7276 = vmatmul.mubr.msk.bf16.gmra.mxu1 %vm797_vm0, %v11196_v29 }
 0x2db   : > { %7279 = vmatprep.mubr.msk.bf16.mxu1 %vm797_vm0, %v11197_v10 }
 0x2e2   : > { %7280 = vmatmul.mubr.msk.bf16.gmra.mxu1 %vm797_vm0, %v11198_v1 }
 0x2e3   : > { %7283 = vmatprep.mubr.msk.bf16.mxu1 %vm797_vm0, %v11199_v52 }
 0x2ea   : > { %7284 = vmatmul.mubr.msk.bf16.gmra.mxu1 %vm797_vm0, %v11200_v24 }
 0x2eb   : > { %7287 = vmatprep.mubr.msk.bf16.mxu1 %vm797_vm0, %v11201_v22 }
 0x2f2   : > { %7288 = vmatmul.mubr.msk.bf16.gmra.mxu1 %vm797_vm0, %v11202_v23 }
 0x2f3   : > { %7291 = vmatprep.mubr.msk.bf16.mxu1 %vm797_vm0, %v11203_v20 }
 0x2fa   : > { %7292 = vmatmul.mubr.msk.bf16.gmra.mxu1 %vm797_vm0, %v11204_v61 }
 0x2fb   : > { %7295 = vmatprep.mubr.msk.bf16.mxu1 %vm797_vm0, %v11162_v51  ;;  %v11209_v51 = vld [vmem:[#allocation31_spill] sm:$0xff] }
 0x302   : > { %7296 = vmatmul.mubr.msk.bf16.gmra.mxu1 %vm797_vm0, %v11163_v53  ;;  %v9323_v53 = vpop.f32.mrf.mxu0 }
 0x303   : > { %7339 = vmatprep.mubr.msk.bf16.mxu1 %vm797_vm0, %v11205_v14 }
 0x304   : > { %v9325_v60 = vpop.f32.mrf.mxu0 }
 0x306   : > { %v9331_v16 = vpop.f32.mrf.mxu0 }
 0x308   : > { %v9333_v55 = vpop.f32.mrf.mxu0 }
 0x30a   : > { %7340 = vmatmul.mubr.msk.bf16.vlgmr.msra.gmra.mxu1 %vm797_vm0, %v11206_v45  ;;  %v9339_v30 = vpop.f32.mrf.mxu0 }
 0x30b   : > { %7343 = vmatprep.mubr.msk.bf16.mxu1 %vm797_vm0, %v11207_v7  ;;  %7408 = vmatpush3.bf16.msra.mxu1 %v7643_v44  ;;  %v11233_v44 = vld [vmem:[#allocation12_spill] sm:$0xff] }
 0x30c   : > { %v9341_v47 = vpop.f32.mrf.mxu0  ;;  %7409 = vmatprep.subr.bf16.mxu1 %v7644_v13 }
 0x30e   : > { %v9351_v9 = vpop.f32.mrf.mxu0 }
 0x30f   : > { %7410 = vmatpush3.bf16.msra.mxu1 %v7644_v13 }
 0x310   : > { %v9354_v11 = vpop.f32.mrf.mxu0 }
 0x312   : > { %7344 = vmatmul.mubr.msk.bf16.gmra.mxu1 %vm797_vm0, %v11208_v39  ;;  %v9360_v49 = vpop.f32.mrf.mxu0 }
 0x313   : > { %7347 = vmatprep.mubr.msk.bf16.mxu1 %vm797_vm0, %v11209_v51 }
 0x314   : > { %v9362_v17 = vpop.f32.mrf.mxu0 }
 0x316   : > { %v9372_v50 = vpop.f32.mrf.mxu0 }
 0x318   : > { %v9376_v56 = vpop.f32.mrf.mxu0 }
 0x31a   : > { %7348 = vmatmul.mubr.msk.bf16.gmra.mxu1 %vm797_vm0, %v11210_v38  ;;  %v9382_v28 = vpop.f32.mrf.mxu0 }
 0x31b   : > { %7351 = vmatprep.mubr.msk.bf16.mxu1 %vm797_vm0, %v11211_v0  ;;  %11222 = vst [vmem:[#allocation63_spill] sm:$0xff] %v9382_v28  ;;  %v11272_v28 = vld [vmem:[#allocation30_spill] sm:$0xff] }
 0x31c   : > { %v9384_v54 = vpop.f32.mrf.mxu0 }
 0x31d   : > { %11223 = vst [vmem:[#allocation67_spill] sm:$0xff] %v9384_v54 }
 0x31e   : > { %v9392_v1 = vpop.f32.mrf.mxu0 }
 0x31f   : > { %11224 = vst [vmem:[#allocation36_spill] sm:$0xff] %v9392_v1 }
 0x320   : > { %v9398_v20 = vpop.f32.mrf.mxu0 }
 0x321   : > { %11225 = vst [vmem:[#allocation98_spill] sm:$0xff] %v9398_v20 }
 0x322   : > { %7352 = vmatmul.mubr.msk.bf16.gmra.mxu1 %vm797_vm0, %v11212_v31  ;;  %v9406_v59 = vpop.f32.mrf.mxu0 }
 0x323   : > { %7355 = vmatprep.mubr.msk.bf16.mxu1 %vm797_vm0, %v11213_v8  ;;  %11226 = vst [vmem:[#allocation38_spill] sm:$0xff] %v9406_v59 }
 0x324   : > { %v9414_v58 = vpop.f32.mrf.mxu0 }
 0x325   : > { %11227 = vst [vmem:[#allocation99_spill] sm:$0xff] %v9414_v58 }
 0x326   : > { %v9420_v40 = vpop.f32.mrf.mxu0 }
 0x327   : > { %11228 = vst [vmem:[#allocation46_spill] sm:$0xff] %v9420_v40 }
 0x32a   : > { %7356 = vmatmul.mubr.msk.bf16.gmra.mxu1 %vm797_vm0, %v11214_v5 }
 0x32b   : > { %7359 = vmatprep.mubr.msk.bf16.mxu1 %vm797_vm0, %v11215_v15 }
 0x332   : > { %7360 = vmatmul.mubr.msk.bf16.gmra.mxu1 %vm797_vm0, %v11216_v62 }
 0x333   : > { %7363 = vmatprep.mubr.msk.bf16.mxu1 %vm797_vm0, %v11217_v12 }
 0x33a   : > { %7364 = vmatmul.mubr.msk.bf16.gmra.mxu1 %vm797_vm0, %v11218_v34 }
 0x33b   : > { %7367 = vmatprep.mubr.msk.bf16.mxu1 %vm797_vm0, %v11219_v6 }
 0x342   : > { %7368 = vmatmul.mubr.msk.bf16.gmra.mxu1 %vm797_vm0, %v9374_v3 }
 0x343   : > { %7411 = vmatprep.mubr.msk.bf16.mxu1 %vm797_vm0, %v11221_v21 }
 0x34a   : > { %v7197_v43 = vpop.f32.mrf.mxu1  ;;  %7412 = vmatmul.mubr.msk.bf16.vlgmr.msra.gmra.mxu1 %vm797_vm0, %v11229_v32 }
 0x34b   : > { %v3237_v29 = vadd.f32 %v7197_v43, %v9389_v27  ;;  %7415 = vmatprep.mubr.msk.bf16.mxu1 %vm797_vm0, %v11230_v41 }
 0x34c   : > { %v3228_v10 = vpop.f32.mrf.mxu1 }
 0x34d   : > { %v3229_v52 = vadd.f32 %v9389_v27, %v3228_v10  ;;  %5533 = vrot.lane.b32.xlu1 %v3237_v29, %s7674_s17  ;;  %v9433_v29 = vld [vmem:[%s10771_s1 + $0xc8] sm:$0xff]  }
 0x34e   : > { %v7198_v24 = vpop.f32.mrf.mxu1  ;;  %7443 = vmatprep.subr.bf16.mxu0 %v9433_v29 }
 0x34f   : > { %v3240_v22 = vadd.f32 %v7198_v24, %v9389_v27  ;;  %5529 = vrot.lane.b32.xlu0 %v3229_v52, %s7674_s17  ;;  %v9435_v52 = vpop.f32.mrf.mxu0 }
 0x350   : > { %v3231_v23 = vpop.f32.mrf.mxu1  ;;  %11231 = vst [vmem:[#allocation100_spill] sm:$0xff] %v9435_v52 }
 0x351   : > { %v3232_v61 = vadd.f32 %v9389_v27, %v3231_v23  ;;  %5535 = vrot.lane.b32.xlu1 %v3240_v22, %s7674_s17 }
 0x352   : > { %v7201_v42 = vpop.f32.mrf.mxu1  ;;  %7416 = vmatmul.mubr.msk.bf16.gmra.mxu1 %vm797_vm0, %v11233_v44 }
 0x353   : > { %5531 = vrot.lane.b32.xlu0 %v3232_v61, %s7674_s17  ;;  %v3253_v35 = vadd.f32 %v7201_v42, %v9389_v27  ;;  %v9442_v42 = vpop.f32.mrf.mxu0 }
 0x354   : > { %v3244_v2 = vpop.f32.mrf.mxu1  ;;  %11232 = vst [vmem:[#allocation48_spill] sm:$0xff] %v9442_v42 }
 0x355   : > { %v3245_v48 = vadd.f32 %v9389_v27, %v3244_v2 }
 0x356   : > { %v7202_v18 = vpop.f32.mrf.mxu1 }
 0x357   : > { %v3256_v57 = vadd.f32 %v7202_v18, %v9389_v27  ;;  %5541 = vrot.lane.b32.xlu0 %v3253_v35, %s7674_s17  ;;  %v11234_v35 = vld [vmem:[#allocation7_spill] sm:$0xff] }
 0x358   : > { %v3247_v26 = vpop.f32.mrf.mxu1  ;;  %7419 = vmatprep.mubr.msk.bf16.mxu1 %vm797_vm0, %v11234_v35 }
 0x359   : > { %5543 = vrot.lane.b32.xlu1 %v3256_v57, %s7674_s17  ;;  %v3248_v37 = vadd.f32 %v9389_v27, %v3247_v26  ;;  %v9452_v26 = vpop.f32.mrf.mxu0 }
 0x35a   : > { %v7205_v36 = vpop.f32.mrf.mxu1  ;;  %11235 = vst [vmem:[#allocation101_spill] sm:$0xff] %v9452_v26 }
 0x35b   : > { %5537 = vrot.lane.b32.xlu0 %v3245_v48, %s7674_s17  ;;  %v3269_v19 = vadd.f32 %v7205_v36, %v9389_v27 }
 0x35c   : > { %v3260_v63 = vpop.f32.mrf.mxu1 }
 0x35d   : > { %5539 = vrot.lane.b32.xlu1 %v3248_v37, %s7674_s17  ;;  %v3261_v24 = vadd.f32 %v9389_v27, %v3260_v63 }
 0x35e   : > { %v7206_v21 = vpop.f32.mrf.mxu1 }
 0x35f   : > { %v3272_v43 = vadd.f32 %v7206_v21, %v9389_v27  ;;  %5549 = vrot.lane.b32.xlu0 %v3269_v19, %s7674_s17  ;;  %v9458_v19 = vpop.f32.mrf.mxu0  ;;  %v11237_v21 = vld [vmem:[#allocation9_spill] sm:$0xff] }
 0x360   : > { %v3263_v10 = vpop.f32.mrf.mxu1  ;;  %11236 = vst [vmem:[#allocation56_spill] sm:$0xff] %v9458_v19  ;;  %7420 = vmatmul.mubr.msk.bf16.gmra.mxu1 %vm797_vm0, %v11237_v21 }
 0x361   : > { %5551 = vrot.lane.b32.xlu1 %v3272_v43, %s7674_s17  ;;  %v3264_v23 = vadd.f32 %v9389_v27, %v3263_v10  ;;  %v11238_v10 = vld [vmem:[#allocation10_spill] sm:$0xff] }
 0x362   : > { %v7209_v22 = vpop.f32.mrf.mxu1  ;;  %7423 = vmatprep.mubr.msk.bf16.mxu1 %vm797_vm0, %v11238_v10 }
 0x363   : > { %5545 = vrot.lane.b32.xlu0 %v3261_v24, %s7674_s17  ;;  %v3285_v2 = vadd.f32 %v7209_v22, %v9389_v27 }
 0x364   : > { %v3276_v61 = vpop.f32.mrf.mxu1 }
 0x365   : > { %5547 = vrot.lane.b32.xlu1 %v3264_v23, %s7674_s17  ;;  %v3277_v48 = vadd.f32 %v9389_v27, %v3276_v61  ;;  %v9468_v61 = vpop.f32.mrf.mxu0 }
 0x366   : > { %v7210_v18 = vpop.f32.mrf.mxu1  ;;  %11239 = vst [vmem:[#allocation102_spill] sm:$0xff] %v9468_v61 }
 0x367   : > { %v3288_v13 = vadd.f32 %v7210_v18, %v9389_v27  ;;  %5557 = vrot.lane.b32.xlu0 %v3285_v2, %s7674_s17 }
 0x368   : > { %v3279_v57 = vpop.f32.mrf.mxu1 }
 0x369   : > { %5559 = vrot.lane.b32.xlu1 %v3288_v13, %s7674_s17  ;;  %v3280_v37 = vadd.f32 %v9389_v27, %v3279_v57 }
 0x36a   : > { %v7213_v36 = vpop.f32.mrf.mxu1 }
 0x36b   : > { %5553 = vrot.lane.b32.xlu0 %v3277_v48, %s7674_s17  ;;  %v3301_v43 = vadd.f32 %v7213_v36, %v9389_v27  ;;  %v9474_v48 = vpop.f32.mrf.mxu0  ;;  %v11241_v36 = vld [vmem:[#allocation14_spill] sm:$0xff] }
 0x36c   : > { %v3292_v63 = vpop.f32.mrf.mxu1  ;;  %11240 = vst [vmem:[#allocation6_spill] sm:$0xff] %v9474_v48  ;;  %7424 = vmatmul.mubr.msk.bf16.gmra.mxu1 %vm797_vm0, %v11241_v36  ;;  %v7657_v48 = vld [vmem:[%s10773_s3 + $0x8] sm:$0xff]  }
 0x36d   : > { %5555 = vrot.lane.b32.xlu1 %v3280_v37, %s7674_s17  ;;  %v3293_v2 = vadd.f32 %v9389_v27, %v3292_v63 }
 0x36e   : > { %v7214_v24 = vpop.f32.mrf.mxu1 }
 0x36f   : > { %v3304_v22 = vadd.f32 %v7214_v24, %v9389_v27  ;;  %5565 = vrot.lane.b32.xlu0 %v3301_v43, %s7674_s17  ;;  %v11242_v43 = vld [vmem:[#allocation18_spill] sm:$0xff] }
 0x370   : > { %v3295_v23 = vpop.f32.mrf.mxu1  ;;  %7427 = vmatprep.mubr.msk.bf16.mxu1 %vm797_vm0, %v11242_v43  ;;  %v11245_v43 = vld [vmem:[#allocation23_spill] sm:$0xff] }
 0x371   : > { %5567 = vrot.lane.b32.xlu1 %v3304_v22, %s7674_s17  ;;  %v3296_v13 = vadd.f32 %v9389_v27, %v3295_v23  ;;  %v9484_v23 = vpop.f32.mrf.mxu0 }
 0x372   : > { %v7217_v18 = vpop.f32.mrf.mxu1  ;;  %11243 = vst [vmem:[#allocation103_spill] sm:$0xff] %v9484_v23 }
 0x373   : > { %5561 = vrot.lane.b32.xlu0 %v3293_v2, %s7674_s17  ;;  %v3317_v37 = vadd.f32 %v7217_v18, %v9389_v27  ;;  %v9490_v10 = vpop.f32.mrf.mxu0 }
 0x374   : > { %v3308_v57 = vpop.f32.mrf.mxu1  ;;  %11244 = vst [vmem:[#allocation74_spill] sm:$0xff] %v9490_v10  ;;  %7428 = vmatmul.mubr.msk.bf16.gmra.mxu1 %vm797_vm0, %v11245_v43 }
 0x375   : > { %5563 = vrot.lane.b32.xlu1 %v3296_v13, %s7674_s17  ;;  %v3309_v2 = vadd.f32 %v9389_v27, %v3308_v57 }
 0x376   : > { %v7218_v63 = vpop.f32.mrf.mxu1 }
 0x377   : > { %v3320_v24 = vadd.f32 %v7218_v63, %v9389_v27  ;;  %5573 = vrot.lane.b32.xlu0 %v3317_v37, %s7674_s17  ;;  %v11246_v63 = vld [vmem:[#allocation15_spill] sm:$0xff] }
 0x378   : > { %v3311_v22 = vpop.f32.mrf.mxu1  ;;  %7431 = vmatprep.mubr.msk.bf16.mxu1 %vm797_vm0, %v11246_v63  ;;  %v11249_v63 = vld [vmem:[#allocation19_spill] sm:$0xff] }
 0x379   : > { %5575 = vrot.lane.b32.xlu1 %v3320_v24, %s7674_s17  ;;  %v3312_v18 = vadd.f32 %v9389_v27, %v3311_v22 }
 0x37a   : > { %v7221_v36 = vpop.f32.mrf.mxu1 }
 0x37b   : > { %5569 = vrot.lane.b32.xlu0 %v3309_v2, %s7674_s17  ;;  %v3333_v37 = vadd.f32 %v7221_v36, %v9389_v27  ;;  %v9500_v2 = vpop.f32.mrf.mxu0 }
 0x37c   : > { %v3324_v13 = vpop.f32.mrf.mxu1  ;;  %11247 = vst [vmem:[#allocation104_spill] sm:$0xff] %v9500_v2  ;;  %7432 = vmatmul.mubr.msk.bf16.gmra.mxu1 %vm797_vm0, %v11249_v63 }
 0x37d   : > { %5571 = vrot.lane.b32.xlu1 %v3312_v18, %s7674_s17  ;;  %v3325_v21 = vadd.f32 %v9389_v27, %v3324_v13  ;;  %v9506_v35 = vpop.f32.mrf.mxu0 }
 0x37e   : > { %v7222_v57 = vpop.f32.mrf.mxu1  ;;  %11248 = vst [vmem:[#allocation77_spill] sm:$0xff] %v9506_v35 }
 0x37f   : > { %v3336_v24 = vadd.f32 %v7222_v57, %v9389_v27  ;;  %5581 = vrot.lane.b32.xlu0 %v3333_v37, %s7674_s17  ;;  %v11250_v57 = vld [vmem:[#allocation21_spill] sm:$0xff] }
 0x380   : > { %v3327_v22 = vpop.f32.mrf.mxu1  ;;  %7435 = vmatprep.mubr.msk.bf16.mxu1 %vm797_vm0, %v11250_v57 }
 0x381   : > { %5583 = vrot.lane.b32.xlu1 %v3336_v24, %s7674_s17  ;;  %v3328_v36 = vadd.f32 %v9389_v27, %v3327_v22 }
 0x382   : > { %v7225_v43 = vpop.f32.mrf.mxu1 }
 0x383   : > { %5577 = vrot.lane.b32.xlu0 %v3325_v21, %s7674_s17  ;;  %v3349_v37 = vadd.f32 %v7225_v43, %v9389_v27  ;;  %v9516_v21 = vpop.f32.mrf.mxu0 }
 0x384   : > { %v3340_v18 = vpop.f32.mrf.mxu1 }
 0x385   : > { %5579 = vrot.lane.b32.xlu1 %v3328_v36, %s7674_s17  ;;  %v3341_v44 = vadd.f32 %v9389_v27, %v3340_v18  ;;  %v9526_v57 = vpop.f32.mrf.mxu0 }
 0x386   : > { %v7226_v13 = vpop.f32.mrf.mxu1 }
 0x387   : > { %v3352_v24 = vadd.f32 %v7226_v13, %v9389_v27  ;;  %5589 = vrot.lane.b32.xlu0 %v3349_v37, %s7674_s17  ;;  %v11251_v13 = vld [vmem:[#allocation24_spill] sm:$0xff]  ;;  %v11252_v37 = vld [vmem:[#allocation27_spill] sm:$0xff]  ;;  %v9537_v41 = vpop.f32.mrf.mxu0 }
 0x388   : > { %v3343_v22 = vpop.f32.mrf.mxu1  ;;  %7436 = vmatmul.mubr.msk.bf16.gmra.mxu1 %vm797_vm0, %v11251_v13  ;;  %v7648_v13 = vld [vmem:[%s10771_s1 + $0xe0] sm:$0xff]  }
 0x389   : > { %5591 = vrot.lane.b32.xlu1 %v3352_v24, %s7674_s17  ;;  %v3344_v43 = vadd.f32 %v9389_v27, %v3343_v22  ;;  %7439 = vmatprep.mubr.msk.bf16.mxu1 %vm797_vm0, %v11252_v37  ;;  %v11253_v37 = vld [vmem:[#allocation32_spill] sm:$0xff] }
 0x38a   : > { %v9520_v63 = vpop.f32.mrf.mxu1 }
 0x38b   : > { %5585 = vrot.lane.b32.xlu0 %v3341_v44, %s7674_s17  ;;  %v7647_v44 = vld [vmem:[%s10771_s1 + $0xe8] sm:$0xff]  }
 0x38c   : > { %v9524_v36 = vpop.f32.mrf.mxu1  ;;  %7479 = vmatprep.subr.bf16.mxu1 %v7647_v44 }
 0x38d   : > { %5587 = vrot.lane.b32.xlu1 %v3344_v43, %s7674_s17  ;;  %v9547_v43 = vpop.f32.mrf.mxu0  ;;  %7480 = vmatpush3.bf16.msra.mxu1 %v7647_v44 }
 0x38e   : > { %v9533_v18 = vpop.f32.mrf.mxu1  ;;  %7481 = vmatprep.subr.bf16.mxu1 %v7648_v13 }
 0x38f   : > { %v9557_v2 = vpop.f32.mrf.mxu0 }
 0x390   : > { %v9535_v24 = vpop.f32.mrf.mxu1  ;;  %7440 = vmatmul.mubr.msk.bf16.gmra.mxu1 %vm797_vm0, %v11253_v37 }
 0x391   : > { %7483 = vmatprep.mubr.msk.bf16.mxu1 %vm797_vm0, %v11205_v14  ;;  %7482 = vmatpush3.bf16.msra.mxu1 %v7648_v13  ;;  %v9566_v37 = vpop.f32.mrf.mxu0  ;;  %v7658_v13 = vld [vmem:[%s10773_s3] sm:$0xff]  }
 0x392   : > { %v9539_v22 = vpop.f32.mrf.mxu1  ;;  %7551 = vmatprep.subr.bf16.mxu1 %v7657_v48 }
 0x393   : > { %v9579_v61 = vpop.f32.mrf.mxu0 }
 0x394   : > { %v9549_v32 = vpop.f32.mrf.mxu1 }
 0x395   : > { %v9585_v42 = vpop.f32.mrf.mxu0 }
 0x396   : > { %v9555_v35 = vpop.f32.mrf.mxu1 }
 0x398   : > { %v9559_v10 = vpop.f32.mrf.mxu1  ;;  %7484 = vmatmul.mubr.msk.bf16.vlgmr.msra.gmra.mxu1 %vm797_vm0, %v11206_v45 }
 0x399   : > { %7487 = vmatprep.mubr.msk.bf16.mxu1 %vm797_vm0, %v11207_v7  ;;  %7552 = vmatpush3.bf16.msra.mxu1 %v7657_v48  ;;  %v9595_v7 = vpop.f32.mrf.mxu0 }
 0x39a   : > { %v9561_v23 = vpop.f32.mrf.mxu1  ;;  %7553 = vmatprep.subr.bf16.mxu1 %v7658_v13 }
 0x39c   : > { %v9568_v44 = vpop.f32.mrf.mxu1 }
 0x39d   : > { %7554 = vmatpush3.bf16.msra.mxu1 %v7658_v13  ;;  %v9601_v13 = vpop.f32.mrf.mxu0 }
 0x39e   : > { %v9574_v14 = vpop.f32.mrf.mxu1 }
 0x3a0   : > { %v9581_v19 = vpop.f32.mrf.mxu1  ;;  %7488 = vmatmul.mubr.msk.bf16.gmra.mxu1 %vm797_vm0, %v11208_v39 }
 0x3a1   : > { %7491 = vmatprep.mubr.msk.bf16.mxu1 %vm797_vm0, %v11209_v51  ;;  %v9611_v51 = vpop.f32.mrf.mxu0 }
 0x3a2   : > { %v9583_v26 = vpop.f32.mrf.mxu1 }
 0x3a3   : > { %v9617_v1 = vpop.f32.mrf.mxu0 }
 0x3a4   : > { %v9587_v45 = vpop.f32.mrf.mxu1 }
 0x3a6   : > { %v9593_v48 = vpop.f32.mrf.mxu1 }
 0x3a7   : > { %11254 = vst [vmem:[#allocation105_spill] sm:$0xff] %v9593_v48 }
 0x3a8   : > { %v9597_v52 = vpop.f32.mrf.mxu1  ;;  %7492 = vmatmul.mubr.msk.bf16.gmra.mxu1 %vm797_vm0, %v11210_v38 }
 0x3a9   : > { %11255 = vst [vmem:[#allocation80_spill] sm:$0xff] %v9597_v52  ;;  %7495 = vmatprep.mubr.msk.bf16.mxu1 %vm797_vm0, %v11211_v0  ;;  %v9627_v0 = vpop.f32.mrf.mxu0 }
 0x3aa   : > { %v9599_v40 = vpop.f32.mrf.mxu1  ;;  %11263 = vst [vmem:[#allocation92_spill] sm:$0xff] %v9627_v0  ;;  %v11274_v0 = vld [vmem:[#allocation34_spill] sm:$0xff] }
 0x3ab   : > { %11256 = vst [vmem:[#allocation106_spill] sm:$0xff] %v9599_v40 }
 0x3ac   : > { %v9603_v58 = vpop.f32.mrf.mxu1 }
 0x3ad   : > { %11257 = vst [vmem:[#allocation83_spill] sm:$0xff] %v9603_v58 }
 0x3ae   : > { %v9609_v39 = vpop.f32.mrf.mxu1 }
 0x3af   : > { %11258 = vst [vmem:[#allocation107_spill] sm:$0xff] %v9609_v39 }
 0x3b0   : > { %v9613_v59 = vpop.f32.mrf.mxu1  ;;  %7496 = vmatmul.mubr.msk.bf16.gmra.mxu1 %vm797_vm0, %v11212_v31 }
 0x3b1   : > { %11259 = vst [vmem:[#allocation86_spill] sm:$0xff] %v9613_v59  ;;  %7499 = vmatprep.mubr.msk.bf16.mxu1 %vm797_vm0, %v11213_v8  ;;  %v9633_v59 = vpop.f32.mrf.mxu0  ;;  %v11268_v8 = vld [vmem:[#allocation25_spill] sm:$0xff] }
 0x3b2   : > { %v9615_v20 = vpop.f32.mrf.mxu1  ;;  %11266 = vst [vmem:[#allocation2_spill] sm:$0xff] %v9633_v59  ;;  %v1951_v31 = vadd.f32 %v11268_v8, %v9389_v27 }
 0x3b3   : > { %11260 = vst [vmem:[#allocation108_spill] sm:$0xff] %v9615_v20  ;;  %v9647_v54 = vpop.f32.mrf.mxu0 }
 0x3b4   : > { %v9619_v40 = vpop.f32.mrf.mxu1 }
 0x3b5   : > { %11261 = vst [vmem:[#allocation89_spill] sm:$0xff] %v9619_v40  ;;  %v9663_v48 = vpop.f32.mrf.mxu0 }
 0x3b6   : > { %v9625_v38 = vpop.f32.mrf.mxu1 }
 0x3b7   : > { %11262 = vst [vmem:[#allocation109_spill] sm:$0xff] %v9625_v38 }
 0x3b8   : > { %v9629_v39 = vpop.f32.mrf.mxu1  ;;  %7500 = vmatmul.mubr.msk.bf16.gmra.mxu1 %vm797_vm0, %v11214_v5 }
 0x3b9   : > { %11264 = vst [vmem:[#allocation110_spill] sm:$0xff] %v9629_v39  ;;  %7503 = vmatprep.mubr.msk.bf16.mxu1 %vm797_vm0, %v11215_v15  ;;  %v11270_v39 = vld [vmem:[#allocation29_spill] sm:$0xff]  ;;  %v1954_v15 = vadd.f32 %v11272_v28, %v9389_v27 }
 0x3ba   : > { %v9631_v58 = vpop.f32.mrf.mxu1 }
 0x3bb   : > { %11265 = vst [vmem:[#allocation95_spill] sm:$0xff] %v9631_v58  ;;  %v1943_v58 = vadd.f32 %v9389_v27, %v11270_v39  ;;  %v1946_v39 = vadd.f32 %v9389_v27, %v11274_v0 }
 0x3bc   : > { %v9635_v20 = vpop.f32.mrf.mxu1 }
 0x3bd   : > { %11267 = vst [vmem:[#allocation4_spill] sm:$0xff] %v9635_v20 }
 0x3be   : > { %v9643_v38 = vpop.f32.mrf.mxu1 }
 0x3bf   : > { %11269 = vst [vmem:[#allocation8_spill] sm:$0xff] %v9643_v38  ;;  %v5534_v40 = vpop.permute.xlu1 %5533 }
 0x3c0   : > { %v9650_v20 = vsel %vm5881_vm7, %v1951_v31, %v5534_v40  ;;  %v9652_v52 = vpop.f32.mrf.mxu1  ;;  %7504 = vmatmul.mubr.msk.bf16.gmra.mxu1 %vm797_vm0, %v11216_v62 }
 0x3c1   : > { %11271 = vst [vmem:[#allocation13_spill] sm:$0xff] %v9650_v20  ;;  %v5530_v5 = vpop.permute.xlu0 %5529  ;;  %7507 = vmatprep.mubr.msk.bf16.mxu1 %vm797_vm0, %v11217_v12 }
 0x3c2   : > { %v9657_v59 = vsel %vm5881_vm7, %v1943_v58, %v5530_v5  ;;  %v9659_v8 = vpop.f32.mrf.mxu1  ;;  %v3583_v5 = vadd.f32 %v9520_v63, %v9309_v4  ;;  %v3586_v63 = vadd.f32 %v9533_v18, %v9317_v46 }
 0x3c3   : > { %11273 = vst [vmem:[#allocation17_spill] sm:$0xff] %v9657_v59  ;;  %v5536_v38 = vpop.permute.xlu1 %5535 }
 0x3c4   : > { %v9666_v31 = vsel %vm5881_vm7, %v1954_v15, %v5536_v38  ;;  %v9668_v40 = vpop.f32.mrf.mxu1  ;;  %v3575_v38 = vadd.f32 %v9524_v36, %v9315_v25  ;;  %v11278_v15 = vld [vmem:[#allocation41_spill] sm:$0xff]  ;;  %v3884_v4 = vadd.f32 %v9516_v21, %v3583_v5 }
 0x3c5   : > { %11275 = vst [vmem:[#allocation22_spill] sm:$0xff] %v9666_v31  ;;  %v5532_v28 = vpop.permute.xlu0 %5531  ;;  %v1967_v59 = vadd.f32 %v11278_v15, %v9389_v27  ;;  %v9685_v31 = vpop.f32.mrf.mxu0  ;;  %v3578_v15 = vadd.f32 %v9535_v24, %v9323_v53  ;;  %v11284_v24 = vld [vmem:[#allocation43_spill] sm:$0xff] }
 0x3c6   : > { %v9677_v58 = vsel %vm5881_vm7, %v1946_v39, %v5532_v28  ;;  %v9679_v0 = vpop.f32.mrf.mxu1  ;;  %v11280_v39 = vld [vmem:[#allocation40_spill] sm:$0xff]  ;;  %v3882_v36 = vadd.f32 %v9526_v57, %v3575_v38 }
 0x3c7   : > { %11276 = vst [vmem:[#allocation28_spill] sm:$0xff] %v9677_v58  ;;  %11277 = vst [vmem:[#allocation33_spill] sm:$0xff] %v9679_v0  ;;  %v1970_v28 = vadd.f32 %v11280_v39, %v9389_v27  ;;  %v11282_v0 = vld [vmem:[#allocation35_spill] sm:$0xff]  ;;  %v9702_v5 = vpop.f32.mrf.mxu0 }
 0x3c8   : > { %v9687_v20 = vpop.f32.mrf.mxu1  ;;  %v1959_v21 = vadd.f32 %v9389_v27, %v11282_v0  ;;  %7508 = vmatmul.mubr.msk.bf16.gmra.mxu1 %vm797_vm0, %v11218_v34  ;;  %v1962_v0 = vadd.f32 %v9389_v27, %v11284_v24  ;;  %v11286_v39 = vld [vmem:[#allocation51_spill] sm:$0xff] }
 0x3c9   : > { %11279 = vst [vmem:[#allocation39_spill] sm:$0xff] %v9687_v20  ;;  %v5542_v12 = vpop.permute.xlu0 %5541  ;;  %7511 = vmatprep.mubr.msk.bf16.mxu1 %vm797_vm0, %v11219_v6 }
 0x3ca   : > { %v9695_v58 = vsel %vm5881_vm7, %v1967_v59, %v5542_v12  ;;  %v7341_v25 = vpop.f32.mrf.mxu1  ;;  %v3885_v12 = vadd.f32 %v9537_v41, %v3586_v63  ;;  %v3599_v59 = vadd.f32 %v9539_v22, %v9325_v60  ;;  %v3883_v41 = vadd.f32 %v9547_v43, %v3578_v15 }
 0x3cb   : > { %11281 = vst [vmem:[#allocation45_spill] sm:$0xff] %v9695_v58  ;;  %v4119_v62 = vadd.f32 %v7341_v25, %v3884_v4  ;;  %v5544_v20 = vpop.permute.xlu1 %5543  ;;  %v3602_v25 = vadd.f32 %v9555_v35, %v9333_v55  ;;  %v3594_v55 = vadd.f32 %v9559_v10, %v9339_v30 }
 0x3cc   : > { %v9705_v46 = vsel %vm5881_vm7, %v1970_v28, %v5544_v20  ;;  %v3990_v18 = vpop.f32.mrf.mxu1  ;;  %v3591_v20 = vadd.f32 %v9549_v32, %v9331_v16  ;;  %v1983_v28 = vadd.f32 %v11286_v39, %v9389_v27 }
 0x3cd   : > { %11283 = vst [vmem:[#allocation49_spill] sm:$0xff] %v9705_v46  ;;  %v4117_v53 = vadd.f32 %v3990_v18, %v3882_v36  ;;  %v5538_v57 = vpop.permute.xlu0 %5537  ;;  %v4151_v63 = vadd.f32 %v9178_v33, %v4119_v62  ;;  %v9727_v36 = vpop.f32.mrf.mxu0  ;;  %v3889_v39 = vadd.f32 %v9579_v61, %v3602_v25 }
 0x3ce   : > { %v9719_v38 = vsel %vm5881_vm7, %v1959_v21, %v5538_v57  ;;  %v7342_v4 = vpop.f32.mrf.mxu1  ;;  %v3888_v21 = vadd.f32 %v9557_v2, %v3599_v59  ;;  %v3886_v24 = vadd.f32 %v9566_v37, %v3591_v20  ;;  %v3615_v37 = vadd.f32 %v9561_v23, %v9341_v47 }
 0x3cf   : > { %11285 = vst [vmem:[#allocation54_spill] sm:$0xff] %v9719_v38  ;;  %v4120_v60 = vadd.f32 %v7342_v4, %v3885_v12  ;;  %v5540_v22 = vpop.permute.xlu1 %5539  ;;  %v4149_v43 = vadd.f32 %v9178_v33, %v4117_v53  ;;  %v11288_v12 = vld [vmem:[#allocation50_spill] sm:$0xff]  ;;  %v4183_v4 = vmax.f32 %v4151_v63, 0.0  ;;  %v9749_v20 = vpop.f32.mrf.mxu0  ;;  %v3607_v47 = vadd.f32 %v9568_v44, %v9351_v9 }
 0x3d0   : > { %v9730_v16 = vsel %vm5881_vm7, %v1962_v0, %v5540_v22  ;;  %v3993_v32 = vpop.f32.mrf.mxu1  ;;  %v1986_v57 = vadd.f32 %v11288_v12, %v9389_v27  ;;  %7512 = vmatmul.mubr.msk.bf16.gmra.mxu1 %vm797_vm0, %v9374_v3  ;;  %v9767_v3 = vld [vmem:[%s10772_s2] ss:$0 sm:$0xff]  ;;  %v3618_v9 = vadd.f32 %v9574_v14, %v9354_v11  ;;  %v11296_v11 = vld [vmem:[#allocation72_spill] sm:$0xff] }
 0x3d1   : > { %11287 = vst [vmem:[#allocation59_spill] sm:$0xff] %v9730_v16  ;;  %v4152_v62 = vadd.f32 %v9178_v33, %v4120_v60  ;;  %v4118_v15 = vadd.f32 %v3993_v32, %v3883_v41  ;;  %v5550_v18 = vpop.permute.xlu0 %5549  ;;  %v11290_v41 = vld [vmem:[#allocation44_spill] sm:$0xff]  ;;  %v9774_v44 = vpop.f32.mrf.mxu0 }
 0x3d2   : > { %v9741_v35 = vsel %vm5881_vm7, %v1983_v28, %v5550_v18  ;;  %v7345_v0 = vpop.f32.mrf.mxu1  ;;  %v1975_v22 = vadd.f32 %v9389_v27, %v11290_v41  ;;  %v2002_v41 = vadd.f32 %v11296_v11, %v9389_v27 }
 0x3d3   : > { %11289 = vst [vmem:[#allocation61_spill] sm:$0xff] %v9741_v35  ;;  %v4184_v2 = vmax.f32 %v4152_v62, 0.0  ;;  %v4150_v59 = vadd.f32 %v9178_v33, %v4118_v15  ;;  %v4123_v53 = vadd.f32 %v7345_v0, %v3888_v21  ;;  %v5552_v60 = vpop.permute.xlu1 %5551  ;;  %v4181_v33 = vmax.f32 %v4149_v43, 0.0  ;;  %v11292_v62 = vld [vmem:[#allocation52_spill] sm:$0xff] }
 0x3d4   : > { %v9752_v30 = vsel %vm5881_vm7, %v1986_v57, %v5552_v60  ;;  %v4006_v10 = vpop.f32.mrf.mxu1  ;;  %v1978_v61 = vadd.f32 %v9389_v27, %v11292_v62  ;;  %v3887_v15 = vadd.f32 %v9585_v42, %v3594_v55  ;;  %v11298_v62 = vld [vmem:[#allocation57_spill] sm:$0xff] }
 0x3d5   : > { %11291 = vst [vmem:[#allocation65_spill] sm:$0xff] %v9752_v30  ;;  %v4214_v63 = vpack.c.bf16 %v4184_v2, %v4183_v4  ;;  %v4182_v28 = vmax.f32 %v4150_v59, 0.0  ;;  %v4121_v32 = vadd.f32 %v4006_v10, %v3886_v24  ;;  %v5546_v21 = vpop.permute.xlu0 %5545  ;;  %v4155_v43 = vadd.f32 %v9767_v3, %v4123_v53  ;;  %v11294_v24 = vld [vmem:[#allocation55_spill] sm:$0xff]  ;;  %v7646_v4 = vld [vmem:[%s10771_s1 + $0xc0] sm:$0xff]  }
 0x3d6   : > { %v9761_v23 = vsel %vm5881_vm7, %v1975_v22, %v5546_v21  ;;  %v7346_v25 = vpop.f32.mrf.mxu1  ;;  %v1999_v0 = vadd.f32 %v11294_v24, %v9389_v27  ;;  %v3892_v2 = vadd.f32 %v9595_v7, %v3615_v37  ;;  %v3890_v22 = vadd.f32 %v9601_v13, %v3607_v47 }
 0x3d7   : > { %11293 = vst [vmem:[#allocation66_spill] sm:$0xff] %v9761_v23  ;;  %v4213_v18 = vpack.c.bf16 %v4182_v28, %v4181_v33  ;;  %v4124_v12 = vadd.f32 %v7346_v25, %v3889_v39  ;;  %v5548_v57 = vpop.permute.xlu1 %5547  ;;  %v4153_v59 = vadd.f32 %v9767_v3, %v4121_v32  ;;  %v3610_v39 = vadd.f32 %v9581_v19, %v9360_v49  ;;  %v9802_v19 = vpop.f32.mrf.mxu0 }
 0x3d8   : > { %v9777_v42 = vsel %vm5881_vm7, %v1978_v61, %v5548_v57  ;;  %v4009_v55 = vpop.f32.mrf.mxu1  ;;  %v4187_v37 = vmax.f32 %v4155_v43, 0.0  ;;  %v1991_v13 = vadd.f32 %v9389_v27, %v11298_v62  ;;  %v3893_v61 = vadd.f32 %v9611_v51, %v3618_v9  ;;  %v11309_v62 = vld [vmem:[#allocation80_spill] sm:$0xff] }
 0x3d9   : > { %11295 = vst [vmem:[#allocation3_spill] sm:$0xff] %v9777_v42  ;;  %v4156_v53 = vadd.f32 %v9767_v3, %v4124_v12  ;;  %v4122_v60 = vadd.f32 %v4009_v55, %v3887_v15  ;;  %7375 = vmatprep.mubr.msk.bf16.mxu0 %vm797_vm0, %v4213_v18  ;;  %v5558_v14 = vpop.permute.xlu0 %5557  ;;  %v3631_v49 = vadd.f32 %v9583_v26, %v9362_v17  ;;  %v4185_v25 = vmax.f32 %v4153_v59, 0.0  ;;  %v11300_v12 = vld [vmem:[#allocation73_spill] sm:$0xff] }
 0x3da   : > { %v9792_v10 = vsel %vm5881_vm7, %v1999_v0, %v5558_v14  ;;  %v7349_v7 = vpop.f32.mrf.mxu1  ;;  %7376 = vmatmul.mubr.msk.bf16.vlgmr.msra.gmra.mxu0 %vm797_vm0, %v4214_v63  ;;  %v1994_v17 = vadd.f32 %v9389_v27, %v11300_v12  ;;  %v3623_v26 = vadd.f32 %v9587_v45, %v9372_v50  ;;  %v3891_v0 = vadd.f32 %v9617_v1, %v3610_v39  ;;  %v11303_v14 = vld [vmem:[#allocation105_spill] sm:$0xff]  ;;  %v11305_v1 = vld [vmem:[#allocation92_spill] sm:$0xff] }
 0x3db   : > { %11297 = vst [vmem:[#allocation69_spill] sm:$0xff] %v9792_v10  ;;  %v4188_v33 = vmax.f32 %v4156_v53, 0.0  ;;  %v4154_v28 = vadd.f32 %v9767_v3, %v4122_v60  ;;  %v4127_v32 = vadd.f32 %v7349_v7, %v3892_v2  ;;  %7444 = vmatpush3.bf16.msra.mxu0 %v9433_v29  ;;  %v5560_v21 = vpop.permute.xlu1 %5559  ;;  %v9810_v29 = vld [vmem:[%s10771_s1 + $0xf8] sm:$0xff]   ;;  %v11302_v53 = vld [vmem:[#allocation75_spill] sm:$0xff]  ;;  %v3634_v11 = vadd.f32 %v11303_v14, %v9376_v56  ;;  %v11306_v56 = vld [vmem:[#allocation78_spill] sm:$0xff] }
 0x3dc   : > { %v9805_v63 = vsel %vm5881_vm7, %v2002_v41, %v5560_v21  ;;  %v4022_v47 = vpop.f32.mrf.mxu1  ;;  %7445 = vmatprep.subr.bf16.mxu0 %v7646_v4  ;;  %v2015_v60 = vadd.f32 %v11302_v53, %v9389_v27  ;;  %v9825_v41 = vpop.f32.mrf.mxu0  ;;  %v11308_v21 = vld [vmem:[#allocation63_spill] sm:$0xff]  ;;  %v11311_v12 = vld [vmem:[#allocation76_spill] sm:$0xff] }
 0x3dd   : > { %11299 = vst [vmem:[#allocation25_spill] sm:$0xff] %v9805_v63  ;;  %v4216_v15 = vpack.c.bf16 %v4188_v33, %v4187_v37  ;;  %v4186_v18 = vmax.f32 %v4154_v28, 0.0  ;;  %v4125_v43 = vadd.f32 %v4022_v47, %v3890_v22  ;;  %v5554_v51 = vpop.permute.xlu0 %5553  ;;  %v4159_v55 = vadd.f32 %v9767_v3, %v4127_v32  ;;  %v11307_v28 = vld [vmem:[#allocation2_spill] sm:$0xff] }
 0x3de   : > { %v9817_v57 = vsel %vm5881_vm7, %v1991_v13, %v5554_v51  ;;  %v7350_v24 = vpop.f32.mrf.mxu1  ;;  %v3896_v22 = vadd.f32 %v11305_v1, %v3631_v49  ;;  %v2018_v33 = vadd.f32 %v11306_v56, %v9389_v27  ;;  %v3894_v32 = vadd.f32 %v11307_v28, %v3623_v26  ;;  %v11315_v1 = vld [vmem:[#allocation79_spill] sm:$0xff] }
 0x3df   : > { %11301 = vst [vmem:[#allocation29_spill] sm:$0xff] %v9817_v57  ;;  %v4215_v9 = vpack.c.bf16 %v4186_v18, %v4185_v25  ;;  %v4128_v2 = vadd.f32 %v7350_v24, %v3893_v61  ;;  %v5556_v59 = vpop.permute.xlu1 %5555  ;;  %7446 = vmatpush3.bf16.msra.mxu0 %v7646_v4  ;;  %v4157_v39 = vadd.f32 %v9767_v3, %v4125_v43  ;;  %v4191_v47 = vmax.f32 %v4159_v55, 0.0  ;;  %v11312_v24 = vld [vmem:[#allocation67_spill] sm:$0xff] }
 0x3e0   : > { %v9828_v45 = vsel %vm5881_vm7, %v1994_v17, %v5556_v59  ;;  %v4025_v50 = vpop.f32.mrf.mxu1  ;;  %7515 = vmatprep.subr.bf16.mxu0 %v9810_v29  ;;  %v3626_v13 = vadd.f32 %v11309_v62, %v11308_v21  ;;  %v2007_v17 = vadd.f32 %v9389_v27, %v11311_v12  ;;  %v3897_v26 = vadd.f32 %v9647_v54, %v3634_v11 }
 0x3e1   : > { %11304 = vst [vmem:[#allocation30_spill] sm:$0xff] %v9828_v45  ;;  %v4160_v4 = vadd.f32 %v9767_v3, %v4128_v2  ;;  %v4126_v7 = vadd.f32 %v4025_v50, %v3891_v0  ;;  %7379 = vmatprep.mubr.msk.bf16.mxu0 %vm797_vm0, %v4215_v9  ;;  %v5566_v37 = vpop.permute.xlu0 %5565  ;;  %v11313_v0 = vld [vmem:[#allocation106_spill] sm:$0xff]  ;;  %v9850_v2 = vpop.f32.mrf.mxu0  ;;  %v4189_v55 = vmax.f32 %v4157_v39, 0.0 }
 0x3e2   : > { %v9841_v61 = vsel %vm5881_vm7, %v2015_v60, %v5566_v37  ;;  %v7353_v49 = vpop.f32.mrf.mxu1  ;;  %7380 = vmatmul.mubr.msk.bf16.gmra.mxu0 %vm797_vm0, %v4216_v15  ;;  %v3647_v9 = vadd.f32 %v11313_v0, %v11312_v24  ;;  %v3895_v56 = vadd.f32 %v9663_v48, %v3626_v13  ;;  %v11323_v24 = vld [vmem:[#allocation84_spill] sm:$0xff] }
 0x3e3   : > { %11310 = vst [vmem:[#allocation34_spill] sm:$0xff] %v9841_v61  ;;  %v4192_v25 = vmax.f32 %v4160_v4, 0.0  ;;  %v4158_v18 = vadd.f32 %v9767_v3, %v4126_v7  ;;  %v4131_v43 = vadd.f32 %v7353_v49, %v3896_v22  ;;  %v5568_v51 = vpop.permute.xlu1 %5567  ;;  %v2010_v22 = vadd.f32 %v9389_v27, %v11315_v1  ;;  %v11316_v4 = vld [vmem:[#allocation36_spill] sm:$0xff]  ;;  %v11317_v7 = vld [vmem:[#allocation83_spill] sm:$0xff]  ;;  %v11320_v49 = vld [vmem:[#allocation98_spill] sm:$0xff] }
 0x3e4   : > { %v9853_v59 = vsel %vm5881_vm7, %v2018_v33, %v5568_v51  ;;  %v4038_v15 = vpop.f32.mrf.mxu1  ;;  %v3639_v54 = vadd.f32 %v11317_v7, %v11316_v4  ;;  %v2034_v0 = vadd.f32 %v11323_v24, %v9389_v27 }
 0x3e5   : > { %11314 = vst [vmem:[#allocation41_spill] sm:$0xff] %v9853_v59  ;;  %v4218_v53 = vpack.c.bf16 %v4192_v25, %v4191_v47  ;;  %v4190_v60 = vmax.f32 %v4158_v18, 0.0  ;;  %v4129_v14 = vadd.f32 %v4038_v15, %v3894_v32  ;;  %v5562_v50 = vpop.permute.xlu0 %5561  ;;  %v4163_v28 = vadd.f32 %v9767_v3, %v4131_v43  ;;  %v11319_v32 = vld [vmem:[#allocation81_spill] sm:$0xff]  ;;  %v11321_v47 = vld [vmem:[#allocation107_spill] sm:$0xff]  ;;  %v9868_v18 = vpop.f32.mrf.mxu0 }
 0x3e6   : > { %v9860_v11 = vsel %vm5881_vm7, %v2007_v17, %v5562_v50  ;;  %v7354_v37 = vpop.f32.mrf.mxu1  ;;  %v2031_v62 = vadd.f32 %v11319_v32, %v9389_v27  ;;  %v3650_v25 = vadd.f32 %v11321_v47, %v11320_v49  ;;  %v3900_v17 = vadd.f32 %v9685_v31, %v3647_v9 }
 0x3e7   : > { %11318 = vst [vmem:[#allocation40_spill] sm:$0xff] %v9860_v11  ;;  %v4217_v33 = vpack.c.bf16 %v4190_v60, %v4189_v55  ;;  %v4132_v39 = vadd.f32 %v7354_v37, %v3897_v26  ;;  %v5564_v21 = vpop.permute.xlu1 %5563  ;;  %v4161_v48 = vadd.f32 %v9767_v3, %v4129_v14  ;;  %v3898_v15 = vadd.f32 %v9702_v5, %v3639_v54  ;;  %v11324_v55 = vld [vmem:[#allocation38_spill] sm:$0xff]  ;;  %v11328_v54 = vld [vmem:[#allocation99_spill] sm:$0xff] }
 0x3e8   : > { %v9871_v51 = vsel %vm5881_vm7, %v2010_v22, %v5564_v21  ;;  %v4041_v12 = vpop.f32.mrf.mxu1  ;;  %v11325_v60 = vld [vmem:[#allocation86_spill] sm:$0xff]  ;;  %v4195_v9 = vmax.f32 %v4163_v28, 0.0  ;;  %v3901_v5 = vadd.f32 %v9727_v36, %v3650_v25  ;;  %v9892_v21 = vpop.f32.mrf.mxu0 }
 0x3e9   : > { %11322 = vst [vmem:[#allocation35_spill] sm:$0xff] %v9871_v51  ;;  %v4164_v13 = vadd.f32 %v9767_v3, %v4132_v39  ;;  %v4130_v43 = vadd.f32 %v4041_v12, %v3895_v56  ;;  %7383 = vmatprep.mubr.msk.bf16.mxu0 %vm797_vm0, %v4217_v33  ;;  %v5574_v26 = vpop.permute.xlu0 %5573  ;;  %v3642_v50 = vadd.f32 %v11325_v60, %v11324_v55  ;;  %v11327_v37 = vld [vmem:[#allocation82_spill] sm:$0xff]  ;;  %v11329_v33 = vld [vmem:[#allocation108_spill] sm:$0xff]  ;;  %v4193_v28 = vmax.f32 %v4161_v48, 0.0 }
 0x3ea   : > { %v9883_v1 = vsel %vm5881_vm7, %v2031_v62, %v5574_v26  ;;  %v7357_v31 = vpop.f32.mrf.mxu1  ;;  %7384 = vmatmul.mubr.msk.bf16.gmra.mxu0 %vm797_vm0, %v4218_v53  ;;  %v2023_v56 = vadd.f32 %v9389_v27, %v11327_v37  ;;  %v3663_v39 = vadd.f32 %v11329_v33, %v11328_v54  ;;  %v11333_v26 = vld [vmem:[#allocation89_spill] sm:$0xff]  ;;  %v7330_v37 = vpop.f32.mrf.mxu0 }
 0x3eb   : > { %11326 = vst [vmem:[#allocation43_spill] sm:$0xff] %v9883_v1  ;;  %v4196_v14 = vmax.f32 %v4164_v13, 0.0  ;;  %v4162_v22 = vadd.f32 %v9767_v3, %v4130_v43  ;;  %v4135_v4 = vadd.f32 %v7357_v31, %v3900_v17  ;;  %v5576_v7 = vpop.permute.xlu1 %5575  ;;  %v11331_v17 = vld [vmem:[#allocation85_spill] sm:$0xff]  ;;  %v11332_v43 = vld [vmem:[#allocation46_spill] sm:$0xff]  ;;  %v3899_v55 = vadd.f32 %v9749_v20, %v3642_v50 }
 0x3ec   : > { %v9895_v32 = vsel %vm5881_vm7, %v2034_v0, %v5576_v7  ;;  %v4054_v53 = vpop.f32.mrf.mxu1  ;;  %v2026_v13 = vadd.f32 %v9389_v27, %v11331_v17  ;;  %v3655_v36 = vadd.f32 %v11333_v26, %v11332_v43  ;;  %v3904_v33 = vadd.f32 %v9774_v44, %v3663_v39  ;;  %v11341_v17 = vld [vmem:[#allocation110_spill] sm:$0xff] }
 0x3ed   : > { %11330 = vst [vmem:[#allocation51_spill] sm:$0xff] %v9895_v32  ;;  %v4220_v62 = vpack.c.bf16 %v4196_v14, %v4195_v9  ;;  %v4194_v49 = vmax.f32 %v4162_v22, 0.0  ;;  %v4133_v47 = vadd.f32 %v4054_v53, %v3898_v15  ;;  %v5570_v12 = vpop.permute.xlu0 %5569  ;;  %v4167_v60 = vadd.f32 %v9767_v3, %v4135_v4  ;;  %v11335_v15 = vld [vmem:[#allocation87_spill] sm:$0xff]  ;;  %v11336_v14 = vld [vmem:[#allocation100_spill] sm:$0xff]  ;;  %v11337_v22 = vld [vmem:[#allocation109_spill] sm:$0xff] }
 0x3ee   : > { %v9902_v25 = vsel %vm5881_vm7, %v2023_v56, %v5570_v12  ;;  %v7358_v24 = vpop.f32.mrf.mxu1  ;;  %v2047_v9 = vadd.f32 %v11335_v15, %v9389_v27  ;;  %v3666_v7 = vadd.f32 %v11337_v22, %v11336_v14  ;;  %v11339_v53 = vld [vmem:[#allocation90_spill] sm:$0xff]  ;;  %v11340_v12 = vld [vmem:[#allocation48_spill] sm:$0xff]  ;;  %v3854_v14 = vpop.f32.mrf.mxu0 }
 0x3ef   : > { %11334 = vst [vmem:[#allocation50_spill] sm:$0xff] %v9902_v25  ;;  %v4219_v0 = vpack.c.bf16 %v4194_v49, %v4193_v28  ;;  %v4136_v48 = vadd.f32 %v7358_v24, %v3901_v5  ;;  %v5572_v31 = vpop.permute.xlu1 %5571  ;;  %v4165_v20 = vadd.f32 %v9767_v3, %v4133_v47  ;;  %v2050_v28 = vadd.f32 %v11339_v53, %v9389_v27  ;;  %v11348_v53 = vld [vmem:[#allocation56_spill] sm:$0xff] }
 0x3f0   : > { %v9911_v54 = vsel %vm5881_vm7, %v2026_v13, %v5572_v31  ;;  %v4057_v56 = vpop.f32.mrf.mxu1  ;;  %v3902_v49 = vadd.f32 %v9802_v19, %v3655_v36  ;;  %v3658_v13 = vadd.f32 %v11341_v17, %v11340_v12  ;;  %v4199_v39 = vmax.f32 %v4167_v60, 0.0  ;;  %v11344_v36 = vld [vmem:[#allocation101_spill] sm:$0xff]  ;;  %v11345_v31 = vld [vmem:[#allocation95_spill] sm:$0xff]  ;;  %v11349_v12 = vld [vmem:[#allocation4_spill] sm:$0xff] }
 0x3f1   : > { %11338 = vst [vmem:[#allocation44_spill] sm:$0xff] %v9911_v54  ;;  %v4168_v50 = vadd.f32 %v9767_v3, %v4136_v48  ;;  %v4134_v4 = vadd.f32 %v4057_v56, %v3899_v55  ;;  %7387 = vmatprep.mubr.msk.bf16.mxu0 %vm797_vm0, %v4219_v0  ;;  %v5582_v5 = vpop.permute.xlu0 %5581  ;;  %v11343_v0 = vld [vmem:[#allocation88_spill] sm:$0xff]  ;;  %v3905_v19 = vadd.f32 %v9825_v41, %v3666_v7 }
 0x3f2   : > { %v9923_v43 = vsel %vm5881_vm7, %v2047_v9, %v5582_v5  ;;  %v7361_v44 = vpop.f32.mrf.mxu1  ;;  %7388 = vmatmul.mubr.msk.bf16.gmra.mxu0 %vm797_vm0, %v4220_v62  ;;  %v2039_v48 = vadd.f32 %v9389_v27, %v11343_v0  ;;  %v3679_v15 = vadd.f32 %v11345_v31, %v11344_v36  ;;  %v4197_v62 = vmax.f32 %v4165_v20, 0.0  ;;  %v11353_v0 = vld [vmem:[#allocation8_spill] sm:$0xff]  ;;  %v7333_v31 = vpop.f32.mrf.mxu0 }
 0x3f3   : > { %11342 = vst [vmem:[#allocation52_spill] sm:$0xff] %v9923_v43  ;;  %v4200_v47 = vmax.f32 %v4168_v50, 0.0  ;;  %v4166_v26 = vadd.f32 %v9767_v3, %v4134_v4  ;;  %v4139_v24 = vadd.f32 %v7361_v44, %v3904_v33  ;;  %v5584_v55 = vpop.permute.xlu1 %5583  ;;  %v11347_v33 = vld [vmem:[#allocation91_spill] sm:$0xff]  ;;  %v3671_v17 = vadd.f32 %v11349_v12, %v11348_v53  ;;  %v11356_v53 = vld [vmem:[#allocation6_spill] sm:$0xff] }
 0x3f4   : > { %v9933_v9 = vsel %vm5881_vm7, %v2050_v28, %v5584_v55  ;;  %v4070_v22 = vpop.f32.mrf.mxu1  ;;  %v2042_v5 = vadd.f32 %v9389_v27, %v11347_v33  ;;  %v3903_v44 = vadd.f32 %v9850_v2, %v3658_v13 }
 0x3f5   : > { %11346 = vst [vmem:[#allocation55_spill] sm:$0xff] %v9933_v9  ;;  %v4222_v60 = vpack.c.bf16 %v4200_v47, %v4199_v39  ;;  %v4198_v56 = vmax.f32 %v4166_v26, 0.0  ;;  %v4137_v50 = vadd.f32 %v4070_v22, %v3902_v49  ;;  %v5578_v4 = vpop.permute.xlu0 %5577  ;;  %v4171_v55 = vadd.f32 %v9767_v3, %v4139_v24  ;;  %v11351_v49 = vld [vmem:[#allocation93_spill] sm:$0xff]  ;;  %v11352_v26 = vld [vmem:[#allocation102_spill] sm:$0xff] }
 0x3f6   : > { %v9940_v41 = vsel %vm5881_vm7, %v2039_v48, %v5578_v4  ;;  %v7362_v7 = vpop.f32.mrf.mxu1  ;;  %v2063_v47 = vadd.f32 %v11351_v49, %v9389_v27  ;;  %v3682_v36 = vadd.f32 %v11353_v0, %v11352_v26  ;;  %v3908_v4 = vadd.f32 %v9868_v18, %v3679_v15 }
 0x3f7   : > { %11350 = vst [vmem:[#allocation72_spill] sm:$0xff] %v9940_v41  ;;  %v4221_v28 = vpack.c.bf16 %v4198_v56, %v4197_v62  ;;  %v4140_v20 = vadd.f32 %v7362_v7, %v3905_v19  ;;  %v5580_v39 = vpop.permute.xlu1 %5579  ;;  %v4169_v2 = vadd.f32 %v9767_v3, %v4137_v50  ;;  %v11355_v62 = vld [vmem:[#allocation96_spill] sm:$0xff]  ;;  %v3906_v33 = vadd.f32 %v9892_v21, %v3671_v17  ;;  %v3867_v21 = vpop.f32.mrf.mxu0 }
 0x3f8   : > { %v9949_v22 = vsel %vm5881_vm7, %v2042_v5, %v5580_v39  ;;  %v4073_v48 = vpop.f32.mrf.mxu1  ;;  %v2066_v56 = vadd.f32 %v11355_v62, %v9389_v27  ;;  %v3674_v5 = vadd.f32 %v9652_v52, %v11356_v53  ;;  %v4203_v15 = vmax.f32 %v4171_v55, 0.0  ;;  %v11358_v39 = vld [vmem:[#allocation103_spill] sm:$0xff] }
 0x3f9   : > { %11354 = vst [vmem:[#allocation57_spill] sm:$0xff] %v9949_v22  ;;  %v4172_v13 = vadd.f32 %v9767_v3, %v4140_v20  ;;  %v4138_v24 = vadd.f32 %v4073_v48, %v3903_v44  ;;  %7391 = vmatprep.mubr.msk.bf16.mxu0 %vm797_vm0, %v4221_v28  ;;  %v5590_v19 = vpop.permute.xlu0 %5589  ;;  %v3909_v20 = vadd.f32 %v7330_v37, %v3682_v36  ;;  %v4201_v49 = vmax.f32 %v4169_v2, 0.0  ;;  %v7334_v62 = vpop.f32.mrf.mxu0 }
 0x3fa   : > { %v9961_v12 = vsel %vm5881_vm7, %v2063_v47, %v5590_v19  ;;  %v7365_v18 = vpop.f32.mrf.mxu1  ;;  %7392 = vmatmul.mubr.msk.bf16.gmra.mxu0 %vm797_vm0, %v4222_v60  ;;  %v3695_v27 = vadd.f32 %v9659_v8, %v11358_v39  ;;  %v11360_v60 = vld [vmem:[#allocation74_spill] sm:$0xff]  ;;  %v11362_v8 = vld [vmem:[#allocation33_spill] sm:$0xff] }
 0x3fb   : > { %11357 = vst [vmem:[#allocation73_spill] sm:$0xff] %v9961_v12  ;;  %v4204_v50 = vmax.f32 %v4172_v13, 0.0  ;;  %v4170_v7 = vadd.f32 %v9767_v3, %v4138_v24  ;;  %v4143_v44 = vadd.f32 %v7365_v18, %v3908_v4  ;;  %v5592_v28 = vpop.permute.xlu1 %5591  ;;  %v3687_v55 = vadd.f32 %v9668_v40, %v11360_v60  ;;  %v11361_v24 = vld [vmem:[#allocation104_spill] sm:$0xff]  ;;  %v3870_v39 = vpop.f32.mrf.mxu0 }
 0x3fc   : > { %v9968_v17 = vsel %vm5881_vm7, %v2066_v56, %v5592_v28  ;;  %v4086_v52 = vpop.f32.mrf.mxu1  ;;  %v3907_v13 = vadd.f32 %v3854_v14, %v3674_v5  ;;  %v3698_v19 = vadd.f32 %v11362_v8, %v11361_v24  ;;  %v3912_v53 = vadd.f32 %v7333_v31, %v3695_v27  ;;  %v11364_v14 = vld [vmem:[#allocation39_spill] sm:$0xff] }
 0x3fd   : > { %11359 = vst [vmem:[#allocation75_spill] sm:$0xff] %v9968_v17  ;;  %v4224_v47 = vpack.c.bf16 %v4204_v50, %v4203_v15  ;;  %v4202_v26 = vmax.f32 %v4170_v7, 0.0  ;;  %v4141_v0 = vadd.f32 %v4086_v52, %v3906_v33  ;;  %v4175_v37 = vadd.f32 %v9767_v3, %v4143_v44  ;;  %v11363_v15 = vld [vmem:[#allocation77_spill] sm:$0xff] }
 0x3fe   : > { %v7366_v48 = vpop.f32.mrf.mxu1  ;;  %v3910_v40 = vadd.f32 %v3867_v21, %v3687_v55  ;;  %v3690_v5 = vadd.f32 %v11364_v14, %v11363_v15  ;;  %v3913_v31 = vadd.f32 %v7334_v62, %v3698_v19  ;;  %v11367_v15 = vld [vmem:[#allocation16_spill] sm:$0xff] }
 0x3ff   : > { %v4223_v4 = vpack.c.bf16 %v4202_v26, %v4201_v49  ;;  %v4144_v36 = vadd.f32 %v7366_v48, %v3909_v20  ;;  %v4173_v2 = vadd.f32 %v9767_v3, %v4141_v0  ;;  %v4207_v7 = vmax.f32 %v4175_v37, 0.0  ;;  %v11368_v14 = vld [vmem:[#allocation20_spill] sm:$0xff] }
 0x400   : > { %v4089_v56 = vpop.f32.mrf.mxu1  ;;  %v3911_v21 = vadd.f32 %v3870_v39, %v3690_v5  ;;  %v11369_v5 = vld [vmem:[#allocation26_spill] sm:$0xff] }
 0x401   : > { %v4176_v18 = vadd.f32 %v9767_v3, %v4144_v36  ;;  %v4142_v33 = vadd.f32 %v4089_v56, %v3907_v13  ;;  %7395 = vmatprep.mubr.msk.bf16.mxu0 %vm797_vm0, %v4223_v4  ;;  %v4205_v52 = vmax.f32 %v4173_v2, 0.0  ;;  %v11377_v39 = vld [vmem:[#allocation62_spill] sm:$0xff] }
 0x402   : > { %v7369_v50 = vpop.f32.mrf.mxu1  ;;  %7396 = vmatmul.mubr.msk.bf16.gmra.mxu0 %vm797_vm0, %v4224_v47 }
 0x403   : > { %v4208_v44 = vmax.f32 %v4176_v18, 0.0  ;;  %v4174_v28 = vadd.f32 %v9767_v3, %v4142_v33  ;;  %v4147_v20 = vadd.f32 %v7369_v50, %v3912_v53  ;;  %v11365_v18 = vld [vmem:[#allocation5_spill] sm:$0xff]  ;;  %v7650_v33 = vld [vmem:[%s10771_s1 + $0xf0] sm:$0xff]   ;;  %v11370_v50 = vld [vmem:[#allocation31_spill] sm:$0xff] }
 0x404   : > { %v4102_v27 = vpop.f32.mrf.mxu1 }
 0x405   : > { %v4226_v49 = vpack.c.bf16 %v4208_v44, %v4207_v7  ;;  %v4206_v26 = vmax.f32 %v4174_v28, 0.0  ;;  %v4145_v0 = vadd.f32 %v4102_v27, %v3910_v40  ;;  %v4179_v48 = vadd.f32 %v9767_v3, %v4147_v20  ;;  %v11366_v40 = vld [vmem:[#allocation11_spill] sm:$0xff]  ;;  %v11371_v7 = vld [vmem:[#allocation37_spill] sm:$0xff]  ;;  %v11372_v44 = vld [vmem:[#allocation42_spill] sm:$0xff] }
 0x406   : > { %v7370_v60 = vpop.f32.mrf.mxu1  ;;  %v11374_v28 = vld [vmem:[#allocation53_spill] sm:$0xff]  ;;  %v11375_v20 = vld [vmem:[#allocation58_spill] sm:$0xff]  ;;  %v11378_v27 = vld [vmem:[#allocation64_spill] sm:$0xff] }
 0x407   : > { %v4225_v55 = vpack.c.bf16 %v4206_v26, %v4205_v52  ;;  %v4148_v13 = vadd.f32 %v7370_v60, %v3913_v31  ;;  %v4177_v47 = vadd.f32 %v9767_v3, %v4145_v0  ;;  %v4211_v24 = vmax.f32 %v4179_v48, 0.0  ;;  %v11376_v31 = vld [vmem:[#allocation60_spill] sm:$0xff]  ;;  %v11379_v52 = vld [vmem:[#allocation70_spill] sm:$0xff]  ;;  %v11380_v26 = vld [vmem:[#allocation71_spill] sm:$0xff] }
 0x408   : > { %v4105_v4 = vpop.f32.mrf.mxu1  ;;  %v11381_v0 = vld [vmem:[#allocation12_spill] sm:$0xff] }
 0x409   : > { %v4180_v37 = vadd.f32 %v9767_v3, %v4148_v13  ;;  %v4146_v36 = vadd.f32 %v4105_v4, %v3911_v21  ;;  %7399 = vmatprep.mubr.msk.bf16.mxu0 %vm797_vm0, %v4225_v55  ;;  %v4209_v62 = vmax.f32 %v4177_v47, 0.0  ;;  %v11382_v55 = vld [vmem:[#allocation7_spill] sm:$0xff]  ;;  %v11384_v13 = vld [vmem:[#allocation10_spill] sm:$0xff] }
 0x40a   : > { %7400 = vmatmul.mubr.msk.bf16.gmra.mxu0 %vm797_vm0, %v4226_v49  ;;  %v10028_v49 = vpop.f32.mrf.mxu1  ;;  %v11385_v4 = vld [vmem:[#allocation14_spill] sm:$0xff] }
 0x40b   : > { %v4212_v8 = vmax.f32 %v4180_v37, 0.0  ;;  %v4178_v19 = vadd.f32 %v9767_v3, %v4146_v36  ;;  %v11386_v36 = vld [vmem:[#allocation18_spill] sm:$0xff] }
 0x40c   : > { %v10034_v60 = vpop.f32.mrf.mxu1 }
 0x40d   : > { %v4228_v56 = vpack.c.bf16 %v4212_v8, %v4211_v24  ;;  %v4210_v53 = vmax.f32 %v4178_v19, 0.0  ;;  %v11387_v24 = vld [vmem:[#allocation23_spill] sm:$0xff] }
 0x40e   : > { %v10036_v21 = vpop.f32.mrf.mxu1 }
 0x40f   : > { %v4227_v2 = vpack.c.bf16 %v4210_v53, %v4209_v62  ;;  %v11388_v62 = vld [vmem:[#allocation15_spill] sm:$0xff] }
 0x411   : > { %7403 = vmatprep.mubr.msk.bf16.mxu0 %vm797_vm0, %v4227_v2 }
 0x412   : > { %7404 = vmatmul.mubr.msk.bf16.gmra.mxu0 %vm797_vm0, %v4228_v56  ;;  %v11389_v56 = vld [vmem:[#allocation19_spill] sm:$0xff] }
 0x413   : > { %7447 = vmatprep.mubr.msk.bf16.mxu0 %vm797_vm0, %v11365_v18  ;;  %v11390_v18 = vld [vmem:[#allocation21_spill] sm:$0xff] }
 0x41a   : > { %7448 = vmatmul.mubr.msk.bf16.vlgmr.msra.gmra.mxu0 %vm797_vm0, %v11366_v40  ;;  %v7660_v40 = vld [vmem:[%s7738_s8 + $0xd0] sm:$0xf] }
 0x41b   : > { %7516 = vmatpush3.bf16.msra.mxu0 %v9810_v29  ;;  %7451 = vmatprep.mubr.msk.bf16.mxu0 %vm797_vm0, %v11367_v15  ;;  %v11373_v29 = vld [vmem:[#allocation47_spill] sm:$0xff]  ;;  %v4992_v15 = vrot.slane %v7660_v40, 5 }
 0x41c   : > { %7517 = vmatprep.subr.bf16.mxu0 %v7650_v33 }
 0x41f   : > { %7518 = vmatpush3.bf16.msra.mxu0 %v7650_v33  ;;  %v11391_v33 = vld [vmem:[#allocation24_spill] sm:$0xff] }
 0x422   : > { %7452 = vmatmul.mubr.msk.bf16.gmra.mxu0 %vm797_vm0, %v11368_v14 }
 0x423   : > { %7455 = vmatprep.mubr.msk.bf16.mxu0 %vm797_vm0, %v11369_v5  ;;  %v7661_v5 = vld [vmem:[%s7738_s8 + $0xcc] sm:$0xf] }
 0x42a   : > { %7456 = vmatmul.mubr.msk.bf16.gmra.mxu0 %vm797_vm0, %v11370_v50  ;;  %v6468_v50 = vrot.slane %v7661_v5, 9 }
 0x42b   : > { %7459 = vmatprep.mubr.msk.bf16.mxu0 %vm797_vm0, %v11371_v7  ;;  %v4994_v7 = vrot.slane %v4992_v15, 4 }
 0x432   : > { %7460 = vmatmul.mubr.msk.bf16.gmra.mxu0 %vm797_vm0, %v11372_v44  ;;  %v7662_v44 = vld [vmem:[%s7738_s8 + $0xd4] sm:$0x1] }
 0x433   : > { %7463 = vmatprep.mubr.msk.bf16.mxu0 %vm797_vm0, %v11373_v29  ;;  %v4995_v29 = vrot.slane %v7662_v44, 5 }
 0x43a   : > { %7464 = vmatmul.mubr.msk.bf16.gmra.mxu0 %vm797_vm0, %v11374_v28 }
 0x43b   : > { %7467 = vmatprep.mubr.msk.bf16.mxu0 %vm797_vm0, %v11375_v20  ;;  %v11392_v20 = vld [vmem:[#allocation27_spill] sm:$0xff] }
 0x442   : > { %7468 = vmatmul.mubr.msk.bf16.gmra.mxu0 %vm797_vm0, %v11376_v31  ;;  %v11393_v31 = vld [vmem:[#allocation32_spill] sm:$0xff] }
 0x443   : > { %7471 = vmatprep.mubr.msk.bf16.mxu0 %vm797_vm0, %v11377_v39 }
 0x44a   : > { %7472 = vmatmul.mubr.msk.bf16.gmra.mxu0 %vm797_vm0, %v11378_v27  ;;  %v4993_v27 = vsel %vm8302_vm6, %v6468_v50, %v4992_v15 }
 0x44b   : > { %7475 = vmatprep.mubr.msk.bf16.mxu0 %vm797_vm0, %v11218_v34  ;;  %v11383_v34 = vld [vmem:[#allocation9_spill] sm:$0xff] }
 0x452   : > { %7476 = vmatmul.mubr.msk.bf16.gmra.mxu0 %vm797_vm0, %v11219_v6  ;;  %v10042_v6 = vpop.f32.mrf.mxu1 }
 0x453   : > { %7519 = vmatprep.mubr.msk.bf16.mxu0 %vm797_vm0, %v11379_v52  ;;  %v4996_v52 = vsel %vm8302_vm6, %v4994_v7, %v4995_v29 }
 0x454   : > { %v10044_v48 = vpop.f32.mrf.mxu1 }
 0x456   : > { %v10050_v47 = vpop.f32.mrf.mxu1 }
 0x458   : > { %v10052_v37 = vpop.f32.mrf.mxu1 }
 0x45a   : > { %7520 = vmatmul.mubr.msk.bf16.vlgmr.msra.gmra.mxu0 %vm797_vm0, %v11380_v26  ;;  %v10058_v8 = vpop.f32.mrf.mxu1 }
 0x45b   : > { %7523 = vmatprep.mubr.msk.bf16.mxu0 %vm797_vm0, %v11381_v0  ;;  %v6469_v0 = vcombine.low %v4993_v27, %v4996_v52 }
 0x45c   : > { %v10060_v19 = vpop.f32.mrf.mxu1 }
 0x45e   : > { %v10066_v53 = vpop.f32.mrf.mxu1 }
 0x460   : > { %v10068_v2 = vpop.f32.mrf.mxu1 }
 0x462   : > { %7524 = vmatmul.mubr.msk.bf16.gmra.mxu0 %vm797_vm0, %v11382_v55  ;;  %v10075_v14 = vpop.f32.mrf.mxu1 }
 0x463   : > { %7527 = vmatprep.mubr.msk.bf16.mxu0 %vm797_vm0, %v11383_v34 }
 0x464   : > { %v10079_v28 = vpop.f32.mrf.mxu1 }
 0x466   : > { %v10089_v26 = vpop.f32.mrf.mxu1 }
 0x468   : > { %v10091_v55 = vpop.f32.mrf.mxu1 }
 0x46a   : > { %7528 = vmatmul.mubr.msk.bf16.gmra.mxu0 %vm797_vm0, %v11384_v13  ;;  %v10094_v34 = vpop.f32.mrf.mxu1 }
 0x46b   : > { %7531 = vmatprep.mubr.msk.bf16.mxu0 %vm797_vm0, %v11385_v4 }
 0x46c   : > { %v10096_v13 = vpop.f32.mrf.mxu1 }
 0x472   : > { %7532 = vmatmul.mubr.msk.bf16.gmra.mxu0 %vm797_vm0, %v11386_v36  ;;  %v10101_v36 = vld [vmem:[%s10774_s4] ss:$0 sm:$0xff] }
 0x473   : > { %7535 = vmatprep.mubr.msk.bf16.mxu0 %vm797_vm0, %v11387_v24  ;;  %11395 = vst [vmem:[#allocation105_spill] sm:$0xff] %v10101_v36 }
 0x47a   : > { %7536 = vmatmul.mubr.msk.bf16.gmra.mxu0 %vm797_vm0, %v11388_v62 }
 0x47b   : > { %7539 = vmatprep.mubr.msk.bf16.mxu0 %vm797_vm0, %v11389_v56  ;;  %v10104_v56 = vpop.f32.mrf.mxu1 }
 0x47d   : > { %v10109_v5 = vpop.f32.mrf.mxu1 }
 0x47e   : > { %11396 = vst [vmem:[#allocation92_spill] sm:$0xff] %v10109_v5 }
 0x482   : > { %7540 = vmatmul.mubr.msk.bf16.gmra.mxu0 %vm797_vm0, %v11390_v18 }
 0x483   : > { %7543 = vmatprep.mubr.msk.bf16.mxu0 %vm797_vm0, %v11391_v33 }
 0x48a   : > { %7544 = vmatmul.mubr.msk.bf16.gmra.mxu0 %vm797_vm0, %v11392_v20  ;;  %v10115_v20 = vpop.f32.mrf.mxu1 }
 0x48b   : > { %7547 = vmatprep.mubr.msk.bf16.mxu0 %vm797_vm0, %v11393_v31  ;;  %11397 = vst [vmem:[#allocation78_spill] sm:$0xff] %v10115_v20 }
 0x492   : > { %7548 = vmatmul.mubr.msk.bf16.gmra.mxu0 %vm797_vm0, %v6469_v0  ;;  %v10121_v0 = vpop.f32.mrf.mxu1 }
 0x493   : > { %11398 = vst [vmem:[#allocation2_spill] sm:$0xff] %v10121_v0 }
 0x49a   : > { %v7377_v4 = vpop.f32.mrf.mxu0 }
 0x49b   : > { %v4320_v24 = vadd.f32 %v10101_v36, %v7377_v4 }
 0x49c   : > { %v4311_v62 = vpop.f32.mrf.mxu0 }
 0x49d   : > { %5661 = vrot.lane.b32.xlu0 %v4320_v24, %s7675_s21  ;;  %v4312_v33 = vadd.f32 %v10101_v36, %v4311_v62 }
 0x49e   : > { %v7378_v18 = vpop.f32.mrf.mxu0 }
 0x49f   : > { %v4323_v40 = vadd.f32 %v10101_v36, %v7378_v18 }
 0x4a0   : > { %v4314_v15 = vpop.f32.mrf.mxu0 }
 0x4a1   : > { %5663 = vrot.lane.b32.xlu1 %v4323_v40, %s7675_s21  ;;  %5657 = vrot.lane.b32.xlu0 %v4312_v33, %s7675_s21  ;;  %v4315_v7 = vadd.f32 %v10101_v36, %v4314_v15  ;;  %v10127_v33 = vpop.f32.mrf.mxu1 }
 0x4a2   : > { %v7381_v50 = vpop.f32.mrf.mxu0  ;;  %11399 = vst [vmem:[#allocation63_spill] sm:$0xff] %v10127_v33 }
 0x4a3   : > { %v4336_v44 = vadd.f32 %v10101_v36, %v7381_v50 }
 0x4a4   : > { %v4327_v29 = vpop.f32.mrf.mxu0 }
 0x4a5   : > { %5659 = vrot.lane.b32.xlu1 %v4315_v7, %s7675_s21  ;;  %5669 = vrot.lane.b32.xlu0 %v4336_v44, %s7675_s21  ;;  %v4328_v39 = vadd.f32 %v10101_v36, %v4327_v29  ;;  %v10133_v44 = vpop.f32.mrf.mxu1 }
 0x4a6   : > { %v7382_v31 = vpop.f32.mrf.mxu0  ;;  %11400 = vst [vmem:[#allocation80_spill] sm:$0xff] %v10133_v44 }
 0x4a7   : > { %v4339_v27 = vadd.f32 %v10101_v36, %v7382_v31 }
 0x4a8   : > { %v4330_v52 = vpop.f32.mrf.mxu0 }
 0x4a9   : > { %5671 = vrot.lane.b32.xlu1 %v4339_v27, %s7675_s21  ;;  %5665 = vrot.lane.b32.xlu0 %v4328_v39, %s7675_s21  ;;  %v4331_v24 = vadd.f32 %v10101_v36, %v4330_v52  ;;  %v10139_v52 = vpop.f32.mrf.mxu1 }
 0x4aa   : > { %v7385_v4 = vpop.f32.mrf.mxu0  ;;  %11401 = vst [vmem:[#allocation76_spill] sm:$0xff] %v10139_v52 }
 0x4ab   : > { %v4352_v62 = vadd.f32 %v10101_v36, %v7385_v4 }
 0x4ac   : > { %v4343_v18 = vpop.f32.mrf.mxu0 }
 0x4ad   : > { %5667 = vrot.lane.b32.xlu1 %v4331_v24, %s7675_s21  ;;  %5677 = vrot.lane.b32.xlu0 %v4352_v62, %s7675_s21  ;;  %v4344_v15 = vadd.f32 %v10101_v36, %v4343_v18 }
 0x4ae   : > { %v7386_v40 = vpop.f32.mrf.mxu0 }
 0x4af   : > { %v4355_v50 = vadd.f32 %v10101_v36, %v7386_v40  ;;  %v10145_v40 = vpop.f32.mrf.mxu1 }
 0x4b0   : > { %v4346_v7 = vpop.f32.mrf.mxu0  ;;  %11402 = vst [vmem:[#allocation67_spill] sm:$0xff] %v10145_v40  ;;  %v10255_v40 = vpop.permute.xlu0 %5585 }
 0x4b1   : > { %5679 = vrot.lane.b32.xlu1 %v4355_v50, %s7675_s21  ;;  %5673 = vrot.lane.b32.xlu0 %v4344_v15, %s7675_s21  ;;  %v4347_v31 = vadd.f32 %v10101_v36, %v4346_v7  ;;  %11417 = vst [vmem:[#allocation46_spill] sm:$0xff] %v10255_v40 }
 0x4b2   : > { %v7389_v29 = vpop.f32.mrf.mxu0 }
 0x4b3   : > { %v4368_v39 = vadd.f32 %v10101_v36, %v7389_v29 }
 0x4b4   : > { %v4359_v27 = vpop.f32.mrf.mxu0 }
 0x4b5   : > { %5675 = vrot.lane.b32.xlu1 %v4347_v31, %s7675_s21  ;;  %5685 = vrot.lane.b32.xlu0 %v4368_v39, %s7675_s21  ;;  %v4360_v24 = vadd.f32 %v10101_v36, %v4359_v27  ;;  %v10151_v31 = vpop.f32.mrf.mxu1 }
 0x4b6   : > { %v7390_v4 = vpop.f32.mrf.mxu0  ;;  %11403 = vst [vmem:[#allocation106_spill] sm:$0xff] %v10151_v31 }
 0x4b7   : > { %v4371_v62 = vadd.f32 %v10101_v36, %v7390_v4  ;;  %v10157_v22 = vpop.f32.mrf.mxu1 }
 0x4b8   : > { %v4362_v18 = vpop.f32.mrf.mxu0  ;;  %11404 = vst [vmem:[#allocation79_spill] sm:$0xff] %v10157_v22 }
 0x4b9   : > { %5687 = vrot.lane.b32.xlu1 %v4371_v62, %s7675_s21  ;;  %5681 = vrot.lane.b32.xlu0 %v4360_v24, %s7675_s21  ;;  %v4363_v50 = vadd.f32 %v10101_v36, %v4362_v18  ;;  %v10163_v41 = vpop.f32.mrf.mxu1 }
 0x4ba   : > { %v7393_v15 = vpop.f32.mrf.mxu0  ;;  %11405 = vst [vmem:[#allocation36_spill] sm:$0xff] %v10163_v41 }
 0x4bb   : > { %v4384_v7 = vadd.f32 %v10101_v36, %v7393_v15  ;;  %v10169_v9 = vpop.f32.mrf.mxu1 }
 0x4bc   : > { %v4375_v29 = vpop.f32.mrf.mxu0  ;;  %11406 = vst [vmem:[#allocation83_spill] sm:$0xff] %v10169_v9 }
 0x4bd   : > { %5683 = vrot.lane.b32.xlu1 %v4363_v50, %s7675_s21  ;;  %5693 = vrot.lane.b32.xlu0 %v4384_v7, %s7675_s21  ;;  %v4376_v27 = vadd.f32 %v10101_v36, %v4375_v29  ;;  %v10175_v43 = vpop.f32.mrf.mxu1 }
 0x4be   : > { %v7394_v39 = vpop.f32.mrf.mxu0  ;;  %11407 = vst [vmem:[#allocation81_spill] sm:$0xff] %v10175_v43 }
 0x4bf   : > { %v4387_v4 = vadd.f32 %v10101_v36, %v7394_v39  ;;  %v10181_v54 = vpop.f32.mrf.mxu1 }
 0x4c0   : > { %v4378_v62 = vpop.f32.mrf.mxu0  ;;  %11408 = vst [vmem:[#allocation98_spill] sm:$0xff] %v10181_v54 }
 0x4c1   : > { %5695 = vrot.lane.b32.xlu1 %v4387_v4, %s7675_s21  ;;  %5689 = vrot.lane.b32.xlu0 %v4376_v27, %s7675_s21  ;;  %v4379_v18 = vadd.f32 %v10101_v36, %v4378_v62  ;;  %v10187_v25 = vpop.f32.mrf.mxu1 }
 0x4c2   : > { %v7397_v24 = vpop.f32.mrf.mxu0  ;;  %11409 = vst [vmem:[#allocation107_spill] sm:$0xff] %v10187_v25 }
 0x4c3   : > { %v4400_v15 = vadd.f32 %v10101_v36, %v7397_v24  ;;  %v7485_v32 = vpop.f32.mrf.mxu1 }
 0x4c4   : > { %v4391_v50 = vpop.f32.mrf.mxu0 }
 0x4c5   : > { %5691 = vrot.lane.b32.xlu1 %v4379_v18, %s7675_s21  ;;  %5701 = vrot.lane.b32.xlu0 %v4400_v15, %s7675_s21  ;;  %v4392_v29 = vadd.f32 %v10101_v36, %v4391_v50  ;;  %v4830_v1 = vpop.f32.mrf.mxu1 }
 0x4c6   : > { %v7398_v7 = vpop.f32.mrf.mxu0 }
 0x4c7   : > { %v4403_v39 = vadd.f32 %v10101_v36, %v7398_v7  ;;  %v7486_v51 = vpop.f32.mrf.mxu1 }
 0x4c8   : > { %v4394_v4 = vpop.f32.mrf.mxu0 }
 0x4c9   : > { %5703 = vrot.lane.b32.xlu1 %v4403_v39, %s7675_s21  ;;  %5697 = vrot.lane.b32.xlu0 %v4392_v29, %s7675_s21  ;;  %v4395_v62 = vadd.f32 %v10101_v36, %v4394_v4 }
 0x4ca   : > { %v7401_v27 = vpop.f32.mrf.mxu0 }
 0x4cb   : > { %v4416_v24 = vadd.f32 %v10101_v36, %v7401_v27 }
 0x4cc   : > { %v4407_v18 = vpop.f32.mrf.mxu0 }
 0x4cd   : > { %5699 = vrot.lane.b32.xlu1 %v4395_v62, %s7675_s21  ;;  %5709 = vrot.lane.b32.xlu0 %v4416_v24, %s7675_s21  ;;  %v4408_v50 = vadd.f32 %v10101_v36, %v4407_v18 }
 0x4ce   : > { %v7402_v15 = vpop.f32.mrf.mxu0 }
 0x4cf   : > { %v4419_v7 = vadd.f32 %v10101_v36, %v7402_v15 }
 0x4d0   : > { %v4410_v39 = vpop.f32.mrf.mxu0 }
 0x4d1   : > { %5711 = vrot.lane.b32.xlu1 %v4419_v7, %s7675_s21  ;;  %5705 = vrot.lane.b32.xlu0 %v4408_v50, %s7675_s21  ;;  %v4411_v4 = vadd.f32 %v10101_v36, %v4410_v39 }
 0x4d2   : > { %v7405_v29 = vpop.f32.mrf.mxu0 }
 0x4d3   : > { %v4432_v27 = vadd.f32 %v10101_v36, %v7405_v29 }
 0x4d4   : > { %v4423_v62 = vpop.f32.mrf.mxu0 }
 0x4d5   : > { %5707 = vrot.lane.b32.xlu1 %v4411_v4, %s7675_s21  ;;  %5717 = vrot.lane.b32.xlu0 %v4432_v27, %s7675_s21  ;;  %v4424_v18 = vadd.f32 %v10101_v36, %v4423_v62  ;;  %v10197_v62 = vpop.f32.mrf.mxu1 }
 0x4d6   : > { %v7406_v24 = vpop.f32.mrf.mxu0 }
 0x4d7   : > { %v4435_v15 = vadd.f32 %v10101_v36, %v7406_v24  ;;  %v10201_v61 = vpop.f32.mrf.mxu1 }
 0x4d8   : > { %v4426_v7 = vpop.f32.mrf.mxu0 }
 0x4d9   : > { %5719 = vrot.lane.b32.xlu1 %v4435_v15, %s7675_s21  ;;  %5713 = vrot.lane.b32.xlu0 %v4424_v18, %s7675_s21  ;;  %v4427_v39 = vadd.f32 %v10101_v36, %v4426_v7  ;;  %v10207_v7 = vpop.f32.mrf.mxu1 }
 0x4da   : > { %v7449_v50 = vpop.f32.mrf.mxu0 }
 0x4db   : > { %v10213_v57 = vpop.f32.mrf.mxu1 }
 0x4dc   : > { %v4657_v29 = vpop.f32.mrf.mxu0 }
 0x4dd   : > { %5715 = vrot.lane.b32.xlu1 %v4427_v39, %s7675_s21  ;;  %v10219_v42 = vpop.f32.mrf.mxu1 }
 0x4de   : > { %v7450_v4 = vpop.f32.mrf.mxu0 }
 0x4df   : > { %v10225_v35 = vpop.f32.mrf.mxu1 }
 0x4e0   : > { %v4660_v27 = vpop.f32.mrf.mxu0 }
 0x4e1   : > { %v10231_v46 = vpop.f32.mrf.mxu1 }
 0x4e2   : > { %v7453_v11 = vpop.f32.mrf.mxu0 }
 0x4e3   : > { %v10237_v25 = vpop.f32.mrf.mxu1 }
 0x4e4   : > { %v4673_v24 = vpop.f32.mrf.mxu0 }
 0x4e5   : > { %v10243_v17 = vpop.f32.mrf.mxu1 }
 0x4e6   : > { %v10199_v59 = vpop.f32.mrf.mxu0 }
 0x4e7   : > { %v10249_v12 = vpop.f32.mrf.mxu1 }
 0x4e8   : > { %v10203_v15 = vpop.f32.mrf.mxu0 }
 0x4e9   : > { %v10257_v52 = vpop.f32.mrf.mxu1 }
 0x4ea   : > { %v10205_v18 = vpop.f32.mrf.mxu0 }
 0x4ec   : > { %v10209_v45 = vpop.f32.mrf.mxu0 }
 0x4ee   : > { %v10211_v39 = vpop.f32.mrf.mxu0 }
 0x4f0   : > { %v10215_v63 = vpop.f32.mrf.mxu0 }
 0x4f2   : > { %v10217_v10 = vpop.f32.mrf.mxu0 }
 0x4f4   : > { %v10221_v23 = vpop.f32.mrf.mxu0 }
 0x4f6   : > { %v10223_v30 = vpop.f32.mrf.mxu0 }
 0x4f8   : > { %v10227_v16 = vpop.f32.mrf.mxu0 }
 0x4fa   : > { %v10229_v38 = vpop.f32.mrf.mxu0 }
 0x4fc   : > { %v10233_v58 = vpop.f32.mrf.mxu0 }
 0x4fe   : > { %v10235_v36 = vpop.f32.mrf.mxu0 }
 0x4ff   : > { %11410 = vst [vmem:[#allocation84_spill] sm:$0xff] %v10235_v36 }
 0x500   : > { %v10239_v54 = vpop.f32.mrf.mxu0 }
 0x501   : > { %11411 = vst [vmem:[#allocation38_spill] sm:$0xff] %v10239_v54 }
 0x502   : > { %v10241_v43 = vpop.f32.mrf.mxu0 }
 0x503   : > { %11412 = vst [vmem:[#allocation86_spill] sm:$0xff] %v10241_v43  ;;  %v10263_v43 = vpop.permute.xlu1 %5587 }
 0x504   : > { %v10245_v9 = vpop.f32.mrf.mxu0  ;;  %11420 = vst [vmem:[#allocation100_spill] sm:$0xff] %v10263_v43  ;;  %v4658_v43 = vadd.f32 %v4657_v29, %v10034_v60 }
 0x505   : > { %11413 = vst [vmem:[#allocation82_spill] sm:$0xff] %v10245_v9  ;;  %v10267_v9 = vpop.f32.mrf.mxu1 }
 0x506   : > { %v10247_v41 = vpop.f32.mrf.mxu0 }
 0x507   : > { %11414 = vst [vmem:[#allocation99_spill] sm:$0xff] %v10247_v41  ;;  %v10277_v40 = vpop.f32.mrf.mxu1 }
 0x508   : > { %v10251_v22 = vpop.f32.mrf.mxu0  ;;  %11426 = vst [vmem:[#allocation101_spill] sm:$0xff] %v10277_v40  ;;  %v4957_v40 = vadd.f32 %v4830_v1, %v4658_v43 }
 0x509   : > { %11415 = vst [vmem:[#allocation108_spill] sm:$0xff] %v10251_v22 }
 0x50a   : > { %v10253_v31 = vpop.f32.mrf.mxu0 }
 0x50b   : > { %11416 = vst [vmem:[#allocation85_spill] sm:$0xff] %v10253_v31 }
 0x50c   : > { %v10259_v44 = vpop.f32.mrf.mxu0 }
 0x50d   : > { %11418 = vst [vmem:[#allocation89_spill] sm:$0xff] %v10259_v44 }
 0x50e   : > { %v10261_v33 = vpop.f32.mrf.mxu0 }
 0x50f   : > { %11419 = vst [vmem:[#allocation87_spill] sm:$0xff] %v10261_v33  ;;  %v10265_v0 = vpop.permute.xlu0 %5661  ;;  %v4666_v33 = vadd.f32 %v7449_v50, %v10028_v49 }
 0x510   : > { %11421 = vst [vmem:[#allocation109_spill] sm:$0xff] %v10265_v0  ;;  %v10269_v41 = vpop.f32.mrf.mxu0 }
 0x511   : > { %11422 = vst [vmem:[#allocation90_spill] sm:$0xff] %v10269_v41  ;;  %v10289_v41 = vpop.f32.mrf.mxu1 }
 0x512   : > { %v10271_v54 = vpop.f32.mrf.mxu0  ;;  %11431 = vst [vmem:[#allocation93_spill] sm:$0xff] %v10289_v41 }
 0x513   : > { %11423 = vst [vmem:[#allocation48_spill] sm:$0xff] %v10271_v54  ;;  %v10273_v22 = vpop.permute.xlu1 %5663  ;;  %v10275_v31 = vpop.permute.xlu0 %5657 }
 0x514   : > { %11424 = vst [vmem:[#allocation110_spill] sm:$0xff] %v10273_v22  ;;  %11425 = vst [vmem:[#allocation88_spill] sm:$0xff] %v10275_v31  ;;  %v10279_v20 = vpop.f32.mrf.mxu0  ;;  %v4959_v22 = vadd.f32 %v7485_v32, %v4666_v33  ;;  %v4669_v31 = vadd.f32 %v7450_v4, %v10036_v21  ;;  %v10299_v60 = vpop.f32.mrf.mxu1  ;;  %v4674_v32 = vadd.f32 %v4673_v24, %v10050_v47  ;;  %v10318_v47 = vld [vmem:[%s10772_s2] ss:$0 sm:$0xff] }
 0x515   : > { %11427 = vst [vmem:[#allocation95_spill] sm:$0xff] %v10279_v20  ;;  %v4661_v20 = vadd.f32 %v4660_v27, %v10042_v6  ;;  %v4698_v24 = vadd.f32 %v10205_v18, %v10060_v19  ;;  %v4701_v18 = vadd.f32 %v10211_v39, %v10068_v2 }
 0x516   : > { %v10282_v44 = vpop.f32.mrf.mxu0  ;;  %v10311_v4 = vpop.f32.mrf.mxu1 }
 0x517   : > { %11428 = vst [vmem:[#allocation91_spill] sm:$0xff] %v10282_v44  ;;  %v10285_v0 = vpop.permute.xlu1 %5659  ;;  %v10287_v36 = vpop.permute.xlu0 %5669  ;;  %v4958_v21 = vadd.f32 %v10197_v62, %v4661_v20 }
 0x518   : > { %11429 = vst [vmem:[#allocation56_spill] sm:$0xff] %v10285_v0  ;;  %11430 = vst [vmem:[#allocation4_spill] sm:$0xff] %v10287_v36  ;;  %v10291_v54 = vpop.f32.mrf.mxu0  ;;  %v4960_v36 = vadd.f32 %v7486_v51, %v4669_v31  ;;  %v4682_v0 = vadd.f32 %v7453_v11, %v10044_v48 }
 0x51a   : > { %v7521_v5 = vpop.f32.mrf.mxu0  ;;  %v4963_v11 = vadd.f32 %v10201_v61, %v4682_v0 }
 0x51b   : > { %v5178_v49 = vadd.f32 %v7521_v5, %v4959_v22  ;;  %v10295_v50 = vpop.permute.xlu1 %5671  ;;  %v10297_v44 = vpop.permute.xlu0 %5665  ;;  %v4685_v5 = vadd.f32 %v10199_v59, %v10052_v37  ;;  %v4677_v59 = vadd.f32 %v10203_v15, %v10058_v8 }
 0x51c   : > { %v5049_v29 = vpop.f32.mrf.mxu0 }
 0x51d   : > { %v5176_v41 = vadd.f32 %v5049_v29, %v4957_v40  ;;  %v5210_v1 = vadd.f32 %v9767_v3, %v5178_v49  ;;  %v4961_v40 = vadd.f32 %v10207_v7, %v4674_v32  ;;  %v4964_v62 = vadd.f32 %v10213_v57, %v4685_v5  ;;  %v10332_v49 = vpop.f32.mrf.mxu1 }
 0x51e   : > { %v7522_v33 = vpop.f32.mrf.mxu0 }
 0x51f   : > { %v5179_v43 = vadd.f32 %v7522_v33, %v4960_v36  ;;  %v10305_v22 = vpop.permute.xlu1 %5667  ;;  %v10307_v6 = vpop.permute.xlu0 %5677  ;;  %v5208_v48 = vadd.f32 %v9767_v3, %v5176_v41  ;;  %v5242_v31 = vmax.f32 %v5210_v1, 0.0  ;;  %v4690_v33 = vadd.f32 %v10209_v45, %v10066_v53 }
 0x520   : > { %v5052_v51 = vpop.f32.mrf.mxu0  ;;  %v4962_v1 = vadd.f32 %v10219_v42, %v4677_v59 }
 0x521   : > { %v5211_v36 = vadd.f32 %v10318_v47, %v5179_v43  ;;  %v5177_v20 = vadd.f32 %v5052_v51, %v4958_v21  ;;  %v5240_v29 = vmax.f32 %v5208_v48, 0.0 }
 0x522   : > { %v7525_v37 = vpop.f32.mrf.mxu0 }
 0x523   : > { %v5243_v27 = vmax.f32 %v5211_v36, 0.0  ;;  %v5209_v61 = vadd.f32 %v10318_v47, %v5177_v20  ;;  %v5182_v0 = vadd.f32 %v7525_v37, %v4963_v11  ;;  %v10325_v3 = vpop.permute.xlu1 %5679  ;;  %v10327_v41 = vpop.permute.xlu0 %5673  ;;  %v4967_v36 = vadd.f32 %v10225_v35, %v4698_v24 }
 0x524   : > { %v5065_v7 = vpop.f32.mrf.mxu0  ;;  %v10344_v11 = vpop.f32.mrf.mxu1  ;;  %v4965_v20 = vadd.f32 %v10231_v46, %v4690_v33  ;;  %v4714_v46 = vadd.f32 %v10217_v10, %v10079_v28  ;;  %v4717_v28 = vadd.f32 %v10223_v30, %v10091_v55 }
 0x525   : > { %v5273_v8 = vpack.c.bf16 %v5243_v27, %v5242_v31  ;;  %v5241_v15 = vmax.f32 %v5209_v61, 0.0  ;;  %v5180_v32 = vadd.f32 %v5065_v7, %v4961_v40  ;;  %v5214_v51 = vadd.f32 %v10318_v47, %v5182_v0 }
 0x526   : > { %v7526_v21 = vpop.f32.mrf.mxu0  ;;  %v4693_v40 = vadd.f32 %v10215_v63, %v10075_v14  ;;  %v4968_v61 = vadd.f32 %v10237_v25, %v4701_v18  ;;  %v10362_v0 = vpop.f32.mrf.mxu1  ;;  %v4709_v18 = vadd.f32 %v10227_v16, %v10094_v34 }
 0x527   : > { %v5272_v43 = vpack.c.bf16 %v5241_v15, %v5240_v29  ;;  %v5183_v57 = vadd.f32 %v7526_v21, %v4964_v62  ;;  %v10338_v5 = vpop.permute.xlu1 %5675  ;;  %v10340_v19 = vpop.permute.xlu0 %5685  ;;  %v5212_v45 = vadd.f32 %v10318_v47, %v5180_v32  ;;  %v5246_v2 = vmax.f32 %v5214_v51, 0.0 }
 0x528   : > { %v5068_v48 = vpop.f32.mrf.mxu0  ;;  %v4706_v29 = vadd.f32 %v10221_v23, %v10089_v26  ;;  %v4966_v15 = vadd.f32 %v10243_v17, %v4693_v40  ;;  %v4971_v51 = vadd.f32 %v10249_v12, %v4714_v46 }
 0x529   : > { %v5215_v42 = vadd.f32 %v10318_v47, %v5183_v57  ;;  %v5181_v53 = vadd.f32 %v5068_v48, %v4962_v1  ;;  %7555 = vmatprep.mubr.msk.bf16.mxu1 %vm797_vm0, %v5272_v43  ;;  %v5244_v14 = vmax.f32 %v5212_v45, 0.0  ;;  %v10374_v1 = vpop.f32.mrf.mxu1 }
 0x52a   : > { %v7529_v59 = vpop.f32.mrf.mxu0  ;;  %7556 = vmatmul.mubr.msk.bf16.vlgmr.msra.gmra.mxu1 %vm797_vm0, %v5273_v8  ;;  %v4969_v57 = vadd.f32 %v10257_v52, %v4706_v29  ;;  %v4730_v52 = vadd.f32 %v10229_v38, %v10096_v13  ;;  %v11433_v13 = vld [vmem:[#allocation92_spill] sm:$0xff] }
 0x52b   : > { %v5247_v39 = vmax.f32 %v5215_v42, 0.0  ;;  %v5213_v37 = vadd.f32 %v10318_v47, %v5181_v53  ;;  %v5186_v35 = vadd.f32 %v7529_v59, %v4967_v36  ;;  %v10355_v31 = vpop.permute.xlu1 %5687  ;;  %v10357_v27 = vpop.permute.xlu0 %5681  ;;  %v4972_v53 = vadd.f32 %v10267_v9, %v4717_v28  ;;  %v11437_v28 = vld [vmem:[#allocation38_spill] sm:$0xff] }
 0x52c   : > { %v5081_v63 = vpop.f32.mrf.mxu0 }
 0x52d   : > { %v5275_v62 = vpack.c.bf16 %v5247_v39, %v5246_v2  ;;  %v5245_v24 = vmax.f32 %v5213_v37, 0.0  ;;  %v5184_v7 = vadd.f32 %v5081_v63, %v4965_v20  ;;  %v5218_v33 = vadd.f32 %v10318_v47, %v5186_v35  ;;  %v10392_v20 = vpop.f32.mrf.mxu1  ;;  %v11432_v35 = vld [vmem:[#allocation101_spill] sm:$0xff] }
 0x52e   : > { %v7530_v8 = vpop.f32.mrf.mxu0  ;;  %v4722_v39 = vadd.f32 %v10233_v58, %v10104_v56 }
 0x52f   : > { %v5274_v32 = vpack.c.bf16 %v5245_v24, %v5244_v14  ;;  %v5187_v25 = vadd.f32 %v7530_v8, %v4968_v61  ;;  %v10368_v21 = vpop.permute.xlu1 %5683  ;;  %v10370_v10 = vpop.permute.xlu0 %5693  ;;  %v5216_v23 = vadd.f32 %v10318_v47, %v5184_v7  ;;  %v5250_v30 = vmax.f32 %v5218_v33, 0.0  ;;  %v11435_v8 = vld [vmem:[#allocation93_spill] sm:$0xff] }
 0x530   : > { %v5084_v43 = vpop.f32.mrf.mxu0  ;;  %v4970_v61 = vadd.f32 %v11432_v35, %v4709_v18  ;;  %v10404_v7 = vpop.f32.mrf.mxu1  ;;  %v4973_v33 = vadd.f32 %v10299_v60, %v4722_v39 }
 0x531   : > { %v5219_v17 = vadd.f32 %v10318_v47, %v5187_v25  ;;  %v5185_v26 = vadd.f32 %v5084_v43, %v4966_v15  ;;  %7559 = vmatprep.mubr.msk.bf16.mxu1 %vm797_vm0, %v5274_v32  ;;  %v5248_v34 = vmax.f32 %v5216_v23, 0.0  ;;  %v4975_v15 = vadd.f32 %v11435_v8, %v4730_v52  ;;  %v11436_v25 = vld [vmem:[#allocation78_spill] sm:$0xff] }
 0x532   : > { %v7533_v48 = vpop.f32.mrf.mxu0  ;;  %7560 = vmatmul.mubr.msk.bf16.gmra.mxu1 %vm797_vm0, %v5275_v62  ;;  %v11434_v62 = vld [vmem:[#allocation84_spill] sm:$0xff]  ;;  %v4725_v43 = vadd.f32 %v11437_v28, %v11436_v25 }
 0x533   : > { %v5251_v55 = vmax.f32 %v5219_v17, 0.0  ;;  %v5217_v36 = vadd.f32 %v10318_v47, %v5185_v26  ;;  %v5190_v12 = vadd.f32 %v7533_v48, %v4971_v51  ;;  %v10385_v45 = vpop.permute.xlu1 %5695  ;;  %v10387_v42 = vpop.permute.xlu0 %5689  ;;  %v4733_v24 = vadd.f32 %v11434_v62, %v11433_v13  ;;  %v11442_v13 = vld [vmem:[#allocation80_spill] sm:$0xff]  ;;  %v11443_v62 = vld [vmem:[#allocation99_spill] sm:$0xff] }
 0x534   : > { %v5097_v16 = vpop.f32.mrf.mxu0  ;;  %v4974_v35 = vadd.f32 %v10332_v49, %v4725_v43  ;;  %v11445_v25 = vld [vmem:[#allocation108_spill] sm:$0xff] }
 0x535   : > { %v5277_v40 = vpack.c.bf16 %v5251_v55, %v5250_v30  ;;  %v5249_v59 = vmax.f32 %v5217_v36, 0.0  ;;  %v5188_v2 = vadd.f32 %v5097_v16, %v4969_v57  ;;  %v5222_v63 = vadd.f32 %v10318_v47, %v5190_v12  ;;  %v11438_v55 = vld [vmem:[#allocation2_spill] sm:$0xff]  ;;  %v4926_v12 = vpop.f32.mrf.mxu1 }
 0x536   : > { %v7534_v37 = vpop.f32.mrf.mxu0  ;;  %v4976_v30 = vadd.f32 %v10311_v4, %v4733_v24  ;;  %v11439_v36 = vld [vmem:[#allocation86_spill] sm:$0xff]  ;;  %v4749_v24 = vadd.f32 %v11443_v62, %v11442_v13  ;;  %v11450_v62 = vld [vmem:[#allocation79_spill] sm:$0xff] }
 0x537   : > { %v5276_v46 = vpack.c.bf16 %v5249_v59, %v5248_v34  ;;  %v5191_v9 = vadd.f32 %v7534_v37, %v4972_v53  ;;  %v10398_v14 = vpop.permute.xlu1 %5691  ;;  %v10400_v38 = vpop.permute.xlu0 %5701  ;;  %v5220_v58 = vadd.f32 %v10318_v47, %v5188_v2  ;;  %v5254_v23 = vmax.f32 %v5222_v63, 0.0  ;;  %v11440_v59 = vld [vmem:[#allocation63_spill] sm:$0xff]  ;;  %v11441_v2 = vld [vmem:[#allocation82_spill] sm:$0xff] }
 0x538   : > { %v5100_v29 = vpop.f32.mrf.mxu0  ;;  %v4746_v60 = vadd.f32 %v11439_v36, %v11438_v55  ;;  %v4738_v39 = vadd.f32 %v11441_v2, %v11440_v59  ;;  %v11446_v55 = vld [vmem:[#allocation67_spill] sm:$0xff]  ;;  %v11447_v36 = vld [vmem:[#allocation85_spill] sm:$0xff]  ;;  %v11448_v59 = vld [vmem:[#allocation106_spill] sm:$0xff] }
 0x539   : > { %v5223_v56 = vadd.f32 %v10318_v47, %v5191_v9  ;;  %v5189_v32 = vadd.f32 %v5100_v29, %v4970_v61  ;;  %7563 = vmatprep.mubr.msk.bf16.mxu1 %vm797_vm0, %v5276_v46  ;;  %v5252_v52 = vmax.f32 %v5220_v58, 0.0  ;;  %v7510_v29 = vpop.f32.mrf.mxu1  ;;  %v11449_v2 = vld [vmem:[#allocation89_spill] sm:$0xff] }
 0x53a   : > { %v7537_v51 = vpop.f32.mrf.mxu0  ;;  %7564 = vmatmul.mubr.msk.bf16.gmra.mxu1 %vm797_vm0, %v5277_v40 }
 0x53b   : > { %v5255_v17 = vmax.f32 %v5223_v56, 0.0  ;;  %v5221_v26 = vadd.f32 %v10318_v47, %v5189_v32  ;;  %v5194_v57 = vadd.f32 %v7537_v51, %v4975_v15  ;;  %v10415_v18 = vpop.permute.xlu1 %5703  ;;  %v10417_v48 = vpop.permute.xlu0 %5697  ;;  %v4979_v15 = vadd.f32 %v10344_v11, %v4746_v60 }
 0x53c   : > { %v5113_v53 = vpop.f32.mrf.mxu0  ;;  %v4977_v32 = vadd.f32 %v10362_v0, %v4738_v39  ;;  %v4762_v0 = vadd.f32 %v11447_v36, %v11446_v55  ;;  %v4929_v60 = vpop.f32.mrf.mxu1  ;;  %v4754_v39 = vadd.f32 %v11449_v2, %v11448_v59  ;;  %v11457_v59 = vld [vmem:[#allocation75_spill] sm:$0xff] }
 0x53d   : > { %v5279_v16 = vpack.c.bf16 %v5255_v17, %v5254_v23  ;;  %v5253_v34 = vmax.f32 %v5221_v26, 0.0  ;;  %v5192_v40 = vadd.f32 %v5113_v53, %v4973_v33  ;;  %v5226_v46 = vadd.f32 %v10318_v47, %v5194_v57  ;;  %v11444_v33 = vld [vmem:[#allocation76_spill] sm:$0xff] }
 0x53e   : > { %v7538_v37 = vpop.f32.mrf.mxu0  ;;  %v4741_v28 = vadd.f32 %v11445_v25, %v11444_v33 }
 0x53f   : > { %v5278_v61 = vpack.c.bf16 %v5253_v34, %v5252_v52  ;;  %v5195_v63 = vadd.f32 %v7538_v37, %v4976_v30  ;;  %v10426_v4 = vpop.permute.xlu1 %5699  ;;  %v10428_v9 = vpop.permute.xlu0 %5709  ;;  %v5224_v58 = vadd.f32 %v10318_v47, %v5192_v40  ;;  %v5258_v51 = vmax.f32 %v5226_v46, 0.0 }
 0x540   : > { %v5116_v8 = vpop.f32.mrf.mxu0  ;;  %v4980_v30 = vadd.f32 %v10374_v1, %v4749_v24  ;;  %v11451_v24 = vld [vmem:[#allocation87_spill] sm:$0xff] }
 0x541   : > { %v5227_v56 = vadd.f32 %v10318_v47, %v5195_v63  ;;  %v5193_v49 = vadd.f32 %v5116_v8, %v4974_v35  ;;  %7567 = vmatprep.mubr.msk.bf16.mxu1 %vm797_vm0, %v5278_v61  ;;  %v5256_v52 = vmax.f32 %v5224_v58, 0.0  ;;  %v4978_v35 = vadd.f32 %v10392_v20, %v4741_v28  ;;  %v11452_v58 = vld [vmem:[#allocation73_spill] sm:$0xff] }
 0x542   : > { %v7541_v43 = vpop.f32.mrf.mxu0  ;;  %7568 = vmatmul.mubr.msk.bf16.gmra.mxu1 %vm797_vm0, %v5279_v16  ;;  %v4765_v8 = vadd.f32 %v11451_v24, %v11450_v62  ;;  %v4981_v28 = vadd.f32 %v4926_v12, %v4754_v39 }
 0x543   : > { %v5259_v23 = vmax.f32 %v5227_v56, 0.0  ;;  %v5225_v17 = vadd.f32 %v10318_v47, %v5193_v49  ;;  %v5198_v11 = vadd.f32 %v7541_v43, %v4979_v15  ;;  %v10441_v26 = vpop.permute.xlu1 %5711  ;;  %v10443_v57 = vpop.permute.xlu0 %5705  ;;  %v11453_v43 = vld [vmem:[#allocation36_spill] sm:$0xff] }
 0x544   : > { %v5129_v53 = vpop.f32.mrf.mxu0  ;;  %v7513_v15 = vpop.f32.mrf.mxu1 }
 0x545   : > { %v5281_v34 = vpack.c.bf16 %v5259_v23, %v5258_v51  ;;  %v5257_v40 = vmax.f32 %v5225_v17, 0.0  ;;  %v5196_v16 = vadd.f32 %v5129_v53, %v4977_v32  ;;  %v5230_v46 = vadd.f32 %v10318_v47, %v5198_v11  ;;  %v11454_v51 = vld [vmem:[#allocation90_spill] sm:$0xff]  ;;  %v11455_v53 = vld [vmem:[#allocation83_spill] sm:$0xff] }
 0x546   : > { %v7542_v37 = vpop.f32.mrf.mxu0  ;;  %v4983_v32 = vadd.f32 %v10404_v7, %v4762_v0  ;;  %v4757_v23 = vadd.f32 %v11454_v51, %v11453_v43  ;;  %v4984_v0 = vadd.f32 %v7510_v29, %v4765_v8 }
 0x547   : > { %v5280_v61 = vpack.c.bf16 %v5257_v40, %v5256_v52  ;;  %v5199_v1 = vadd.f32 %v7542_v37, %v4980_v30  ;;  %v10452_v63 = vpop.permute.xlu1 %5707  ;;  %v5718_v13 = vpop.permute.xlu0 %5717  ;;  %v5228_v20 = vadd.f32 %v10318_v47, %v5196_v16  ;;  %v5262_v11 = vmax.f32 %v5230_v46, 0.0  ;;  %v11456_v52 = vld [vmem:[#allocation48_spill] sm:$0xff]  ;;  %v11459_v46 = vld [vmem:[#allocation95_spill] sm:$0xff] }
 0x548   : > { %v10458_v56 = vsel %vm5914_vm8, %v11452_v58, %v5718_v13  ;;  %v5132_v49 = vpop.f32.mrf.mxu0  ;;  %v4778_v40 = vadd.f32 %v11456_v52, %v11455_v53  ;;  %v4942_v16 = vpop.f32.mrf.mxu1  ;;  %v4982_v62 = vadd.f32 %v4929_v60, %v4757_v23  ;;  %v11460_v58 = vld [vmem:[#allocation98_spill] sm:$0xff] }
 0x549   : > { %v5231_v33 = vadd.f32 %v10318_v47, %v5199_v1  ;;  %v5197_v25 = vadd.f32 %v5132_v49, %v4978_v35  ;;  %7571 = vmatprep.mubr.msk.bf16.mxu1 %vm797_vm0, %v5280_v61  ;;  %v5260_v39 = vmax.f32 %v5228_v20, 0.0  ;;  %v11458_v61 = vld [vmem:[#allocation81_spill] sm:$0xff]  ;;  %v11461_v49 = vld [vmem:[#allocation91_spill] sm:$0xff] }
 0x54a   : > { %v7545_v17 = vpop.f32.mrf.mxu0  ;;  %7572 = vmatmul.mubr.msk.bf16.gmra.mxu1 %vm797_vm0, %v5281_v34  ;;  %v4770_v1 = vadd.f32 %v11459_v46, %v11458_v61  ;;  %v4987_v43 = vadd.f32 %v7513_v15, %v4778_v40 }
 0x54b   : > { %v5263_v30 = vmax.f32 %v5231_v33, 0.0  ;;  %v5229_v55 = vadd.f32 %v10318_v47, %v5197_v25  ;;  %v5202_v36 = vadd.f32 %v7545_v17, %v4983_v32  ;;  %v5720_v7 = vpop.permute.xlu1 %5719  ;;  %v4781_v32 = vadd.f32 %v11461_v49, %v11460_v58  ;;  %v7514_v33 = vpop.f32.mrf.mxu1 }
 0x54c   : > { %v10472_v12 = vsel %vm5914_vm8, %v11457_v59, %v5720_v7  ;;  %v5145_v2 = vpop.f32.mrf.mxu0  ;;  %v4985_v17 = vadd.f32 %v4942_v16, %v4770_v1 }
 0x54d   : > { %v5283_v37 = vpack.c.bf16 %v5263_v30, %v5262_v11  ;;  %v5261_v35 = vmax.f32 %v5229_v55, 0.0  ;;  %v5200_v34 = vadd.f32 %v5145_v2, %v4981_v28  ;;  %v5234_v29 = vadd.f32 %v10318_v47, %v5202_v36  ;;  %v11462_v11 = vld [vmem:[#allocation107_spill] sm:$0xff] }
 0x54e   : > { %v7546_v13 = vpop.f32.mrf.mxu0  ;;  %v4773_v60 = vadd.f32 %v10291_v54, %v11462_v11  ;;  %v4988_v15 = vadd.f32 %v7514_v33, %v4781_v32  ;;  %v11463_v33 = vld [vmem:[#allocation105_spill] sm:$0xff] }
 0x54f   : > { %v5282_v24 = vpack.c.bf16 %v5261_v35, %v5260_v39  ;;  %v5203_v8 = vadd.f32 %v7546_v13, %v4984_v0  ;;  %v5232_v20 = vadd.f32 %v10318_v47, %v5200_v34  ;;  %v5266_v30 = vmax.f32 %v5234_v29, 0.0  ;;  %v4945_v0 = vpop.f32.mrf.mxu1 }
 0x550   : > { %v5148_v25 = vpop.f32.mrf.mxu0  ;;  %v4986_v16 = vadd.f32 %v4945_v0, %v4773_v60 }
 0x551   : > { %v5235_v51 = vadd.f32 %v10318_v47, %v5203_v8  ;;  %v5201_v28 = vadd.f32 %v5148_v25, %v4982_v62  ;;  %7575 = vmatprep.mubr.msk.bf16.mxu1 %vm797_vm0, %v5282_v24  ;;  %v5264_v52 = vmax.f32 %v5232_v20, 0.0 }
 0x552   : > { %v7549_v23 = vpop.f32.mrf.mxu0  ;;  %7576 = vmatmul.mubr.msk.bf16.gmra.mxu1 %vm797_vm0, %v5283_v37 }
 0x553   : > { %v5267_v55 = vmax.f32 %v5235_v51, 0.0  ;;  %v5233_v36 = vadd.f32 %v10318_v47, %v5201_v28  ;;  %v5206_v7 = vadd.f32 %v7549_v23, %v4987_v43 }
 0x554   : > { %v5161_v53 = vpop.f32.mrf.mxu0 }
 0x555   : > { %v5285_v40 = vpack.c.bf16 %v5267_v55, %v5266_v30  ;;  %v5265_v59 = vmax.f32 %v5233_v36, 0.0  ;;  %v5204_v2 = vadd.f32 %v5161_v53, %v4985_v17  ;;  %v5238_v54 = vadd.f32 %v10318_v47, %v5206_v7 }
 0x556   : > { %v7550_v39 = vpop.f32.mrf.mxu0 }
 0x557   : > { %v5284_v35 = vpack.c.bf16 %v5265_v59, %v5264_v52  ;;  %v5207_v34 = vadd.f32 %v7550_v39, %v4988_v15  ;;  %v5236_v37 = vadd.f32 %v10318_v47, %v5204_v2  ;;  %v5270_v13 = vmax.f32 %v5238_v54, 0.0 }
 0x558   : > { %v5164_v61 = vpop.f32.mrf.mxu0 }
 0x559   : > { %v5239_v46 = vadd.f32 %v10318_v47, %v5207_v34  ;;  %v5205_v1 = vadd.f32 %v5164_v61, %v4986_v16  ;;  %7579 = vmatprep.mubr.msk.bf16.mxu1 %vm797_vm0, %v5284_v35  ;;  %v5268_v29 = vmax.f32 %v5236_v37, 0.0 }
 0x55a   : > { %7580 = vmatmul.mubr.msk.bf16.gmra.mxu1 %vm797_vm0, %v5285_v40 }
 0x55b   : > { %v5271_v62 = vmax.f32 %v5239_v46, 0.0  ;;  %v5237_v24 = vadd.f32 %v10318_v47, %v5205_v1 }
 0x55d   : > { %v5287_v8 = vpack.c.bf16 %v5271_v62, %v5270_v13  ;;  %v5269_v58 = vmax.f32 %v5237_v24, 0.0 }
 0x55f   : > { %v5286_v49 = vpack.c.bf16 %v5269_v58, %v5268_v29 }
 0x561   : > { %7583 = vmatprep.mubr.msk.bf16.mxu1 %vm797_vm0, %v5286_v49 }
 0x562   : > { %7584 = vmatmul.mubr.msk.bf16.gmra.mxu1 %vm797_vm0, %v5287_v8 }
 0x5ea   : > { %v7557_v32 = vpop.f32.mrf.mxu1 }
 0x5eb   : > { %v5379_v25 = vadd.f32 %v11463_v33, %v7557_v32 }
 0x5ec   : > { %v5370_v43 = vpop.f32.mrf.mxu1 }
 0x5ed   : > { %5789 = vrot.lane.b32.xlu0 %v5379_v25, %s7676_s24  ;;  %v5371_v51 = vadd.f32 %v11463_v33, %v5370_v43 }
 0x5ee   : > { %v7558_v20 = vpop.f32.mrf.mxu1 }
 0x5ef   : > { %v5382_v47 = vadd.f32 %v11463_v33, %v7558_v20 }
 0x5f0   : > { %v5373_v28 = vpop.f32.mrf.mxu1 }
 0x5f1   : > { %5791 = vrot.lane.b32.xlu1 %v5382_v47, %s7676_s24  ;;  %5785 = vrot.lane.b32.xlu0 %v5371_v51, %s7676_s24  ;;  %v5374_v11 = vadd.f32 %v11463_v33, %v5373_v28 }
 0x5f2   : > { %v7561_v17 = vpop.f32.mrf.mxu1 }
 0x5f3   : > { %v5395_v60 = vadd.f32 %v11463_v33, %v7561_v17 }
 0x5f4   : > { %v5386_v23 = vpop.f32.mrf.mxu1 }
 0x5f5   : > { %5787 = vrot.lane.b32.xlu1 %v5374_v11, %s7676_s24  ;;  %5797 = vrot.lane.b32.xlu0 %v5395_v60, %s7676_s24  ;;  %v5387_v55 = vadd.f32 %v11463_v33, %v5386_v23 }
 0x5f6   : > { %v7562_v30 = vpop.f32.mrf.mxu1 }
 0x5f7   : > { %v5398_v36 = vadd.f32 %v11463_v33, %v7562_v30 }
 0x5f8   : > { %v5389_v7 = vpop.f32.mrf.mxu1 }
 0x5f9   : > { %5799 = vrot.lane.b32.xlu1 %v5398_v36, %s7676_s24  ;;  %5793 = vrot.lane.b32.xlu0 %v5387_v55, %s7676_s24  ;;  %v5390_v0 = vadd.f32 %v11463_v33, %v5389_v7 }
 0x5fa   : > { %v7565_v15 = vpop.f32.mrf.mxu1 }
 0x5fb   : > { %v5411_v53 = vadd.f32 %v11463_v33, %v7565_v15  ;;  %v10548_v15 = vld [vmem:[%s10774_s4] ss:$0 sm:$0xff] }
 0x5fc   : > { %v5402_v52 = vpop.f32.mrf.mxu1 }
 0x5fd   : > { %5795 = vrot.lane.b32.xlu1 %v5390_v0, %s7676_s24  ;;  %5805 = vrot.lane.b32.xlu0 %v5411_v53, %s7676_s24  ;;  %v5403_v59 = vadd.f32 %v11463_v33, %v5402_v52 }
 0x5fe   : > { %v7566_v40 = vpop.f32.mrf.mxu1 }
 0x5ff   : > { %v5414_v2 = vadd.f32 %v11463_v33, %v7566_v40 }
 0x600   : > { %v5405_v39 = vpop.f32.mrf.mxu1 }
 0x601   : > { %5807 = vrot.lane.b32.xlu1 %v5414_v2, %s7676_s24  ;;  %5801 = vrot.lane.b32.xlu0 %v5403_v59, %s7676_s24  ;;  %v5406_v35 = vadd.f32 %v11463_v33, %v5405_v39 }
 0x602   : > { %v7569_v16 = vpop.f32.mrf.mxu1 }
 0x603   : > { %v5427_v54 = vadd.f32 %v11463_v33, %v7569_v16 }
 0x604   : > { %v5418_v34 = vpop.f32.mrf.mxu1 }
 0x605   : > { %5803 = vrot.lane.b32.xlu1 %v5406_v35, %s7676_s24  ;;  %5813 = vrot.lane.b32.xlu0 %v5427_v54, %s7676_s24  ;;  %v5419_v37 = vadd.f32 %v11463_v33, %v5418_v34  ;;  %v10563_v34 = vpop.permute.xlu0 %5713 }
 0x606   : > { %v7570_v61 = vpop.f32.mrf.mxu1 }
 0x607   : > { %v5430_v46 = vadd.f32 %v11463_v33, %v7570_v61  ;;  %v11464_v61 = vld [vmem:[#allocation109_spill] sm:$0xff] }
 0x608   : > { %v5421_v1 = vpop.f32.mrf.mxu1 }
 0x609   : > { %5815 = vrot.lane.b32.xlu1 %v5430_v46, %s7676_s24  ;;  %5809 = vrot.lane.b32.xlu0 %v5419_v37, %s7676_s24  ;;  %v5422_v62 = vadd.f32 %v11463_v33, %v5421_v1  ;;  %v11465_v37 = vld [vmem:[#allocation13_spill] sm:$0xff]  ;;  %v10574_v1 = vpop.permute.xlu1 %5715 }
 0x60a   : > { %v7573_v13 = vpop.f32.mrf.mxu1  ;;  %v5917_v46 = vsel %vm5914_vm8, %v11465_v37, %v11464_v61 }
 0x60b   : > { %v5443_v24 = vadd.f32 %v11463_v33, %v7573_v13 }
 0x60c   : > { %v5434_v29 = vpop.f32.mrf.mxu1 }
 0x60d   : > { %5811 = vrot.lane.b32.xlu1 %v5422_v62, %s7676_s24  ;;  %5821 = vrot.lane.b32.xlu0 %v5443_v24, %s7676_s24  ;;  %v5435_v58 = vadd.f32 %v11463_v33, %v5434_v29  ;;  %v11466_v24 = vld [vmem:[#allocation110_spill] sm:$0xff] }
 0x60e   : > { %v7574_v8 = vpop.f32.mrf.mxu1  ;;  %v11467_v29 = vld [vmem:[#allocation22_spill] sm:$0xff] }
 0x60f   : > { %v5446_v49 = vadd.f32 %v11463_v33, %v7574_v8  ;;  %v5918_v8 = vsel %vm5914_vm8, %v11467_v29, %v11466_v24 }
 0x610   : > { %v5437_v32 = vpop.f32.mrf.mxu1 }
 0x611   : > { %5823 = vrot.lane.b32.xlu1 %v5446_v49, %s7676_s24  ;;  %5817 = vrot.lane.b32.xlu0 %v5435_v58, %s7676_s24  ;;  %v5438_v43 = vadd.f32 %v11463_v33, %v5437_v32  ;;  %v11468_v58 = vld [vmem:[#allocation88_spill] sm:$0xff]  ;;  %v11469_v49 = vld [vmem:[#allocation17_spill] sm:$0xff] }
 0x612   : > { %v7577_v25 = vpop.f32.mrf.mxu1  ;;  %v5915_v32 = vsel %vm5914_vm8, %v11469_v49, %v11468_v58  ;;  %v11480_v49 = vld [vmem:[#allocation3_spill] sm:$0xff] }
 0x613   : > { %v5459_v20 = vadd.f32 %v11463_v33, %v7577_v25 }
 0x614   : > { %v5450_v51 = vpop.f32.mrf.mxu1 }
 0x615   : > { %5819 = vrot.lane.b32.xlu1 %v5438_v43, %s7676_s24  ;;  %5829 = vrot.lane.b32.xlu0 %v5459_v20, %s7676_s24  ;;  %v5451_v28 = vadd.f32 %v11463_v33, %v5450_v51 }
 0x616   : > { %v7578_v47 = vpop.f32.mrf.mxu1 }
 0x617   : > { %v5462_v17 = vadd.f32 %v11463_v33, %v7578_v47  ;;  %v11470_v47 = vld [vmem:[#allocation56_spill] sm:$0xff] }
 0x618   : > { %v5453_v11 = vpop.f32.mrf.mxu1 }
 0x619   : > { %5831 = vrot.lane.b32.xlu1 %v5462_v17, %s7676_s24  ;;  %5825 = vrot.lane.b32.xlu0 %v5451_v28, %s7676_s24  ;;  %v5454_v23 = vadd.f32 %v11463_v33, %v5453_v11  ;;  %v11471_v28 = vld [vmem:[#allocation28_spill] sm:$0xff] }
 0x61a   : > { %v7581_v60 = vpop.f32.mrf.mxu1  ;;  %v5916_v17 = vsel %vm5914_vm8, %v11471_v28, %v11470_v47  ;;  %v11472_v11 = vld [vmem:[#allocation4_spill] sm:$0xff]  ;;  %v11482_v47 = vld [vmem:[#allocation25_spill] sm:$0xff] }
 0x61b   : > { %v5475_v30 = vadd.f32 %v11463_v33, %v7581_v60  ;;  %v11473_v60 = vld [vmem:[#allocation45_spill] sm:$0xff] }
 0x61c   : > { %v5466_v55 = vpop.f32.mrf.mxu1  ;;  %v11483_v28 = vld [vmem:[#allocation29_spill] sm:$0xff] }
 0x61d   : > { %5827 = vrot.lane.b32.xlu1 %v5454_v23, %s7676_s24  ;;  %5837 = vrot.lane.b32.xlu0 %v5475_v30, %s7676_s24  ;;  %v5467_v7 = vadd.f32 %v11463_v33, %v5466_v55  ;;  %v5921_v23 = vsel %vm5914_vm8, %v11473_v60, %v11472_v11 }
 0x61e   : > { %v7582_v36 = vpop.f32.mrf.mxu1 }
 0x61f   : > { %v5478_v0 = vadd.f32 %v10548_v15, %v7582_v36 }
 0x620   : > { %v5469_v53 = vpop.f32.mrf.mxu1 }
 0x621   : > { %5839 = vrot.lane.b32.xlu1 %v5478_v0, %s7676_s24  ;;  %5833 = vrot.lane.b32.xlu0 %v5467_v7, %s7676_s24  ;;  %v5470_v40 = vadd.f32 %v10548_v15, %v5469_v53  ;;  %v11474_v0 = vld [vmem:[#allocation49_spill] sm:$0xff] }
 0x622   : > { %v7585_v52 = vpop.f32.mrf.mxu1  ;;  %v5922_v53 = vsel %vm5914_vm8, %v11474_v0, %v10295_v50 }
 0x623   : > { %v5491_v16 = vadd.f32 %v10548_v15, %v7585_v52  ;;  %v11475_v52 = vld [vmem:[#allocation54_spill] sm:$0xff] }
 0x624   : > { %v5482_v59 = vpop.f32.mrf.mxu1 }
 0x625   : > { %v5483_v2 = vadd.f32 %v10548_v15, %v5482_v59  ;;  %5835 = vrot.lane.b32.xlu1 %v5470_v40, %s7676_s24  ;;  %v5919_v40 = vsel %vm5914_vm8, %v11475_v52, %v10297_v44  ;;  %v11486_v52 = vld [vmem:[#allocation41_spill] sm:$0xff] }
 0x626   : > { %v7586_v33 = vpop.f32.mrf.mxu1 }
 0x627   : > { %5841 = vrot.lane.b32.xlu0 %v5483_v2, %s7676_s24  ;;  %v5494_v54 = vadd.f32 %v10548_v15, %v7586_v33 }
 0x628   : > { %v5485_v39 = vpop.f32.mrf.mxu1 }
 0x629   : > { %v5486_v35 = vadd.f32 %v10548_v15, %v5485_v39 }
 0x62b   : > { %5843 = vrot.lane.b32.xlu1 %v5486_v35, %s7676_s24  ;;  %5845 = vrot.lane.b32.xlu0 %v5491_v16, %s7676_s24  ;;  %v11476_v16 = vld [vmem:[#allocation59_spill] sm:$0xff]  ;;  %v11477_v35 = vld [vmem:[#allocation61_spill] sm:$0xff] }
 0x62c   : > { %v5920_v50 = vsel %vm5914_vm8, %v11476_v16, %v10305_v22  ;;  %v5925_v44 = vsel %vm5914_vm8, %v11477_v35, %v10307_v6  ;;  %v11488_v16 = vld [vmem:[#allocation35_spill] sm:$0xff] }
 0x62f   : > { %5847 = vrot.lane.b32.xlu1 %v5494_v54, %s7676_s24 }
 0x65f   : > { %v5790_v13 = vpop.permute.xlu0 %5789 }
 0x660   : > { %v5950_v62 = vsel %vm5947_vm9, %v5917_v46, %v5790_v13  ;;  %v11478_v13 = vld [vmem:[#allocation65_spill] sm:$0xff] }
 0x661   : > { %5983 = vst.msk [vmem:[%s10569_s30 + $0x10] sm:$0xff] %vm5980_vm10, %v5950_v62  ;;  %v5926_v22 = vsel %vm5914_vm8, %v11478_v13, %v10325_v3  ;;  %v11479_v62 = vld [vmem:[#allocation66_spill] sm:$0xff]  ;;  %v5924_v3 = vsel %vm5914_vm8, %v11480_v49, %v10338_v5  ;;  %v5930_v5 = vsel %vm5914_vm8, %v11482_v47, %v10355_v31 }
 0x662   : > { %v5923_v6 = vsel %vm5914_vm8, %v11479_v62, %v10327_v41  ;;  %v11496_v47 = vld [vmem:[#allocation94_spill] sm:$0xff] }
 0x663   : > { %v5792_v25 = vpop.permute.xlu1 %5791  ;;  %v5786_v43 = vpop.permute.xlu0 %5785 }
 0x664   : > { %v5951_v20 = vsel %vm5947_vm9, %v5918_v8, %v5792_v25  ;;  %v5948_v51 = vsel %vm5947_vm9, %v5915_v32, %v5786_v43  ;;  %v11481_v32 = vld [vmem:[#allocation69_spill] sm:$0xff] }
 0x665   : > { %5984 = vst.msk [vmem:[%s10569_s30 + $0x18] sm:$0xff] %vm5980_vm10, %v5951_v20  ;;  %5981 = vst.msk [vmem:[%s10569_s30] sm:$0xff] %vm5980_vm10, %v5948_v51  ;;  %v5929_v41 = vsel %vm5914_vm8, %v11481_v32, %v10340_v19  ;;  %v5927_v19 = vsel %vm5914_vm8, %v11483_v28, %v10357_v27  ;;  %v11494_v32 = vld [vmem:[#allocation55_spill] sm:$0xff] }
 0x667   : > { %v5788_v30 = vpop.permute.xlu1 %5787  ;;  %v5798_v55 = vpop.permute.xlu0 %5797 }
 0x668   : > { %v5949_v36 = vsel %vm5947_vm9, %v5916_v17, %v5788_v30  ;;  %v5954_v7 = vsel %vm5947_vm9, %v5921_v23, %v5798_v55  ;;  %v11484_v30 = vld [vmem:[#allocation30_spill] sm:$0xff] }
 0x669   : > { %5982 = vst.msk [vmem:[%s10569_s30 + $0x8] sm:$0xff] %vm5980_vm10, %v5949_v36  ;;  %5987 = vst.msk [vmem:[%s10569_s30 + $0x30] sm:$0xff] %vm5980_vm10, %v5954_v7  ;;  %v5928_v31 = vsel %vm5914_vm8, %v11484_v30, %v10368_v21  ;;  %v11485_v55 = vld [vmem:[#allocation34_spill] sm:$0xff]  ;;  %v5934_v21 = vsel %vm5914_vm8, %v11486_v52, %v10385_v45  ;;  %v5932_v45 = vsel %vm5914_vm8, %v11488_v16, %v10398_v14  ;;  %v11499_v30 = vld [vmem:[#allocation97_spill] sm:$0xff] }
 0x66a   : > { %v5933_v27 = vsel %vm5914_vm8, %v11485_v55, %v10370_v10  ;;  %v11500_v55 = vld [vmem:[#allocation100_spill] sm:$0xff] }
 0x66b   : > { %v5800_v59 = vpop.permute.xlu1 %5799  ;;  %v5794_v2 = vpop.permute.xlu0 %5793 }
 0x66c   : > { %v5955_v33 = vsel %vm5947_vm9, %v5922_v53, %v5800_v59  ;;  %v5952_v39 = vsel %vm5947_vm9, %v5919_v40, %v5794_v2  ;;  %v11487_v40 = vld [vmem:[#allocation40_spill] sm:$0xff] }
 0x66d   : > { %5988 = vst.msk [vmem:[%s10569_s30 + $0x38] sm:$0xff] %vm5980_vm10, %v5955_v33  ;;  %5985 = vst.msk [vmem:[%s10569_s30 + $0x20] sm:$0xff] %vm5980_vm10, %v5952_v39  ;;  %v5931_v10 = vsel %vm5914_vm8, %v11487_v40, %v10387_v42 }
 0x66f   : > { %v5796_v54 = vpop.permute.xlu1 %5795  ;;  %v5806_v61 = vpop.permute.xlu0 %5805 }
 0x670   : > { %v5953_v37 = vsel %vm5947_vm9, %v5920_v50, %v5796_v54  ;;  %v5958_v46 = vsel %vm5947_vm9, %v5925_v44, %v5806_v61  ;;  %v11489_v50 = vld [vmem:[#allocation43_spill] sm:$0xff] }
 0x671   : > { %5986 = vst.msk [vmem:[%s10569_s30 + $0x28] sm:$0xff] %vm5980_vm10, %v5953_v37  ;;  %5991 = vst.msk [vmem:[%s10569_s30 + $0x50] sm:$0xff] %vm5980_vm10, %v5958_v46  ;;  %v5937_v42 = vsel %vm5914_vm8, %v11489_v50, %v10400_v38  ;;  %v11490_v37 = vld [vmem:[#allocation51_spill] sm:$0xff]  ;;  %v11491_v46 = vld [vmem:[#allocation50_spill] sm:$0xff] }
 0x672   : > { %v5938_v14 = vsel %vm5914_vm8, %v11490_v37, %v10415_v18  ;;  %v5935_v38 = vsel %vm5914_vm8, %v11491_v46, %v10417_v48 }
 0x673   : > { %v5808_v24 = vpop.permute.xlu1 %5807  ;;  %v5802_v29 = vpop.permute.xlu0 %5801 }
 0x674   : > { %v5959_v8 = vsel %vm5947_vm9, %v5926_v22, %v5808_v24  ;;  %v5956_v58 = vsel %vm5947_vm9, %v5923_v6, %v5802_v29  ;;  %v11492_v24 = vld [vmem:[#allocation44_spill] sm:$0xff] }
 0x675   : > { %5992 = vst.msk [vmem:[%s10569_s30 + $0x58] sm:$0xff] %vm5980_vm10, %v5959_v8  ;;  %5989 = vst.msk [vmem:[%s10569_s30 + $0x40] sm:$0xff] %vm5980_vm10, %v5956_v58  ;;  %v5936_v18 = vsel %vm5914_vm8, %v11492_v24, %v10426_v4  ;;  %v11493_v29 = vld [vmem:[#allocation52_spill] sm:$0xff] }
 0x676   : > { %v5941_v48 = vsel %vm5914_vm8, %v11493_v29, %v10428_v9  ;;  %v11495_v4 = vld [vmem:[#allocation72_spill] sm:$0xff] }
 0x677   : > { %v5804_v25 = vpop.permute.xlu1 %5803  ;;  %v5814_v43 = vpop.permute.xlu0 %5813 }
 0x678   : > { %v5957_v20 = vsel %vm5947_vm9, %v5924_v3, %v5804_v25  ;;  %v5962_v51 = vsel %vm5947_vm9, %v5929_v41, %v5814_v43  ;;  %v5942_v41 = vsel %vm5914_vm8, %v11494_v32, %v10441_v26  ;;  %v5939_v25 = vsel %vm5914_vm8, %v11495_v4, %v10443_v57  ;;  %v11497_v26 = vld [vmem:[#allocation57_spill] sm:$0xff] }
 0x679   : > { %5990 = vst.msk [vmem:[%s10569_s30 + $0x48] sm:$0xff] %vm5980_vm10, %v5957_v20  ;;  %5995 = vst.msk [vmem:[%s10569_s30 + $0x70] sm:$0xff] %vm5980_vm10, %v5962_v51  ;;  %v5940_v28 = vsel %vm5914_vm8, %v11497_v26, %v10452_v63 }
 0x67b   : > { %v5816_v17 = vpop.permute.xlu1 %5815  ;;  %v5810_v11 = vpop.permute.xlu0 %5809 }
 0x67c   : > { %v5963_v60 = vsel %vm5947_vm9, %v5930_v5, %v5816_v17  ;;  %v5960_v23 = vsel %vm5947_vm9, %v5927_v19, %v5810_v11  ;;  %v2055_v5 = vadd.f32 %v10548_v15, %v11496_v47  ;;  %v11498_v19 = vld [vmem:[#allocation46_spill] sm:$0xff] }
 0x67d   : > { %5996 = vst.msk [vmem:[%s10569_s30 + $0x78] sm:$0xff] %vm5980_vm10, %v5963_v60  ;;  %5993 = vst.msk [vmem:[%s10569_s30 + $0x60] sm:$0xff] %vm5980_vm10, %v5960_v23 }
 0x67e   : > { %v5910_v17 = vsel %vm5881_vm7, %v2055_v5, %v11498_v19 }
 0x67f   : > { %v5812_v36 = vpop.permute.xlu1 %5811  ;;  %v5822_v7 = vpop.permute.xlu0 %5821  ;;  %v5943_v60 = vsel %vm5914_vm8, %v5910_v17, %v10563_v34 }
 0x680   : > { %v5961_v0 = vsel %vm5947_vm9, %v5928_v31, %v5812_v36  ;;  %v5966_v53 = vsel %vm5947_vm9, %v5933_v27, %v5822_v7  ;;  %v2058_v31 = vadd.f32 %v10548_v15, %v11499_v30 }
 0x681   : > { %5994 = vst.msk [vmem:[%s10569_s30 + $0x68] sm:$0xff] %vm5980_vm10, %v5961_v0  ;;  %5999 = vst.msk [vmem:[%s10569_s30 + $0x90] sm:$0xff] %vm5980_vm10, %v5966_v53 }
 0x682   : > { %v5911_v27 = vsel %vm5881_vm7, %v2058_v31, %v11500_v55 }
 0x683   : > { %v5824_v59 = vpop.permute.xlu1 %5823  ;;  %v5818_v2 = vpop.permute.xlu0 %5817  ;;  %v5944_v36 = vsel %vm5914_vm8, %v5911_v27, %v10574_v1 }
 0x684   : > { %v5967_v33 = vsel %vm5947_vm9, %v5934_v21, %v5824_v59  ;;  %v5964_v39 = vsel %vm5947_vm9, %v5931_v10, %v5818_v2 }
 0x685   : > { %6000 = vst.msk [vmem:[%s10569_s30 + $0x98] sm:$0xff] %vm5980_vm10, %v5967_v33  ;;  %5997 = vst.msk [vmem:[%s10569_s30 + $0x80] sm:$0xff] %vm5980_vm10, %v5964_v39 }
 0x687   : > { %v5820_v35 = vpop.permute.xlu1 %5819  ;;  %v5830_v44 = vpop.permute.xlu0 %5829 }
 0x688   : > { %v5965_v54 = vsel %vm5947_vm9, %v5932_v45, %v5820_v35  ;;  %v5970_v61 = vsel %vm5947_vm9, %v5937_v42, %v5830_v44 }
 0x689   : > { %5998 = vst.msk [vmem:[%s10569_s30 + $0x88] sm:$0xff] %vm5980_vm10, %v5965_v54  ;;  %6003 = vst.msk [vmem:[%s10569_s30 + $0xb0] sm:$0xff] %vm5980_vm10, %v5970_v61 }
 0x68b   : > { %v5832_v13 = vpop.permute.xlu1 %5831  ;;  %v5826_v22 = vpop.permute.xlu0 %5825 }
 0x68c   : > { %v5971_v62 = vsel %vm5947_vm9, %v5938_v14, %v5832_v13  ;;  %v5968_v6 = vsel %vm5947_vm9, %v5935_v38, %v5826_v22 }
 0x68d   : > { %6004 = vst.msk [vmem:[%s10569_s30 + $0xb8] sm:$0xff] %vm5980_vm10, %v5971_v62  ;;  %6001 = vst.msk [vmem:[%s10569_s30 + $0xa0] sm:$0xff] %vm5980_vm10, %v5968_v6 }
 0x68f   : > { %v5828_v8 = vpop.permute.xlu1 %5827  ;;  %v5838_v58 = vpop.permute.xlu0 %5837 }
 0x690   : > { %v5969_v49 = vsel %vm5947_vm9, %v5936_v18, %v5828_v8  ;;  %v5974_v3 = vsel %vm5947_vm9, %v5941_v48, %v5838_v58 }
 0x691   : > { %6002 = vst.msk [vmem:[%s10569_s30 + $0xa8] sm:$0xff] %vm5980_vm10, %v5969_v49  ;;  %6007 = vst.msk [vmem:[%s10569_s30 + $0xd0] sm:$0xff] %vm5980_vm10, %v5974_v3 }
 0x693   : > { %v5840_v9 = vpop.permute.xlu1 %5839  ;;  %v5834_v43 = vpop.permute.xlu0 %5833 }
 0x694   : > { %v5975_v20 = vsel %vm5947_vm9, %v5942_v41, %v5840_v9  ;;  %v5972_v51 = vsel %vm5947_vm9, %v5939_v25, %v5834_v43 }
 0x695   : > { %6008 = vst.msk [vmem:[%s10569_s30 + $0xd8] sm:$0xff] %vm5980_vm10, %v5975_v20  ;;  %6005 = vst.msk [vmem:[%s10569_s30 + $0xc0] sm:$0xff] %vm5980_vm10, %v5972_v51 }
 0x697   : > { %v5836_v57 = vpop.permute.xlu1 %5835 }
 0x698   : > { %v5973_v11 = vsel %vm5947_vm9, %v5940_v28, %v5836_v57 }
 0x699   : > { %6006 = vst.msk [vmem:[%s10569_s30 + $0xc8] sm:$0xff] %vm5980_vm10, %v5973_v11  ;;  %v5842_v23 = vpop.permute.xlu0 %5841 }
 0x69a   : > { %v5976_v63 = vsel %vm5947_vm9, %v5943_v60, %v5842_v23 }
 0x69b   : > { %6009 = vst.msk [vmem:[%s10569_s30 + $0xe0] sm:$0xff] %vm5980_vm10, %v5976_v63 }
 0x69d   : > { %v5844_v7 = vpop.permute.xlu1 %5843  ;;  %v5846_v0 = vpop.permute.xlu0 %5845 }
 0x69e   : > { %v5977_v34 = vsel %vm5947_vm9, %v5944_v36, %v5844_v7  ;;  %v5978_v53 = vsel %vm5947_vm9, %v10458_v56, %v5846_v0 }
 0x69f   : > { %6010 = vst.msk [vmem:[%s10569_s30 + $0xe8] sm:$0xff] %vm5980_vm10, %v5977_v34  ;;  %6011 = vst.msk [vmem:[%s10569_s30 + $0xf0] sm:$0xff] %vm5980_vm10, %v5978_v53 }
 0x6a1   : > { %v5848_v15 = vpop.permute.xlu1 %5847 }
 0x6a2   : > { %v5979_v52 = vsel %vm5947_vm9, %v10472_v12, %v5848_v15 }
 0x6a3   : > { %6012 = vst.msk [vmem:[%s10569_s30 + $0xf8] sm:$0xff] %vm5980_vm10, %v5979_v52 }
 0x6a4 PF: > { %s15_s18 = sadd.s32 1, %s7672_s18  }
 0x6a5   : > { %p12_p4 = scmp.ge.s32.totalorder %s15_s18, 4  }
 0x6a7   :  { %14 = sbr.rel (!%p12_p4) target bundleno = 1 (0x1), region = 70 }

</bundles_post_ra>
